<compile_context>
chip_gen: v6e
topology: v6e:2x2x1
jax: 0.10.0
libtpu: 0.0.40
codegen_flags: <defaults>
</compile_context>

<pallas_src>
import functools

import numpy as np
import jax
import jax.numpy as jnp
from jax.experimental import pallas as pl
from jax.experimental.pallas import tpu as pltpu

KERNEL_SIZES = [795, 400, 200, 100, 50, 20]
STRIDES = [1, 200, 100, 50, 25, 10]
DENSE_UNITS = [16, 32, 64, 128, 256, 512]
CONV_OUT = 64
BN_EPS = 1e-5
LANE = 128
VMEM_LIMIT = 32 << 20   # <= physical VMEM on v5e/v6e (128 MiB) and v7x (64 MiB)


def _ru(x, m):
    return (x + m - 1) // m * m


# ---------------------------------------------------------------------------
# Pallas kernels
# ---------------------------------------------------------------------------
def _block_kernel(p_ref, cw_ref, shift_ref, fcw_ref, fcb_ref, o_ref, acc_ref):
    """One ConvDenseBlock (conv+BN+ReLU+flatten+fc), both branches via grid axis 0.

    grid = (branch, t):
      conv_t = relu(patch_t @ Wconv + shift)    # BN scale folded into Wconv, bias+BN into shift
      acc   += conv_t @ Wfc_seg[t]              # dense layer via per-position weight segments
      out    = acc + b_fc        (at last t; dropout = identity in eval mode)
    """
    t = pl.program_id(1)

    @pl.when(t == 0)
    def _():
        acc_ref[...] = jnp.zeros_like(acc_ref)

    conv = jnp.dot(p_ref[...], cw_ref[...], preferred_element_type=jnp.float32)
    conv = jnp.maximum(conv + shift_ref[...], 0.0).astype(jnp.bfloat16)   # (Bp, 128)
    acc_ref[...] += jnp.dot(conv, fcw_ref[...], preferred_element_type=jnp.float32)

    @pl.when(t == pl.num_programs(1) - 1)
    def _():
        o_ref[...] = (acc_ref[...] + fcb_ref[...]).astype(o_ref.dtype)


def _head_kernel(*refs, num_blocks):
    """All 6 fusion layers + final 1008->64->8->1 MLP, fully VMEM-resident."""
    nb = num_blocks
    cat_refs = refs[:nb]                    # (Bp, 2*dp_i) bf16  [f1 | pad | f2 | pad]
    fw_refs = refs[nb:2 * nb]               # (2*dp_i, dp_i) bf16
    fb_refs = refs[2 * nb:3 * nb]           # (1, dp_i) f32
    w1_refs = refs[3 * nb:4 * nb]           # (dp_i, 128) bf16 — row blocks of final W1
    b1_ref, w2_ref, b2_ref, w3_ref, b3_ref, o_ref = refs[4 * nb:]

    bp = cat_refs[0].shape[0]
    h1 = jnp.zeros((bp, LANE), jnp.float32)
    for i in range(nb):
        acc = jnp.dot(cat_refs[i][...], fw_refs[i][...],
                      preferred_element_type=jnp.float32)
        fused = jnp.maximum(acc + fb_refs[i][...], 0.0).astype(jnp.bfloat16)
        # merged @ W1 == sum_i fused_i @ W1_seg_i  (row-block decomposition of W1)
        h1 = h1 + jnp.dot(fused, w1_refs[i][...], preferred_element_type=jnp.float32)
    h1 = jnp.maximum(h1 + b1_ref[...], 0.0).astype(jnp.bfloat16)
    h2 = jnp.dot(h1, w2_ref[...], preferred_element_type=jnp.float32) + b2_ref[...]
    h2 = jnp.maximum(h2, 0.0).astype(jnp.bfloat16)
    h3 = jnp.dot(h2, w3_ref[...], preferred_element_type=jnp.float32) + b3_ref[...]
    o_ref[...] = jax.nn.sigmoid(h3)


# ---------------------------------------------------------------------------
# pallas_call wrappers
# ---------------------------------------------------------------------------
def conv_dense_block(patches, cw, shift, fcw, fcb):
    """Fused ConvDenseBlock for both branches.

    patches: (2, Lo, Bp, Kcp) bf16   cw: (2, Kcp, 128) bf16   shift: (2, 1, 128) f32
    fcw:     (2, Lo, 128, dp) bf16   fcb: (2, 1, dp) f32
    returns  (Bp, 2*dp) bf16 laid out [branch1 | branch2] along lanes.
    """
    _, lo, bp, kcp = patches.shape
    dp = fcw.shape[-1]
    return pl.pallas_call(
        _block_kernel,
        out_shape=jax.ShapeDtypeStruct((bp, 2 * dp), jnp.bfloat16),
        grid=(2, lo),
        in_specs=[
            pl.BlockSpec((None, None, bp, kcp), lambda br, t: (br, t, 0, 0)),
            pl.BlockSpec((None, kcp, LANE), lambda br, t: (br, 0, 0)),   # resident over t
            pl.BlockSpec((None, 1, LANE), lambda br, t: (br, 0, 0)),
            pl.BlockSpec((None, None, LANE, dp), lambda br, t: (br, t, 0, 0)),  # streamed
            pl.BlockSpec((None, 1, dp), lambda br, t: (br, 0, 0)),
        ],
        out_specs=pl.BlockSpec((bp, dp), lambda br, t: (0, br)),
        scratch_shapes=[pltpu.VMEM((bp, dp), jnp.float32)],
        compiler_params=pltpu.CompilerParams(
            dimension_semantics=("parallel", "arbitrary"),
            vmem_limit_bytes=VMEM_LIMIT),
    )(patches, cw, shift, fcw, fcb)


def _full_spec(shape):
    n = len(shape)
    return pl.BlockSpec(shape, lambda *args, n=n: (0,) * n)


def head(cats, packed):
    """Fusion layers + final MLP in a single kernel. Returns (Bp, 128) f32."""
    bp = cats[0].shape[0]
    nb = len(cats)
    inputs = (list(cats) + list(packed["fus_w"]) + list(packed["fus_b"])
              + list(packed["w1_seg"])
              + [packed["b1"], packed["w2"], packed["b2"], packed["w3"], packed["b3"]])
    return pl.pallas_call(
        functools.partial(_head_kernel, num_blocks=nb),
        out_shape=jax.ShapeDtypeStruct((bp, LANE), jnp.float32),
        grid=(1,),
        in_specs=[_full_spec(a.shape) for a in inputs],
        out_specs=pl.BlockSpec((bp, LANE), lambda i: (0, 0)),
        compiler_params=pltpu.CompilerParams(
            dimension_semantics=("arbitrary",), vmem_limit_bytes=VMEM_LIMIT),
    )(*inputs)


# ---------------------------------------------------------------------------
# Forward (the only XLA glue left is the tiny im2col patch extraction)
# ---------------------------------------------------------------------------
@jax.jit
def full_ppi_forward(packed, input1, input2):
    B, L, C = input1.shape
    Bp = _ru(B, 16)                       # native bf16 sublane tile is (16, 128)
    xs = jnp.stack([input1, input2])      # (2, B, L, C)

    cats = []
    for i, (k, s) in enumerate(zip(KERNEL_SIZES, STRIDES)):
        Lo = (L - k) // s + 1
        Kc, Kcp = C * k, _ru(C * k, LANE)

        # im2col, (j, c) feature order, one padded (Bp, Kcp) tile per output position t
        idx = np.arange(Lo)[:, None] * s + np.arange(k)[None, :]        # (Lo, k) const
        p = xs[:, :, idx, :]                                            # (2, B, Lo, k, C)
        p = jnp.transpose(p, (0, 2, 1, 3, 4)).reshape(2, Lo, B, Kc)     # (2, Lo, B, Kc)
        p = jnp.pad(p, ((0, 0), (0, 0), (0, Bp - B), (0, Kcp - Kc)))
        patches = p.astype(jnp.bfloat16)

        # fused conv+BN+ReLU+flatten+fc, result already in concat layout (Bp, 2*dp)
        cats.append(conv_dense_block(patches,
                                     packed["conv_w"][i], packed["conv_shift"][i],
                                     packed["fc_w"][i], packed["fc_b"][i]))

    out = head(cats, packed)              # (Bp, 128) f32
    return out[:B, :1]


# ---------------------------------------------------------------------------
# One-time weight packing (numpy; BN fold / transpose / pad / bf16 / segmenting)
# ---------------------------------------------------------------------------
def pack_params(raw, in_channels, seq_len):
    C = in_channels
    packed = {key: [] for key in
              ["conv_w", "conv_shift", "fc_w", "fc_b", "fus_w", "fus_b", "w1_seg"]}

    def bf16(a):
        return jnp.asarray(a, dtype=jnp.bfloat16)

    def f32(a):
        return jnp.asarray(a, dtype=jnp.float32)

    for i, (k, s, d) in enumerate(zip(KERNEL_SIZES, STRIDES, DENSE_UNITS)):
        Lo = (seq_len - k) // s + 1
        Kc, Kcp = C * k, _ru(C * k, LANE)
        dp = _ru(d, LANE)

        cw_s, cs_s, fw_s, fb_s = [], [], [], []
        for br in ("branch1", "branch2"):
            p = raw[br][i]
            a = p["bn_gamma"] / np.sqrt(p["bn_var"] + BN_EPS)            # BN fold
            shift = p["conv_b"] * a + p["bn_beta"] - p["bn_mean"] * a
            # conv weight (64,C,k) -> (j,c) column order, BN-scaled, transposed, padded
            w = np.transpose(p["conv_w"], (0, 2, 1)).reshape(CONV_OUT, Kc) * a[:, None]
            cw = np.zeros((Kcp, LANE), np.float32)
            cw[:Kc, :CONV_OUT] = w.T
            cw_s.append(cw)
            cs = np.zeros((1, LANE), np.float32)
            cs[0, :CONV_OUT] = shift
            cs_s.append(cs)
            # fc weight (d, 64*Lo) with PyTorch flatten index c*Lo + t
            #   -> per-position segments seg[t, c, o] = W[o, c*Lo + t], padded to (Lo,128,dp)
            seg = p["fc_w"].reshape(d, CONV_OUT, Lo).transpose(2, 1, 0)  # (Lo, 64, d)
            fw = np.zeros((Lo, LANE, dp), np.float32)
            fw[:, :CONV_OUT, :d] = seg
            fw_s.append(fw)
            fb = np.zeros((1, dp), np.float32)
            fb[0, :d] = p["fc_b"]
            fb_s.append(fb)
        packed["conv_w"].append(bf16(np.stack(cw_s)))
        packed["conv_shift"].append(f32(np.stack(cs_s)))
        packed["fc_w"].append(bf16(np.stack(fw_s)))
        packed["fc_b"].append(f32(np.stack(fb_s)))

        # fusion weight repacked for the concat layout [f1(0:d) | 0 | f2(dp:dp+d) | 0]
        wfu, bfu = raw["fusion"][i]
        fus = np.zeros((2 * dp, dp), np.float32)
        fus[:d, :d] = wfu[:, :d].T
        fus[dp:dp + d, :d] = wfu[:, d:2 * d].T
        packed["fus_w"].append(bf16(fus))
        fbu = np.zeros((1, dp), np.float32)
        fbu[0, :d] = bfu
        packed["fus_b"].append(f32(fbu))

    (w1, b1), (w2, b2), (w3, b3) = raw["final"]
    off = 0
    for d in DENSE_UNITS:                       # split final W1 into per-block row blocks
        dp = _ru(d, LANE)
        seg = np.zeros((dp, LANE), np.float32)
        seg[:d, :64] = w1[:, off:off + d].T
        packed["w1_seg"].append(bf16(seg))
        off += d
    b1p = np.zeros((1, LANE), np.float32); b1p[0, :64] = b1
    w2p = np.zeros((LANE, LANE), np.float32); w2p[:64, :8] = w2.T
    b2p = np.zeros((1, LANE), np.float32); b2p[0, :8] = b2
    w3p = np.zeros((LANE, LANE), np.float32); w3p[:8, :1] = w3.T
    b3p = np.zeros((1, LANE), np.float32); b3p[0, :1] = b3
    packed["b1"] = f32(b1p); packed["w2"] = bf16(w2p); packed["b2"] = f32(b2p)
    packed["w3"] = bf16(w3p); packed["b3"] = f32(b3p)
    return packed


# ---------------------------------------------------------------------------
# Deterministic raw parameter initialization (numpy, PyTorch-like fan-in init)
# ---------------------------------------------------------------------------
def init_params(seed, in_channels, seq_len):
    rng = np.random.default_rng(seed)

    def linear(n_in, n_out):
        lim = 1.0 / np.sqrt(n_in)
        w = rng.uniform(-lim, lim, (n_out, n_in)).astype(np.float32)
        b = rng.uniform(-lim, lim, (n_out,)).astype(np.float32)
        return w, b

    def branch():
        blocks = []
        for k, s, d in zip(KERNEL_SIZES, STRIDES, DENSE_UNITS):
            Lo = (seq_len - k) // s + 1
            lim = 1.0 / np.sqrt(in_channels * k)
            fc_w, fc_b = linear(CONV_OUT * Lo, d)
            blocks.append(dict(
                conv_w=rng.uniform(-lim, lim,
                                   (CONV_OUT, in_channels, k)).astype(np.float32),
                conv_b=rng.uniform(-lim, lim, (CONV_OUT,)).astype(np.float32),
                bn_gamma=(1.0 + 0.1 * rng.standard_normal(CONV_OUT)).astype(np.float32),
                bn_beta=(0.1 * rng.standard_normal(CONV_OUT)).astype(np.float32),
                bn_mean=(0.1 * rng.standard_normal(CONV_OUT)).astype(np.float32),
                bn_var=rng.uniform(0.5, 1.5, (CONV_OUT,)).astype(np.float32),
                fc_w=fc_w, fc_b=fc_b))
        return blocks

    return {
        "branch1": branch(),
        "branch2": branch(),
        "fusion": [linear(2 * d, d) for d in DENSE_UNITS],
        "final": [linear(sum(DENSE_UNITS), 64), linear(64, 8), linear(8, 1)],
    }


if __name__ == "__main__":
    B, L, C = 2, 800, 4          # seq_len must cover the largest conv kernel (795)

    raw_params = init_params(0, in_channels=C, seq_len=L)
    packed = pack_params(raw_params, in_channels=C, seq_len=L)   # one-time weight prep

    k1, k2 = jax.random.split(jax.random.PRNGKey(0))
    input1 = jax.random.normal(k1, (B, L, C), jnp.float32)
    input2 = jax.random.normal(k2, (B, L, C), jnp.float32)

    out = full_ppi_forward(packed, input1, input2)
    out = jax.block_until_ready(out)

    assert out.shape == (B, 1), out.shape
    assert bool(jnp.all(jnp.isfinite(out)))
    assert bool(jnp.all((out >= 0.0) & (out <= 1.0)))
    print("KERNEL_OK")
</pallas_src>

<mosaic_0001>
module attributes {stable_mosaic.version = 11 : i64} {
  func.func @_block_kernel(%arg0: i32, %arg1: i32, %arg2: memref<1x1x16x1664xbf16, #tpu.memory_space<vmem>>, %arg3: memref<1x1664x128xbf16, #tpu.memory_space<vmem>>, %arg4: memref<1x1x128xf32, #tpu.memory_space<vmem>>, %arg5: memref<1x1x128x128xbf16, #tpu.memory_space<vmem>>, %arg6: memref<1x1x128xf32, #tpu.memory_space<vmem>>, %arg7: memref<16x128xbf16, #tpu.memory_space<vmem>>, %arg8: memref<16x128xf32, #tpu.memory_space<vmem>>) attributes {dimension_semantics = [#tpu.dimension_semantics<parallel>, #tpu.dimension_semantics<arbitrary>], iteration_bounds = array<i64: 2, 3>, scalar_prefetch = 0 : i64, scratch_operands = 1 : i64, tpu.core_type = #tpu.core_type<tc>, window_params = [{transform_indices = @transform_0, window_bounds = array<i64: 1, 1, 16, 1664>}, {transform_indices = @transform_1, window_bounds = array<i64: 1, 1664, 128>}, {transform_indices = @transform_2, window_bounds = array<i64: 1, 1, 128>}, {transform_indices = @transform_3, window_bounds = array<i64: 1, 1, 128, 128>}, {transform_indices = @transform_4, window_bounds = array<i64: 1, 1, 128>}, {transform_indices = @transform_5, window_bounds = array<i64: 16, 128>}]} {
    %c0_i32 = arith.constant 0 : i32
    %0 = arith.cmpi eq, %arg1, %c0_i32 : i32
    %1 = arith.extui %0 : i1 to i32
    %c0_i32_0 = arith.constant 0 : i32
    %2 = arith.cmpi ne, %1, %c0_i32_0 : i32
    scf.if %2 {
      %cst_21 = arith.constant 0.000000e+00 : f32
      %24 = vector.broadcast %cst_21 : f32 to vector<16x128xf32>
      %c0_22 = arith.constant 0 : index
      %c0_23 = arith.constant 0 : index
      %25 = vector.load %arg8[%c0_22, %c0_23] : memref<16x128xf32, #tpu.memory_space<vmem>>, vector<16x128xf32>
      tpu.vector_store %arg8[%c0_22, %c0_23], %24 {strides = array<i32>} : memref<16x128xf32, #tpu.memory_space<vmem>>, vector<16x128xf32>,
    } else {
    }
    %c0 = arith.constant 0 : index
    %c0_1 = arith.constant 0 : index
    %c0_2 = arith.constant 0 : index
    %c0_3 = arith.constant 0 : index
    %3 = vector.load %arg2[%c0, %c0_1, %c0_2, %c0_3] : memref<1x1x16x1664xbf16, #tpu.memory_space<vmem>>, vector<1x1x16x1664xbf16>
    %4 = vector.shape_cast %3 : vector<1x1x16x1664xbf16> to vector<16x1664xbf16>
    %c0_4 = arith.constant 0 : index
    %c0_5 = arith.constant 0 : index
    %c0_6 = arith.constant 0 : index
    %5 = vector.load %arg3[%c0_4, %c0_5, %c0_6] : memref<1x1664x128xbf16, #tpu.memory_space<vmem>>, vector<1x1664x128xbf16>
    %6 = vector.shape_cast %5 : vector<1x1664x128xbf16> to vector<1664x128xbf16>
    %cst = arith.constant dense<0.000000e+00> : vector<16x128xf32>
    %7 = tpu.matmul %4, %6, %cst {dimension_numbers = #tpu.dot_dimension_numbers<[1], [0], [0], [1], [0, 0, 1, 1], [], []>} : vector<16x1664xbf16>, vector<1664x128xbf16>, vector<16x128xf32> -> vector<16x128xf32>
    %c0_7 = arith.constant 0 : index
    %c0_8 = arith.constant 0 : index
    %c0_9 = arith.constant 0 : index
    %8 = vector.load %arg4[%c0_7, %c0_8, %c0_9] : memref<1x1x128xf32, #tpu.memory_space<vmem>>, vector<1x1x128xf32>
    %9 = vector.shape_cast %8 : vector<1x1x128xf32> to vector<1x128xf32>
    %10 = vector.broadcast %9 : vector<1x128xf32> to vector<16x128xf32>
    %11 = arith.addf %7, %10 : vector<16x128xf32>
    %cst_10 = arith.constant 0.000000e+00 : f32
    %12 = vector.broadcast %cst_10 : f32 to vector<16x128xf32>
    %13 = arith.maximumf %11, %12 : vector<16x128xf32>
    %14 = arith.truncf %13 : vector<16x128xf32> to vector<16x128xbf16>
    %c0_11 = arith.constant 0 : index
    %c0_12 = arith.constant 0 : index
    %15 = vector.load %arg8[%c0_11, %c0_12] : memref<16x128xf32, #tpu.memory_space<vmem>>, vector<16x128xf32>
    %c0_13 = arith.constant 0 : index
    %c0_14 = arith.constant 0 : index
    %c0_15 = arith.constant 0 : index
    %c0_16 = arith.constant 0 : index
    %16 = vector.load %arg5[%c0_13, %c0_14, %c0_15, %c0_16] : memref<1x1x128x128xbf16, #tpu.memory_space<vmem>>, vector<1x1x128x128xbf16>
    %17 = vector.shape_cast %16 : vector<1x1x128x128xbf16> to vector<128x128xbf16>
    %cst_17 = arith.constant dense<0.000000e+00> : vector<16x128xf32>
    %18 = tpu.matmul %14, %17, %cst_17 {dimension_numbers = #tpu.dot_dimension_numbers<[1], [0], [0], [1], [0, 0, 1, 1], [], []>} : vector<16x128xbf16>, vector<128x128xbf16>, vector<16x128xf32> -> vector<16x128xf32>
    %19 = arith.addf %15, %18 : vector<16x128xf32>
    %c0_18 = arith.constant 0 : index
    %c0_19 = arith.constant 0 : index
    %20 = vector.load %arg8[%c0_18, %c0_19] : memref<16x128xf32, #tpu.memory_space<vmem>>, vector<16x128xf32>
    tpu.vector_store %arg8[%c0_18, %c0_19], %19 {strides = array<i32>} : memref<16x128xf32, #tpu.memory_space<vmem>>, vector<16x128xf32>,
    %c2_i32 = arith.constant 2 : i32
    %21 = arith.cmpi eq, %arg1, %c2_i32 : i32
    %22 = arith.extui %21 : i1 to i32
    %c0_i32_20 = arith.constant 0 : i32
    %23 = arith.cmpi ne, %22, %c0_i32_20 : i32
    scf.if %23 {
      %c0_21 = arith.constant 0 : index
      %c0_22 = arith.constant 0 : index
      %24 = vector.load %arg8[%c0_21, %c0_22] : memref<16x128xf32, #tpu.memory_space<vmem>>, vector<16x128xf32>
      %c0_23 = arith.constant 0 : index
      %c0_24 = arith.constant 0 : index
      %c0_25 = arith.constant 0 : index
      %25 = vector.load %arg6[%c0_23, %c0_24, %c0_25] : memref<1x1x128xf32, #tpu.memory_space<vmem>>, vector<1x1x128xf32>
      %26 = vector.shape_cast %25 : vector<1x1x128xf32> to vector<1x128xf32>
      %27 = vector.broadcast %26 : vector<1x128xf32> to vector<16x128xf32>
      %28 = arith.addf %24, %27 : vector<16x128xf32>
      %29 = arith.truncf %28 : vector<16x128xf32> to vector<16x128xbf16>
      %c0_26 = arith.constant 0 : index
      %c0_27 = arith.constant 0 : index
      %30 = vector.load %arg7[%c0_26, %c0_27] : memref<16x128xbf16, #tpu.memory_space<vmem>>, vector<16x128xbf16>
      tpu.vector_store %arg7[%c0_26, %c0_27], %29 {strides = array<i32>} : memref<16x128xbf16, #tpu.memory_space<vmem>>, vector<16x128xbf16>,
    } else {
    }
    return
  }
  func.func @transform_0(%arg0: i32, %arg1: i32) -> (i32, i32, i32, i32) {
    %c0_i32 = arith.constant 0 : i32
    %c0_i32_0 = arith.constant 0 : i32
    %c0_i32_1 = arith.constant 0 : i32
    return %arg0, %arg1, %c0_i32, %c0_i32_0 : i32, i32, i32, i32
  }
  func.func @transform_1(%arg0: i32, %arg1: i32) -> (i32, i32, i32) {
    %c0_i32 = arith.constant 0 : i32
    %c0_i32_0 = arith.constant 0 : i32
    %c0_i32_1 = arith.constant 0 : i32
    return %arg0, %c0_i32, %c0_i32_0 : i32, i32, i32
  }
  func.func @transform_2(%arg0: i32, %arg1: i32) -> (i32, i32, i32) {
    %c0_i32 = arith.constant 0 : i32
    %c0_i32_0 = arith.constant 0 : i32
    %c0_i32_1 = arith.constant 0 : i32
    return %arg0, %c0_i32, %c0_i32_0 : i32, i32, i32
  }
  func.func @transform_3(%arg0: i32, %arg1: i32) -> (i32, i32, i32, i32) {
    %c0_i32 = arith.constant 0 : i32
    %c0_i32_0 = arith.constant 0 : i32
    %c0_i32_1 = arith.constant 0 : i32
    return %arg0, %arg1, %c0_i32, %c0_i32_0 : i32, i32, i32, i32
  }
  func.func @transform_4(%arg0: i32, %arg1: i32) -> (i32, i32, i32) {
    %c0_i32 = arith.constant 0 : i32
    %c0_i32_0 = arith.constant 0 : i32
    %c0_i32_1 = arith.constant 0 : i32
    return %arg0, %c0_i32, %c0_i32_0 : i32, i32, i32
  }
  func.func @transform_5(%arg0: i32, %arg1: i32) -> (i32, i32) {
    %c0_i32 = arith.constant 0 : i32
    %c0_i32_0 = arith.constant 0 : i32
    return %c0_i32, %arg0 : i32, i32
  }
}

module attributes {stable_mosaic.version = 11 : i64} {
  func.func @_block_kernel(%arg0: i32, %arg1: i32, %arg2: memref<1x1x16x896xbf16, #tpu.memory_space<vmem>>, %arg3: memref<1x896x128xbf16, #tpu.memory_space<vmem>>, %arg4: memref<1x1x128xf32, #tpu.memory_space<vmem>>, %arg5: memref<1x1x128x128xbf16, #tpu.memory_space<vmem>>, %arg6: memref<1x1x128xf32, #tpu.memory_space<vmem>>, %arg7: memref<16x128xbf16, #tpu.memory_space<vmem>>, %arg8: memref<16x128xf32, #tpu.memory_space<vmem>>) attributes {dimension_semantics = [#tpu.dimension_semantics<parallel>, #tpu.dimension_semantics<arbitrary>], iteration_bounds = array<i64: 2, 7>, scalar_prefetch = 0 : i64, scratch_operands = 1 : i64, tpu.core_type = #tpu.core_type<tc>, window_params = [{transform_indices = @transform_0, window_bounds = array<i64: 1, 1, 16, 896>}, {transform_indices = @transform_1, window_bounds = array<i64: 1, 896, 128>}, {transform_indices = @transform_2, window_bounds = array<i64: 1, 1, 128>}, {transform_indices = @transform_3, window_bounds = array<i64: 1, 1, 128, 128>}, {transform_indices = @transform_4, window_bounds = array<i64: 1, 1, 128>}, {transform_indices = @transform_5, window_bounds = array<i64: 16, 128>}]} {
    %c0_i32 = arith.constant 0 : i32
    %0 = arith.cmpi eq, %arg1, %c0_i32 : i32
    %1 = arith.extui %0 : i1 to i32
    %c0_i32_0 = arith.constant 0 : i32
    %2 = arith.cmpi ne, %1, %c0_i32_0 : i32
    scf.if %2 {
      %cst_21 = arith.constant 0.000000e+00 : f32
      %24 = vector.broadcast %cst_21 : f32 to vector<16x128xf32>
      %c0_22 = arith.constant 0 : index
      %c0_23 = arith.constant 0 : index
      %25 = vector.load %arg8[%c0_22, %c0_23] : memref<16x128xf32, #tpu.memory_space<vmem>>, vector<16x128xf32>
      tpu.vector_store %arg8[%c0_22, %c0_23], %24 {strides = array<i32>} : memref<16x128xf32, #tpu.memory_space<vmem>>, vector<16x128xf32>,
    } else {
    }
    %c0 = arith.constant 0 : index
    %c0_1 = arith.constant 0 : index
    %c0_2 = arith.constant 0 : index
    %c0_3 = arith.constant 0 : index
    %3 = vector.load %arg2[%c0, %c0_1, %c0_2, %c0_3] : memref<1x1x16x896xbf16, #tpu.memory_space<vmem>>, vector<1x1x16x896xbf16>
    %4 = vector.shape_cast %3 : vector<1x1x16x896xbf16> to vector<16x896xbf16>
    %c0_4 = arith.constant 0 : index
    %c0_5 = arith.constant 0 : index
    %c0_6 = arith.constant 0 : index
    %5 = vector.load %arg3[%c0_4, %c0_5, %c0_6] : memref<1x896x128xbf16, #tpu.memory_space<vmem>>, vector<1x896x128xbf16>
    %6 = vector.shape_cast %5 : vector<1x896x128xbf16> to vector<896x128xbf16>
    %cst = arith.constant dense<0.000000e+00> : vector<16x128xf32>
    %7 = tpu.matmul %4, %6, %cst {dimension_numbers = #tpu.dot_dimension_numbers<[1], [0], [0], [1], [0, 0, 1, 1], [], []>} : vector<16x896xbf16>, vector<896x128xbf16>, vector<16x128xf32> -> vector<16x128xf32>
    %c0_7 = arith.constant 0 : index
    %c0_8 = arith.constant 0 : index
    %c0_9 = arith.constant 0 : index
    %8 = vector.load %arg4[%c0_7, %c0_8, %c0_9] : memref<1x1x128xf32, #tpu.memory_space<vmem>>, vector<1x1x128xf32>
    %9 = vector.shape_cast %8 : vector<1x1x128xf32> to vector<1x128xf32>
    %10 = vector.broadcast %9 : vector<1x128xf32> to vector<16x128xf32>
    %11 = arith.addf %7, %10 : vector<16x128xf32>
    %cst_10 = arith.constant 0.000000e+00 : f32
    %12 = vector.broadcast %cst_10 : f32 to vector<16x128xf32>
    %13 = arith.maximumf %11, %12 : vector<16x128xf32>
    %14 = arith.truncf %13 : vector<16x128xf32> to vector<16x128xbf16>
    %c0_11 = arith.constant 0 : index
    %c0_12 = arith.constant 0 : index
    %15 = vector.load %arg8[%c0_11, %c0_12] : memref<16x128xf32, #tpu.memory_space<vmem>>, vector<16x128xf32>
    %c0_13 = arith.constant 0 : index
    %c0_14 = arith.constant 0 : index
    %c0_15 = arith.constant 0 : index
    %c0_16 = arith.constant 0 : index
    %16 = vector.load %arg5[%c0_13, %c0_14, %c0_15, %c0_16] : memref<1x1x128x128xbf16, #tpu.memory_space<vmem>>, vector<1x1x128x128xbf16>
    %17 = vector.shape_cast %16 : vector<1x1x128x128xbf16> to vector<128x128xbf16>
    %cst_17 = arith.constant dense<0.000000e+00> : vector<16x128xf32>
    %18 = tpu.matmul %14, %17, %cst_17 {dimension_numbers = #tpu.dot_dimension_numbers<[1], [0], [0], [1], [0, 0, 1, 1], [], []>} : vector<16x128xbf16>, vector<128x128xbf16>, vector<16x128xf32> -> vector<16x128xf32>
    %19 = arith.addf %15, %18 : vector<16x128xf32>
    %c0_18 = arith.constant 0 : index
    %c0_19 = arith.constant 0 : index
    %20 = vector.load %arg8[%c0_18, %c0_19] : memref<16x128xf32, #tpu.memory_space<vmem>>, vector<16x128xf32>
    tpu.vector_store %arg8[%c0_18, %c0_19], %19 {strides = array<i32>} : memref<16x128xf32, #tpu.memory_space<vmem>>, vector<16x128xf32>,
    %c6_i32 = arith.constant 6 : i32
    %21 = arith.cmpi eq, %arg1, %c6_i32 : i32
    %22 = arith.extui %21 : i1 to i32
    %c0_i32_20 = arith.constant 0 : i32
    %23 = arith.cmpi ne, %22, %c0_i32_20 : i32
    scf.if %23 {
      %c0_21 = arith.constant 0 : index
      %c0_22 = arith.constant 0 : index
      %24 = vector.load %arg8[%c0_21, %c0_22] : memref<16x128xf32, #tpu.memory_space<vmem>>, vector<16x128xf32>
      %c0_23 = arith.constant 0 : index
      %c0_24 = arith.constant 0 : index
      %c0_25 = arith.constant 0 : index
      %25 = vector.load %arg6[%c0_23, %c0_24, %c0_25] : memref<1x1x128xf32, #tpu.memory_space<vmem>>, vector<1x1x128xf32>
      %26 = vector.shape_cast %25 : vector<1x1x128xf32> to vector<1x128xf32>
      %27 = vector.broadcast %26 : vector<1x128xf32> to vector<16x128xf32>
      %28 = arith.addf %24, %27 : vector<16x128xf32>
      %29 = arith.truncf %28 : vector<16x128xf32> to vector<16x128xbf16>
      %c0_26 = arith.constant 0 : index
      %c0_27 = arith.constant 0 : index
      %30 = vector.load %arg7[%c0_26, %c0_27] : memref<16x128xbf16, #tpu.memory_space<vmem>>, vector<16x128xbf16>
      tpu.vector_store %arg7[%c0_26, %c0_27], %29 {strides = array<i32>} : memref<16x128xbf16, #tpu.memory_space<vmem>>, vector<16x128xbf16>,
    } else {
    }
    return
  }
  func.func @transform_0(%arg0: i32, %arg1: i32) -> (i32, i32, i32, i32) {
    %c0_i32 = arith.constant 0 : i32
    %c0_i32_0 = arith.constant 0 : i32
    %c0_i32_1 = arith.constant 0 : i32
    return %arg0, %arg1, %c0_i32, %c0_i32_0 : i32, i32, i32, i32
  }
  func.func @transform_1(%arg0: i32, %arg1: i32) -> (i32, i32, i32) {
    %c0_i32 = arith.constant 0 : i32
    %c0_i32_0 = arith.constant 0 : i32
    %c0_i32_1 = arith.constant 0 : i32
    return %arg0, %c0_i32, %c0_i32_0 : i32, i32, i32
  }
  func.func @transform_2(%arg0: i32, %arg1: i32) -> (i32, i32, i32) {
    %c0_i32 = arith.constant 0 : i32
    %c0_i32_0 = arith.constant 0 : i32
    %c0_i32_1 = arith.constant 0 : i32
    return %arg0, %c0_i32, %c0_i32_0 : i32, i32, i32
  }
  func.func @transform_3(%arg0: i32, %arg1: i32) -> (i32, i32, i32, i32) {
    %c0_i32 = arith.constant 0 : i32
    %c0_i32_0 = arith.constant 0 : i32
    %c0_i32_1 = arith.constant 0 : i32
    return %arg0, %arg1, %c0_i32, %c0_i32_0 : i32, i32, i32, i32
  }
  func.func @transform_4(%arg0: i32, %arg1: i32) -> (i32, i32, i32) {
    %c0_i32 = arith.constant 0 : i32
    %c0_i32_0 = arith.constant 0 : i32
    %c0_i32_1 = arith.constant 0 : i32
    return %arg0, %c0_i32, %c0_i32_0 : i32, i32, i32
  }
  func.func @transform_5(%arg0: i32, %arg1: i32) -> (i32, i32) {
    %c0_i32 = arith.constant 0 : i32
    %c0_i32_0 = arith.constant 0 : i32
    return %c0_i32, %arg0 : i32, i32
  }
}

module attributes {stable_mosaic.version = 11 : i64} {
  func.func @_block_kernel(%arg0: i32, %arg1: i32, %arg2: memref<1x1x16x512xbf16, #tpu.memory_space<vmem>>, %arg3: memref<1x512x128xbf16, #tpu.memory_space<vmem>>, %arg4: memref<1x1x128xf32, #tpu.memory_space<vmem>>, %arg5: memref<1x1x128x128xbf16, #tpu.memory_space<vmem>>, %arg6: memref<1x1x128xf32, #tpu.memory_space<vmem>>, %arg7: memref<16x128xbf16, #tpu.memory_space<vmem>>, %arg8: memref<16x128xf32, #tpu.memory_space<vmem>>) attributes {dimension_semantics = [#tpu.dimension_semantics<parallel>, #tpu.dimension_semantics<arbitrary>], iteration_bounds = array<i64: 2, 15>, scalar_prefetch = 0 : i64, scratch_operands = 1 : i64, tpu.core_type = #tpu.core_type<tc>, window_params = [{transform_indices = @transform_0, window_bounds = array<i64: 1, 1, 16, 512>}, {transform_indices = @transform_1, window_bounds = array<i64: 1, 512, 128>}, {transform_indices = @transform_2, window_bounds = array<i64: 1, 1, 128>}, {transform_indices = @transform_3, window_bounds = array<i64: 1, 1, 128, 128>}, {transform_indices = @transform_4, window_bounds = array<i64: 1, 1, 128>}, {transform_indices = @transform_5, window_bounds = array<i64: 16, 128>}]} {
    %c0_i32 = arith.constant 0 : i32
    %0 = arith.cmpi eq, %arg1, %c0_i32 : i32
    %1 = arith.extui %0 : i1 to i32
    %c0_i32_0 = arith.constant 0 : i32
    %2 = arith.cmpi ne, %1, %c0_i32_0 : i32
    scf.if %2 {
      %cst_21 = arith.constant 0.000000e+00 : f32
      %24 = vector.broadcast %cst_21 : f32 to vector<16x128xf32>
      %c0_22 = arith.constant 0 : index
      %c0_23 = arith.constant 0 : index
      %25 = vector.load %arg8[%c0_22, %c0_23] : memref<16x128xf32, #tpu.memory_space<vmem>>, vector<16x128xf32>
      tpu.vector_store %arg8[%c0_22, %c0_23], %24 {strides = array<i32>} : memref<16x128xf32, #tpu.memory_space<vmem>>, vector<16x128xf32>,
    } else {
    }
    %c0 = arith.constant 0 : index
    %c0_1 = arith.constant 0 : index
    %c0_2 = arith.constant 0 : index
    %c0_3 = arith.constant 0 : index
    %3 = vector.load %arg2[%c0, %c0_1, %c0_2, %c0_3] : memref<1x1x16x512xbf16, #tpu.memory_space<vmem>>, vector<1x1x16x512xbf16>
    %4 = vector.shape_cast %3 : vector<1x1x16x512xbf16> to vector<16x512xbf16>
    %c0_4 = arith.constant 0 : index
    %c0_5 = arith.constant 0 : index
    %c0_6 = arith.constant 0 : index
    %5 = vector.load %arg3[%c0_4, %c0_5, %c0_6] : memref<1x512x128xbf16, #tpu.memory_space<vmem>>, vector<1x512x128xbf16>
    %6 = vector.shape_cast %5 : vector<1x512x128xbf16> to vector<512x128xbf16>
    %cst = arith.constant dense<0.000000e+00> : vector<16x128xf32>
    %7 = tpu.matmul %4, %6, %cst {dimension_numbers = #tpu.dot_dimension_numbers<[1], [0], [0], [1], [0, 0, 1, 1], [], []>} : vector<16x512xbf16>, vector<512x128xbf16>, vector<16x128xf32> -> vector<16x128xf32>
    %c0_7 = arith.constant 0 : index
    %c0_8 = arith.constant 0 : index
    %c0_9 = arith.constant 0 : index
    %8 = vector.load %arg4[%c0_7, %c0_8, %c0_9] : memref<1x1x128xf32, #tpu.memory_space<vmem>>, vector<1x1x128xf32>
    %9 = vector.shape_cast %8 : vector<1x1x128xf32> to vector<1x128xf32>
    %10 = vector.broadcast %9 : vector<1x128xf32> to vector<16x128xf32>
    %11 = arith.addf %7, %10 : vector<16x128xf32>
    %cst_10 = arith.constant 0.000000e+00 : f32
    %12 = vector.broadcast %cst_10 : f32 to vector<16x128xf32>
    %13 = arith.maximumf %11, %12 : vector<16x128xf32>
    %14 = arith.truncf %13 : vector<16x128xf32> to vector<16x128xbf16>
    %c0_11 = arith.constant 0 : index
    %c0_12 = arith.constant 0 : index
    %15 = vector.load %arg8[%c0_11, %c0_12] : memref<16x128xf32, #tpu.memory_space<vmem>>, vector<16x128xf32>
    %c0_13 = arith.constant 0 : index
    %c0_14 = arith.constant 0 : index
    %c0_15 = arith.constant 0 : index
    %c0_16 = arith.constant 0 : index
    %16 = vector.load %arg5[%c0_13, %c0_14, %c0_15, %c0_16] : memref<1x1x128x128xbf16, #tpu.memory_space<vmem>>, vector<1x1x128x128xbf16>
    %17 = vector.shape_cast %16 : vector<1x1x128x128xbf16> to vector<128x128xbf16>
    %cst_17 = arith.constant dense<0.000000e+00> : vector<16x128xf32>
    %18 = tpu.matmul %14, %17, %cst_17 {dimension_numbers = #tpu.dot_dimension_numbers<[1], [0], [0], [1], [0, 0, 1, 1], [], []>} : vector<16x128xbf16>, vector<128x128xbf16>, vector<16x128xf32> -> vector<16x128xf32>
    %19 = arith.addf %15, %18 : vector<16x128xf32>
    %c0_18 = arith.constant 0 : index
    %c0_19 = arith.constant 0 : index
    %20 = vector.load %arg8[%c0_18, %c0_19] : memref<16x128xf32, #tpu.memory_space<vmem>>, vector<16x128xf32>
    tpu.vector_store %arg8[%c0_18, %c0_19], %19 {strides = array<i32>} : memref<16x128xf32, #tpu.memory_space<vmem>>, vector<16x128xf32>,
    %c14_i32 = arith.constant 14 : i32
    %21 = arith.cmpi eq, %arg1, %c14_i32 : i32
    %22 = arith.extui %21 : i1 to i32
    %c0_i32_20 = arith.constant 0 : i32
    %23 = arith.cmpi ne, %22, %c0_i32_20 : i32
    scf.if %23 {
      %c0_21 = arith.constant 0 : index
      %c0_22 = arith.constant 0 : index
      %24 = vector.load %arg8[%c0_21, %c0_22] : memref<16x128xf32, #tpu.memory_space<vmem>>, vector<16x128xf32>
      %c0_23 = arith.constant 0 : index
      %c0_24 = arith.constant 0 : index
      %c0_25 = arith.constant 0 : index
      %25 = vector.load %arg6[%c0_23, %c0_24, %c0_25] : memref<1x1x128xf32, #tpu.memory_space<vmem>>, vector<1x1x128xf32>
      %26 = vector.shape_cast %25 : vector<1x1x128xf32> to vector<1x128xf32>
      %27 = vector.broadcast %26 : vector<1x128xf32> to vector<16x128xf32>
      %28 = arith.addf %24, %27 : vector<16x128xf32>
      %29 = arith.truncf %28 : vector<16x128xf32> to vector<16x128xbf16>
      %c0_26 = arith.constant 0 : index
      %c0_27 = arith.constant 0 : index
      %30 = vector.load %arg7[%c0_26, %c0_27] : memref<16x128xbf16, #tpu.memory_space<vmem>>, vector<16x128xbf16>
      tpu.vector_store %arg7[%c0_26, %c0_27], %29 {strides = array<i32>} : memref<16x128xbf16, #tpu.memory_space<vmem>>, vector<16x128xbf16>,
    } else {
    }
    return
  }
  func.func @transform_0(%arg0: i32, %arg1: i32) -> (i32, i32, i32, i32) {
    %c0_i32 = arith.constant 0 : i32
    %c0_i32_0 = arith.constant 0 : i32
    %c0_i32_1 = arith.constant 0 : i32
    return %arg0, %arg1, %c0_i32, %c0_i32_0 : i32, i32, i32, i32
  }
  func.func @transform_1(%arg0: i32, %arg1: i32) -> (i32, i32, i32) {
    %c0_i32 = arith.constant 0 : i32
    %c0_i32_0 = arith.constant 0 : i32
    %c0_i32_1 = arith.constant 0 : i32
    return %arg0, %c0_i32, %c0_i32_0 : i32, i32, i32
  }
  func.func @transform_2(%arg0: i32, %arg1: i32) -> (i32, i32, i32) {
    %c0_i32 = arith.constant 0 : i32
    %c0_i32_0 = arith.constant 0 : i32
    %c0_i32_1 = arith.constant 0 : i32
    return %arg0, %c0_i32, %c0_i32_0 : i32, i32, i32
  }
  func.func @transform_3(%arg0: i32, %arg1: i32) -> (i32, i32, i32, i32) {
    %c0_i32 = arith.constant 0 : i32
    %c0_i32_0 = arith.constant 0 : i32
    %c0_i32_1 = arith.constant 0 : i32
    return %arg0, %arg1, %c0_i32, %c0_i32_0 : i32, i32, i32, i32
  }
  func.func @transform_4(%arg0: i32, %arg1: i32) -> (i32, i32, i32) {
    %c0_i32 = arith.constant 0 : i32
    %c0_i32_0 = arith.constant 0 : i32
    %c0_i32_1 = arith.constant 0 : i32
    return %arg0, %c0_i32, %c0_i32_0 : i32, i32, i32
  }
  func.func @transform_5(%arg0: i32, %arg1: i32) -> (i32, i32) {
    %c0_i32 = arith.constant 0 : i32
    %c0_i32_0 = arith.constant 0 : i32
    return %c0_i32, %arg0 : i32, i32
  }
}

module attributes {stable_mosaic.version = 11 : i64} {
  func.func @_block_kernel(%arg0: i32, %arg1: i32, %arg2: memref<1x1x16x256xbf16, #tpu.memory_space<vmem>>, %arg3: memref<1x256x128xbf16, #tpu.memory_space<vmem>>, %arg4: memref<1x1x128xf32, #tpu.memory_space<vmem>>, %arg5: memref<1x1x128x256xbf16, #tpu.memory_space<vmem>>, %arg6: memref<1x1x256xf32, #tpu.memory_space<vmem>>, %arg7: memref<16x256xbf16, #tpu.memory_space<vmem>>, %arg8: memref<16x256xf32, #tpu.memory_space<vmem>>) attributes {dimension_semantics = [#tpu.dimension_semantics<parallel>, #tpu.dimension_semantics<arbitrary>], iteration_bounds = array<i64: 2, 31>, scalar_prefetch = 0 : i64, scratch_operands = 1 : i64, tpu.core_type = #tpu.core_type<tc>, window_params = [{transform_indices = @transform_0, window_bounds = array<i64: 1, 1, 16, 256>}, {transform_indices = @transform_1, window_bounds = array<i64: 1, 256, 128>}, {transform_indices = @transform_2, window_bounds = array<i64: 1, 1, 128>}, {transform_indices = @transform_3, window_bounds = array<i64: 1, 1, 128, 256>}, {transform_indices = @transform_4, window_bounds = array<i64: 1, 1, 256>}, {transform_indices = @transform_5, window_bounds = array<i64: 16, 256>}]} {
    %c0_i32 = arith.constant 0 : i32
    %0 = arith.cmpi eq, %arg1, %c0_i32 : i32
    %1 = arith.extui %0 : i1 to i32
    %c0_i32_0 = arith.constant 0 : i32
    %2 = arith.cmpi ne, %1, %c0_i32_0 : i32
    scf.if %2 {
      %cst_21 = arith.constant 0.000000e+00 : f32
      %24 = vector.broadcast %cst_21 : f32 to vector<16x256xf32>
      %c0_22 = arith.constant 0 : index
      %c0_23 = arith.constant 0 : index
      %25 = vector.load %arg8[%c0_22, %c0_23] : memref<16x256xf32, #tpu.memory_space<vmem>>, vector<16x256xf32>
      tpu.vector_store %arg8[%c0_22, %c0_23], %24 {strides = array<i32>} : memref<16x256xf32, #tpu.memory_space<vmem>>, vector<16x256xf32>,
    } else {
    }
    %c0 = arith.constant 0 : index
    %c0_1 = arith.constant 0 : index
    %c0_2 = arith.constant 0 : index
    %c0_3 = arith.constant 0 : index
    %3 = vector.load %arg2[%c0, %c0_1, %c0_2, %c0_3] : memref<1x1x16x256xbf16, #tpu.memory_space<vmem>>, vector<1x1x16x256xbf16>
    %4 = vector.shape_cast %3 : vector<1x1x16x256xbf16> to vector<16x256xbf16>
    %c0_4 = arith.constant 0 : index
    %c0_5 = arith.constant 0 : index
    %c0_6 = arith.constant 0 : index
    %5 = vector.load %arg3[%c0_4, %c0_5, %c0_6] : memref<1x256x128xbf16, #tpu.memory_space<vmem>>, vector<1x256x128xbf16>
    %6 = vector.shape_cast %5 : vector<1x256x128xbf16> to vector<256x128xbf16>
    %cst = arith.constant dense<0.000000e+00> : vector<16x128xf32>
    %7 = tpu.matmul %4, %6, %cst {dimension_numbers = #tpu.dot_dimension_numbers<[1], [0], [0], [1], [0, 0, 1, 1], [], []>} : vector<16x256xbf16>, vector<256x128xbf16>, vector<16x128xf32> -> vector<16x128xf32>
    %c0_7 = arith.constant 0 : index
    %c0_8 = arith.constant 0 : index
    %c0_9 = arith.constant 0 : index
    %8 = vector.load %arg4[%c0_7, %c0_8, %c0_9] : memref<1x1x128xf32, #tpu.memory_space<vmem>>, vector<1x1x128xf32>
    %9 = vector.shape_cast %8 : vector<1x1x128xf32> to vector<1x128xf32>
    %10 = vector.broadcast %9 : vector<1x128xf32> to vector<16x128xf32>
    %11 = arith.addf %7, %10 : vector<16x128xf32>
    %cst_10 = arith.constant 0.000000e+00 : f32
    %12 = vector.broadcast %cst_10 : f32 to vector<16x128xf32>
    %13 = arith.maximumf %11, %12 : vector<16x128xf32>
    %14 = arith.truncf %13 : vector<16x128xf32> to vector<16x128xbf16>
    %c0_11 = arith.constant 0 : index
    %c0_12 = arith.constant 0 : index
    %15 = vector.load %arg8[%c0_11, %c0_12] : memref<16x256xf32, #tpu.memory_space<vmem>>, vector<16x256xf32>
    %c0_13 = arith.constant 0 : index
    %c0_14 = arith.constant 0 : index
    %c0_15 = arith.constant 0 : index
    %c0_16 = arith.constant 0 : index
    %16 = vector.load %arg5[%c0_13, %c0_14, %c0_15, %c0_16] : memref<1x1x128x256xbf16, #tpu.memory_space<vmem>>, vector<1x1x128x256xbf16>
    %17 = vector.shape_cast %16 : vector<1x1x128x256xbf16> to vector<128x256xbf16>
    %cst_17 = arith.constant dense<0.000000e+00> : vector<16x256xf32>
    %18 = tpu.matmul %14, %17, %cst_17 {dimension_numbers = #tpu.dot_dimension_numbers<[1], [0], [0], [1], [0, 0, 1, 1], [], []>} : vector<16x128xbf16>, vector<128x256xbf16>, vector<16x256xf32> -> vector<16x256xf32>
    %19 = arith.addf %15, %18 : vector<16x256xf32>
    %c0_18 = arith.constant 0 : index
    %c0_19 = arith.constant 0 : index
    %20 = vector.load %arg8[%c0_18, %c0_19] : memref<16x256xf32, #tpu.memory_space<vmem>>, vector<16x256xf32>
    tpu.vector_store %arg8[%c0_18, %c0_19], %19 {strides = array<i32>} : memref<16x256xf32, #tpu.memory_space<vmem>>, vector<16x256xf32>,
    %c30_i32 = arith.constant 30 : i32
    %21 = arith.cmpi eq, %arg1, %c30_i32 : i32
    %22 = arith.extui %21 : i1 to i32
    %c0_i32_20 = arith.constant 0 : i32
    %23 = arith.cmpi ne, %22, %c0_i32_20 : i32
    scf.if %23 {
      %c0_21 = arith.constant 0 : index
      %c0_22 = arith.constant 0 : index
      %24 = vector.load %arg8[%c0_21, %c0_22] : memref<16x256xf32, #tpu.memory_space<vmem>>, vector<16x256xf32>
      %c0_23 = arith.constant 0 : index
      %c0_24 = arith.constant 0 : index
      %c0_25 = arith.constant 0 : index
      %25 = vector.load %arg6[%c0_23, %c0_24, %c0_25] : memref<1x1x256xf32, #tpu.memory_space<vmem>>, vector<1x1x256xf32>
      %26 = vector.shape_cast %25 : vector<1x1x256xf32> to vector<1x256xf32>
      %27 = vector.broadcast %26 : vector<1x256xf32> to vector<16x256xf32>
      %28 = arith.addf %24, %27 : vector<16x256xf32>
      %29 = arith.truncf %28 : vector<16x256xf32> to vector<16x256xbf16>
      %c0_26 = arith.constant 0 : index
      %c0_27 = arith.constant 0 : index
      %30 = vector.load %arg7[%c0_26, %c0_27] : memref<16x256xbf16, #tpu.memory_space<vmem>>, vector<16x256xbf16>
      tpu.vector_store %arg7[%c0_26, %c0_27], %29 {strides = array<i32>} : memref<16x256xbf16, #tpu.memory_space<vmem>>, vector<16x256xbf16>,
    } else {
    }
    return
  }
  func.func @transform_0(%arg0: i32, %arg1: i32) -> (i32, i32, i32, i32) {
    %c0_i32 = arith.constant 0 : i32
    %c0_i32_0 = arith.constant 0 : i32
    %c0_i32_1 = arith.constant 0 : i32
    return %arg0, %arg1, %c0_i32, %c0_i32_0 : i32, i32, i32, i32
  }
  func.func @transform_1(%arg0: i32, %arg1: i32) -> (i32, i32, i32) {
    %c0_i32 = arith.constant 0 : i32
    %c0_i32_0 = arith.constant 0 : i32
    %c0_i32_1 = arith.constant 0 : i32
    return %arg0, %c0_i32, %c0_i32_0 : i32, i32, i32
  }
  func.func @transform_2(%arg0: i32, %arg1: i32) -> (i32, i32, i32) {
    %c0_i32 = arith.constant 0 : i32
    %c0_i32_0 = arith.constant 0 : i32
    %c0_i32_1 = arith.constant 0 : i32
    return %arg0, %c0_i32, %c0_i32_0 : i32, i32, i32
  }
  func.func @transform_3(%arg0: i32, %arg1: i32) -> (i32, i32, i32, i32) {
    %c0_i32 = arith.constant 0 : i32
    %c0_i32_0 = arith.constant 0 : i32
    %c0_i32_1 = arith.constant 0 : i32
    return %arg0, %arg1, %c0_i32, %c0_i32_0 : i32, i32, i32, i32
  }
  func.func @transform_4(%arg0: i32, %arg1: i32) -> (i32, i32, i32) {
    %c0_i32 = arith.constant 0 : i32
    %c0_i32_0 = arith.constant 0 : i32
    %c0_i32_1 = arith.constant 0 : i32
    return %arg0, %c0_i32, %c0_i32_0 : i32, i32, i32
  }
  func.func @transform_5(%arg0: i32, %arg1: i32) -> (i32, i32) {
    %c0_i32 = arith.constant 0 : i32
    %c0_i32_0 = arith.constant 0 : i32
    return %c0_i32, %arg0 : i32, i32
  }
}

module attributes {stable_mosaic.version = 11 : i64} {
  func.func @_block_kernel(%arg0: i32, %arg1: i32, %arg2: memref<1x1x16x128xbf16, #tpu.memory_space<vmem>>, %arg3: memref<1x128x128xbf16, #tpu.memory_space<vmem>>, %arg4: memref<1x1x128xf32, #tpu.memory_space<vmem>>, %arg5: memref<1x1x128x512xbf16, #tpu.memory_space<vmem>>, %arg6: memref<1x1x512xf32, #tpu.memory_space<vmem>>, %arg7: memref<16x512xbf16, #tpu.memory_space<vmem>>, %arg8: memref<16x512xf32, #tpu.memory_space<vmem>>) attributes {dimension_semantics = [#tpu.dimension_semantics<parallel>, #tpu.dimension_semantics<arbitrary>], iteration_bounds = array<i64: 2, 79>, scalar_prefetch = 0 : i64, scratch_operands = 1 : i64, tpu.core_type = #tpu.core_type<tc>, window_params = [{transform_indices = @transform_0, window_bounds = array<i64: 1, 1, 16, 128>}, {transform_indices = @transform_1, window_bounds = array<i64: 1, 128, 128>}, {transform_indices = @transform_2, window_bounds = array<i64: 1, 1, 128>}, {transform_indices = @transform_3, window_bounds = array<i64: 1, 1, 128, 512>}, {transform_indices = @transform_4, window_bounds = array<i64: 1, 1, 512>}, {transform_indices = @transform_5, window_bounds = array<i64: 16, 512>}]} {
    %c0_i32 = arith.constant 0 : i32
    %0 = arith.cmpi eq, %arg1, %c0_i32 : i32
    %1 = arith.extui %0 : i1 to i32
    %c0_i32_0 = arith.constant 0 : i32
    %2 = arith.cmpi ne, %1, %c0_i32_0 : i32
    scf.if %2 {
      %cst_21 = arith.constant 0.000000e+00 : f32
      %24 = vector.broadcast %cst_21 : f32 to vector<16x512xf32>
      %c0_22 = arith.constant 0 : index
      %c0_23 = arith.constant 0 : index
      %25 = vector.load %arg8[%c0_22, %c0_23] : memref<16x512xf32, #tpu.memory_space<vmem>>, vector<16x512xf32>
      tpu.vector_store %arg8[%c0_22, %c0_23], %24 {strides = array<i32>} : memref<16x512xf32, #tpu.memory_space<vmem>>, vector<16x512xf32>,
    } else {
    }
    %c0 = arith.constant 0 : index
    %c0_1 = arith.constant 0 : index
    %c0_2 = arith.constant 0 : index
    %c0_3 = arith.constant 0 : index
    %3 = vector.load %arg2[%c0, %c0_1, %c0_2, %c0_3] : memref<1x1x16x128xbf16, #tpu.memory_space<vmem>>, vector<1x1x16x128xbf16>
    %4 = vector.shape_cast %3 : vector<1x1x16x128xbf16> to vector<16x128xbf16>
    %c0_4 = arith.constant 0 : index
    %c0_5 = arith.constant 0 : index
    %c0_6 = arith.constant 0 : index
    %5 = vector.load %arg3[%c0_4, %c0_5, %c0_6] : memref<1x128x128xbf16, #tpu.memory_space<vmem>>, vector<1x128x128xbf16>
    %6 = vector.shape_cast %5 : vector<1x128x128xbf16> to vector<128x128xbf16>
    %cst = arith.constant dense<0.000000e+00> : vector<16x128xf32>
    %7 = tpu.matmul %4, %6, %cst {dimension_numbers = #tpu.dot_dimension_numbers<[1], [0], [0], [1], [0, 0, 1, 1], [], []>} : vector<16x128xbf16>, vector<128x128xbf16>, vector<16x128xf32> -> vector<16x128xf32>
    %c0_7 = arith.constant 0 : index
    %c0_8 = arith.constant 0 : index
    %c0_9 = arith.constant 0 : index
    %8 = vector.load %arg4[%c0_7, %c0_8, %c0_9] : memref<1x1x128xf32, #tpu.memory_space<vmem>>, vector<1x1x128xf32>
    %9 = vector.shape_cast %8 : vector<1x1x128xf32> to vector<1x128xf32>
    %10 = vector.broadcast %9 : vector<1x128xf32> to vector<16x128xf32>
    %11 = arith.addf %7, %10 : vector<16x128xf32>
    %cst_10 = arith.constant 0.000000e+00 : f32
    %12 = vector.broadcast %cst_10 : f32 to vector<16x128xf32>
    %13 = arith.maximumf %11, %12 : vector<16x128xf32>
    %14 = arith.truncf %13 : vector<16x128xf32> to vector<16x128xbf16>
    %c0_11 = arith.constant 0 : index
    %c0_12 = arith.constant 0 : index
    %15 = vector.load %arg8[%c0_11, %c0_12] : memref<16x512xf32, #tpu.memory_space<vmem>>, vector<16x512xf32>
    %c0_13 = arith.constant 0 : index
    %c0_14 = arith.constant 0 : index
    %c0_15 = arith.constant 0 : index
    %c0_16 = arith.constant 0 : index
    %16 = vector.load %arg5[%c0_13, %c0_14, %c0_15, %c0_16] : memref<1x1x128x512xbf16, #tpu.memory_space<vmem>>, vector<1x1x128x512xbf16>
    %17 = vector.shape_cast %16 : vector<1x1x128x512xbf16> to vector<128x512xbf16>
    %cst_17 = arith.constant dense<0.000000e+00> : vector<16x512xf32>
    %18 = tpu.matmul %14, %17, %cst_17 {dimension_numbers = #tpu.dot_dimension_numbers<[1], [0], [0], [1], [0, 0, 1, 1], [], []>} : vector<16x128xbf16>, vector<128x512xbf16>, vector<16x512xf32> -> vector<16x512xf32>
    %19 = arith.addf %15, %18 : vector<16x512xf32>
    %c0_18 = arith.constant 0 : index
    %c0_19 = arith.constant 0 : index
    %20 = vector.load %arg8[%c0_18, %c0_19] : memref<16x512xf32, #tpu.memory_space<vmem>>, vector<16x512xf32>
    tpu.vector_store %arg8[%c0_18, %c0_19], %19 {strides = array<i32>} : memref<16x512xf32, #tpu.memory_space<vmem>>, vector<16x512xf32>,
    %c78_i32 = arith.constant 78 : i32
    %21 = arith.cmpi eq, %arg1, %c78_i32 : i32
    %22 = arith.extui %21 : i1 to i32
    %c0_i32_20 = arith.constant 0 : i32
    %23 = arith.cmpi ne, %22, %c0_i32_20 : i32
    scf.if %23 {
      %c0_21 = arith.constant 0 : index
      %c0_22 = arith.constant 0 : index
      %24 = vector.load %arg8[%c0_21, %c0_22] : memref<16x512xf32, #tpu.memory_space<vmem>>, vector<16x512xf32>
      %c0_23 = arith.constant 0 : index
      %c0_24 = arith.constant 0 : index
      %c0_25 = arith.constant 0 : index
      %25 = vector.load %arg6[%c0_23, %c0_24, %c0_25] : memref<1x1x512xf32, #tpu.memory_space<vmem>>, vector<1x1x512xf32>
      %26 = vector.shape_cast %25 : vector<1x1x512xf32> to vector<1x512xf32>
      %27 = vector.broadcast %26 : vector<1x512xf32> to vector<16x512xf32>
      %28 = arith.addf %24, %27 : vector<16x512xf32>
      %29 = arith.truncf %28 : vector<16x512xf32> to vector<16x512xbf16>
      %c0_26 = arith.constant 0 : index
      %c0_27 = arith.constant 0 : index
      %30 = vector.load %arg7[%c0_26, %c0_27] : memref<16x512xbf16, #tpu.memory_space<vmem>>, vector<16x512xbf16>
      tpu.vector_store %arg7[%c0_26, %c0_27], %29 {strides = array<i32>} : memref<16x512xbf16, #tpu.memory_space<vmem>>, vector<16x512xbf16>,
    } else {
    }
    return
  }
  func.func @transform_0(%arg0: i32, %arg1: i32) -> (i32, i32, i32, i32) {
    %c0_i32 = arith.constant 0 : i32
    %c0_i32_0 = arith.constant 0 : i32
    %c0_i32_1 = arith.constant 0 : i32
    return %arg0, %arg1, %c0_i32, %c0_i32_0 : i32, i32, i32, i32
  }
  func.func @transform_1(%arg0: i32, %arg1: i32) -> (i32, i32, i32) {
    %c0_i32 = arith.constant 0 : i32
    %c0_i32_0 = arith.constant 0 : i32
    %c0_i32_1 = arith.constant 0 : i32
    return %arg0, %c0_i32, %c0_i32_0 : i32, i32, i32
  }
  func.func @transform_2(%arg0: i32, %arg1: i32) -> (i32, i32, i32) {
    %c0_i32 = arith.constant 0 : i32
    %c0_i32_0 = arith.constant 0 : i32
    %c0_i32_1 = arith.constant 0 : i32
    return %arg0, %c0_i32, %c0_i32_0 : i32, i32, i32
  }
  func.func @transform_3(%arg0: i32, %arg1: i32) -> (i32, i32, i32, i32) {
    %c0_i32 = arith.constant 0 : i32
    %c0_i32_0 = arith.constant 0 : i32
    %c0_i32_1 = arith.constant 0 : i32
    return %arg0, %arg1, %c0_i32, %c0_i32_0 : i32, i32, i32, i32
  }
  func.func @transform_4(%arg0: i32, %arg1: i32) -> (i32, i32, i32) {
    %c0_i32 = arith.constant 0 : i32
    %c0_i32_0 = arith.constant 0 : i32
    %c0_i32_1 = arith.constant 0 : i32
    return %arg0, %c0_i32, %c0_i32_0 : i32, i32, i32
  }
  func.func @transform_5(%arg0: i32, %arg1: i32) -> (i32, i32) {
    %c0_i32 = arith.constant 0 : i32
    %c0_i32_0 = arith.constant 0 : i32
    return %c0_i32, %arg0 : i32, i32
  }
}

module attributes {stable_mosaic.version = 11 : i64} {
  func.func @_block_kernel(%arg0: i32, %arg1: i32, %arg2: memref<1x1x16x3200xbf16, #tpu.memory_space<vmem>>, %arg3: memref<1x3200x128xbf16, #tpu.memory_space<vmem>>, %arg4: memref<1x1x128xf32, #tpu.memory_space<vmem>>, %arg5: memref<1x1x128x128xbf16, #tpu.memory_space<vmem>>, %arg6: memref<1x1x128xf32, #tpu.memory_space<vmem>>, %arg7: memref<16x128xbf16, #tpu.memory_space<vmem>>, %arg8: memref<16x128xf32, #tpu.memory_space<vmem>>) attributes {dimension_semantics = [#tpu.dimension_semantics<parallel>, #tpu.dimension_semantics<arbitrary>], iteration_bounds = array<i64: 2, 6>, scalar_prefetch = 0 : i64, scratch_operands = 1 : i64, tpu.core_type = #tpu.core_type<tc>, window_params = [{transform_indices = @transform_0, window_bounds = array<i64: 1, 1, 16, 3200>}, {transform_indices = @transform_1, window_bounds = array<i64: 1, 3200, 128>}, {transform_indices = @transform_2, window_bounds = array<i64: 1, 1, 128>}, {transform_indices = @transform_3, window_bounds = array<i64: 1, 1, 128, 128>}, {transform_indices = @transform_4, window_bounds = array<i64: 1, 1, 128>}, {transform_indices = @transform_5, window_bounds = array<i64: 16, 128>}]} {
    %c0_i32 = arith.constant 0 : i32
    %0 = arith.cmpi eq, %arg1, %c0_i32 : i32
    %1 = arith.extui %0 : i1 to i32
    %c0_i32_0 = arith.constant 0 : i32
    %2 = arith.cmpi ne, %1, %c0_i32_0 : i32
    scf.if %2 {
      %cst_21 = arith.constant 0.000000e+00 : f32
      %24 = vector.broadcast %cst_21 : f32 to vector<16x128xf32>
      %c0_22 = arith.constant 0 : index
      %c0_23 = arith.constant 0 : index
      %25 = vector.load %arg8[%c0_22, %c0_23] : memref<16x128xf32, #tpu.memory_space<vmem>>, vector<16x128xf32>
      tpu.vector_store %arg8[%c0_22, %c0_23], %24 {strides = array<i32>} : memref<16x128xf32, #tpu.memory_space<vmem>>, vector<16x128xf32>,
    } else {
    }
    %c0 = arith.constant 0 : index
    %c0_1 = arith.constant 0 : index
    %c0_2 = arith.constant 0 : index
    %c0_3 = arith.constant 0 : index
    %3 = vector.load %arg2[%c0, %c0_1, %c0_2, %c0_3] : memref<1x1x16x3200xbf16, #tpu.memory_space<vmem>>, vector<1x1x16x3200xbf16>
    %4 = vector.shape_cast %3 : vector<1x1x16x3200xbf16> to vector<16x3200xbf16>
    %c0_4 = arith.constant 0 : index
    %c0_5 = arith.constant 0 : index
    %c0_6 = arith.constant 0 : index
    %5 = vector.load %arg3[%c0_4, %c0_5, %c0_6] : memref<1x3200x128xbf16, #tpu.memory_space<vmem>>, vector<1x3200x128xbf16>
    %6 = vector.shape_cast %5 : vector<1x3200x128xbf16> to vector<3200x128xbf16>
    %cst = arith.constant dense<0.000000e+00> : vector<16x128xf32>
    %7 = tpu.matmul %4, %6, %cst {dimension_numbers = #tpu.dot_dimension_numbers<[1], [0], [0], [1], [0, 0, 1, 1], [], []>} : vector<16x3200xbf16>, vector<3200x128xbf16>, vector<16x128xf32> -> vector<16x128xf32>
    %c0_7 = arith.constant 0 : index
    %c0_8 = arith.constant 0 : index
    %c0_9 = arith.constant 0 : index
    %8 = vector.load %arg4[%c0_7, %c0_8, %c0_9] : memref<1x1x128xf32, #tpu.memory_space<vmem>>, vector<1x1x128xf32>
    %9 = vector.shape_cast %8 : vector<1x1x128xf32> to vector<1x128xf32>
    %10 = vector.broadcast %9 : vector<1x128xf32> to vector<16x128xf32>
    %11 = arith.addf %7, %10 : vector<16x128xf32>
    %cst_10 = arith.constant 0.000000e+00 : f32
    %12 = vector.broadcast %cst_10 : f32 to vector<16x128xf32>
    %13 = arith.maximumf %11, %12 : vector<16x128xf32>
    %14 = arith.truncf %13 : vector<16x128xf32> to vector<16x128xbf16>
    %c0_11 = arith.constant 0 : index
    %c0_12 = arith.constant 0 : index
    %15 = vector.load %arg8[%c0_11, %c0_12] : memref<16x128xf32, #tpu.memory_space<vmem>>, vector<16x128xf32>
    %c0_13 = arith.constant 0 : index
    %c0_14 = arith.constant 0 : index
    %c0_15 = arith.constant 0 : index
    %c0_16 = arith.constant 0 : index
    %16 = vector.load %arg5[%c0_13, %c0_14, %c0_15, %c0_16] : memref<1x1x128x128xbf16, #tpu.memory_space<vmem>>, vector<1x1x128x128xbf16>
    %17 = vector.shape_cast %16 : vector<1x1x128x128xbf16> to vector<128x128xbf16>
    %cst_17 = arith.constant dense<0.000000e+00> : vector<16x128xf32>
    %18 = tpu.matmul %14, %17, %cst_17 {dimension_numbers = #tpu.dot_dimension_numbers<[1], [0], [0], [1], [0, 0, 1, 1], [], []>} : vector<16x128xbf16>, vector<128x128xbf16>, vector<16x128xf32> -> vector<16x128xf32>
    %19 = arith.addf %15, %18 : vector<16x128xf32>
    %c0_18 = arith.constant 0 : index
    %c0_19 = arith.constant 0 : index
    %20 = vector.load %arg8[%c0_18, %c0_19] : memref<16x128xf32, #tpu.memory_space<vmem>>, vector<16x128xf32>
    tpu.vector_store %arg8[%c0_18, %c0_19], %19 {strides = array<i32>} : memref<16x128xf32, #tpu.memory_space<vmem>>, vector<16x128xf32>,
    %c5_i32 = arith.constant 5 : i32
    %21 = arith.cmpi eq, %arg1, %c5_i32 : i32
    %22 = arith.extui %21 : i1 to i32
    %c0_i32_20 = arith.constant 0 : i32
    %23 = arith.cmpi ne, %22, %c0_i32_20 : i32
    scf.if %23 {
      %c0_21 = arith.constant 0 : index
      %c0_22 = arith.constant 0 : index
      %24 = vector.load %arg8[%c0_21, %c0_22] : memref<16x128xf32, #tpu.memory_space<vmem>>, vector<16x128xf32>
      %c0_23 = arith.constant 0 : index
      %c0_24 = arith.constant 0 : index
      %c0_25 = arith.constant 0 : index
      %25 = vector.load %arg6[%c0_23, %c0_24, %c0_25] : memref<1x1x128xf32, #tpu.memory_space<vmem>>, vector<1x1x128xf32>
      %26 = vector.shape_cast %25 : vector<1x1x128xf32> to vector<1x128xf32>
      %27 = vector.broadcast %26 : vector<1x128xf32> to vector<16x128xf32>
      %28 = arith.addf %24, %27 : vector<16x128xf32>
      %29 = arith.truncf %28 : vector<16x128xf32> to vector<16x128xbf16>
      %c0_26 = arith.constant 0 : index
      %c0_27 = arith.constant 0 : index
      %30 = vector.load %arg7[%c0_26, %c0_27] : memref<16x128xbf16, #tpu.memory_space<vmem>>, vector<16x128xbf16>
      tpu.vector_store %arg7[%c0_26, %c0_27], %29 {strides = array<i32>} : memref<16x128xbf16, #tpu.memory_space<vmem>>, vector<16x128xbf16>,
    } else {
    }
    return
  }
  func.func @transform_0(%arg0: i32, %arg1: i32) -> (i32, i32, i32, i32) {
    %c0_i32 = arith.constant 0 : i32
    %c0_i32_0 = arith.constant 0 : i32
    %c0_i32_1 = arith.constant 0 : i32
    return %arg0, %arg1, %c0_i32, %c0_i32_0 : i32, i32, i32, i32
  }
  func.func @transform_1(%arg0: i32, %arg1: i32) -> (i32, i32, i32) {
    %c0_i32 = arith.constant 0 : i32
    %c0_i32_0 = arith.constant 0 : i32
    %c0_i32_1 = arith.constant 0 : i32
    return %arg0, %c0_i32, %c0_i32_0 : i32, i32, i32
  }
  func.func @transform_2(%arg0: i32, %arg1: i32) -> (i32, i32, i32) {
    %c0_i32 = arith.constant 0 : i32
    %c0_i32_0 = arith.constant 0 : i32
    %c0_i32_1 = arith.constant 0 : i32
    return %arg0, %c0_i32, %c0_i32_0 : i32, i32, i32
  }
  func.func @transform_3(%arg0: i32, %arg1: i32) -> (i32, i32, i32, i32) {
    %c0_i32 = arith.constant 0 : i32
    %c0_i32_0 = arith.constant 0 : i32
    %c0_i32_1 = arith.constant 0 : i32
    return %arg0, %arg1, %c0_i32, %c0_i32_0 : i32, i32, i32, i32
  }
  func.func @transform_4(%arg0: i32, %arg1: i32) -> (i32, i32, i32) {
    %c0_i32 = arith.constant 0 : i32
    %c0_i32_0 = arith.constant 0 : i32
    %c0_i32_1 = arith.constant 0 : i32
    return %arg0, %c0_i32, %c0_i32_0 : i32, i32, i32
  }
  func.func @transform_5(%arg0: i32, %arg1: i32) -> (i32, i32) {
    %c0_i32 = arith.constant 0 : i32
    %c0_i32_0 = arith.constant 0 : i32
    return %c0_i32, %arg0 : i32, i32
  }
}

module attributes {stable_mosaic.version = 11 : i64} {
  func.func @_head_kernel(%arg0: i32, %arg1: memref<16x256xbf16, #tpu.memory_space<vmem>>, %arg2: memref<16x256xbf16, #tpu.memory_space<vmem>>, %arg3: memref<16x256xbf16, #tpu.memory_space<vmem>>, %arg4: memref<16x256xbf16, #tpu.memory_space<vmem>>, %arg5: memref<16x512xbf16, #tpu.memory_space<vmem>>, %arg6: memref<16x1024xbf16, #tpu.memory_space<vmem>>, %arg7: memref<256x128xbf16, #tpu.memory_space<vmem>>, %arg8: memref<256x128xbf16, #tpu.memory_space<vmem>>, %arg9: memref<256x128xbf16, #tpu.memory_space<vmem>>, %arg10: memref<256x128xbf16, #tpu.memory_space<vmem>>, %arg11: memref<512x256xbf16, #tpu.memory_space<vmem>>, %arg12: memref<1024x512xbf16, #tpu.memory_space<vmem>>, %arg13: memref<1x128xf32, #tpu.memory_space<vmem>>, %arg14: memref<1x128xf32, #tpu.memory_space<vmem>>, %arg15: memref<1x128xf32, #tpu.memory_space<vmem>>, %arg16: memref<1x128xf32, #tpu.memory_space<vmem>>, %arg17: memref<1x256xf32, #tpu.memory_space<vmem>>, %arg18: memref<1x512xf32, #tpu.memory_space<vmem>>, %arg19: memref<128x128xbf16, #tpu.memory_space<vmem>>, %arg20: memref<128x128xbf16, #tpu.memory_space<vmem>>, %arg21: memref<128x128xbf16, #tpu.memory_space<vmem>>, %arg22: memref<128x128xbf16, #tpu.memory_space<vmem>>, %arg23: memref<256x128xbf16, #tpu.memory_space<vmem>>, %arg24: memref<512x128xbf16, #tpu.memory_space<vmem>>, %arg25: memref<1x128xf32, #tpu.memory_space<vmem>>, %arg26: memref<128x128xbf16, #tpu.memory_space<vmem>>, %arg27: memref<1x128xf32, #tpu.memory_space<vmem>>, %arg28: memref<128x128xbf16, #tpu.memory_space<vmem>>, %arg29: memref<1x128xf32, #tpu.memory_space<vmem>>, %arg30: memref<16x128xf32, #tpu.memory_space<vmem>>) attributes {dimension_semantics = [#tpu.dimension_semantics<arbitrary>], iteration_bounds = array<i64: 1>, scalar_prefetch = 0 : i64, scratch_operands = 0 : i64, tpu.core_type = #tpu.core_type<tc>, window_params = [{pipeline_mode = #tpu.pipeline_mode<synchronous>, transform_indices = @transform_0, window_bounds = array<i64: 16, 256>}, {pipeline_mode = #tpu.pipeline_mode<synchronous>, transform_indices = @transform_1, window_bounds = array<i64: 16, 256>}, {pipeline_mode = #tpu.pipeline_mode<synchronous>, transform_indices = @transform_2, window_bounds = array<i64: 16, 256>}, {pipeline_mode = #tpu.pipeline_mode<synchronous>, transform_indices = @transform_3, window_bounds = array<i64: 16, 256>}, {pipeline_mode = #tpu.pipeline_mode<synchronous>, transform_indices = @transform_4, window_bounds = array<i64: 16, 512>}, {pipeline_mode = #tpu.pipeline_mode<synchronous>, transform_indices = @transform_5, window_bounds = array<i64: 16, 1024>}, {pipeline_mode = #tpu.pipeline_mode<synchronous>, transform_indices = @transform_6, window_bounds = array<i64: 256, 128>}, {pipeline_mode = #tpu.pipeline_mode<synchronous>, transform_indices = @transform_7, window_bounds = array<i64: 256, 128>}, {pipeline_mode = #tpu.pipeline_mode<synchronous>, transform_indices = @transform_8, window_bounds = array<i64: 256, 128>}, {pipeline_mode = #tpu.pipeline_mode<synchronous>, transform_indices = @transform_9, window_bounds = array<i64: 256, 128>}, {pipeline_mode = #tpu.pipeline_mode<synchronous>, transform_indices = @transform_10, window_bounds = array<i64: 512, 256>}, {pipeline_mode = #tpu.pipeline_mode<synchronous>, transform_indices = @transform_11, window_bounds = array<i64: 1024, 512>}, {pipeline_mode = #tpu.pipeline_mode<synchronous>, transform_indices = @transform_12, window_bounds = array<i64: 1, 128>}, {pipeline_mode = #tpu.pipeline_mode<synchronous>, transform_indices = @transform_13, window_bounds = array<i64: 1, 128>}, {pipeline_mode = #tpu.pipeline_mode<synchronous>, transform_indices = @transform_14, window_bounds = array<i64: 1, 128>}, {pipeline_mode = #tpu.pipeline_mode<synchronous>, transform_indices = @transform_15, window_bounds = array<i64: 1, 128>}, {pipeline_mode = #tpu.pipeline_mode<synchronous>, transform_indices = @transform_16, window_bounds = array<i64: 1, 256>}, {pipeline_mode = #tpu.pipeline_mode<synchronous>, transform_indices = @transform_17, window_bounds = array<i64: 1, 512>}, {pipeline_mode = #tpu.pipeline_mode<synchronous>, transform_indices = @transform_18, window_bounds = array<i64: 128, 128>}, {pipeline_mode = #tpu.pipeline_mode<synchronous>, transform_indices = @transform_19, window_bounds = array<i64: 128, 128>}, {pipeline_mode = #tpu.pipeline_mode<synchronous>, transform_indices = @transform_20, window_bounds = array<i64: 128, 128>}, {pipeline_mode = #tpu.pipeline_mode<synchronous>, transform_indices = @transform_21, window_bounds = array<i64: 128, 128>}, {pipeline_mode = #tpu.pipeline_mode<synchronous>, transform_indices = @transform_22, window_bounds = array<i64: 256, 128>}, {pipeline_mode = #tpu.pipeline_mode<synchronous>, transform_indices = @transform_23, window_bounds = array<i64: 512, 128>}, {pipeline_mode = #tpu.pipeline_mode<synchronous>, transform_indices = @transform_24, window_bounds = array<i64: 1, 128>}, {pipeline_mode = #tpu.pipeline_mode<synchronous>, transform_indices = @transform_25, window_bounds = array<i64: 128, 128>}, {pipeline_mode = #tpu.pipeline_mode<synchronous>, transform_indices = @transform_26, window_bounds = array<i64: 1, 128>}, {pipeline_mode = #tpu.pipeline_mode<synchronous>, transform_indices = @transform_27, window_bounds = array<i64: 128, 128>}, {pipeline_mode = #tpu.pipeline_mode<synchronous>, transform_indices = @transform_28, window_bounds = array<i64: 1, 128>}, {pipeline_mode = #tpu.pipeline_mode<synchronous>, transform_indices = @transform_29, window_bounds = array<i64: 16, 128>}]} {
    %cst = arith.constant 0.000000e+00 : f32
    %0 = vector.broadcast %cst : f32 to vector<16x128xf32>
    %c0 = arith.constant 0 : index
    %c0_0 = arith.constant 0 : index
    %1 = vector.load %arg1[%c0, %c0_0] : memref<16x256xbf16, #tpu.memory_space<vmem>>, vector<16x256xbf16>
    %c0_1 = arith.constant 0 : index
    %c0_2 = arith.constant 0 : index
    %2 = vector.load %arg7[%c0_1, %c0_2] : memref<256x128xbf16, #tpu.memory_space<vmem>>, vector<256x128xbf16>
    %cst_3 = arith.constant dense<0.000000e+00> : vector<16x128xf32>
    %3 = tpu.matmul %1, %2, %cst_3 {dimension_numbers = #tpu.dot_dimension_numbers<[1], [0], [0], [1], [0, 0, 1, 1], [], []>} : vector<16x256xbf16>, vector<256x128xbf16>, vector<16x128xf32> -> vector<16x128xf32>
    %c0_4 = arith.constant 0 : index
    %c0_5 = arith.constant 0 : index
    %4 = vector.load %arg13[%c0_4, %c0_5] : memref<1x128xf32, #tpu.memory_space<vmem>>, vector<1x128xf32>
    %5 = vector.broadcast %4 : vector<1x128xf32> to vector<16x128xf32>
    %6 = arith.addf %3, %5 : vector<16x128xf32>
    %cst_6 = arith.constant 0.000000e+00 : f32
    %7 = vector.broadcast %cst_6 : f32 to vector<16x128xf32>
    %8 = arith.maximumf %6, %7 : vector<16x128xf32>
    %9 = arith.truncf %8 : vector<16x128xf32> to vector<16x128xbf16>
    %c0_7 = arith.constant 0 : index
    %c0_8 = arith.constant 0 : index
    %10 = vector.load %arg19[%c0_7, %c0_8] : memref<128x128xbf16, #tpu.memory_space<vmem>>, vector<128x128xbf16>
    %cst_9 = arith.constant dense<0.000000e+00> : vector<16x128xf32>
    %11 = tpu.matmul %9, %10, %cst_9 {dimension_numbers = #tpu.dot_dimension_numbers<[1], [0], [0], [1], [0, 0, 1, 1], [], []>} : vector<16x128xbf16>, vector<128x128xbf16>, vector<16x128xf32> -> vector<16x128xf32>
    %12 = arith.addf %0, %11 : vector<16x128xf32>
    %c0_10 = arith.constant 0 : index
    %c0_11 = arith.constant 0 : index
    %13 = vector.load %arg2[%c0_10, %c0_11] : memref<16x256xbf16, #tpu.memory_space<vmem>>, vector<16x256xbf16>
    %c0_12 = arith.constant 0 : index
    %c0_13 = arith.constant 0 : index
    %14 = vector.load %arg8[%c0_12, %c0_13] : memref<256x128xbf16, #tpu.memory_space<vmem>>, vector<256x128xbf16>
    %cst_14 = arith.constant dense<0.000000e+00> : vector<16x128xf32>
    %15 = tpu.matmul %13, %14, %cst_14 {dimension_numbers = #tpu.dot_dimension_numbers<[1], [0], [0], [1], [0, 0, 1, 1], [], []>} : vector<16x256xbf16>, vector<256x128xbf16>, vector<16x128xf32> -> vector<16x128xf32>
    %c0_15 = arith.constant 0 : index
    %c0_16 = arith.constant 0 : index
    %16 = vector.load %arg14[%c0_15, %c0_16] : memref<1x128xf32, #tpu.memory_space<vmem>>, vector<1x128xf32>
    %17 = vector.broadcast %16 : vector<1x128xf32> to vector<16x128xf32>
    %18 = arith.addf %15, %17 : vector<16x128xf32>
    %cst_17 = arith.constant 0.000000e+00 : f32
    %19 = vector.broadcast %cst_17 : f32 to vector<16x128xf32>
    %20 = arith.maximumf %18, %19 : vector<16x128xf32>
    %21 = arith.truncf %20 : vector<16x128xf32> to vector<16x128xbf16>
    %c0_18 = arith.constant 0 : index
    %c0_19 = arith.constant 0 : index
    %22 = vector.load %arg20[%c0_18, %c0_19] : memref<128x128xbf16, #tpu.memory_space<vmem>>, vector<128x128xbf16>
    %cst_20 = arith.constant dense<0.000000e+00> : vector<16x128xf32>
    %23 = tpu.matmul %21, %22, %cst_20 {dimension_numbers = #tpu.dot_dimension_numbers<[1], [0], [0], [1], [0, 0, 1, 1], [], []>} : vector<16x128xbf16>, vector<128x128xbf16>, vector<16x128xf32> -> vector<16x128xf32>
    %24 = arith.addf %12, %23 : vector<16x128xf32>
    %c0_21 = arith.constant 0 : index
    %c0_22 = arith.constant 0 : index
    %25 = vector.load %arg3[%c0_21, %c0_22] : memref<16x256xbf16, #tpu.memory_space<vmem>>, vector<16x256xbf16>
    %c0_23 = arith.constant 0 : index
    %c0_24 = arith.constant 0 : index
    %26 = vector.load %arg9[%c0_23, %c0_24] : memref<256x128xbf16, #tpu.memory_space<vmem>>, vector<256x128xbf16>
    %cst_25 = arith.constant dense<0.000000e+00> : vector<16x128xf32>
    %27 = tpu.matmul %25, %26, %cst_25 {dimension_numbers = #tpu.dot_dimension_numbers<[1], [0], [0], [1], [0, 0, 1, 1], [], []>} : vector<16x256xbf16>, vector<256x128xbf16>, vector<16x128xf32> -> vector<16x128xf32>
    %c0_26 = arith.constant 0 : index
    %c0_27 = arith.constant 0 : index
    %28 = vector.load %arg15[%c0_26, %c0_27] : memref<1x128xf32, #tpu.memory_space<vmem>>, vector<1x128xf32>
    %29 = vector.broadcast %28 : vector<1x128xf32> to vector<16x128xf32>
    %30 = arith.addf %27, %29 : vector<16x128xf32>
    %cst_28 = arith.constant 0.000000e+00 : f32
    %31 = vector.broadcast %cst_28 : f32 to vector<16x128xf32>
    %32 = arith.maximumf %30, %31 : vector<16x128xf32>
    %33 = arith.truncf %32 : vector<16x128xf32> to vector<16x128xbf16>
    %c0_29 = arith.constant 0 : index
    %c0_30 = arith.constant 0 : index
    %34 = vector.load %arg21[%c0_29, %c0_30] : memref<128x128xbf16, #tpu.memory_space<vmem>>, vector<128x128xbf16>
    %cst_31 = arith.constant dense<0.000000e+00> : vector<16x128xf32>
    %35 = tpu.matmul %33, %34, %cst_31 {dimension_numbers = #tpu.dot_dimension_numbers<[1], [0], [0], [1], [0, 0, 1, 1], [], []>} : vector<16x128xbf16>, vector<128x128xbf16>, vector<16x128xf32> -> vector<16x128xf32>
    %36 = arith.addf %24, %35 : vector<16x128xf32>
    %c0_32 = arith.constant 0 : index
    %c0_33 = arith.constant 0 : index
    %37 = vector.load %arg4[%c0_32, %c0_33] : memref<16x256xbf16, #tpu.memory_space<vmem>>, vector<16x256xbf16>
    %c0_34 = arith.constant 0 : index
    %c0_35 = arith.constant 0 : index
    %38 = vector.load %arg10[%c0_34, %c0_35] : memref<256x128xbf16, #tpu.memory_space<vmem>>, vector<256x128xbf16>
    %cst_36 = arith.constant dense<0.000000e+00> : vector<16x128xf32>
    %39 = tpu.matmul %37, %38, %cst_36 {dimension_numbers = #tpu.dot_dimension_numbers<[1], [0], [0], [1], [0, 0, 1, 1], [], []>} : vector<16x256xbf16>, vector<256x128xbf16>, vector<16x128xf32> -> vector<16x128xf32>
    %c0_37 = arith.constant 0 : index
    %c0_38 = arith.constant 0 : index
    %40 = vector.load %arg16[%c0_37, %c0_38] : memref<1x128xf32, #tpu.memory_space<vmem>>, vector<1x128xf32>
    %41 = vector.broadcast %40 : vector<1x128xf32> to vector<16x128xf32>
    %42 = arith.addf %39, %41 : vector<16x128xf32>
    %cst_39 = arith.constant 0.000000e+00 : f32
    %43 = vector.broadcast %cst_39 : f32 to vector<16x128xf32>
    %44 = arith.maximumf %42, %43 : vector<16x128xf32>
    %45 = arith.truncf %44 : vector<16x128xf32> to vector<16x128xbf16>
    %c0_40 = arith.constant 0 : index
    %c0_41 = arith.constant 0 : index
    %46 = vector.load %arg22[%c0_40, %c0_41] : memref<128x128xbf16, #tpu.memory_space<vmem>>, vector<128x128xbf16>
    %cst_42 = arith.constant dense<0.000000e+00> : vector<16x128xf32>
    %47 = tpu.matmul %45, %46, %cst_42 {dimension_numbers = #tpu.dot_dimension_numbers<[1], [0], [0], [1], [0, 0, 1, 1], [], []>} : vector<16x128xbf16>, vector<128x128xbf16>, vector<16x128xf32> -> vector<16x128xf32>
    %48 = arith.addf %36, %47 : vector<16x128xf32>
    %c0_43 = arith.constant 0 : index
    %c0_44 = arith.constant 0 : index
    %49 = vector.load %arg5[%c0_43, %c0_44] : memref<16x512xbf16, #tpu.memory_space<vmem>>, vector<16x512xbf16>
    %c0_45 = arith.constant 0 : index
    %c0_46 = arith.constant 0 : index
    %50 = vector.load %arg11[%c0_45, %c0_46] : memref<512x256xbf16, #tpu.memory_space<vmem>>, vector<512x256xbf16>
    %cst_47 = arith.constant dense<0.000000e+00> : vector<16x256xf32>
    %51 = tpu.matmul %49, %50, %cst_47 {dimension_numbers = #tpu.dot_dimension_numbers<[1], [0], [0], [1], [0, 0, 1, 1], [], []>} : vector<16x512xbf16>, vector<512x256xbf16>, vector<16x256xf32> -> vector<16x256xf32>
    %c0_48 = arith.constant 0 : index
    %c0_49 = arith.constant 0 : index
    %52 = vector.load %arg17[%c0_48, %c0_49] : memref<1x256xf32, #tpu.memory_space<vmem>>, vector<1x256xf32>
    %53 = vector.broadcast %52 : vector<1x256xf32> to vector<16x256xf32>
    %54 = arith.addf %51, %53 : vector<16x256xf32>
    %cst_50 = arith.constant 0.000000e+00 : f32
    %55 = vector.broadcast %cst_50 : f32 to vector<16x256xf32>
    %56 = arith.maximumf %54, %55 : vector<16x256xf32>
    %57 = arith.truncf %56 : vector<16x256xf32> to vector<16x256xbf16>
    %c0_51 = arith.constant 0 : index
    %c0_52 = arith.constant 0 : index
    %58 = vector.load %arg23[%c0_51, %c0_52] : memref<256x128xbf16, #tpu.memory_space<vmem>>, vector<256x128xbf16>
    %cst_53 = arith.constant dense<0.000000e+00> : vector<16x128xf32>
    %59 = tpu.matmul %57, %58, %cst_53 {dimension_numbers = #tpu.dot_dimension_numbers<[1], [0], [0], [1], [0, 0, 1, 1], [], []>} : vector<16x256xbf16>, vector<256x128xbf16>, vector<16x128xf32> -> vector<16x128xf32>
    %60 = arith.addf %48, %59 : vector<16x128xf32>
    %c0_54 = arith.constant 0 : index
    %c0_55 = arith.constant 0 : index
    %61 = vector.load %arg6[%c0_54, %c0_55] : memref<16x1024xbf16, #tpu.memory_space<vmem>>, vector<16x1024xbf16>
    %c0_56 = arith.constant 0 : index
    %c0_57 = arith.constant 0 : index
    %62 = vector.load %arg12[%c0_56, %c0_57] : memref<1024x512xbf16, #tpu.memory_space<vmem>>, vector<1024x512xbf16>
    %cst_58 = arith.constant dense<0.000000e+00> : vector<16x512xf32>
    %63 = tpu.matmul %61, %62, %cst_58 {dimension_numbers = #tpu.dot_dimension_numbers<[1], [0], [0], [1], [0, 0, 1, 1], [], []>} : vector<16x1024xbf16>, vector<1024x512xbf16>, vector<16x512xf32> -> vector<16x512xf32>
    %c0_59 = arith.constant 0 : index
    %c0_60 = arith.constant 0 : index
    %64 = vector.load %arg18[%c0_59, %c0_60] : memref<1x512xf32, #tpu.memory_space<vmem>>, vector<1x512xf32>
    %65 = vector.broadcast %64 : vector<1x512xf32> to vector<16x512xf32>
    %66 = arith.addf %63, %65 : vector<16x512xf32>
    %cst_61 = arith.constant 0.000000e+00 : f32
    %67 = vector.broadcast %cst_61 : f32 to vector<16x512xf32>
    %68 = arith.maximumf %66, %67 : vector<16x512xf32>
    %69 = arith.truncf %68 : vector<16x512xf32> to vector<16x512xbf16>
    %c0_62 = arith.constant 0 : index
    %c0_63 = arith.constant 0 : index
    %70 = vector.load %arg24[%c0_62, %c0_63] : memref<512x128xbf16, #tpu.memory_space<vmem>>, vector<512x128xbf16>
    %cst_64 = arith.constant dense<0.000000e+00> : vector<16x128xf32>
    %71 = tpu.matmul %69, %70, %cst_64 {dimension_numbers = #tpu.dot_dimension_numbers<[1], [0], [0], [1], [0, 0, 1, 1], [], []>} : vector<16x512xbf16>, vector<512x128xbf16>, vector<16x128xf32> -> vector<16x128xf32>
    %72 = arith.addf %60, %71 : vector<16x128xf32>
    %c0_65 = arith.constant 0 : index
    %c0_66 = arith.constant 0 : index
    %73 = vector.load %arg25[%c0_65, %c0_66] : memref<1x128xf32, #tpu.memory_space<vmem>>, vector<1x128xf32>
    %74 = vector.broadcast %73 : vector<1x128xf32> to vector<16x128xf32>
    %75 = arith.addf %72, %74 : vector<16x128xf32>
    %cst_67 = arith.constant 0.000000e+00 : f32
    %76 = vector.broadcast %cst_67 : f32 to vector<16x128xf32>
    %77 = arith.maximumf %75, %76 : vector<16x128xf32>
    %78 = arith.truncf %77 : vector<16x128xf32> to vector<16x128xbf16>
    %c0_68 = arith.constant 0 : index
    %c0_69 = arith.constant 0 : index
    %79 = vector.load %arg26[%c0_68, %c0_69] : memref<128x128xbf16, #tpu.memory_space<vmem>>, vector<128x128xbf16>
    %cst_70 = arith.constant dense<0.000000e+00> : vector<16x128xf32>
    %80 = tpu.matmul %78, %79, %cst_70 {dimension_numbers = #tpu.dot_dimension_numbers<[1], [0], [0], [1], [0, 0, 1, 1], [], []>} : vector<16x128xbf16>, vector<128x128xbf16>, vector<16x128xf32> -> vector<16x128xf32>
    %c0_71 = arith.constant 0 : index
    %c0_72 = arith.constant 0 : index
    %81 = vector.load %arg27[%c0_71, %c0_72] : memref<1x128xf32, #tpu.memory_space<vmem>>, vector<1x128xf32>
    %82 = vector.broadcast %81 : vector<1x128xf32> to vector<16x128xf32>
    %83 = arith.addf %80, %82 : vector<16x128xf32>
    %cst_73 = arith.constant 0.000000e+00 : f32
    %84 = vector.broadcast %cst_73 : f32 to vector<16x128xf32>
    %85 = arith.maximumf %83, %84 : vector<16x128xf32>
    %86 = arith.truncf %85 : vector<16x128xf32> to vector<16x128xbf16>
    %c0_74 = arith.constant 0 : index
    %c0_75 = arith.constant 0 : index
    %87 = vector.load %arg28[%c0_74, %c0_75] : memref<128x128xbf16, #tpu.memory_space<vmem>>, vector<128x128xbf16>
    %cst_76 = arith.constant dense<0.000000e+00> : vector<16x128xf32>
    %88 = tpu.matmul %86, %87, %cst_76 {dimension_numbers = #tpu.dot_dimension_numbers<[1], [0], [0], [1], [0, 0, 1, 1], [], []>} : vector<16x128xbf16>, vector<128x128xbf16>, vector<16x128xf32> -> vector<16x128xf32>
    %c0_77 = arith.constant 0 : index
    %c0_78 = arith.constant 0 : index
    %89 = vector.load %arg29[%c0_77, %c0_78] : memref<1x128xf32, #tpu.memory_space<vmem>>, vector<1x128xf32>
    %90 = vector.broadcast %89 : vector<1x128xf32> to vector<16x128xf32>
    %91 = arith.addf %88, %90 : vector<16x128xf32>
    %92 = arith.negf %91 : vector<16x128xf32>
    %93 = math.exp %92 : vector<16x128xf32>
    %cst_79 = arith.constant 1.000000e+00 : f32
    %94 = vector.broadcast %cst_79 : f32 to vector<16x128xf32>
    %95 = arith.addf %94, %93 : vector<16x128xf32>
    %96 = arith.divf %94, %95 : vector<16x128xf32>
    %c0_80 = arith.constant 0 : index
    %c0_81 = arith.constant 0 : index
    %97 = vector.load %arg30[%c0_80, %c0_81] : memref<16x128xf32, #tpu.memory_space<vmem>>, vector<16x128xf32>
    tpu.vector_store %arg30[%c0_80, %c0_81], %96 {strides = array<i32>} : memref<16x128xf32, #tpu.memory_space<vmem>>, vector<16x128xf32>,
    return
  }
  func.func @transform_0(%arg0: i32) -> (i32, i32) {
    %c0_i32 = arith.constant 0 : i32
    %c0_i32_0 = arith.constant 0 : i32
    %c0_i32_1 = arith.constant 0 : i32
    return %c0_i32, %c0_i32_0 : i32, i32
  }
  func.func @transform_1(%arg0: i32) -> (i32, i32) {
    %c0_i32 = arith.constant 0 : i32
    %c0_i32_0 = arith.constant 0 : i32
    %c0_i32_1 = arith.constant 0 : i32
    return %c0_i32, %c0_i32_0 : i32, i32
  }
  func.func @transform_2(%arg0: i32) -> (i32, i32) {
    %c0_i32 = arith.constant 0 : i32
    %c0_i32_0 = arith.constant 0 : i32
    %c0_i32_1 = arith.constant 0 : i32
    return %c0_i32, %c0_i32_0 : i32, i32
  }
  func.func @transform_3(%arg0: i32) -> (i32, i32) {
    %c0_i32 = arith.constant 0 : i32
    %c0_i32_0 = arith.constant 0 : i32
    %c0_i32_1 = arith.constant 0 : i32
    return %c0_i32, %c0_i32_0 : i32, i32
  }
  func.func @transform_4(%arg0: i32) -> (i32, i32) {
    %c0_i32 = arith.constant 0 : i32
    %c0_i32_0 = arith.constant 0 : i32
    %c0_i32_1 = arith.constant 0 : i32
    return %c0_i32, %c0_i32_0 : i32, i32
  }
  func.func @transform_5(%arg0: i32) -> (i32, i32) {
    %c0_i32 = arith.constant 0 : i32
    %c0_i32_0 = arith.constant 0 : i32
    %c0_i32_1 = arith.constant 0 : i32
    return %c0_i32, %c0_i32_0 : i32, i32
  }
  func.func @transform_6(%arg0: i32) -> (i32, i32) {
    %c0_i32 = arith.constant 0 : i32
    %c0_i32_0 = arith.constant 0 : i32
    %c0_i32_1 = arith.constant 0 : i32
    return %c0_i32, %c0_i32_0 : i32, i32
  }
  func.func @transform_7(%arg0: i32) -> (i32, i32) {
    %c0_i32 = arith.constant 0 : i32
    %c0_i32_0 = arith.constant 0 : i32
    %c0_i32_1 = arith.constant 0 : i32
    return %c0_i32, %c0_i32_0 : i32, i32
  }
  func.func @transform_8(%arg0: i32) -> (i32, i32) {
    %c0_i32 = arith.constant 0 : i32
    %c0_i32_0 = arith.constant 0 : i32
    %c0_i32_1 = arith.constant 0 : i32
    return %c0_i32, %c0_i32_0 : i32, i32
  }
  func.func @transform_9(%arg0: i32) -> (i32, i32) {
    %c0_i32 = arith.constant 0 : i32
    %c0_i32_0 = arith.constant 0 : i32
    %c0_i32_1 = arith.constant 0 : i32
    return %c0_i32, %c0_i32_0 : i32, i32
  }
  func.func @transform_10(%arg0: i32) -> (i32, i32) {
    %c0_i32 = arith.constant 0 : i32
    %c0_i32_0 = arith.constant 0 : i32
    %c0_i32_1 = arith.constant 0 : i32
    return %c0_i32, %c0_i32_0 : i32, i32
  }
  func.func @transform_11(%arg0: i32) -> (i32, i32) {
    %c0_i32 = arith.constant 0 : i32
    %c0_i32_0 = arith.constant 0 : i32
    %c0_i32_1 = arith.constant 0 : i32
    return %c0_i32, %c0_i32_0 : i32, i32
  }
  func.func @transform_12(%arg0: i32) -> (i32, i32) {
    %c0_i32 = arith.constant 0 : i32
    %c0_i32_0 = arith.constant 0 : i32
    %c0_i32_1 = arith.constant 0 : i32
    return %c0_i32, %c0_i32_0 : i32, i32
  }
  func.func @transform_13(%arg0: i32) -> (i32, i32) {
    %c0_i32 = arith.constant 0 : i32
    %c0_i32_0 = arith.constant 0 : i32
    %c0_i32_1 = arith.constant 0 : i32
    return %c0_i32, %c0_i32_0 : i32, i32
  }
  func.func @transform_14(%arg0: i32) -> (i32, i32) {
    %c0_i32 = arith.constant 0 : i32
    %c0_i32_0 = arith.constant 0 : i32
    %c0_i32_1 = arith.constant 0 : i32
    return %c0_i32, %c0_i32_0 : i32, i32
  }
  func.func @transform_15(%arg0: i32) -> (i32, i32) {
    %c0_i32 = arith.constant 0 : i32
    %c0_i32_0 = arith.constant 0 : i32
    %c0_i32_1 = arith.constant 0 : i32
    return %c0_i32, %c0_i32_0 : i32, i32
  }
  func.func @transform_16(%arg0: i32) -> (i32, i32) {
    %c0_i32 = arith.constant 0 : i32
    %c0_i32_0 = arith.constant 0 : i32
    %c0_i32_1 = arith.constant 0 : i32
    return %c0_i32, %c0_i32_0 : i32, i32
  }
  func.func @transform_17(%arg0: i32) -> (i32, i32) {
    %c0_i32 = arith.constant 0 : i32
    %c0_i32_0 = arith.constant 0 : i32
    %c0_i32_1 = arith.constant 0 : i32
    return %c0_i32, %c0_i32_0 : i32, i32
  }
  func.func @transform_18(%arg0: i32) -> (i32, i32) {
    %c0_i32 = arith.constant 0 : i32
    %c0_i32_0 = arith.constant 0 : i32
    %c0_i32_1 = arith.constant 0 : i32
    return %c0_i32, %c0_i32_0 : i32, i32
  }
  func.func @transform_19(%arg0: i32) -> (i32, i32) {
    %c0_i32 = arith.constant 0 : i32
    %c0_i32_0 = arith.constant 0 : i32
    %c0_i32_1 = arith.constant 0 : i32
    return %c0_i32, %c0_i32_0 : i32, i32
  }
  func.func @transform_20(%arg0: i32) -> (i32, i32) {
    %c0_i32 = arith.constant 0 : i32
    %c0_i32_0 = arith.constant 0 : i32
    %c0_i32_1 = arith.constant 0 : i32
    return %c0_i32, %c0_i32_0 : i32, i32
  }
  func.func @transform_21(%arg0: i32) -> (i32, i32) {
    %c0_i32 = arith.constant 0 : i32
    %c0_i32_0 = arith.constant 0 : i32
    %c0_i32_1 = arith.constant 0 : i32
    return %c0_i32, %c0_i32_0 : i32, i32
  }
  func.func @transform_22(%arg0: i32) -> (i32, i32) {
    %c0_i32 = arith.constant 0 : i32
    %c0_i32_0 = arith.constant 0 : i32
    %c0_i32_1 = arith.constant 0 : i32
    return %c0_i32, %c0_i32_0 : i32, i32
  }
  func.func @transform_23(%arg0: i32) -> (i32, i32) {
    %c0_i32 = arith.constant 0 : i32
    %c0_i32_0 = arith.constant 0 : i32
    %c0_i32_1 = arith.constant 0 : i32
    return %c0_i32, %c0_i32_0 : i32, i32
  }
  func.func @transform_24(%arg0: i32) -> (i32, i32) {
    %c0_i32 = arith.constant 0 : i32
    %c0_i32_0 = arith.constant 0 : i32
    %c0_i32_1 = arith.constant 0 : i32
    return %c0_i32, %c0_i32_0 : i32, i32
  }
  func.func @transform_25(%arg0: i32) -> (i32, i32) {
    %c0_i32 = arith.constant 0 : i32
    %c0_i32_0 = arith.constant 0 : i32
    %c0_i32_1 = arith.constant 0 : i32
    return %c0_i32, %c0_i32_0 : i32, i32
  }
  func.func @transform_26(%arg0: i32) -> (i32, i32) {
    %c0_i32 = arith.constant 0 : i32
    %c0_i32_0 = arith.constant 0 : i32
    %c0_i32_1 = arith.constant 0 : i32
    return %c0_i32, %c0_i32_0 : i32, i32
  }
  func.func @transform_27(%arg0: i32) -> (i32, i32) {
    %c0_i32 = arith.constant 0 : i32
    %c0_i32_0 = arith.constant 0 : i32
    %c0_i32_1 = arith.constant 0 : i32
    return %c0_i32, %c0_i32_0 : i32, i32
  }
  func.func @transform_28(%arg0: i32) -> (i32, i32) {
    %c0_i32 = arith.constant 0 : i32
    %c0_i32_0 = arith.constant 0 : i32
    %c0_i32_1 = arith.constant 0 : i32
    return %c0_i32, %c0_i32_0 : i32, i32
  }
  func.func @transform_29(%arg0: i32) -> (i32, i32) {
    %c0_i32 = arith.constant 0 : i32
    %c0_i32_0 = arith.constant 0 : i32
    %c0_i32_1 = arith.constant 0 : i32
    return %c0_i32, %c0_i32_0 : i32, i32
  }
}

</mosaic_0001>

<bundles_post_ra>
// kernel: full_ppi_forward.8
= control target key start
LH: loop header
LB: loop body
LE: loop exit
PB: predicated region body
PF: predicated region fallthrough
CT: control target
= control target key end

     0   :  { %s2480_s18 = smov 0   ;;  %s2482_s19 = smov 0   ;;  %s2735_s0 = inlined_call_operand.vmem [shape: bf16[2,3,16,1664], index: 0, kind: input, shape index: {}]   ;;  %s2736_s1 = inlined_call_operand.vmem [shape: bf16[2,1664,128], index: 1, kind: input, shape index: {}]   ;;  %s2737_s2 = inlined_call_operand.vmem [shape: f32[2,1,128], index: 2, kind: input, shape index: {}]   ;;  %s2738_s3 = inlined_call_operand.vmem [shape: bf16[2,3,128,128], index: 3, kind: input, shape index: {}]   ;;  %s2739_s4 = inlined_call_operand.vmem [shape: f32[2,1,128], index: 4, kind: input, shape index: {}]   ;;  %s2740_s5 = inlined_call_operand.vmem [shape: bf16[16,256], index: 5, kind: output, shape index: {}]  }
   0x1   :  { %s2484_s20 = smov 0   ;;  %s2486_s21 = smov 0  }
   0x2   :  { %s2488_s22 = smov 0   ;;  %s2490_s23 = smov 0  }
   0x3   :  { %s2492_s24 = smov 0  }
   0x4 LB: > { %2746 = sst [smem:[#allocation4_spill]] %s2425_s19  ;;  %s24_s25 = sadd.s32 1, %s2437_s22  ;;  %s2445_s24 = sphi %s2492_s24, %s15_s24   ;;  %s2441_s23 = sphi %s2490_s23, %s2761_s23   ;;  %s2437_s22 = sphi %s2488_s22, %s2760_s22   ;;  %s2433_s21 = sphi %s2486_s21, %s2759_s21   ;;  %s2429_s20 = sphi %s2484_s20, %s2758_s20   ;;  %s2425_s19 = sphi %s2482_s19, %s2757_s19   ;;  %s2421_s18 = sphi %s2480_s18, %s2756_s18  }
   0x5   : > { %2747 = sst [smem:[#allocation5_spill]] %s2437_s22  ;;  %p25_p0 = scmp.ge.s32.totalorder %s24_s25, 3 }
   0x6   : > { %2748 = sst [smem:[#allocation6_spill]] %s2441_s23  ;;  %s27_s26 = sadd.s32 1, %s2441_s23 }
   0x7   : > { %2749 = sst [smem:[#allocation7_spill]] %s2445_s24  ;;  %s1855_s27 = sadd.s32 4294967295, %s2445_s24  }
   0x8   : > { %p178_p1 = scmp.ne.s32.totalorder %s2425_s19, %s2421_s18  ;;  %s2763_s25 = smov (%p25_p0, %s24_s25), 0 }
   0x9   : > { %2750 = sst [smem:[#allocation8_spill]] %s2763_s25  ;;  %s2765_s26 = smov (!%p25_p0, %s27_s26), %s2441_s23 }
   0xa   : > { %p179_p2 = scmp.eq.s32.totalorder %s1855_s27, 5  ;;  %p1859_p3 = scmp.ge.s32.totalorder %s2445_s24, 1 }
   0xb   : > { %p29_p4 = scmp.ge.s32.totalorder %s2765_s26, 2  ;;  %p247_p5 = scmp.lt.s32.totalorder %s2445_s24, 7 }
   0xc   : > { %p2522_p6 = por %p179_p2, %p178_p1  ;;  %s168_s30 = sadd.s32 1, %s2425_s19 }
   0xd   : > { %s2767_s26 = smov (%p29_p4, %s2765_s26), 0  ;;  %p248_p7 = pnand %p1859_p3, %p247_p5 }
   0xe   : > { %2752 = sst [smem:[#allocation9_spill]] %s2767_s26  ;;  %s165_s29 = ssub.s32 %s2441_s23, %s2767_s26 }
   0xf   : > { %p166_p8 = scmp.eq.s32.totalorder %s165_s29, 0  ;;  %251 = sbr.rel (%p248_p7) target bundleno = 588 (0x24c), region = 40 }
  0x10   : > { %s295_s7 = sand.u32 (!%p248_p7), 1, %s2421_s18   ;;  %p298_p9 = scmp.lt.s32.totalorder (!%p248_p7), %s2433_s21, 1 }
  0x11   : > { %s2532_s6 = scalar_select %p166_p8, %s2425_s19, %s168_s30  }
  0x12   : > { %s1860_s8 = sshll.u32 (!%p248_p7), %s295_s7, 3  ;;  %p300_p10 = scmp.lt.s32.totalorder (!%p248_p7), %s2429_s20, 2 }
  0x13   : > { %2753 = sst [smem:[#allocation10_spill]] %s2532_s6  ;;  %p1865_p11 = scmp.ne.s32.totalorder (!%p248_p7), %s2429_s20, 0 }
  0x14   : > { %s2537_s9 = scalar_select %p298_p9, %s2433_s21, 1 }
  0x15   : > { %s301_s10 = scalar_select %p300_p10, %s2429_s20, 2 }
  0x16   : > { %s2198_s11 = smul.u32 78, %s2537_s9  ;;  %s326_s29 = scalar_lea.vmem %s2739_s4, %s2537_s9 }
  0x17   : > { %s2197_s15 = smul.u32 26, %s301_s10  ;;  %s1863_s16 = sshll.u32 %s301_s10, 4 }
  0x18   : > { %s2199_s17 = smul.u32 832, %s2537_s9 }
  0x19   : > { %s304_s30 = sadd.s32 %s2198_s11, %s2197_s15  ;;  %s2200_s7 = smul.u32 48, %s2537_s9 }
  0x1a   : > { %s1861_s26 = sshll.u32 %s304_s30, 2  ;;  %s2554_s22 = scalar_lea.vmem %s2736_s1, %s2199_s17 }
  0x1b   : > { %s2559_s12 = scalar_lea.vmem %s2735_s0, %s1861_s26  ;;  %s321_s13 = sadd.s32 %s2200_s7, %s1863_s16 }
  0x1c   : > { %s1864_s10 = sshll.u32 %s321_s13, 2  ;;  %s2566_s11 = scalar_lea.vmem [#allocation3], %s1860_s8 }
  0x1d   : > { %s2564_s18 = scalar_lea.vmem %s2738_s3, %s1864_s10  ;;  %331 = sbr.rel (%p1865_p11) target bundleno = 36 (0x24), region = 44 }
  0x22   : > { %v2447_v0 = vmov 0.0  }
  0x23   : > { %332 = vst [vmem:[#allocation2] sm:$0xff] %v2447_v0  ;;  %333 = vst [vmem:[#allocation2 + $0x8] sm:$0xff] %v2447_v0 }
  0x24 PF: > { %v2260_v1 = vld [vmem:[%s2554_s22 + $0x78] sm:$0xff]   ;;  %v2264_v5 = vld [vmem:[%s2554_s22 + $0x70] sm:$0xff]   ;;  %v2268_v9 = vld [vmem:[%s2554_s22 + $0x68] sm:$0xff]   ;;  %vm2449_vm0 = vmmov 0   ;;  %s2754_s23 = scalar_lea.vmem %s2737_s2, %s2537_s9  ;;  %p1992_p12 = scmp.ne.s32.totalorder %s2429_s20, 2 }
  0x25   : > { %v2261_v2 = vld [vmem:[%s2554_s22 + $0x38] sm:$0xff]   ;;  %2007 = vmatprep.subr.bf16.mxu0 %v2260_v1  ;;  %v2265_v6 = vld [vmem:[%s2554_s22 + $0x30] sm:$0xff]   ;;  %v2269_v10 = vld [vmem:[%s2554_s22 + $0x28] sm:$0xff]  }
  0x26   : > { %v2262_v3 = vld [vmem:[%s2554_s22 + $0xf8] sm:$0xff]   ;;  %2008 = vmatpush3.bf16.msra.mxu0 %v2261_v2  ;;  %v2266_v7 = vld [vmem:[%s2554_s22 + $0xf0] sm:$0xff]   ;;  %v2270_v11 = vld [vmem:[%s2554_s22 + $0xe8] sm:$0xff]  }
  0x27   : > { %v2263_v4 = vld [vmem:[%s2554_s22 + $0xb8] sm:$0xff]   ;;  %2029 = vmatprep.subr.bf16.mxu1 %v2262_v3  ;;  %2009 = vmatprep.subr.bf16.mxu0 %v2264_v5  ;;  %v2267_v8 = vld [vmem:[%s2554_s22 + $0xb0] sm:$0xff]   ;;  %v2271_v12 = vld [vmem:[%s2554_s22 + $0xa8] sm:$0xff]  }
  0x28   : > { %2030 = vmatpush3.bf16.msra.mxu1 %v2263_v4  ;;  %v2272_v13 = vld [vmem:[%s2554_s22 + $0x60] sm:$0xff]   ;;  %v2276_v17 = vld [vmem:[%s2554_s22 + $0x58] sm:$0xff]   ;;  %v2280_v21 = vld [vmem:[%s2554_s22 + $0x50] sm:$0xff]  }
  0x29   : > { %2031 = vmatprep.subr.bf16.mxu1 %v2266_v7  ;;  %v2273_v14 = vld [vmem:[%s2554_s22 + $0x20] sm:$0xff]   ;;  %v2277_v18 = vld [vmem:[%s2554_s22 + $0x18] sm:$0xff]   ;;  %v2281_v22 = vld [vmem:[%s2554_s22 + $0x10] sm:$0xff]  }
  0x2a   : > { %2010 = vmatpush3.bf16.msra.mxu0 %v2265_v6  ;;  %v2274_v15 = vld [vmem:[%s2554_s22 + $0xe0] sm:$0xff]   ;;  %v2278_v19 = vld [vmem:[%s2554_s22 + $0xd8] sm:$0xff]   ;;  %v2282_v23 = vld [vmem:[%s2554_s22 + $0xd0] sm:$0xff]  }
  0x2b   : > { %2011 = vmatprep.subr.bf16.mxu0 %v2268_v9  ;;  %v2275_v16 = vld [vmem:[%s2554_s22 + $0xa0] sm:$0xff]   ;;  %v2279_v20 = vld [vmem:[%s2554_s22 + $0x98] sm:$0xff]   ;;  %v2283_v24 = vld [vmem:[%s2554_s22 + $0x90] sm:$0xff]  }
  0x2c   : > { %2032 = vmatpush3.bf16.msra.mxu1 %v2267_v8  ;;  %v2284_v25 = vld [vmem:[%s2554_s22 + $0x48] sm:$0xff]   ;;  %v2288_v29 = vld [vmem:[%s2554_s22 + $0x40] sm:$0xff]   ;;  %v2295_v35 = vld [vmem:[%s2554_s22 + $0x178] sm:$0xff]  }
  0x2d   : > { %2033 = vmatprep.subr.bf16.mxu1 %v2270_v11  ;;  %v2285_v26 = vld [vmem:[%s2554_s22 + $0x8] sm:$0xff]   ;;  %v2289_v30 = vld [vmem:[%s2554_s22] sm:$0xff]   ;;  %v2299_v38 = vld [vmem:[%s2554_s22 + $0x138] sm:$0xff]  }
  0x2e   : > { %2012 = vmatpush3.bf16.msra.mxu0 %v2269_v10  ;;  %v2286_v27 = vld [vmem:[%s2554_s22 + $0xc8] sm:$0xff]   ;;  %v2290_v31 = vld [vmem:[%s2554_s22 + $0xc0] sm:$0xff]   ;;  %v2300_v39 = vld [vmem:[%s2554_s22 + $0x1f8] sm:$0xff]  }
  0x2f   : > { %2013 = vmatprep.subr.bf16.mxu0 %v2272_v13  ;;  %v2287_v28 = vld [vmem:[%s2554_s22 + $0x88] sm:$0xff]   ;;  %v2291_v32 = vld [vmem:[%s2559_s12] ss:$52 sps:$4 sm:$0xff]   ;;  %v2293_v33 = vld [vmem:[%s2559_s12 + $0x4] ss:$52 sps:$4 sm:$0xff]  }
  0x30   : > { %2034 = vmatpush3.bf16.msra.mxu1 %v2271_v12  ;;  %v2294_v34 = vld [vmem:[%s2554_s22 + $0x80] sm:$0xff]   ;;  %1285 = vmatprep.mubr.bf16.mxu0 %v2293_v33  ;;  %v2296_v36 = vld [vmem:[%s2559_s12 + $0x8] ss:$52 sps:$4 sm:$0xff]   ;;  %v2302_v41 = vld [vmem:[%s2554_s22 + $0x170] sm:$0xff]  }
  0x31   : > { %2035 = vmatprep.subr.bf16.mxu1 %v2274_v15  ;;  %v2298_v37 = vld [vmem:[%s2559_s12 + $0xc] ss:$52 sps:$4 sm:$0xff]   ;;  %v2301_v40 = vld [vmem:[%s2554_s22 + $0x1b8] sm:$0xff]   ;;  %v2303_v42 = vld [vmem:[%s2554_s22 + $0x130] sm:$0xff]  }
  0x32   : > { %2014 = vmatpush3.bf16.msra.mxu0 %v2273_v14  ;;  %1326 = vmatprep.mubr.bf16.mxu1 %v2298_v37  ;;  %v2304_v43 = vld [vmem:[%s2554_s22 + $0x1f0] sm:$0xff]   ;;  %v2306_v45 = vld [vmem:[%s2554_s22 + $0x168] sm:$0xff]   ;;  %v2310_v49 = vld [vmem:[%s2554_s22 + $0x160] sm:$0xff]  }
  0x33   : > { %2015 = vmatprep.subr.bf16.mxu0 %v2276_v17  ;;  %v2305_v44 = vld [vmem:[%s2554_s22 + $0x1b0] sm:$0xff]   ;;  %v2307_v46 = vld [vmem:[%s2554_s22 + $0x128] sm:$0xff]   ;;  %v2311_v50 = vld [vmem:[%s2554_s22 + $0x120] sm:$0xff]  }
  0x34   : > { %2036 = vmatpush3.bf16.msra.mxu1 %v2275_v16  ;;  %v2308_v47 = vld [vmem:[%s2554_s22 + $0x1e8] sm:$0xff]   ;;  %v2312_v51 = vld [vmem:[%s2554_s22 + $0x1e0] sm:$0xff]   ;;  %v2314_v53 = vld [vmem:[%s2554_s22 + $0x158] sm:$0xff]  }
  0x35   : > { %2037 = vmatprep.subr.bf16.mxu1 %v2278_v19  ;;  %v2309_v48 = vld [vmem:[%s2554_s22 + $0x1a8] sm:$0xff]   ;;  %v2313_v52 = vld [vmem:[%s2554_s22 + $0x1a0] sm:$0xff]   ;;  %v2315_v54 = vld [vmem:[%s2554_s22 + $0x118] sm:$0xff]  }
  0x36   : > { %2016 = vmatpush3.bf16.msra.mxu0 %v2277_v18  ;;  %v2316_v55 = vld [vmem:[%s2554_s22 + $0x1d8] sm:$0xff]   ;;  %v2318_v57 = vld [vmem:[%s2554_s22 + $0x150] sm:$0xff]   ;;  %v2322_v61 = vld [vmem:[%s2554_s22 + $0x148] sm:$0xff]  }
  0x37   : > { %2017 = vmatprep.subr.bf16.mxu0 %v2280_v21  ;;  %v2317_v56 = vld [vmem:[%s2554_s22 + $0x198] sm:$0xff]   ;;  %v2319_v58 = vld [vmem:[%s2554_s22 + $0x110] sm:$0xff]   ;;  %v2323_v62 = vld [vmem:[%s2554_s22 + $0x108] sm:$0xff]  }
  0x38   : > { %2038 = vmatpush3.bf16.msra.mxu1 %v2279_v20  ;;  %v2320_v59 = vld [vmem:[%s2554_s22 + $0x1d0] sm:$0xff]   ;;  %v2324_v63 = vld [vmem:[%s2554_s22 + $0x1c8] sm:$0xff]   ;;  %v2326_v1 = vld [vmem:[%s2554_s22 + $0x140] sm:$0xff]  }
  0x39   : > { %2039 = vmatprep.subr.bf16.mxu1 %v2282_v23  ;;  %v2321_v60 = vld [vmem:[%s2554_s22 + $0x190] sm:$0xff]   ;;  %v2325_v0 = vld [vmem:[%s2554_s22 + $0x188] sm:$0xff]   ;;  %v2327_v2 = vld [vmem:[%s2554_s22 + $0x100] sm:$0xff]  }
  0x3a   : > { %2018 = vmatpush3.bf16.msra.mxu0 %v2281_v22  ;;  %v2328_v3 = vld [vmem:[%s2554_s22 + $0x1c0] sm:$0xff]   ;;  %v2331_v5 = vld [vmem:[%s2559_s12 + $0x14] ss:$52 sps:$4 sm:$0xff]   ;;  %v2333_v7 = vld [vmem:[%s2554_s22 + $0x278] sm:$0xff]  }
  0x3b   : > { %2019 = vmatprep.subr.bf16.mxu0 %v2284_v25  ;;  %v2329_v4 = vld [vmem:[%s2559_s12 + $0x10] ss:$52 sps:$4 sm:$0xff]   ;;  %v2334_v8 = vld [vmem:[%s2559_s12 + $0x18] ss:$52 sps:$4 sm:$0xff]  }
  0x3c   : > { %2040 = vmatpush3.bf16.msra.mxu1 %v2283_v24  ;;  %v2332_v6 = vld [vmem:[%s2554_s22 + $0x180] sm:$0xff]   ;;  %v2336_v9 = vld [vmem:[%s2559_s12 + $0x1c] ss:$52 sps:$4 sm:$0xff]   ;;  %v2344_v17 = vld [vmem:[%s2554_s22 + $0x268] sm:$0xff]  }
  0x3d   : > { %2041 = vmatprep.subr.bf16.mxu1 %v2286_v27  ;;  %v2337_v10 = vld [vmem:[%s2554_s22 + $0x238] sm:$0xff]   ;;  %v2340_v13 = vld [vmem:[%s2554_s22 + $0x270] sm:$0xff]   ;;  %v2345_v18 = vld [vmem:[%s2554_s22 + $0x228] sm:$0xff]  }
  0x3e   : > { %2020 = vmatpush3.bf16.msra.mxu0 %v2285_v26  ;;  %v2338_v11 = vld [vmem:[%s2554_s22 + $0x2f8] sm:$0xff]   ;;  %v2341_v14 = vld [vmem:[%s2554_s22 + $0x230] sm:$0xff]   ;;  %v2346_v19 = vld [vmem:[%s2554_s22 + $0x2e8] sm:$0xff]  }
  0x3f   : > { %2021 = vmatprep.subr.bf16.mxu0 %v2288_v29  ;;  %v2339_v12 = vld [vmem:[%s2554_s22 + $0x2b8] sm:$0xff]   ;;  %v2342_v15 = vld [vmem:[%s2554_s22 + $0x2f0] sm:$0xff]   ;;  %v2347_v20 = vld [vmem:[%s2554_s22 + $0x2a8] sm:$0xff]  }
  0x40   : > { %2042 = vmatpush3.bf16.msra.mxu1 %v2287_v28  ;;  %v2343_v16 = vld [vmem:[%s2554_s22 + $0x2b0] sm:$0xff]   ;;  %v2348_v21 = vld [vmem:[%s2554_s22 + $0x260] sm:$0xff]   ;;  %v2352_v25 = vld [vmem:[%s2554_s22 + $0x258] sm:$0xff]  }
  0x41   : > { %2043 = vmatprep.subr.bf16.mxu1 %v2290_v31  ;;  %v2349_v22 = vld [vmem:[%s2554_s22 + $0x220] sm:$0xff]   ;;  %v2353_v26 = vld [vmem:[%s2554_s22 + $0x218] sm:$0xff]   ;;  %v2356_v29 = vld [vmem:[%s2554_s22 + $0x250] sm:$0xff]  }
  0x42   : > { %2022 = vmatpush3.bf16.msra.mxu0 %v2289_v30  ;;  %v2350_v23 = vld [vmem:[%s2554_s22 + $0x2e0] sm:$0xff]   ;;  %v2354_v27 = vld [vmem:[%s2554_s22 + $0x2d8] sm:$0xff]   ;;  %v2357_v30 = vld [vmem:[%s2554_s22 + $0x210] sm:$0xff]  }
  0x43   : > { %2051 = vmatprep.subr.bf16.mxu0 %v2295_v35  ;;  %v2351_v24 = vld [vmem:[%s2554_s22 + $0x2a0] sm:$0xff]   ;;  %v2355_v28 = vld [vmem:[%s2554_s22 + $0x298] sm:$0xff]   ;;  %v2358_v31 = vld [vmem:[%s2554_s22 + $0x2d0] sm:$0xff]  }
  0x44   : > { %2044 = vmatpush3.bf16.msra.mxu1 %v2294_v34  ;;  %v2360_v33 = vld [vmem:[%s2554_s22 + $0x248] sm:$0xff]   ;;  %v2364_v37 = vld [vmem:[%s2554_s22 + $0x240] sm:$0xff]  }
  0x45   : > { %1286 = vmatmul.mubr.bf16.vlgmr.msra.gmra.mxu0 %v2291_v32  ;;  %2073 = vmatprep.subr.bf16.mxu1 %v2300_v39  ;;  %v2359_v32 = vld [vmem:[%s2554_s22 + $0x290] sm:$0xff]   ;;  %v2361_v34 = vld [vmem:[%s2554_s22 + $0x208] sm:$0xff]   ;;  %v2366_v39 = vld [vmem:[%s2554_s22 + $0x2c0] sm:$0xff]  }
  0x46   : > { %2052 = vmatpush3.bf16.msra.mxu0 %v2299_v38  ;;  %1367 = vmatprep.mubr.bf16.mxu0 %v2331_v5  ;;  %v2362_v35 = vld [vmem:[%s2554_s22 + $0x2c8] sm:$0xff]   ;;  %v2365_v38 = vld [vmem:[%s2554_s22 + $0x200] sm:$0xff]  }
  0x47   : > { %1327 = vmatmul.mubr.bf16.vlgmr.msra.gmra.mxu1 %v2296_v36  ;;  %2053 = vmatprep.subr.bf16.mxu0 %v2302_v41  ;;  %v2363_v36 = vld [vmem:[%s2554_s22 + $0x288] sm:$0xff]   ;;  %v2369_v41 = vld [vmem:[%s2559_s12 + $0x24] ss:$52 sps:$4 sm:$0xff]  }
  0x48   : > { %2074 = vmatpush3.bf16.msra.mxu1 %v2301_v40  ;;  %1408 = vmatprep.mubr.bf16.mxu1 %v2336_v9  ;;  %v2367_v40 = vld [vmem:[%s2559_s12 + $0x20] ss:$52 sps:$4 sm:$0xff]  }
  0x49   : > { %2075 = vmatprep.subr.bf16.mxu1 %v2304_v43  ;;  %v2448_v43 = vmov 0.0  }
  0x4a   : > { %2054 = vmatpush3.bf16.msra.mxu0 %v2303_v42  ;;  %v2370_v42 = vld [vmem:[%s2554_s22 + $0x280] sm:$0xff]  }
  0x4b   : > { %2055 = vmatprep.subr.bf16.mxu0 %v2306_v45  ;;  %v2373_v45 = vld [vmem:[%s2559_s12 + $0x2c] ss:$52 sps:$4 sm:$0xff]  }
  0x4c   : > { %2076 = vmatpush3.bf16.msra.mxu1 %v2305_v44  ;;  %v2371_v44 = vld [vmem:[%s2559_s12 + $0x28] ss:$52 sps:$4 sm:$0xff]  }
  0x4d   : > { %2077 = vmatprep.subr.bf16.mxu1 %v2308_v47  ;;  %v2375_v47 = vld [vmem:[%s2554_s22 + $0x330] sm:$0xff]  }
  0x4e   : > { %2056 = vmatpush3.bf16.msra.mxu0 %v2307_v46  ;;  %v2374_v46 = vld [vmem:[%s2554_s22 + $0x338] sm:$0xff]  }
  0x4f   : > { %2057 = vmatprep.subr.bf16.mxu0 %v2310_v49  ;;  %v2377_v49 = vld [vmem:[%s2554_s22 + $0x320] sm:$0xff]  }
  0x50   : > { %2078 = vmatpush3.bf16.msra.mxu1 %v2309_v48  ;;  %v2376_v48 = vld [vmem:[%s2554_s22 + $0x328] sm:$0xff]  }
  0x51   : > { %2079 = vmatprep.subr.bf16.mxu1 %v2312_v51  ;;  %v2379_v51 = vld [vmem:[%s2554_s22 + $0x310] sm:$0xff]  }
  0x52   : > { %2058 = vmatpush3.bf16.msra.mxu0 %v2311_v50  ;;  %v2378_v50 = vld [vmem:[%s2554_s22 + $0x318] sm:$0xff]  }
  0x53   : > { %2059 = vmatprep.subr.bf16.mxu0 %v2314_v53  ;;  %v2381_v53 = vld [vmem:[%s2554_s22 + $0x300] sm:$0xff]  }
  0x54   : > { %2080 = vmatpush3.bf16.msra.mxu1 %v2313_v52  ;;  %v2380_v52 = vld [vmem:[%s2554_s22 + $0x308] sm:$0xff]  }
  0x55   : > { %2081 = vmatprep.subr.bf16.mxu1 %v2316_v55  ;;  %v2383_v55 = vld [vmem:[%s2564_s18 + $0x38] sm:$0xff]  }
  0x56   : > { %2060 = vmatpush3.bf16.msra.mxu0 %v2315_v54  ;;  %v2382_v54 = vld [vmem:[%s2559_s12 + $0x30] ss:$52 sps:$4 sm:$0xff]  }
  0x57   : > { %2061 = vmatprep.subr.bf16.mxu0 %v2318_v57  ;;  %v2385_v57 = vld [vmem:[%s2564_s18 + $0x28] sm:$0xff]  }
  0x58   : > { %2082 = vmatpush3.bf16.msra.mxu1 %v2317_v56  ;;  %v2384_v56 = vld [vmem:[%s2564_s18 + $0x30] sm:$0xff]  }
  0x59   : > { %2083 = vmatprep.subr.bf16.mxu1 %v2320_v59  ;;  %v2387_v59 = vld [vmem:[%s2564_s18 + $0x18] sm:$0xff]  }
  0x5a   : > { %2062 = vmatpush3.bf16.msra.mxu0 %v2319_v58  ;;  %v2386_v58 = vld [vmem:[%s2564_s18 + $0x20] sm:$0xff]  }
  0x5b   : > { %2063 = vmatprep.subr.bf16.mxu0 %v2322_v61  ;;  %v2389_v61 = vld [vmem:[%s2564_s18 + $0x8] sm:$0xff]  }
  0x5c   : > { %2084 = vmatpush3.bf16.msra.mxu1 %v2321_v60  ;;  %v2388_v60 = vld [vmem:[%s2564_s18 + $0x10] sm:$0xff]  }
  0x5d   : > { %2085 = vmatprep.subr.bf16.mxu1 %v2324_v63 }
  0x5e   : > { %2064 = vmatpush3.bf16.msra.mxu0 %v2323_v62  ;;  %v2390_v62 = vld [vmem:[%s2564_s18] sm:$0xff]  }
  0x5f   : > { %2065 = vmatprep.subr.bf16.mxu0 %v2326_v1 }
  0x60   : > { %2086 = vmatpush3.bf16.msra.mxu1 %v2325_v0 }
  0x61   : > { %2087 = vmatprep.subr.bf16.mxu1 %v2328_v3 }
  0x62   : > { %2066 = vmatpush3.bf16.msra.mxu0 %v2327_v2 }
  0x63   : > { %2095 = vmatprep.subr.bf16.mxu0 %v2333_v7 }
  0x64   : > { %2088 = vmatpush3.bf16.msra.mxu1 %v2332_v6 }
  0x65   : > { %1368 = vmatmul.mubr.bf16.vlgmr.msra.gmra.mxu0 %v2329_v4  ;;  %2117 = vmatprep.subr.bf16.mxu1 %v2338_v11 }
  0x66   : > { %2096 = vmatpush3.bf16.msra.mxu0 %v2337_v10  ;;  %1449 = vmatprep.mubr.bf16.mxu0 %v2369_v41 }
  0x67   : > { %1409 = vmatmul.mubr.bf16.vlgmr.msra.gmra.mxu1 %v2334_v8  ;;  %2097 = vmatprep.subr.bf16.mxu0 %v2340_v13 }
  0x68   : > { %2118 = vmatpush3.bf16.msra.mxu1 %v2339_v12  ;;  %1490 = vmatprep.mubr.bf16.mxu1 %v2373_v45 }
  0x69   : > { %2119 = vmatprep.subr.bf16.mxu1 %v2342_v15 }
  0x6a   : > { %2098 = vmatpush3.bf16.msra.mxu0 %v2341_v14 }
  0x6b   : > { %2099 = vmatprep.subr.bf16.mxu0 %v2344_v17 }
  0x6c   : > { %2120 = vmatpush3.bf16.msra.mxu1 %v2343_v16  ;;  %v1866_v16 = vld [vmem:[%s2754_s23] ss:$0 sm:$0xff] }
  0x6d   : > { %2121 = vmatprep.subr.bf16.mxu1 %v2346_v19 }
  0x6e   : > { %2100 = vmatpush3.bf16.msra.mxu0 %v2345_v18 }
  0x6f   : > { %2101 = vmatprep.subr.bf16.mxu0 %v2348_v21 }
  0x70   : > { %2122 = vmatpush3.bf16.msra.mxu1 %v2347_v20 }
  0x71   : > { %2123 = vmatprep.subr.bf16.mxu1 %v2350_v23 }
  0x72   : > { %2102 = vmatpush3.bf16.msra.mxu0 %v2349_v22 }
  0x73   : > { %2103 = vmatprep.subr.bf16.mxu0 %v2352_v25 }
  0x74   : > { %2124 = vmatpush3.bf16.msra.mxu1 %v2351_v24 }
  0x75   : > { %2125 = vmatprep.subr.bf16.mxu1 %v2354_v27 }
  0x76   : > { %2104 = vmatpush3.bf16.msra.mxu0 %v2353_v26 }
  0x77   : > { %2105 = vmatprep.subr.bf16.mxu0 %v2356_v29 }
  0x78   : > { %2126 = vmatpush3.bf16.msra.mxu1 %v2355_v28 }
  0x79   : > { %2127 = vmatprep.subr.bf16.mxu1 %v2358_v31 }
  0x7a   : > { %2106 = vmatpush3.bf16.msra.mxu0 %v2357_v30 }
  0x7b   : > { %2107 = vmatprep.subr.bf16.mxu0 %v2360_v33 }
  0x7c   : > { %2128 = vmatpush3.bf16.msra.mxu1 %v2359_v32 }
  0x7d   : > { %2129 = vmatprep.subr.bf16.mxu1 %v2362_v35 }
  0x7e   : > { %2108 = vmatpush3.bf16.msra.mxu0 %v2361_v34 }
  0x7f   : > { %2109 = vmatprep.subr.bf16.mxu0 %v2364_v37 }
  0x80   : > { %2130 = vmatpush3.bf16.msra.mxu1 %v2363_v36 }
  0x81   : > { %2131 = vmatprep.subr.bf16.mxu1 %v2366_v39 }
  0x82   : > { %2110 = vmatpush3.bf16.msra.mxu0 %v2365_v38 }
  0x83   : > { %2157 = vmatprep.subr.bf16.mxu0 %v2448_v43 }
  0x84   : > { %2132 = vmatpush3.bf16.msra.mxu1 %v2370_v42 }
  0x85   : > { %1450 = vmatmul.mubr.bf16.vlgmr.msra.gmra.mxu0 %v2367_v40  ;;  %2177 = vmatprep.subr.bf16.mxu1 %v2448_v43 }
  0x86   : > { %2173 = vmatprep.mubr.msk.bf16.mxu0 %vm2449_vm0, %v2448_v43  ;;  %2158 = vmatpush3.bf16.msra.mxu0 %v2374_v46 }
  0x87   : > { %1491 = vmatmul.mubr.bf16.vlgmr.msra.gmra.mxu1 %v2371_v44  ;;  %2159 = vmatprep.subr.bf16.mxu0 %v2448_v43 }
  0x88   : > { %2193 = vmatprep.mubr.msk.bf16.mxu1 %vm2449_vm0, %v2448_v43  ;;  %2178 = vmatpush3.bf16.msra.mxu1 %v2383_v55 }
  0x89   : > { %2179 = vmatprep.subr.bf16.mxu1 %v2448_v43 }
  0x8a   : > { %2160 = vmatpush3.bf16.msra.mxu0 %v2375_v47 }
  0x8b   : > { %2161 = vmatprep.subr.bf16.mxu0 %v2448_v43 }
  0x8c   : > { %2180 = vmatpush3.bf16.msra.mxu1 %v2384_v56 }
  0x8d   : > { %2181 = vmatprep.subr.bf16.mxu1 %v2448_v43 }
  0x8e   : > { %2162 = vmatpush3.bf16.msra.mxu0 %v2376_v48 }
  0x8f   : > { %2163 = vmatprep.subr.bf16.mxu0 %v2448_v43 }
  0x90   : > { %2182 = vmatpush3.bf16.msra.mxu1 %v2385_v57  ;;  %v1543_v57 = vld [vmem:[#allocation2] sm:$0xff] }
  0x91   : > { %2183 = vmatprep.subr.bf16.mxu1 %v2448_v43 }
  0x92   : > { %2164 = vmatpush3.bf16.msra.mxu0 %v2377_v49 }
  0x93   : > { %2165 = vmatprep.subr.bf16.mxu0 %v2448_v43 }
  0x94   : > { %2184 = vmatpush3.bf16.msra.mxu1 %v2386_v58 }
  0x95   : > { %2185 = vmatprep.subr.bf16.mxu1 %v2448_v43 }
  0x96   : > { %2166 = vmatpush3.bf16.msra.mxu0 %v2378_v50 }
  0x97   : > { %2167 = vmatprep.subr.bf16.mxu0 %v2448_v43 }
  0x98   : > { %2186 = vmatpush3.bf16.msra.mxu1 %v2387_v59 }
  0x99   : > { %2187 = vmatprep.subr.bf16.mxu1 %v2448_v43 }
  0x9a   : > { %2168 = vmatpush3.bf16.msra.mxu0 %v2379_v51 }
  0x9b   : > { %2169 = vmatprep.subr.bf16.mxu0 %v2448_v43 }
  0x9c   : > { %2188 = vmatpush3.bf16.msra.mxu1 %v2388_v60 }
  0x9d   : > { %2189 = vmatprep.subr.bf16.mxu1 %v2448_v43 }
  0x9e   : > { %2170 = vmatpush3.bf16.msra.mxu0 %v2380_v52 }
  0x9f   : > { %2171 = vmatprep.subr.bf16.mxu0 %v2448_v43 }
  0xa0   : > { %2190 = vmatpush3.bf16.msra.mxu1 %v2389_v61  ;;  %v1544_v61 = vld [vmem:[#allocation2 + $0x8] sm:$0xff] }
  0xa1   : > { %2191 = vmatprep.subr.bf16.mxu1 %v2448_v43 }
  0xa2   : > { %2172 = vmatpush3.bf16.msra.mxu0 %v2381_v53 }
  0xa4   : > { %2192 = vmatpush3.bf16.msra.mxu1 %v2390_v62 }
  0xa5   : > { %2174 = vmatmul.mubr.bf16.vlgmr.msra.gmra.mxu0 %v2382_v54 }
 0x105   : > { %v2023_v63 = vpop.f32.mrf.mxu0 }
 0x107   : > { %v2024_v0 = vpop.f32.mrf.mxu0  ;;  %v2045_v1 = vpop.f32.mrf.mxu1 }
 0x108   : > { %v2025_v15 = vadd.f32 %v2024_v0, %v2023_v63 }
 0x109   : > { %v2026_v2 = vpop.f32.mrf.mxu0  ;;  %v2046_v3 = vpop.f32.mrf.mxu1 }
 0x10a   : > { %v1288_v21 = vadd.f32 %v2025_v15, %v1866_v16  ;;  %v2047_v22 = vadd.f32 %v2046_v3, %v2045_v1 }
 0x10b   : > { %v2027_v4 = vpop.f32.mrf.mxu0  ;;  %v2048_v5 = vpop.f32.mrf.mxu1 }
 0x10c   : > { %v2028_v18 = vadd.f32 %v2027_v4, %v2026_v2  ;;  %v1329_v28 = vadd.f32 %v2047_v22, %v1288_v21 }
 0x10d   : > { %v2049_v7 = vpop.f32.mrf.mxu1 }
 0x10e   : > { %v1291_v23 = vadd.f32 %v2028_v18, %v1866_v16  ;;  %v2050_v24 = vadd.f32 %v2049_v7, %v2048_v5 }
 0x110   : > { %v1332_v30 = vadd.f32 %v2050_v24, %v1291_v23 }
 0x125   : > { %v2067_v6 = vpop.f32.mrf.mxu0 }
 0x127   : > { %v2068_v8 = vpop.f32.mrf.mxu0  ;;  %v2089_v9 = vpop.f32.mrf.mxu1 }
 0x128   : > { %v2069_v25 = vadd.f32 %v2068_v8, %v2067_v6 }
 0x129   : > { %v2070_v10 = vpop.f32.mrf.mxu0  ;;  %v2090_v11 = vpop.f32.mrf.mxu1 }
 0x12a   : > { %v1370_v31 = vadd.f32 %v2069_v25, %v1329_v28  ;;  %v2091_v32 = vadd.f32 %v2090_v11, %v2089_v9 }
 0x12b   : > { %v2071_v12 = vpop.f32.mrf.mxu0  ;;  %v2092_v13 = vpop.f32.mrf.mxu1 }
 0x12c   : > { %v2072_v29 = vadd.f32 %v2071_v12, %v2070_v10  ;;  %v1411_v38 = vadd.f32 %v2091_v32, %v1370_v31 }
 0x12d   : > { %v2093_v17 = vpop.f32.mrf.mxu1 }
 0x12e   : > { %v1373_v35 = vadd.f32 %v2072_v29, %v1332_v30  ;;  %v2094_v36 = vadd.f32 %v2093_v17, %v2092_v13 }
 0x130   : > { %v1414_v41 = vadd.f32 %v2094_v36, %v1373_v35 }
 0x145   : > { %v2111_v14 = vpop.f32.mrf.mxu0 }
 0x147   : > { %v2112_v19 = vpop.f32.mrf.mxu0  ;;  %v2133_v20 = vpop.f32.mrf.mxu1 }
 0x148   : > { %v2113_v37 = vadd.f32 %v2112_v19, %v2111_v14 }
 0x149   : > { %v2114_v26 = vpop.f32.mrf.mxu0  ;;  %v2134_v27 = vpop.f32.mrf.mxu1 }
 0x14a   : > { %v1452_v42 = vadd.f32 %v2113_v37, %v1411_v38  ;;  %v2135_v43 = vadd.f32 %v2134_v27, %v2133_v20 }
 0x14b   : > { %v2115_v33 = vpop.f32.mrf.mxu0  ;;  %v2136_v34 = vpop.f32.mrf.mxu1 }
 0x14c   : > { %v2116_v39 = vadd.f32 %v2115_v33, %v2114_v26  ;;  %v1493_v47 = vadd.f32 %v2135_v43, %v1452_v42 }
 0x14d   : > { %v2137_v40 = vpop.f32.mrf.mxu1 }
 0x14e   : > { %v1455_v44 = vadd.f32 %v2116_v39, %v1414_v41  ;;  %v2138_v45 = vadd.f32 %v2137_v40, %v2136_v34 }
 0x150   : > { %v1496_v50 = vadd.f32 %v2138_v45, %v1455_v44 }
 0x165   : > { %v1533_v46 = vpop.f32.mrf.mxu0 }
 0x166   : > { %v1534_v49 = vadd.f32 %v1533_v46, %v1493_v47 }
 0x167   : > { %v2175_v48 = vpop.f32.mrf.mxu0 }
 0x168   : > { %v1540_v54 = vmax.f32 %v1534_v49, 0.0 }
 0x169   : > { %v1536_v51 = vpop.f32.mrf.mxu0 }
 0x16a   : > { %v1537_v52 = vadd.f32 %v1536_v51, %v1496_v50 }
 0x16b   : > { %v2176_v53 = vpop.f32.mrf.mxu0 }
 0x16c   : > { %v1541_v55 = vmax.f32 %v1537_v52, 0.0 }
 0x16e   : > { %v1542_v56 = vpack.c.bf16 %v1541_v55, %v1540_v54 }
 0x170   : > { %2194 = vmatmul.mubr.bf16.vlgmr.msra.gmra.mxu1 %v1542_v56 }
 0x230   : > { %v1643_v58 = vpop.f32.mrf.mxu1 }
 0x231   : > { %v1650_v59 = vadd.f32 %v1643_v58, %v1543_v57 }
 0x232   : > { %v2195_v60 = vpop.f32.mrf.mxu1 }
 0x233   : > { %1652 = vst [vmem:[#allocation2] sm:$0xff] %v1650_v59  ;;  %1657 = sbr.rel (%p1992_p12) target bundleno = 580 (0x244), region = 48 }
 0x234   : > { %v1646_v62 = vpop.f32.mrf.mxu1 }
 0x235   : > { %v1651_v63 = vadd.f32 %v1646_v62, %v1544_v61 }
 0x236   : > { %v2196_v0 = vpop.f32.mrf.mxu1 }
 0x237   : > { %1653 = vst [vmem:[#allocation2 + $0x8] sm:$0xff] %v1651_v63 }
 0x238   : > { %v1993_v3 = vld [vmem:[%s326_s29] ss:$0 sm:$0xff] }
 0x23a   : > { %v1658_v1 = vld [vmem:[#allocation2] sm:$0xff] }
 0x23b   : > { %v1667_v4 = vadd.f32 %v1993_v3, %v1658_v1 }
 0x23e   : > { %v1659_v2 = vld [vmem:[#allocation2 + $0x8] sm:$0xff] }
 0x23f   : > { %v1668_v5 = vadd.f32 %v1993_v3, %v1659_v2 }
 0x241   : > { %v2005_v6 = vpack.c.bf16 %v1668_v5, %v1667_v4 }
 0x243   : > { %2006 = vst [vmem:[%s2566_s11] sm:$0xff] %v2005_v6  }
 0x244 PF: > { %1685 = sbr.rel (!%p2522_p6) target bundleno = 588 (0x24c), region = 52  ;;  %s1997_s20 = sshll.u32 (%p2522_p6), %s2433_s21, 2 }
 0x245   : > { %s1687_s8 = scalar_lea.vmem (%p2522_p6), %s2740_s5, %s1997_s20 }
 0x24a   : > { %v1704_v7 = vld [vmem:[%s2566_s11] sm:$0xf]  ;;  %v1706_v8 = vld [vmem:[%s2566_s11 + $0x4] sm:$0xf] }
 0x24b   : > { %1705 = vst [vmem:[%s1687_s8] sm:$0xf] %v1704_v7  ;;  %1707 = vst [vmem:[%s1687_s8 + $0x8] sm:$0xf] %v1706_v8 }
 0x24c PF: > { %s2755_s9 = sld [smem:[#allocation7_spill]] }
 0x24d   : > { %s2756_s18 = sld [smem:[#allocation4_spill]] }
 0x24e   : > { %s2757_s19 = sld [smem:[#allocation10_spill]] }
 0x24f   : > { %s2758_s20 = sld [smem:[#allocation5_spill]] }
 0x250   : > { %s2759_s21 = sld [smem:[#allocation6_spill]] }
 0x251   : > { %s2760_s22 = sld [smem:[#allocation8_spill]] }
 0x252   : > { %s15_s24 = sadd.s32 1, %s2755_s9   ;;  %s2761_s23 = sld [smem:[#allocation9_spill]] }
 0x253   : > { %p12_p13 = scmp.ge.s32.totalorder %s15_s24, 8  }
 0x255   :  { %14 = sbr.rel (!%p12_p13) target bundleno = 4 (0x4), region = 131 }

// kernel: full_ppi_forward.9
= control target key start
LH: loop header
LB: loop body
LE: loop exit
PB: predicated region body
PF: predicated region fallthrough
CT: control target
= control target key end

     0   :  { %s1760_s18 = smov 0   ;;  %s1762_s19 = smov 0   ;;  %s1981_s0 = inlined_call_operand.vmem [shape: bf16[2,7,16,896], index: 0, kind: input, shape index: {}]   ;;  %s1982_s1 = inlined_call_operand.vmem [shape: bf16[2,896,128], index: 1, kind: input, shape index: {}]   ;;  %s1983_s2 = inlined_call_operand.vmem [shape: f32[2,1,128], index: 2, kind: input, shape index: {}]   ;;  %s1984_s3 = inlined_call_operand.vmem [shape: bf16[2,7,128,128], index: 3, kind: input, shape index: {}]   ;;  %s1985_s4 = inlined_call_operand.vmem [shape: f32[2,1,128], index: 4, kind: input, shape index: {}]   ;;  %s1986_s5 = inlined_call_operand.vmem [shape: bf16[16,256], index: 5, kind: output, shape index: {}]  }
   0x1   :  { %s1764_s20 = smov 0   ;;  %s1766_s21 = smov 0  }
   0x2   :  { %s1768_s22 = smov 0   ;;  %s1770_s23 = smov 0  }
   0x3   :  { %s1772_s24 = smov 0  }
   0x4 LB: > { %1992 = sst [smem:[#allocation4_spill]] %s1705_s19  ;;  %s24_s25 = sadd.s32 1, %s1717_s22  ;;  %s1725_s24 = sphi %s1772_s24, %s15_s24   ;;  %s1721_s23 = sphi %s1770_s23, %s2007_s23   ;;  %s1717_s22 = sphi %s1768_s22, %s2006_s22   ;;  %s1713_s21 = sphi %s1766_s21, %s2005_s21   ;;  %s1709_s20 = sphi %s1764_s20, %s2004_s20   ;;  %s1705_s19 = sphi %s1762_s19, %s2003_s19   ;;  %s1701_s18 = sphi %s1760_s18, %s2002_s18  }
   0x5   : > { %1993 = sst [smem:[#allocation5_spill]] %s1717_s22  ;;  %p25_p0 = scmp.ge.s32.totalorder %s24_s25, 7 }
   0x6   : > { %1994 = sst [smem:[#allocation6_spill]] %s1721_s23  ;;  %s27_s26 = sadd.s32 1, %s1721_s23 }
   0x7   : > { %1995 = sst [smem:[#allocation7_spill]] %s1725_s24  ;;  %s1312_s27 = sadd.s32 4294967295, %s1725_s24  }
   0x8   : > { %p178_p1 = scmp.ne.s32.totalorder %s1705_s19, %s1701_s18  ;;  %s2009_s25 = smov (%p25_p0, %s24_s25), 0 }
   0x9   : > { %1996 = sst [smem:[#allocation8_spill]] %s2009_s25  ;;  %s2011_s26 = smov (!%p25_p0, %s27_s26), %s1721_s23 }
   0xa   : > { %p179_p2 = scmp.eq.s32.totalorder %s1312_s27, 13  ;;  %p1316_p3 = scmp.ge.s32.totalorder %s1725_s24, 1 }
   0xb   : > { %p29_p4 = scmp.ge.s32.totalorder %s2011_s26, 2  ;;  %p247_p5 = scmp.lt.s32.totalorder %s1725_s24, 15 }
   0xc   : > { %p1802_p6 = por %p179_p2, %p178_p1  ;;  %s168_s30 = sadd.s32 1, %s1705_s19 }
   0xd   : > { %s2013_s26 = smov (%p29_p4, %s2011_s26), 0  ;;  %p248_p7 = pnand %p1316_p3, %p247_p5 }
   0xe   : > { %1998 = sst [smem:[#allocation9_spill]] %s2013_s26  ;;  %s165_s29 = ssub.s32 %s1721_s23, %s2013_s26 }
   0xf   : > { %p166_p8 = scmp.eq.s32.totalorder %s165_s29, 0  ;;  %251 = sbr.rel (%p248_p7) target bundleno = 531 (0x213), region = 40 }
  0x10   : > { %s295_s7 = sand.u32 (!%p248_p7), 1, %s1701_s18   ;;  %p298_p9 = scmp.lt.s32.totalorder (!%p248_p7), %s1713_s21, 1 }
  0x11   : > { %s1812_s6 = scalar_select %p166_p8, %s1705_s19, %s168_s30  }
  0x12   : > { %s1317_s8 = sshll.u32 (!%p248_p7), %s295_s7, 3  ;;  %p300_p10 = scmp.lt.s32.totalorder (!%p248_p7), %s1709_s20, 6 }
  0x13   : > { %1999 = sst [smem:[#allocation10_spill]] %s1812_s6  ;;  %p1322_p11 = scmp.ne.s32.totalorder (!%p248_p7), %s1709_s20, 0 }
  0x14   : > { %s1817_s9 = scalar_select %p298_p9, %s1713_s21, 1 }
  0x15   : > { %s301_s10 = scalar_select %p300_p10, %s1709_s20, 6 }
  0x16   : > { %s1535_s11 = smul.u32 98, %s1817_s9  ;;  %s326_s29 = scalar_lea.vmem %s1985_s4, %s1817_s9 }
  0x17   : > { %s1534_s15 = smul.u32 14, %s301_s10  ;;  %s1320_s16 = sshll.u32 %s301_s10, 4 }
  0x18   : > { %s1536_s17 = smul.u32 448, %s1817_s9 }
  0x19   : > { %s304_s30 = sadd.s32 %s1535_s11, %s1534_s15  ;;  %s1537_s7 = smul.u32 112, %s1817_s9 }
  0x1a   : > { %s1318_s26 = sshll.u32 %s304_s30, 2  ;;  %s1834_s22 = scalar_lea.vmem %s1982_s1, %s1536_s17 }
  0x1b   : > { %s1839_s12 = scalar_lea.vmem %s1981_s0, %s1318_s26  ;;  %s321_s13 = sadd.s32 %s1537_s7, %s1320_s16 }
  0x1c   : > { %s1321_s10 = sshll.u32 %s321_s13, 2  ;;  %s1846_s11 = scalar_lea.vmem [#allocation3], %s1317_s8 }
  0x1d   : > { %s1844_s18 = scalar_lea.vmem %s1984_s3, %s1321_s10  ;;  %331 = sbr.rel (%p1322_p11) target bundleno = 36 (0x24), region = 44 }
  0x22   : > { %v1727_v0 = vmov 0.0  }
  0x23   : > { %332 = vst [vmem:[#allocation2] sm:$0xff] %v1727_v0  ;;  %333 = vst [vmem:[#allocation2 + $0x8] sm:$0xff] %v1727_v0 }
  0x24 PF: > { %v1597_v1 = vld [vmem:[%s1834_s22 + $0x78] sm:$0xff]   ;;  %v1601_v5 = vld [vmem:[%s1834_s22 + $0x70] sm:$0xff]   ;;  %v1605_v9 = vld [vmem:[%s1834_s22 + $0x68] sm:$0xff]   ;;  %v1728_v37 = vmov 0.0   ;;  %vm1729_vm0 = vmmov 0   ;;  %s2000_s23 = scalar_lea.vmem %s1983_s2, %s1817_s9  ;;  %p1395_p12 = scmp.ne.s32.totalorder %s1709_s20, 6 }
  0x25   : > { %v1598_v2 = vld [vmem:[%s1834_s22 + $0xf8] sm:$0xff]   ;;  %1410 = vmatprep.subr.bf16.mxu0 %v1597_v1  ;;  %v1602_v6 = vld [vmem:[%s1834_s22 + $0xf0] sm:$0xff]   ;;  %v1606_v10 = vld [vmem:[%s1834_s22 + $0xe8] sm:$0xff]  }
  0x26   : > { %v1599_v3 = vld [vmem:[%s1834_s22 + $0x38] sm:$0xff]   ;;  %1432 = vmatprep.subr.bf16.mxu1 %v1598_v2  ;;  %v1603_v7 = vld [vmem:[%s1834_s22 + $0x30] sm:$0xff]   ;;  %v1607_v11 = vld [vmem:[%s1834_s22 + $0x28] sm:$0xff]  }
  0x27   : > { %v1600_v4 = vld [vmem:[%s1834_s22 + $0xb8] sm:$0xff]   ;;  %1411 = vmatpush3.bf16.msra.mxu0 %v1599_v3  ;;  %v1604_v8 = vld [vmem:[%s1834_s22 + $0xb0] sm:$0xff]   ;;  %v1608_v12 = vld [vmem:[%s1834_s22 + $0xa8] sm:$0xff]  }
  0x28   : > { %1433 = vmatpush3.bf16.msra.mxu1 %v1600_v4  ;;  %1412 = vmatprep.subr.bf16.mxu0 %v1601_v5  ;;  %v1609_v13 = vld [vmem:[%s1834_s22 + $0x60] sm:$0xff]   ;;  %v1613_v17 = vld [vmem:[%s1834_s22 + $0x58] sm:$0xff]   ;;  %v1617_v21 = vld [vmem:[%s1834_s22 + $0x50] sm:$0xff]  }
  0x29   : > { %1434 = vmatprep.subr.bf16.mxu1 %v1602_v6  ;;  %v1610_v14 = vld [vmem:[%s1834_s22 + $0xe0] sm:$0xff]   ;;  %v1614_v18 = vld [vmem:[%s1834_s22 + $0xd8] sm:$0xff]   ;;  %v1618_v22 = vld [vmem:[%s1834_s22 + $0xd0] sm:$0xff]  }
  0x2a   : > { %v1611_v15 = vld [vmem:[%s1834_s22 + $0x20] sm:$0xff]   ;;  %v1615_v19 = vld [vmem:[%s1834_s22 + $0x18] sm:$0xff]   ;;  %v1619_v23 = vld [vmem:[%s1834_s22 + $0x10] sm:$0xff]  }
  0x2b   : > { %1413 = vmatpush3.bf16.msra.mxu0 %v1603_v7  ;;  %v1612_v16 = vld [vmem:[%s1834_s22 + $0xa0] sm:$0xff]   ;;  %v1616_v20 = vld [vmem:[%s1834_s22 + $0x98] sm:$0xff]   ;;  %v1620_v24 = vld [vmem:[%s1834_s22 + $0x90] sm:$0xff]  }
  0x2c   : > { %1435 = vmatpush3.bf16.msra.mxu1 %v1604_v8  ;;  %1414 = vmatprep.subr.bf16.mxu0 %v1605_v9  ;;  %v1621_v25 = vld [vmem:[%s1834_s22 + $0x48] sm:$0xff]   ;;  %v1625_v29 = vld [vmem:[%s1834_s22 + $0x40] sm:$0xff]   ;;  %v1635_v38 = vld [vmem:[%s1834_s22 + $0x178] sm:$0xff]  }
  0x2d   : > { %1436 = vmatprep.subr.bf16.mxu1 %v1606_v10  ;;  %v1622_v26 = vld [vmem:[%s1834_s22 + $0xc8] sm:$0xff]   ;;  %v1626_v30 = vld [vmem:[%s1834_s22 + $0xc0] sm:$0xff]   ;;  %v1636_v39 = vld [vmem:[%s1834_s22 + $0x138] sm:$0xff]  }
  0x2e   : > { %v1623_v27 = vld [vmem:[%s1834_s22 + $0x8] sm:$0xff]   ;;  %v1627_v31 = vld [vmem:[%s1834_s22] sm:$0xff]   ;;  %v1637_v40 = vld [vmem:[%s1834_s22 + $0x1b8] sm:$0xff]  }
  0x2f   : > { %1415 = vmatpush3.bf16.msra.mxu0 %v1607_v11  ;;  %v1624_v28 = vld [vmem:[%s1834_s22 + $0x88] sm:$0xff]   ;;  %v1628_v32 = vld [vmem:[%s1834_s22 + $0x80] sm:$0xff]   ;;  %v1638_v41 = vld [vmem:[%s1834_s22 + $0x170] sm:$0xff]  }
  0x30   : > { %1437 = vmatpush3.bf16.msra.mxu1 %v1608_v12  ;;  %1416 = vmatprep.subr.bf16.mxu0 %v1609_v13  ;;  %v1629_v33 = vld [vmem:[%s1839_s12] ss:$28 sps:$4 sm:$0xff]   ;;  %v1632_v35 = vld [vmem:[%s1839_s12 + $0x8] ss:$28 sps:$4 sm:$0xff]   ;;  %v1639_v42 = vld [vmem:[%s1834_s22 + $0x130] sm:$0xff]  }
  0x31   : > { %1438 = vmatprep.subr.bf16.mxu1 %v1610_v14  ;;  %v1631_v34 = vld [vmem:[%s1839_s12 + $0x4] ss:$28 sps:$4 sm:$0xff]   ;;  %v1634_v36 = vld [vmem:[%s1839_s12 + $0xc] ss:$28 sps:$4 sm:$0xff]   ;;  %v1640_v43 = vld [vmem:[%s1834_s22 + $0x1b0] sm:$0xff]  }
  0x32   : > { %865 = vmatprep.mubr.bf16.mxu0 %v1631_v34  ;;  %906 = vmatprep.mubr.bf16.mxu1 %v1634_v36  ;;  %v1641_v44 = vld [vmem:[%s1834_s22 + $0x168] sm:$0xff]   ;;  %v1644_v47 = vld [vmem:[%s1834_s22 + $0x160] sm:$0xff]   ;;  %v1647_v50 = vld [vmem:[%s1834_s22 + $0x158] sm:$0xff]  }
  0x33   : > { %1417 = vmatpush3.bf16.msra.mxu0 %v1611_v15  ;;  %v1642_v45 = vld [vmem:[%s1834_s22 + $0x128] sm:$0xff]   ;;  %v1645_v48 = vld [vmem:[%s1834_s22 + $0x120] sm:$0xff]   ;;  %v1648_v51 = vld [vmem:[%s1834_s22 + $0x118] sm:$0xff]  }
  0x34   : > { %1439 = vmatpush3.bf16.msra.mxu1 %v1612_v16  ;;  %1418 = vmatprep.subr.bf16.mxu0 %v1613_v17  ;;  %v1643_v46 = vld [vmem:[%s1834_s22 + $0x1a8] sm:$0xff]   ;;  %v1646_v49 = vld [vmem:[%s1834_s22 + $0x1a0] sm:$0xff]   ;;  %v1649_v52 = vld [vmem:[%s1834_s22 + $0x198] sm:$0xff]  }
  0x35   : > { %1440 = vmatprep.subr.bf16.mxu1 %v1614_v18  ;;  %v1650_v53 = vld [vmem:[%s1834_s22 + $0x150] sm:$0xff]   ;;  %v1653_v56 = vld [vmem:[%s1834_s22 + $0x148] sm:$0xff]   ;;  %v1656_v59 = vld [vmem:[%s1834_s22 + $0x140] sm:$0xff]  }
  0x36   : > { %v1651_v54 = vld [vmem:[%s1834_s22 + $0x110] sm:$0xff]   ;;  %v1654_v57 = vld [vmem:[%s1834_s22 + $0x108] sm:$0xff]   ;;  %v1657_v61 = vld [vmem:[%s1834_s22 + $0x100] sm:$0xff]  }
  0x37   : > { %1419 = vmatpush3.bf16.msra.mxu0 %v1615_v19  ;;  %v1652_v55 = vld [vmem:[%s1834_s22 + $0x190] sm:$0xff]   ;;  %v1655_v58 = vld [vmem:[%s1834_s22 + $0x188] sm:$0xff]   ;;  %v1658_v62 = vld [vmem:[%s1834_s22 + $0x180] sm:$0xff]  }
  0x38   : > { %1441 = vmatpush3.bf16.msra.mxu1 %v1616_v20  ;;  %1420 = vmatprep.subr.bf16.mxu0 %v1617_v21  ;;  %v1661_v60 = vld [vmem:[%s1839_s12 + $0x14] ss:$28 sps:$4 sm:$0xff]   ;;  %v1663_v1 = vld [vmem:[%s1844_s18 + $0x38] sm:$0xff]   ;;  %v1665_v3 = vld [vmem:[%s1844_s18 + $0x28] sm:$0xff]  }
  0x39   : > { %1442 = vmatprep.subr.bf16.mxu1 %v1618_v22  ;;  %v1659_v63 = vld [vmem:[%s1839_s12 + $0x10] ss:$28 sps:$4 sm:$0xff]   ;;  %v1662_v0 = vld [vmem:[%s1839_s12 + $0x18] ss:$28 sps:$4 sm:$0xff]   ;;  %v1666_v4 = vld [vmem:[%s1844_s18 + $0x20] sm:$0xff]  }
  0x3a   : > { %v1664_v2 = vld [vmem:[%s1844_s18 + $0x30] sm:$0xff]   ;;  %v1667_v5 = vld [vmem:[%s1844_s18 + $0x18] sm:$0xff]   ;;  %v1669_v7 = vld [vmem:[%s1844_s18 + $0x8] sm:$0xff]  }
  0x3b   : > { %1421 = vmatpush3.bf16.msra.mxu0 %v1619_v23  ;;  %v1668_v6 = vld [vmem:[%s1844_s18 + $0x10] sm:$0xff]   ;;  %v1670_v8 = vld [vmem:[%s1844_s18] sm:$0xff]  }
  0x3c   : > { %1443 = vmatpush3.bf16.msra.mxu1 %v1620_v24  ;;  %1422 = vmatprep.subr.bf16.mxu0 %v1621_v25  ;;  %v1323_v16 = vld [vmem:[%s2000_s23] ss:$0 sm:$0xff] }
  0x3d   : > { %1444 = vmatprep.subr.bf16.mxu1 %v1622_v26 }
  0x3f   : > { %1423 = vmatpush3.bf16.msra.mxu0 %v1623_v27 }
  0x40   : > { %1445 = vmatpush3.bf16.msra.mxu1 %v1624_v28  ;;  %1424 = vmatprep.subr.bf16.mxu0 %v1625_v29 }
  0x41   : > { %1446 = vmatprep.subr.bf16.mxu1 %v1626_v30 }
  0x43   : > { %1425 = vmatpush3.bf16.msra.mxu0 %v1627_v31 }
  0x44   : > { %1447 = vmatpush3.bf16.msra.mxu1 %v1628_v32  ;;  %1454 = vmatprep.subr.bf16.mxu0 %v1635_v38 }
  0x45   : > { %1494 = vmatprep.subr.bf16.mxu1 %v1728_v37 }
  0x46   : > { %866 = vmatmul.mubr.bf16.vlgmr.msra.gmra.mxu0 %v1629_v33 }
  0x47   : > { %907 = vmatmul.mubr.bf16.vlgmr.msra.gmra.mxu1 %v1632_v35  ;;  %1455 = vmatpush3.bf16.msra.mxu0 %v1636_v39 }
  0x48   : > { %1510 = vmatprep.mubr.msk.bf16.mxu1 %vm1729_vm0, %v1728_v37  ;;  %1495 = vmatpush3.bf16.msra.mxu1 %v1637_v40 }
  0x49   : > { %1456 = vmatprep.subr.bf16.mxu0 %v1638_v41  ;;  %1496 = vmatprep.subr.bf16.mxu1 %v1728_v37 }
  0x4a   : > { %947 = vmatprep.mubr.bf16.mxu0 %v1661_v60 }
  0x4b   : > { %1457 = vmatpush3.bf16.msra.mxu0 %v1639_v42 }
  0x4c   : > { %1497 = vmatpush3.bf16.msra.mxu1 %v1640_v43  ;;  %1458 = vmatprep.subr.bf16.mxu0 %v1641_v44  ;;  %v1000_v43 = vld [vmem:[#allocation2] sm:$0xff] }
  0x4d   : > { %1498 = vmatprep.subr.bf16.mxu1 %v1728_v37 }
  0x4f   : > { %1459 = vmatpush3.bf16.msra.mxu0 %v1642_v45 }
  0x50   : > { %1499 = vmatpush3.bf16.msra.mxu1 %v1643_v46  ;;  %1460 = vmatprep.subr.bf16.mxu0 %v1644_v47  ;;  %v1001_v47 = vld [vmem:[#allocation2 + $0x8] sm:$0xff] }
  0x51   : > { %1500 = vmatprep.subr.bf16.mxu1 %v1728_v37 }
  0x53   : > { %1461 = vmatpush3.bf16.msra.mxu0 %v1645_v48 }
  0x54   : > { %1501 = vmatpush3.bf16.msra.mxu1 %v1646_v49  ;;  %1462 = vmatprep.subr.bf16.mxu0 %v1647_v50 }
  0x55   : > { %1502 = vmatprep.subr.bf16.mxu1 %v1728_v37 }
  0x57   : > { %1463 = vmatpush3.bf16.msra.mxu0 %v1648_v51 }
  0x58   : > { %1503 = vmatpush3.bf16.msra.mxu1 %v1649_v52  ;;  %1464 = vmatprep.subr.bf16.mxu0 %v1650_v53 }
  0x59   : > { %1504 = vmatprep.subr.bf16.mxu1 %v1728_v37 }
  0x5b   : > { %1465 = vmatpush3.bf16.msra.mxu0 %v1651_v54 }
  0x5c   : > { %1505 = vmatpush3.bf16.msra.mxu1 %v1652_v55  ;;  %1466 = vmatprep.subr.bf16.mxu0 %v1653_v56 }
  0x5d   : > { %1506 = vmatprep.subr.bf16.mxu1 %v1728_v37 }
  0x5f   : > { %1467 = vmatpush3.bf16.msra.mxu0 %v1654_v57 }
  0x60   : > { %1507 = vmatpush3.bf16.msra.mxu1 %v1655_v58  ;;  %1468 = vmatprep.subr.bf16.mxu0 %v1656_v59 }
  0x61   : > { %1508 = vmatprep.subr.bf16.mxu1 %v1728_v37 }
  0x63   : > { %1469 = vmatpush3.bf16.msra.mxu0 %v1657_v61 }
  0x64   : > { %1509 = vmatpush3.bf16.msra.mxu1 %v1658_v62  ;;  %1514 = vmatprep.subr.bf16.mxu0 %v1728_v37 }
  0x66   : > { %948 = vmatmul.mubr.bf16.vlgmr.msra.gmra.mxu0 %v1659_v63 }
  0x67   : > { %1511 = vmatmul.mubr.bf16.vlgmr.msra.gmra.mxu1 %v1662_v0  ;;  %1530 = vmatprep.mubr.msk.bf16.mxu0 %vm1729_vm0, %v1728_v37 }
  0x68   : > { %1515 = vmatpush3.bf16.msra.mxu0 %v1663_v1 }
  0x69   : > { %1516 = vmatprep.subr.bf16.mxu0 %v1728_v37 }
  0x6c   : > { %1517 = vmatpush3.bf16.msra.mxu0 %v1664_v2 }
  0x6d   : > { %1518 = vmatprep.subr.bf16.mxu0 %v1728_v37 }
  0x70   : > { %1519 = vmatpush3.bf16.msra.mxu0 %v1665_v3 }
  0x71   : > { %1520 = vmatprep.subr.bf16.mxu0 %v1728_v37 }
  0x74   : > { %1521 = vmatpush3.bf16.msra.mxu0 %v1666_v4 }
  0x75   : > { %1522 = vmatprep.subr.bf16.mxu0 %v1728_v37 }
  0x78   : > { %1523 = vmatpush3.bf16.msra.mxu0 %v1667_v5 }
  0x79   : > { %1524 = vmatprep.subr.bf16.mxu0 %v1728_v37 }
  0x7c   : > { %1525 = vmatpush3.bf16.msra.mxu0 %v1668_v6 }
  0x7d   : > { %1526 = vmatprep.subr.bf16.mxu0 %v1728_v37 }
  0x80   : > { %1527 = vmatpush3.bf16.msra.mxu0 %v1669_v7 }
  0x81   : > { %1528 = vmatprep.subr.bf16.mxu0 %v1728_v37 }
  0x84   : > { %1529 = vmatpush3.bf16.msra.mxu0 %v1670_v8 }
 0x106   : > { %v1426_v9 = vpop.f32.mrf.mxu0 }
 0x107   : > { %v1448_v10 = vpop.f32.mrf.mxu1 }
 0x108   : > { %v1427_v11 = vpop.f32.mrf.mxu0 }
 0x109   : > { %v1449_v12 = vpop.f32.mrf.mxu1  ;;  %v1428_v14 = vadd.f32 %v1427_v11, %v1426_v9 }
 0x10a   : > { %v1429_v13 = vpop.f32.mrf.mxu0  ;;  %v1450_v19 = vadd.f32 %v1449_v12, %v1448_v10 }
 0x10b   : > { %v1451_v15 = vpop.f32.mrf.mxu1  ;;  %v868_v18 = vadd.f32 %v1428_v14, %v1323_v16 }
 0x10c   : > { %v1430_v17 = vpop.f32.mrf.mxu0 }
 0x10d   : > { %v1431_v20 = vadd.f32 %v1430_v17, %v1429_v13  ;;  %v1452_v21 = vpop.f32.mrf.mxu1  ;;  %v909_v25 = vadd.f32 %v1450_v19, %v868_v18 }
 0x10e   : > { %v1453_v27 = vadd.f32 %v1452_v21, %v1451_v15 }
 0x10f   : > { %v871_v26 = vadd.f32 %v1431_v20, %v1323_v16 }
 0x111   : > { %v912_v34 = vadd.f32 %v1453_v27, %v871_v26 }
 0x126   : > { %v1470_v22 = vpop.f32.mrf.mxu0 }
 0x127   : > { %v990_v23 = vpop.f32.mrf.mxu1 }
 0x128   : > { %v1471_v24 = vpop.f32.mrf.mxu0 }
 0x129   : > { %v1472_v28 = vadd.f32 %v1471_v24, %v1470_v22  ;;  %v1512_v29 = vpop.f32.mrf.mxu1 }
 0x12a   : > { %v1473_v30 = vpop.f32.mrf.mxu0 }
 0x12b   : > { %v950_v31 = vadd.f32 %v1472_v28, %v909_v25  ;;  %v993_v32 = vpop.f32.mrf.mxu1 }
 0x12c   : > { %v1474_v33 = vpop.f32.mrf.mxu0 }
 0x12d   : > { %v1475_v35 = vadd.f32 %v1474_v33, %v1473_v30  ;;  %v1513_v36 = vpop.f32.mrf.mxu1  ;;  %v991_v37 = vadd.f32 %v990_v23, %v950_v31 }
 0x12f   : > { %v953_v38 = vadd.f32 %v1475_v35, %v912_v34  ;;  %v997_v40 = vmax.f32 %v991_v37, 0.0 }
 0x131   : > { %v994_v39 = vadd.f32 %v993_v32, %v953_v38 }
 0x133   : > { %v998_v41 = vmax.f32 %v994_v39, 0.0 }
 0x135   : > { %v999_v42 = vpack.c.bf16 %v998_v41, %v997_v40 }
 0x137   : > { %1531 = vmatmul.mubr.bf16.vlgmr.msra.gmra.mxu0 %v999_v42 }
 0x1f7   : > { %v1100_v44 = vpop.f32.mrf.mxu0 }
 0x1f8   : > { %v1107_v45 = vadd.f32 %v1100_v44, %v1000_v43 }
 0x1f9   : > { %v1532_v46 = vpop.f32.mrf.mxu0 }
 0x1fa   : > { %1109 = vst [vmem:[#allocation2] sm:$0xff] %v1107_v45  ;;  %1114 = sbr.rel (%p1395_p12) target bundleno = 523 (0x20b), region = 48 }
 0x1fb   : > { %v1103_v48 = vpop.f32.mrf.mxu0 }
 0x1fc   : > { %v1108_v49 = vadd.f32 %v1103_v48, %v1001_v47 }
 0x1fd   : > { %v1533_v50 = vpop.f32.mrf.mxu0 }
 0x1fe   : > { %1110 = vst [vmem:[#allocation2 + $0x8] sm:$0xff] %v1108_v49 }
 0x1ff   : > { %v1396_v53 = vld [vmem:[%s326_s29] ss:$0 sm:$0xff] }
 0x201   : > { %v1115_v51 = vld [vmem:[#allocation2] sm:$0xff] }
 0x202   : > { %v1124_v54 = vadd.f32 %v1396_v53, %v1115_v51 }
 0x205   : > { %v1116_v52 = vld [vmem:[#allocation2 + $0x8] sm:$0xff] }
 0x206   : > { %v1125_v55 = vadd.f32 %v1396_v53, %v1116_v52 }
 0x208   : > { %v1408_v56 = vpack.c.bf16 %v1125_v55, %v1124_v54 }
 0x20a   : > { %1409 = vst [vmem:[%s1846_s11] sm:$0xff] %v1408_v56  }
 0x20b PF: > { %1142 = sbr.rel (!%p1802_p6) target bundleno = 531 (0x213), region = 52  ;;  %s1400_s20 = sshll.u32 (%p1802_p6), %s1713_s21, 2 }
 0x20c   : > { %s1144_s8 = scalar_lea.vmem (%p1802_p6), %s1986_s5, %s1400_s20 }
 0x211   : > { %v1161_v57 = vld [vmem:[%s1846_s11] sm:$0xf]  ;;  %v1163_v58 = vld [vmem:[%s1846_s11 + $0x4] sm:$0xf] }
 0x212   : > { %1162 = vst [vmem:[%s1144_s8] sm:$0xf] %v1161_v57  ;;  %1164 = vst [vmem:[%s1144_s8 + $0x8] sm:$0xf] %v1163_v58 }
 0x213 PF: > { %s2001_s9 = sld [smem:[#allocation7_spill]] }
 0x214   : > { %s2002_s18 = sld [smem:[#allocation4_spill]] }
 0x215   : > { %s2003_s19 = sld [smem:[#allocation10_spill]] }
 0x216   : > { %s2004_s20 = sld [smem:[#allocation5_spill]] }
 0x217   : > { %s2005_s21 = sld [smem:[#allocation6_spill]] }
 0x218   : > { %s2006_s22 = sld [smem:[#allocation8_spill]] }
 0x219   : > { %s15_s24 = sadd.s32 1, %s2001_s9   ;;  %s2007_s23 = sld [smem:[#allocation9_spill]] }
 0x21a   : > { %p12_p13 = scmp.ge.s32.totalorder %s15_s24, 16  }
 0x21c   :  { %14 = sbr.rel (!%p12_p13) target bundleno = 4 (0x4), region = 131 }

// kernel: full_ppi_forward.10
= control target key start
LH: loop header
LB: loop body
LE: loop exit
PB: predicated region body
PF: predicated region fallthrough
CT: control target
= control target key end

     0   :  { %s1361_s18 = smov 0   ;;  %s1363_s19 = smov 0   ;;  %s1535_s0 = inlined_call_operand.vmem [shape: bf16[2,15,16,512], index: 0, kind: input, shape index: {}]   ;;  %s1536_s1 = inlined_call_operand.vmem [shape: bf16[2,512,128], index: 1, kind: input, shape index: {}]   ;;  %s1537_s2 = inlined_call_operand.vmem [shape: f32[2,1,128], index: 2, kind: input, shape index: {}]   ;;  %s1538_s3 = inlined_call_operand.vmem [shape: bf16[2,15,128,128], index: 3, kind: input, shape index: {}]   ;;  %s1539_s4 = inlined_call_operand.vmem [shape: f32[2,1,128], index: 4, kind: input, shape index: {}]   ;;  %s1540_s5 = inlined_call_operand.vmem [shape: bf16[16,256], index: 5, kind: output, shape index: {}]  }
   0x1   :  { %s1365_s20 = smov 0   ;;  %s1367_s21 = smov 0  }
   0x2   :  { %s1369_s22 = smov 0   ;;  %s1371_s23 = smov 0  }
   0x3   :  { %s1373_s24 = smov 0  }
   0x4 LB: > { %1546 = sst [smem:[#allocation4_spill]] %s1306_s19  ;;  %s24_s25 = sadd.s32 1, %s1318_s22  ;;  %s1326_s24 = sphi %s1373_s24, %s15_s24   ;;  %s1322_s23 = sphi %s1371_s23, %s1560_s23   ;;  %s1318_s22 = sphi %s1369_s22, %s1559_s22   ;;  %s1314_s21 = sphi %s1367_s21, %s1558_s21   ;;  %s1310_s20 = sphi %s1365_s20, %s1557_s20   ;;  %s1306_s19 = sphi %s1363_s19, %s1556_s19   ;;  %s1302_s18 = sphi %s1361_s18, %s1555_s18  }
   0x5   : > { %1547 = sst [smem:[#allocation5_spill]] %s1318_s22  ;;  %p25_p0 = scmp.ge.s32.totalorder %s24_s25, 15 }
   0x6   : > { %1548 = sst [smem:[#allocation6_spill]] %s1322_s23  ;;  %s27_s26 = sadd.s32 1, %s1322_s23 }
   0x7   : > { %1549 = sst [smem:[#allocation7_spill]] %s1326_s24  ;;  %s1018_s27 = sadd.s32 4294967295, %s1326_s24  }
   0x8   : > { %p178_p1 = scmp.ne.s32.totalorder %s1306_s19, %s1302_s18  ;;  %s1562_s25 = smov (%p25_p0, %s24_s25), 0 }
   0x9   : > { %1550 = sst [smem:[#allocation8_spill]] %s1562_s25  ;;  %s1564_s26 = smov (!%p25_p0, %s27_s26), %s1322_s23 }
   0xa   : > { %p179_p2 = scmp.eq.s32.totalorder %s1018_s27, 29  ;;  %p1022_p3 = scmp.ge.s32.totalorder %s1326_s24, 1 }
   0xb   : > { %p29_p4 = scmp.ge.s32.totalorder %s1564_s26, 2  ;;  %p247_p5 = scmp.lt.s32.totalorder %s1326_s24, 31 }
   0xc   : > { %p1403_p6 = por %p179_p2, %p178_p1  ;;  %s168_s30 = sadd.s32 1, %s1306_s19 }
   0xd   : > { %s1566_s26 = smov (%p29_p4, %s1564_s26), 0  ;;  %p248_p7 = pnand %p1022_p3, %p247_p5 }
   0xe   : > { %1552 = sst [smem:[#allocation9_spill]] %s1566_s26  ;;  %s165_s29 = ssub.s32 %s1322_s23, %s1566_s26 }
   0xf   : > { %p166_p8 = scmp.eq.s32.totalorder %s165_s29, 0  ;;  %251 = sbr.rel (%p248_p7) target bundleno = 499 (0x1f3), region = 40 }
  0x10   : > { %s295_s7 = sand.u32 (!%p248_p7), 1, %s1302_s18   ;;  %p298_p9 = scmp.lt.s32.totalorder (!%p248_p7), %s1314_s21, 1 }
  0x11   : > { %s1413_s6 = scalar_select %p166_p8, %s1306_s19, %s168_s30  }
  0x12   : > { %s1023_s8 = sshll.u32 (!%p248_p7), %s295_s7, 3  ;;  %p300_p10 = scmp.lt.s32.totalorder (!%p248_p7), %s1310_s20, 14 }
  0x13   : > { %1553 = sst [smem:[#allocation10_spill]] %s1413_s6  ;;  %s1447_s18 = scalar_lea.vmem (!%p248_p7), [#allocation3], %s1023_s8 }
  0x14   : > { %s1418_s9 = scalar_select %p298_p9, %s1314_s21, 1 }
  0x15   : > { %s301_s10 = scalar_select %p300_p10, %s1310_s20, 14 }
  0x16   : > { %s1165_s11 = smul.u32 120, %s1418_s9  ;;  %s1084_s12 = sshll.u32 %s1418_s9, 8 }
  0x17   : > { %s1024_s13 = sshll.u32 %s301_s10, 3  ;;  %s1426_s16 = scalar_lea.vmem %s1536_s1, %s1084_s12 }
  0x18   : > { %s304_s17 = sadd.s32 %s1165_s11, %s1024_s13  ;;  %s314_s29 = scalar_lea.vmem %s1537_s2, %s1418_s9 }
  0x19   : > { %s1025_s30 = sshll.u32 %s304_s17, 2  ;;  %s1028_s7 = sshll.u32 %s301_s10, 4 }
  0x1a   : > { %s1435_s23 = scalar_lea.vmem %s1535_s0, %s1025_s30  ;;  %s1166_s22 = smul.u32 240, %s1418_s9 }
  0x1b   : > { %s326_s24 = scalar_lea.vmem %s1539_s4, %s1418_s9  ;;  %p1030_p11 = scmp.ne.s32.totalorder %s1310_s20, 0 }
  0x1c   : > { %s321_s14 = sadd.s32 %s1166_s22, %s1028_s7 }
  0x1d   : > { %s1029_s12 = sshll.u32 %s321_s14, 2  ;;  %331 = sbr.rel (%p1030_p11) target bundleno = 36 (0x24), region = 44 }
  0x1e   : > { %s1445_s13 = scalar_lea.vmem %s1538_s3, %s1029_s12 }
  0x22   : > { %v1328_v0 = vmov 0.0  }
  0x23   : > { %332 = vst [vmem:[#allocation2] sm:$0xff] %v1328_v0  ;;  %333 = vst [vmem:[#allocation2 + $0x8] sm:$0xff] %v1328_v0 }
  0x24 PF: > { %v1226_v1 = vld [vmem:[%s1426_s16 + $0x78] sm:$0xff]   ;;  %v1230_v5 = vld [vmem:[%s1426_s16 + $0x70] sm:$0xff]   ;;  %v1234_v9 = vld [vmem:[%s1426_s16 + $0x68] sm:$0xff]   ;;  %v1329_v35 = vmov 0.0   ;;  %vm1330_vm0 = vmmov 0   ;;  %p1076_p12 = scmp.ne.s32.totalorder %s1310_s20, 14 }
  0x25   : > { %v1227_v2 = vld [vmem:[%s1426_s16 + $0xf8] sm:$0xff]   ;;  %1092 = vmatprep.subr.bf16.mxu0 %v1226_v1  ;;  %v1231_v6 = vld [vmem:[%s1426_s16 + $0xf0] sm:$0xff]   ;;  %v1235_v10 = vld [vmem:[%s1426_s16 + $0xe8] sm:$0xff]  }
  0x26   : > { %v1228_v3 = vld [vmem:[%s1426_s16 + $0x38] sm:$0xff]   ;;  %1114 = vmatprep.subr.bf16.mxu1 %v1227_v2  ;;  %v1232_v7 = vld [vmem:[%s1426_s16 + $0x30] sm:$0xff]   ;;  %v1236_v11 = vld [vmem:[%s1426_s16 + $0x28] sm:$0xff]  }
  0x27   : > { %v1229_v4 = vld [vmem:[%s1426_s16 + $0xb8] sm:$0xff]   ;;  %1093 = vmatpush3.bf16.msra.mxu0 %v1228_v3  ;;  %v1233_v8 = vld [vmem:[%s1426_s16 + $0xb0] sm:$0xff]   ;;  %v1237_v12 = vld [vmem:[%s1426_s16 + $0xa8] sm:$0xff]  }
  0x28   : > { %1115 = vmatpush3.bf16.msra.mxu1 %v1229_v4  ;;  %1094 = vmatprep.subr.bf16.mxu0 %v1230_v5  ;;  %v1238_v13 = vld [vmem:[%s1426_s16 + $0x60] sm:$0xff]   ;;  %v1242_v17 = vld [vmem:[%s1426_s16 + $0x58] sm:$0xff]   ;;  %v1246_v21 = vld [vmem:[%s1426_s16 + $0x50] sm:$0xff]  }
  0x29   : > { %1116 = vmatprep.subr.bf16.mxu1 %v1231_v6  ;;  %v1239_v14 = vld [vmem:[%s1426_s16 + $0xe0] sm:$0xff]   ;;  %v1243_v18 = vld [vmem:[%s1426_s16 + $0xd8] sm:$0xff]   ;;  %v1247_v22 = vld [vmem:[%s1426_s16 + $0xd0] sm:$0xff]  }
  0x2a   : > { %v1240_v15 = vld [vmem:[%s1426_s16 + $0x20] sm:$0xff]   ;;  %v1244_v19 = vld [vmem:[%s1426_s16 + $0x18] sm:$0xff]   ;;  %v1248_v23 = vld [vmem:[%s1426_s16 + $0x10] sm:$0xff]  }
  0x2b   : > { %1095 = vmatpush3.bf16.msra.mxu0 %v1232_v7  ;;  %v1241_v16 = vld [vmem:[%s1426_s16 + $0xa0] sm:$0xff]   ;;  %v1245_v20 = vld [vmem:[%s1426_s16 + $0x98] sm:$0xff]   ;;  %v1249_v24 = vld [vmem:[%s1426_s16 + $0x90] sm:$0xff]  }
  0x2c   : > { %1117 = vmatpush3.bf16.msra.mxu1 %v1233_v8  ;;  %1096 = vmatprep.subr.bf16.mxu0 %v1234_v9  ;;  %v1250_v25 = vld [vmem:[%s1426_s16 + $0x48] sm:$0xff]   ;;  %v1254_v29 = vld [vmem:[%s1426_s16 + $0x40] sm:$0xff]   ;;  %v1264_v38 = vld [vmem:[%s1445_s13 + $0x38] sm:$0xff]  }
  0x2d   : > { %1118 = vmatprep.subr.bf16.mxu1 %v1235_v10  ;;  %v1251_v26 = vld [vmem:[%s1426_s16 + $0xc8] sm:$0xff]   ;;  %v1255_v30 = vld [vmem:[%s1426_s16 + $0xc0] sm:$0xff]   ;;  %v1265_v39 = vld [vmem:[%s1445_s13 + $0x30] sm:$0xff]  }
  0x2e   : > { %v1252_v27 = vld [vmem:[%s1426_s16 + $0x8] sm:$0xff]   ;;  %v1256_v31 = vld [vmem:[%s1426_s16] sm:$0xff]   ;;  %v1268_v42 = vld [vmem:[%s1445_s13 + $0x18] sm:$0xff]  }
  0x2f   : > { %1097 = vmatpush3.bf16.msra.mxu0 %v1236_v11  ;;  %v1253_v28 = vld [vmem:[%s1426_s16 + $0x88] sm:$0xff]   ;;  %v1257_v32 = vld [vmem:[%s1426_s16 + $0x80] sm:$0xff]   ;;  %v1269_v43 = vld [vmem:[%s1445_s13 + $0x10] sm:$0xff]  }
  0x30   : > { %1119 = vmatpush3.bf16.msra.mxu1 %v1237_v12  ;;  %1098 = vmatprep.subr.bf16.mxu0 %v1238_v13  ;;  %v1258_v33 = vld [vmem:[%s1435_s23] ss:$16 sps:$4 sm:$0xff]   ;;  %v1260_v34 = vld [vmem:[%s1435_s23 + $0x4] ss:$16 sps:$4 sm:$0xff]   ;;  %v1261_v36 = vld [vmem:[%s1435_s23 + $0x8] ss:$16 sps:$4 sm:$0xff]  }
  0x31   : > { %1120 = vmatprep.subr.bf16.mxu1 %v1239_v14  ;;  %v1263_v37 = vld [vmem:[%s1435_s23 + $0xc] ss:$16 sps:$4 sm:$0xff]   ;;  %653 = vmatprep.mubr.bf16.mxu0 %v1260_v34  ;;  %v1267_v41 = vld [vmem:[%s1445_s13 + $0x20] sm:$0xff]  }
  0x32   : > { %694 = vmatprep.mubr.bf16.mxu1 %v1263_v37  ;;  %v1266_v40 = vld [vmem:[%s1445_s13 + $0x28] sm:$0xff]   ;;  %v1271_v45 = vld [vmem:[%s1445_s13] sm:$0xff]  }
  0x33   : > { %1099 = vmatpush3.bf16.msra.mxu0 %v1240_v15  ;;  %v1270_v44 = vld [vmem:[%s1445_s13 + $0x8] sm:$0xff]   ;;  %v1031_v48 = vld [vmem:[%s314_s29] ss:$0 sm:$0xff] }
  0x34   : > { %1121 = vmatpush3.bf16.msra.mxu1 %v1241_v16  ;;  %1100 = vmatprep.subr.bf16.mxu0 %v1242_v17  ;;  %v706_v2 = vld [vmem:[#allocation2] sm:$0xff]  ;;  %v707_v6 = vld [vmem:[#allocation2 + $0x8] sm:$0xff] }
  0x35   : > { %1122 = vmatprep.subr.bf16.mxu1 %v1243_v18 }
  0x37   : > { %1101 = vmatpush3.bf16.msra.mxu0 %v1244_v19 }
  0x38   : > { %1123 = vmatpush3.bf16.msra.mxu1 %v1245_v20  ;;  %1102 = vmatprep.subr.bf16.mxu0 %v1246_v21 }
  0x39   : > { %1124 = vmatprep.subr.bf16.mxu1 %v1247_v22 }
  0x3b   : > { %1103 = vmatpush3.bf16.msra.mxu0 %v1248_v23 }
  0x3c   : > { %1125 = vmatpush3.bf16.msra.mxu1 %v1249_v24  ;;  %1104 = vmatprep.subr.bf16.mxu0 %v1250_v25 }
  0x3d   : > { %1126 = vmatprep.subr.bf16.mxu1 %v1251_v26 }
  0x3f   : > { %1105 = vmatpush3.bf16.msra.mxu0 %v1252_v27 }
  0x40   : > { %1127 = vmatpush3.bf16.msra.mxu1 %v1253_v28  ;;  %1106 = vmatprep.subr.bf16.mxu0 %v1254_v29 }
  0x41   : > { %1128 = vmatprep.subr.bf16.mxu1 %v1255_v30 }
  0x43   : > { %1107 = vmatpush3.bf16.msra.mxu0 %v1256_v31 }
  0x44   : > { %1129 = vmatpush3.bf16.msra.mxu1 %v1257_v32  ;;  %1145 = vmatprep.subr.bf16.mxu0 %v1329_v35 }
  0x46   : > { %654 = vmatmul.mubr.bf16.vlgmr.msra.gmra.mxu0 %v1258_v33 }
  0x47   : > { %695 = vmatmul.mubr.bf16.vlgmr.msra.gmra.mxu1 %v1261_v36  ;;  %1146 = vmatpush3.bf16.msra.mxu0 %v1264_v38 }
  0x48   : > { %1147 = vmatprep.subr.bf16.mxu0 %v1329_v35  ;;  %1161 = vmatprep.mubr.msk.bf16.mxu0 %vm1330_vm0, %v1329_v35 }
  0x4b   : > { %1148 = vmatpush3.bf16.msra.mxu0 %v1265_v39 }
  0x4c   : > { %1149 = vmatprep.subr.bf16.mxu0 %v1329_v35 }
  0x4f   : > { %1150 = vmatpush3.bf16.msra.mxu0 %v1266_v40 }
  0x50   : > { %1151 = vmatprep.subr.bf16.mxu0 %v1329_v35 }
  0x53   : > { %1152 = vmatpush3.bf16.msra.mxu0 %v1267_v41 }
  0x54   : > { %1153 = vmatprep.subr.bf16.mxu0 %v1329_v35 }
  0x57   : > { %1154 = vmatpush3.bf16.msra.mxu0 %v1268_v42 }
  0x58   : > { %1155 = vmatprep.subr.bf16.mxu0 %v1329_v35 }
  0x5b   : > { %1156 = vmatpush3.bf16.msra.mxu0 %v1269_v43 }
  0x5c   : > { %1157 = vmatprep.subr.bf16.mxu0 %v1329_v35 }
  0x5f   : > { %1158 = vmatpush3.bf16.msra.mxu0 %v1270_v44 }
  0x60   : > { %1159 = vmatprep.subr.bf16.mxu0 %v1329_v35 }
  0x63   : > { %1160 = vmatpush3.bf16.msra.mxu0 %v1271_v45 }
 0x106   : > { %v1108_v46 = vpop.f32.mrf.mxu0 }
 0x107   : > { %v1130_v47 = vpop.f32.mrf.mxu1 }
 0x108   : > { %v1109_v49 = vpop.f32.mrf.mxu0 }
 0x109   : > { %v1110_v50 = vadd.f32 %v1109_v49, %v1108_v46  ;;  %v1131_v51 = vpop.f32.mrf.mxu1 }
 0x10a   : > { %v1111_v52 = vpop.f32.mrf.mxu0  ;;  %v1132_v56 = vadd.f32 %v1131_v51, %v1130_v47 }
 0x10b   : > { %v656_v53 = vadd.f32 %v1110_v50, %v1031_v48  ;;  %v1133_v54 = vpop.f32.mrf.mxu1 }
 0x10c   : > { %v1112_v55 = vpop.f32.mrf.mxu0 }
 0x10d   : > { %v1113_v57 = vadd.f32 %v1112_v55, %v1111_v52  ;;  %v1134_v58 = vpop.f32.mrf.mxu1  ;;  %v697_v59 = vadd.f32 %v1132_v56, %v656_v53 }
 0x10e   : > { %v1135_v61 = vadd.f32 %v1134_v58, %v1133_v54 }
 0x10f   : > { %v659_v60 = vadd.f32 %v1113_v57, %v1031_v48  ;;  %v703_v63 = vmax.f32 %v697_v59, 0.0 }
 0x111   : > { %v700_v62 = vadd.f32 %v1135_v61, %v659_v60 }
 0x113   : > { %v704_v0 = vmax.f32 %v700_v62, 0.0 }
 0x115   : > { %v705_v1 = vpack.c.bf16 %v704_v0, %v703_v63 }
 0x117   : > { %1162 = vmatmul.mubr.bf16.vlgmr.msra.gmra.mxu0 %v705_v1 }
 0x1d7   : > { %v806_v3 = vpop.f32.mrf.mxu0 }
 0x1d8   : > { %v813_v4 = vadd.f32 %v806_v3, %v706_v2 }
 0x1d9   : > { %v1163_v5 = vpop.f32.mrf.mxu0 }
 0x1da   : > { %815 = vst [vmem:[#allocation2] sm:$0xff] %v813_v4  ;;  %820 = sbr.rel (%p1076_p12) target bundleno = 491 (0x1eb), region = 48 }
 0x1db   : > { %v809_v7 = vpop.f32.mrf.mxu0 }
 0x1dc   : > { %v814_v8 = vadd.f32 %v809_v7, %v707_v6 }
 0x1dd   : > { %v1164_v9 = vpop.f32.mrf.mxu0 }
 0x1de   : > { %816 = vst [vmem:[#allocation2 + $0x8] sm:$0xff] %v814_v8 }
 0x1df   : > { %v1077_v12 = vld [vmem:[%s326_s24] ss:$0 sm:$0xff] }
 0x1e1   : > { %v821_v10 = vld [vmem:[#allocation2] sm:$0xff] }
 0x1e2   : > { %v830_v13 = vadd.f32 %v1077_v12, %v821_v10 }
 0x1e5   : > { %v822_v11 = vld [vmem:[#allocation2 + $0x8] sm:$0xff] }
 0x1e6   : > { %v831_v14 = vadd.f32 %v1077_v12, %v822_v11 }
 0x1e8   : > { %v1090_v15 = vpack.c.bf16 %v831_v14, %v830_v13 }
 0x1ea   : > { %1091 = vst [vmem:[%s1447_s18] sm:$0xff] %v1090_v15  }
 0x1eb PF: > { %848 = sbr.rel (!%p1403_p6) target bundleno = 499 (0x1f3), region = 52  ;;  %s1081_s20 = sshll.u32 (%p1403_p6), %s1314_s21, 2 }
 0x1ec   : > { %s850_s8 = scalar_lea.vmem (%p1403_p6), %s1540_s5, %s1081_s20 }
 0x1f1   : > { %v867_v16 = vld [vmem:[%s1447_s18] sm:$0xf]  ;;  %v869_v17 = vld [vmem:[%s1447_s18 + $0x4] sm:$0xf] }
 0x1f2   : > { %868 = vst [vmem:[%s850_s8] sm:$0xf] %v867_v16  ;;  %870 = vst [vmem:[%s850_s8 + $0x8] sm:$0xf] %v869_v17 }
 0x1f3 PF: > { %s1554_s24 = sld [smem:[#allocation7_spill]] }
 0x1f4   : > { %s1555_s18 = sld [smem:[#allocation4_spill]] }
 0x1f5   : > { %s1556_s19 = sld [smem:[#allocation10_spill]] }
 0x1f6   : > { %s1557_s20 = sld [smem:[#allocation5_spill]] }
 0x1f7   : > { %s1558_s21 = sld [smem:[#allocation6_spill]] }
 0x1f8   : > { %s1559_s22 = sld [smem:[#allocation8_spill]] }
 0x1f9   : > { %s15_s24 = sadd.s32 1, %s1554_s24   ;;  %s1560_s23 = sld [smem:[#allocation9_spill]] }
 0x1fa   : > { %p12_p13 = scmp.ge.s32.totalorder %s15_s24, 32  }
 0x1fc   :  { %14 = sbr.rel (!%p12_p13) target bundleno = 4 (0x4), region = 131 }

// kernel: full_ppi_forward.11
= control target key start
LH: loop header
LB: loop body
LE: loop exit
PB: predicated region body
PF: predicated region fallthrough
CT: control target
= control target key end

     0   :  { %s1329_s0 = inlined_call_operand.vmem [shape: bf16[2,31,16,256], index: 0, kind: input, shape index: {}]   ;;  %s1330_s1 = inlined_call_operand.vmem [shape: bf16[2,256,128], index: 1, kind: input, shape index: {}]   ;;  %s1331_s2 = inlined_call_operand.vmem [shape: f32[2,1,128], index: 2, kind: input, shape index: {}]   ;;  %s1332_s3 = inlined_call_operand.vmem [shape: bf16[2,31,128,256], index: 3, kind: input, shape index: {}]   ;;  %s1333_s4 = inlined_call_operand.vmem [shape: f32[2,1,256], index: 4, kind: input, shape index: {}]   ;;  %s1334_s5 = inlined_call_operand.vmem [shape: bf16[16,512], index: 5, kind: output, shape index: {}]  }
   0x1   :  { %1340 = sst [smem:[#allocation11_spill]] %s1334_s5 }
   0x2   :  { %s1166_s18 = smov 0   ;;  %s1168_s19 = smov 0  }
   0x3   :  { %s1170_s20 = smov 0   ;;  %s1172_s21 = smov 0  }
   0x4   :  { %s1174_s22 = smov 0   ;;  %s1176_s23 = smov 0  }
   0x5   :  { %s1178_s24 = smov 0  }
   0x6 LB: > { %1341 = sst [smem:[#allocation4_spill]] %s1112_s19  ;;  %s24_s25 = sadd.s32 1, %s1124_s22  ;;  %s1132_s24 = sphi %s1178_s24, %s15_s24   ;;  %s1128_s23 = sphi %s1176_s23, %s1356_s23   ;;  %s1124_s22 = sphi %s1174_s22, %s1355_s22   ;;  %s1120_s21 = sphi %s1172_s21, %s1354_s21   ;;  %s1116_s20 = sphi %s1170_s20, %s1353_s20   ;;  %s1112_s19 = sphi %s1168_s19, %s1352_s19   ;;  %s1108_s18 = sphi %s1166_s18, %s1351_s18  }
   0x7   : > { %1342 = sst [smem:[#allocation5_spill]] %s1124_s22  ;;  %p25_p0 = scmp.ge.s32.totalorder %s24_s25, 31 }
   0x8   : > { %1343 = sst [smem:[#allocation6_spill]] %s1128_s23  ;;  %s27_s26 = sadd.s32 1, %s1128_s23 }
   0x9   : > { %1344 = sst [smem:[#allocation7_spill]] %s1132_s24  ;;  %s892_s27 = sadd.s32 4294967295, %s1132_s24  }
   0xa   : > { %p178_p1 = scmp.ne.s32.totalorder %s1112_s19, %s1108_s18  ;;  %s1358_s25 = smov (%p25_p0, %s24_s25), 0 }
   0xb   : > { %1345 = sst [smem:[#allocation8_spill]] %s1358_s25  ;;  %s1360_s26 = smov (!%p25_p0, %s27_s26), %s1128_s23 }
   0xc   : > { %p179_p2 = scmp.eq.s32.totalorder %s892_s27, 61  ;;  %p896_p3 = scmp.ge.s32.totalorder %s1132_s24, 1 }
   0xd   : > { %p29_p4 = scmp.ge.s32.totalorder %s1360_s26, 2  ;;  %p248_p5 = scmp.lt.s32.totalorder %s1132_s24, 63 }
   0xe   : > { %p1208_p6 = por %p179_p2, %p178_p1  ;;  %s168_s30 = sadd.s32 1, %s1112_s19 }
   0xf   : > { %s1362_s26 = smov (%p29_p4, %s1360_s26), 0  ;;  %p249_p7 = pnand %p896_p3, %p248_p5 }
  0x10   : > { %1347 = sst [smem:[#allocation9_spill]] %s1362_s26  ;;  %s165_s29 = ssub.s32 %s1128_s23, %s1362_s26 }
  0x11   : > { %p166_p8 = scmp.eq.s32.totalorder %s165_s29, 0  ;;  %252 = sbr.rel (%p249_p7) target bundleno = 503 (0x1f7), region = 40 }
  0x12   : > { %s297_s7 = sand.u32 (!%p249_p7), 1, %s1108_s18   ;;  %p300_p9 = scmp.lt.s32.totalorder (!%p249_p7), %s1120_s21, 1 }
  0x13   : > { %s1218_s6 = scalar_select %p166_p8, %s1112_s19, %s168_s30  }
  0x14   : > { %s897_s8 = sshll.u32 (!%p249_p7), %s297_s7, 4  ;;  %p302_p10 = scmp.lt.s32.totalorder (!%p249_p7), %s1116_s20, 30 }
  0x15   : > { %1348 = sst [smem:[#allocation10_spill]] %s1218_s6  ;;  %p905_p11 = scmp.ne.s32.totalorder (!%p249_p7), %s1116_s20, 0 }
  0x16   : > { %s1223_s9 = scalar_select %p300_p9, %s1120_s21, 1 }
  0x17   : > { %s303_s10 = scalar_select %p302_p10, %s1116_s20, 30 }
  0x18   : > { %s975_s11 = smul.u32 124, %s1223_s9  ;;  %s949_s12 = sshll.u32 %s1223_s9, 7 }
  0x19   : > { %s898_s13 = sshll.u32 %s303_s10, 2  ;;  %s1231_s16 = scalar_lea.vmem %s1330_s1, %s949_s12 }
  0x1a   : > { %s306_s17 = sadd.s32 %s975_s11, %s898_s13  ;;  %s316_s29 = scalar_lea.vmem %s1331_s2, %s1223_s9 }
  0x1b   : > { %s899_s30 = sshll.u32 %s306_s17, 2  ;;  %s902_s7 = sshll.u32 %s303_s10, 5 }
  0x1c   : > { %s1240_s23 = scalar_lea.vmem %s1329_s0, %s899_s30  ;;  %s976_s22 = smul.u32 992, %s1223_s9 }
  0x1d   : > { %s904_s6 = sshll.u32 %s1223_s9, 1  ;;  %s1254_s10 = scalar_lea.vmem [#allocation3], %s897_s8 }
  0x1e   : > { %s323_s19 = sadd.s32 %s976_s22, %s902_s7  ;;  %s1247_s12 = scalar_lea.vmem %s1333_s4, %s904_s6 }
  0x1f   : > { %s903_s11 = sshll.u32 %s323_s19, 2  ;;  %335 = sbr.rel (%p905_p11) target bundleno = 39 (0x27), region = 44 }
  0x20   : > { %s1252_s15 = scalar_lea.vmem %s1332_s3, %s903_s11 }
  0x24   : > { %v1134_v0 = vmov 0.0  }
  0x25   : > { %336 = vst [vmem:[#allocation2 + $0x10] sm:$0xff] %v1134_v0  ;;  %337 = vst [vmem:[#allocation2] sm:$0xff] %v1134_v0 }
  0x26   : > { %338 = vst [vmem:[#allocation2 + $0x18] sm:$0xff] %v1134_v0  ;;  %339 = vst [vmem:[#allocation2 + $0x8] sm:$0xff] %v1134_v0 }
  0x27 PF: > { %v1035_v1 = vld [vmem:[%s1231_s16 + $0x78] sm:$0xff]   ;;  %v1037_v3 = vld [vmem:[%s1231_s16 + $0x70] sm:$0xff]   ;;  %v1039_v5 = vld [vmem:[%s1231_s16 + $0x68] sm:$0xff]   ;;  %v1135_v35 = vmov 0   ;;  %p941_p12 = scmp.ne.s32.totalorder %s1116_s20, 30 }
  0x28   : > { %v1036_v2 = vld [vmem:[%s1231_s16 + $0x38] sm:$0xff]   ;;  %953 = vmatprep.subr.bf16.mxu0 %v1035_v1  ;;  %v1038_v4 = vld [vmem:[%s1231_s16 + $0x30] sm:$0xff]   ;;  %v1040_v6 = vld [vmem:[%s1231_s16 + $0x28] sm:$0xff]   ;;  %663 = vmatprep.mubr.bf16.mxu1 %v1135_v35 }
  0x29   : > { %954 = vmatpush3.bf16.msra.mxu0 %v1036_v2  ;;  %v1041_v7 = vld [vmem:[%s1231_s16 + $0x60] sm:$0xff]   ;;  %v1043_v9 = vld [vmem:[%s1231_s16 + $0x58] sm:$0xff]   ;;  %v1045_v11 = vld [vmem:[%s1231_s16 + $0x50] sm:$0xff]  }
  0x2a   : > { %955 = vmatprep.subr.bf16.mxu0 %v1037_v3  ;;  %v1042_v8 = vld [vmem:[%s1231_s16 + $0x20] sm:$0xff]   ;;  %v1044_v10 = vld [vmem:[%s1231_s16 + $0x18] sm:$0xff]   ;;  %v1046_v15 = vld [vmem:[%s1231_s16 + $0x10] sm:$0xff]  }
  0x2b   : > { %v1053_v12 = vld [vmem:[%s1240_s23 + $0x4] ss:$8 sps:$4 sm:$0xff]   ;;  %v1054_v13 = vld [vmem:[%s1252_s15 + $0x74] ss:$8 sps:$4 sm:$0xff]   ;;  %v1056_v14 = vld [vmem:[%s1252_s15 + $0x70] ss:$8 sps:$4 sm:$0xff]  }
  0x2c   : > { %519 = vmatprep.mubr.bf16.mxu0 %v1053_v12  ;;  %v1057_v16 = vld [vmem:[%s1252_s15 + $0x64] ss:$8 sps:$4 sm:$0xff]   ;;  %631 = vmatprep.subr.bf16.mxu1 %v1054_v13  ;;  %v1059_v18 = vld [vmem:[%s1252_s15 + $0x60] ss:$8 sps:$4 sm:$0xff]   ;;  %v1060_v20 = vld [vmem:[%s1252_s15 + $0x54] ss:$8 sps:$4 sm:$0xff]  }
  0x2d   : > { %956 = vmatpush3.bf16.msra.mxu0 %v1038_v4  ;;  %v1047_v17 = vld [vmem:[%s1231_s16 + $0x48] sm:$0xff]   ;;  %632 = vmatpush1.bf16.msra.mxu1 %v1056_v14  ;;  %v1049_v21 = vld [vmem:[%s1231_s16 + $0x40] sm:$0xff]   ;;  %v1062_v22 = vld [vmem:[%s1252_s15 + $0x50] ss:$8 sps:$4 sm:$0xff]  }
  0x2e   : > { %957 = vmatprep.subr.bf16.mxu0 %v1039_v5  ;;  %v1048_v19 = vld [vmem:[%s1231_s16 + $0x8] sm:$0xff]   ;;  %633 = vmatprep.subr.bf16.mxu1 %v1057_v16  ;;  %v1050_v24 = vld [vmem:[%s1231_s16] sm:$0xff]   ;;  %v1066_v27 = vld [vmem:[%s1252_s15 + $0x34] ss:$8 sps:$4 sm:$0xff]  }
  0x2f   : > { %v1063_v23 = vld [vmem:[%s1252_s15 + $0x44] ss:$8 sps:$4 sm:$0xff]   ;;  %v1065_v25 = vld [vmem:[%s1252_s15 + $0x40] ss:$8 sps:$4 sm:$0xff]   ;;  %v1068_v28 = vld [vmem:[%s1252_s15 + $0x30] ss:$8 sps:$4 sm:$0xff]  }
  0x30   : > { %v1051_v26 = vld [vmem:[%s1240_s23] ss:$8 sps:$4 sm:$0xff]   ;;  %v1069_v29 = vld [vmem:[%s1252_s15 + $0x24] ss:$8 sps:$4 sm:$0xff]   ;;  %v1072_v31 = vld [vmem:[%s1252_s15 + $0x14] ss:$8 sps:$4 sm:$0xff]  }
  0x31   : > { %958 = vmatpush3.bf16.msra.mxu0 %v1040_v6  ;;  %634 = vmatpush1.bf16.msra.mxu1 %v1059_v18  ;;  %v1071_v30 = vld [vmem:[%s1252_s15 + $0x20] ss:$8 sps:$4 sm:$0xff]   ;;  %v1074_v32 = vld [vmem:[%s1252_s15 + $0x10] ss:$8 sps:$4 sm:$0xff]   ;;  %v1075_v33 = vld [vmem:[%s1252_s15 + $0x4] ss:$8 sps:$4 sm:$0xff]  }
  0x32   : > { %959 = vmatprep.subr.bf16.mxu0 %v1041_v7  ;;  %635 = vmatprep.subr.bf16.mxu1 %v1060_v20  ;;  %v1077_v34 = vld [vmem:[%s1252_s15] ss:$8 sps:$4 sm:$0xff]   ;;  %v531_v48 = vld [vmem:[#allocation2 + $0x10] sm:$0xff]  ;;  %v533_v53 = vld [vmem:[#allocation2 + $0x18] sm:$0xff] }
  0x33   : > { %v906_v39 = vld [vmem:[%s316_s29] ss:$0 sm:$0xff]  ;;  %v534_v56 = vld [vmem:[#allocation2 + $0x8] sm:$0xff] }
  0x34   : > { %v532_v50 = vld [vmem:[#allocation2] sm:$0xff] }
  0x35   : > { %960 = vmatpush3.bf16.msra.mxu0 %v1042_v8  ;;  %636 = vmatpush1.bf16.msra.mxu1 %v1062_v22 }
  0x36   : > { %961 = vmatprep.subr.bf16.mxu0 %v1043_v9  ;;  %637 = vmatprep.subr.bf16.mxu1 %v1063_v23 }
  0x39   : > { %962 = vmatpush3.bf16.msra.mxu0 %v1044_v10  ;;  %638 = vmatpush1.bf16.msra.mxu1 %v1065_v25 }
  0x3a   : > { %963 = vmatprep.subr.bf16.mxu0 %v1045_v11  ;;  %639 = vmatprep.subr.bf16.mxu1 %v1066_v27 }
  0x3d   : > { %964 = vmatpush3.bf16.msra.mxu0 %v1046_v15  ;;  %640 = vmatpush1.bf16.msra.mxu1 %v1068_v28 }
  0x3e   : > { %965 = vmatprep.subr.bf16.mxu0 %v1047_v17  ;;  %641 = vmatprep.subr.bf16.mxu1 %v1069_v29 }
  0x41   : > { %966 = vmatpush3.bf16.msra.mxu0 %v1048_v19  ;;  %642 = vmatpush1.bf16.msra.mxu1 %v1071_v30 }
  0x42   : > { %967 = vmatprep.subr.bf16.mxu0 %v1049_v21  ;;  %643 = vmatprep.subr.bf16.mxu1 %v1072_v31 }
  0x45   : > { %968 = vmatpush3.bf16.msra.mxu0 %v1050_v24  ;;  %644 = vmatpush1.bf16.msra.mxu1 %v1074_v32 }
  0x46   : > { %645 = vmatprep.subr.bf16.mxu1 %v1075_v33 }
  0x48   : > { %520 = vmatmul.mubr.bf16.vlgmr.msra.gmra.mxu0 %v1051_v26 }
  0x49   : > { %646 = vmatpush1.bf16.msra.mxu1 %v1077_v34 }
 0x108   : > { %v969_v36 = vpop.f32.mrf.mxu0 }
 0x10a   : > { %v970_v37 = vpop.f32.mrf.mxu0 }
 0x10b   : > { %v971_v38 = vadd.f32 %v970_v37, %v969_v36 }
 0x10c   : > { %v972_v40 = vpop.f32.mrf.mxu0 }
 0x10d   : > { %v522_v42 = vadd.f32 %v971_v38, %v906_v39 }
 0x10e   : > { %v973_v41 = vpop.f32.mrf.mxu0 }
 0x10f   : > { %v974_v43 = vadd.f32 %v973_v41, %v972_v40  ;;  %v528_v45 = vmax.f32 %v522_v42, 0.0 }
 0x111   : > { %v525_v44 = vadd.f32 %v974_v43, %v906_v39 }
 0x113   : > { %v529_v46 = vmax.f32 %v525_v44, 0.0 }
 0x115   : > { %v530_v47 = vpack.c.bf16 %v529_v46, %v528_v45 }
 0x117   : > { %664 = vmatmul.mubr.bf16.vlgmr.msra.gmra.mxu1 %v530_v47 }
 0x1d7   : > { %v665_v49 = vpop.f32.mrf.mxu1 }
 0x1d8   : > { %v674_v51 = vadd.f32 %v665_v49, %v531_v48 }
 0x1d9   : > { %v667_v52 = vpop.f32.mrf.mxu1 }
 0x1da   : > { %678 = vst [vmem:[#allocation2 + $0x10] sm:$0xff] %v674_v51  ;;  %v675_v54 = vadd.f32 %v667_v52, %v532_v50 }
 0x1db   : > { %v669_v55 = vpop.f32.mrf.mxu1 }
 0x1dc   : > { %679 = vst [vmem:[#allocation2] sm:$0xff] %v675_v54  ;;  %v676_v57 = vadd.f32 %v669_v55, %v533_v53  ;;  %685 = sbr.rel (%p941_p12) target bundleno = 494 (0x1ee), region = 48 }
 0x1dd   : > { %v671_v58 = vpop.f32.mrf.mxu1 }
 0x1de   : > { %680 = vst [vmem:[#allocation2 + $0x18] sm:$0xff] %v676_v57  ;;  %v677_v59 = vadd.f32 %v671_v58, %v534_v56 }
 0x1e0   : > { %681 = vst [vmem:[#allocation2 + $0x8] sm:$0xff] %v677_v59 }
 0x1e1   : > { %v692_v60 = vlaneseq  ;;  %v690_v62 = vld [vmem:[%s1247_s12] sm:$0x3]  ;;  %v686_v63 = vld [vmem:[#allocation2 + $0x10] sm:$0xff] }
 0x1e3   : > { %v693_v61 = vshrl.u32 %v692_v60, 7  ;;  %v687_v2 = vld [vmem:[#allocation2] sm:$0xff] }
 0x1e5   : > { %v694_v0 = vsub.s32 0, %v693_v61  ;;  %v698_v1 = vsub.s32 1, %v693_v61  ;;  %v688_v3 = vld [vmem:[#allocation2 + $0x18] sm:$0xff] }
 0x1e7   : > { %v689_v4 = vld [vmem:[#allocation2 + $0x8] sm:$0xff]  ;;  %v695_v5 = vrot.slane %v690_v62, %v694_v0  ;;  %v699_v6 = vrot.slane %v690_v62, %v698_v1 }
 0x1e9   : > { %v702_v7 = vadd.f32 %v695_v5, %v686_v63  ;;  %v703_v8 = vadd.f32 %v699_v6, %v687_v2  ;;  %v704_v9 = vadd.f32 %v695_v5, %v688_v3  ;;  %v705_v10 = vadd.f32 %v699_v6, %v689_v4 }
 0x1eb   : > { %v950_v11 = vpack.c.bf16 %v703_v8, %v702_v7  ;;  %v951_v12 = vpack.c.bf16 %v705_v10, %v704_v9 }
 0x1ed   : > { %718 = vst [vmem:[%s1254_s10] sm:$0xff] %v950_v11  ;;  %719 = vst [vmem:[%s1254_s10 + $0x8] sm:$0xff] %v951_v12 }
 0x1ee PF: > { %726 = sbr.rel (!%p1208_p6) target bundleno = 503 (0x1f7), region = 52  ;;  %s952_s20 = sshll.u32 (%p1208_p6), %s1120_s21, 3 }
 0x1ef   : > { %s1349_s24 = sld [smem:[#allocation11_spill]] (%p1208_p6) }
 0x1f4   : > { %v760_v13 = vld [vmem:[%s1254_s10] sm:$0xff]  ;;  %v762_v14 = vld [vmem:[%s1254_s10 + $0x8] sm:$0xff] }
 0x1f5   : > { %s729_s25 = scalar_lea.vmem %s1349_s24, %s952_s20 }
 0x1f6   : > { %761 = vst [vmem:[%s729_s25] sm:$0xff] %v760_v13  ;;  %763 = vst [vmem:[%s729_s25 + $0x10] sm:$0xff] %v762_v14 }
 0x1f7 PF: > { %s1350_s26 = sld [smem:[#allocation7_spill]] }
 0x1f8   : > { %s1351_s18 = sld [smem:[#allocation4_spill]] }
 0x1f9   : > { %s1352_s19 = sld [smem:[#allocation10_spill]] }
 0x1fa   : > { %s1353_s20 = sld [smem:[#allocation5_spill]] }
 0x1fb   : > { %s1354_s21 = sld [smem:[#allocation6_spill]] }
 0x1fc   : > { %s1355_s22 = sld [smem:[#allocation8_spill]] }
 0x1fd   : > { %s15_s24 = sadd.s32 1, %s1350_s26   ;;  %s1356_s23 = sld [smem:[#allocation9_spill]] }
 0x1fe   : > { %p12_p13 = scmp.ge.s32.totalorder %s15_s24, 64  }
 0x200   :  { %14 = sbr.rel (!%p12_p13) target bundleno = 6 (0x6), region = 128 }

// kernel: full_ppi_forward.12
= control target key start
LH: loop header
LB: loop body
LE: loop exit
PB: predicated region body
PF: predicated region fallthrough
CT: control target
= control target key end

     0   :  { %s1481_s0 = inlined_call_operand.vmem [shape: bf16[2,79,16,128], index: 0, kind: input, shape index: {}]   ;;  %s1482_s1 = inlined_call_operand.vmem [shape: bf16[2,128,128], index: 1, kind: input, shape index: {}]   ;;  %s1483_s2 = inlined_call_operand.vmem [shape: f32[2,1,128], index: 2, kind: input, shape index: {}]   ;;  %s1484_s3 = inlined_call_operand.vmem [shape: bf16[2,79,128,512], index: 3, kind: input, shape index: {}]   ;;  %s1485_s4 = inlined_call_operand.vmem [shape: f32[2,1,512], index: 4, kind: input, shape index: {}]   ;;  %s1486_s5 = inlined_call_operand.vmem [shape: bf16[16,1024], index: 5, kind: output, shape index: {}]  }
   0x1   :  { %1492 = sst [smem:[#allocation11_spill]] %s1486_s5 }
   0x2   :  { %s1307_s18 = smov 0   ;;  %s1309_s19 = smov 0  }
   0x3   :  { %s1311_s20 = smov 0   ;;  %s1313_s21 = smov 0  }
   0x4   :  { %s1315_s22 = smov 0   ;;  %s1317_s23 = smov 0  }
   0x5   :  { %s1319_s24 = smov 0  }
   0x6 LB: > { %1493 = sst [smem:[#allocation4_spill]] %s1251_s19  ;;  %s24_s25 = sadd.s32 1, %s1263_s22  ;;  %s1271_s24 = sphi %s1319_s24, %s15_s24   ;;  %s1267_s23 = sphi %s1317_s23, %s1508_s23   ;;  %s1263_s22 = sphi %s1315_s22, %s1507_s22   ;;  %s1259_s21 = sphi %s1313_s21, %s1506_s21   ;;  %s1255_s20 = sphi %s1311_s20, %s1505_s20   ;;  %s1251_s19 = sphi %s1309_s19, %s1504_s19   ;;  %s1247_s18 = sphi %s1307_s18, %s1503_s18  }
   0x7   : > { %1494 = sst [smem:[#allocation5_spill]] %s1263_s22  ;;  %p25_p0 = scmp.ge.s32.totalorder %s24_s25, 79 }
   0x8   : > { %1495 = sst [smem:[#allocation6_spill]] %s1267_s23  ;;  %s27_s26 = sadd.s32 1, %s1267_s23 }
   0x9   : > { %1496 = sst [smem:[#allocation7_spill]] %s1271_s24  ;;  %s997_s27 = sadd.s32 4294967295, %s1271_s24  }
   0xa   : > { %p178_p1 = scmp.ne.s32.totalorder %s1251_s19, %s1247_s18  ;;  %s1510_s25 = smov (%p25_p0, %s24_s25), 0 }
   0xb   : > { %1497 = sst [smem:[#allocation8_spill]] %s1510_s25  ;;  %s1512_s26 = smov (!%p25_p0, %s27_s26), %s1267_s23 }
   0xc   : > { %p179_p2 = scmp.eq.s32.totalorder %s997_s27, 157  ;;  %p1001_p3 = scmp.ge.s32.totalorder %s1271_s24, 1 }
   0xd   : > { %p29_p4 = scmp.ge.s32.totalorder %s1512_s26, 2  ;;  %p248_p5 = scmp.lt.s32.totalorder %s1271_s24, 159 }
   0xe   : > { %p1349_p6 = por %p179_p2, %p178_p1  ;;  %s168_s30 = sadd.s32 1, %s1251_s19 }
   0xf   : > { %s1514_s26 = smov (%p29_p4, %s1512_s26), 0  ;;  %p249_p7 = pnand %p1001_p3, %p248_p5 }
  0x10   : > { %1499 = sst [smem:[#allocation9_spill]] %s1514_s26  ;;  %s165_s29 = ssub.s32 %s1267_s23, %s1514_s26 }
  0x11   : > { %p166_p8 = scmp.eq.s32.totalorder %s165_s29, 0  ;;  %252 = sbr.rel (%p249_p7) target bundleno = 503 (0x1f7), region = 40 }
  0x12   : > { %s297_s7 = sand.u32 (!%p249_p7), 1, %s1247_s18   ;;  %p300_p9 = scmp.lt.s32.totalorder (!%p249_p7), %s1259_s21, 1 }
  0x13   : > { %s1359_s6 = scalar_select %p166_p8, %s1251_s19, %s168_s30  }
  0x14   : > { %s1002_s8 = sshll.u32 (!%p249_p7), %s297_s7, 5  ;;  %p302_p10 = scmp.lt.s32.totalorder (!%p249_p7), %s1255_s20, 78 }
  0x15   : > { %1500 = sst [smem:[#allocation10_spill]] %s1359_s6  ;;  %p1010_p11 = scmp.ne.s32.totalorder (!%p249_p7), %s1255_s20, 0 }
  0x16   : > { %s1364_s9 = scalar_select %p300_p9, %s1259_s21, 1 }
  0x17   : > { %s303_s10 = scalar_select %p302_p10, %s1255_s20, 78 }
  0x18   : > { %s1098_s11 = smul.u32 158, %s1364_s9  ;;  %s1063_s12 = sshll.u32 %s1364_s9, 6 }
  0x19   : > { %s1003_s13 = sshll.u32 %s303_s10, 1  ;;  %s1372_s16 = scalar_lea.vmem %s1482_s1, %s1063_s12 }
  0x1a   : > { %s306_s17 = sadd.s32 %s1098_s11, %s1003_s13  ;;  %s316_s29 = scalar_lea.vmem %s1483_s2, %s1364_s9 }
  0x1b   : > { %s1004_s30 = sshll.u32 %s306_s17, 2  ;;  %s1007_s7 = sshll.u32 %s303_s10, 6 }
  0x1c   : > { %s1381_s23 = scalar_lea.vmem %s1481_s0, %s1004_s30  ;;  %s1099_s22 = smul.u32 5056, %s1364_s9 }
  0x1d   : > { %s1009_s6 = sshll.u32 %s1364_s9, 2  ;;  %s1395_s10 = scalar_lea.vmem [#allocation3], %s1002_s8 }
  0x1e   : > { %s323_s19 = sadd.s32 %s1099_s22, %s1007_s7  ;;  %s1388_s12 = scalar_lea.vmem %s1485_s4, %s1009_s6 }
  0x1f   : > { %s1008_s11 = sshll.u32 %s323_s19, 2  ;;  %335 = sbr.rel (%p1010_p11) target bundleno = 41 (0x29), region = 44 }
  0x20   : > { %s1393_s15 = scalar_lea.vmem %s1484_s3, %s1008_s11 }
  0x24   : > { %v1273_v0 = vmov 0.0  }
  0x25   : > { %336 = vst [vmem:[#allocation2 + $0x30] sm:$0xff] %v1273_v0  ;;  %337 = vst [vmem:[#allocation2] sm:$0xff] %v1273_v0 }
  0x26   : > { %338 = vst [vmem:[#allocation2 + $0x18] sm:$0xff] %v1273_v0  ;;  %339 = vst [vmem:[#allocation2 + $0x10] sm:$0xff] %v1273_v0 }
  0x27   : > { %340 = vst [vmem:[#allocation2 + $0x8] sm:$0xff] %v1273_v0  ;;  %341 = vst [vmem:[#allocation2 + $0x20] sm:$0xff] %v1273_v0 }
  0x28   : > { %342 = vst [vmem:[#allocation2 + $0x28] sm:$0xff] %v1273_v0  ;;  %343 = vst [vmem:[#allocation2 + $0x38] sm:$0xff] %v1273_v0 }
  0x29 PF: > { %v1160_v1 = vld [vmem:[%s1372_s16 + $0x38] sm:$0xff]   ;;  %v1274_v2 = vmov 0.0   ;;  %v1161_v3 = vld [vmem:[%s1372_s16 + $0x30] sm:$0xff]   ;;  %vm1275_vm0 = vmmov 0   ;;  %v1162_v4 = vld [vmem:[%s1372_s16 + $0x28] sm:$0xff]   ;;  %v1276_v43 = vmov 0  }
  0x2a   : > { %1078 = vmatprep.subr.bf16.mxu0 %v1274_v2  ;;  %1094 = vmatprep.mubr.msk.bf16.mxu0 %vm1275_vm0, %v1274_v2  ;;  %v1169_v5 = vld [vmem:[%s1393_s15 + $0xe4] ss:$16 sps:$4 sm:$0xff]   ;;  %v1174_v7 = vld [vmem:[%s1393_s15 + $0xe0] ss:$16 sps:$4 sm:$0xff]   ;;  %v1164_v9 = vld [vmem:[%s1372_s16 + $0x18] sm:$0xff]   ;;  %p1053_p12 = scmp.ne.s32.totalorder %s1255_s20, 78 }
  0x2b   : > { %1079 = vmatpush3.bf16.msra.mxu0 %v1160_v1  ;;  %v1163_v6 = vld [vmem:[%s1372_s16 + $0x20] sm:$0xff]   ;;  %667 = vmatprep.subr.bf16.mxu1 %v1169_v5  ;;  %v1165_v12 = vld [vmem:[%s1372_s16 + $0x10] sm:$0xff]   ;;  %v1166_v15 = vld [vmem:[%s1372_s16 + $0x8] sm:$0xff]  }
  0x2c   : > { %1080 = vmatprep.subr.bf16.mxu0 %v1274_v2  ;;  %v1175_v8 = vld [vmem:[%s1393_s15 + $0xc4] ss:$16 sps:$4 sm:$0xff]   ;;  %668 = vmatpush1.bf16.msra.mxu1 %v1174_v7  ;;  %v1180_v10 = vld [vmem:[%s1393_s15 + $0xc0] ss:$16 sps:$4 sm:$0xff]   ;;  %v1173_v21 = vld [vmem:[%s1393_s15 + $0xec] ss:$16 sps:$4 sm:$0xff]  }
  0x2d   : > { %669 = vmatprep.subr.bf16.mxu1 %v1175_v8  ;;  %v1181_v11 = vld [vmem:[%s1393_s15 + $0xa4] ss:$16 sps:$4 sm:$0xff]   ;;  %v1186_v13 = vld [vmem:[%s1393_s15 + $0xa0] ss:$16 sps:$4 sm:$0xff]   ;;  %v1171_v23 = vld [vmem:[%s1393_s15 + $0xe8] ss:$16 sps:$4 sm:$0xff]   ;;  %699 = vmatprep.mubr.bf16.mxu1 %v1276_v43 }
  0x2e   : > { %v1187_v14 = vld [vmem:[%s1393_s15 + $0x84] ss:$16 sps:$4 sm:$0xff]   ;;  %v1192_v16 = vld [vmem:[%s1393_s15 + $0x80] ss:$16 sps:$4 sm:$0xff]   ;;  %v1179_v24 = vld [vmem:[%s1393_s15 + $0xcc] ss:$16 sps:$4 sm:$0xff]  }
  0x2f   : > { %1081 = vmatpush3.bf16.msra.mxu0 %v1161_v3  ;;  %v1193_v17 = vld [vmem:[%s1393_s15 + $0x64] ss:$16 sps:$4 sm:$0xff]   ;;  %v1198_v19 = vld [vmem:[%s1393_s15 + $0x60] ss:$16 sps:$4 sm:$0xff]   ;;  %v1177_v25 = vld [vmem:[%s1393_s15 + $0xc8] ss:$16 sps:$4 sm:$0xff]  }
  0x30   : > { %1082 = vmatprep.subr.bf16.mxu0 %v1274_v2  ;;  %670 = vmatpush1.bf16.msra.mxu1 %v1180_v10  ;;  %v1167_v18 = vld [vmem:[%s1372_s16] sm:$0xff]   ;;  %v1185_v26 = vld [vmem:[%s1393_s15 + $0xac] ss:$16 sps:$4 sm:$0xff]   ;;  %v1183_v27 = vld [vmem:[%s1393_s15 + $0xa8] ss:$16 sps:$4 sm:$0xff]  }
  0x31   : > { %671 = vmatprep.subr.bf16.mxu1 %v1181_v11  ;;  %v1199_v20 = vld [vmem:[%s1393_s15 + $0x44] ss:$16 sps:$4 sm:$0xff]   ;;  %v1191_v28 = vld [vmem:[%s1393_s15 + $0x8c] ss:$16 sps:$4 sm:$0xff]   ;;  %v1189_v29 = vld [vmem:[%s1393_s15 + $0x88] ss:$16 sps:$4 sm:$0xff]  }
  0x32   : > { %v1168_v22 = vld [vmem:[%s1381_s23] sm:$0xff]   ;;  %v1197_v30 = vld [vmem:[%s1393_s15 + $0x6c] ss:$16 sps:$4 sm:$0xff]   ;;  %v1195_v31 = vld [vmem:[%s1393_s15 + $0x68] ss:$16 sps:$4 sm:$0xff]  }
  0x33   : > { %1083 = vmatpush3.bf16.msra.mxu0 %v1162_v4  ;;  %v1203_v32 = vld [vmem:[%s1393_s15 + $0x4c] ss:$16 sps:$4 sm:$0xff]   ;;  %v1201_v33 = vld [vmem:[%s1393_s15 + $0x48] ss:$16 sps:$4 sm:$0xff]   ;;  %v1204_v34 = vld [vmem:[%s1393_s15 + $0x40] ss:$16 sps:$4 sm:$0xff]  }
  0x34   : > { %1084 = vmatprep.subr.bf16.mxu0 %v1274_v2  ;;  %672 = vmatpush1.bf16.msra.mxu1 %v1186_v13  ;;  %v1205_v35 = vld [vmem:[%s1393_s15 + $0x24] ss:$16 sps:$4 sm:$0xff]   ;;  %v1209_v36 = vld [vmem:[%s1393_s15 + $0x2c] ss:$16 sps:$4 sm:$0xff]   ;;  %v1207_v37 = vld [vmem:[%s1393_s15 + $0x28] ss:$16 sps:$4 sm:$0xff]  }
  0x35   : > { %673 = vmatprep.subr.bf16.mxu1 %v1187_v14  ;;  %v1210_v38 = vld [vmem:[%s1393_s15 + $0x20] ss:$16 sps:$4 sm:$0xff]   ;;  %v1211_v39 = vld [vmem:[%s1393_s15 + $0x4] ss:$16 sps:$4 sm:$0xff]   ;;  %v1215_v40 = vld [vmem:[%s1393_s15 + $0xc] ss:$16 sps:$4 sm:$0xff]  }
  0x36   : > { %v1213_v41 = vld [vmem:[%s1393_s15 + $0x8] ss:$16 sps:$4 sm:$0xff]   ;;  %v1216_v42 = vld [vmem:[%s1393_s15] ss:$16 sps:$4 sm:$0xff]  }
  0x37   : > { %1085 = vmatpush3.bf16.msra.mxu0 %v1163_v6  ;;  %v1011_v44 = vld [vmem:[%s316_s29] ss:$0 sm:$0xff]  ;;  %v467_v54 = vld [vmem:[#allocation2 + $0x30] sm:$0xff]  ;;  %v469_v55 = vld [vmem:[#allocation2 + $0x18] sm:$0xff] }
  0x38   : > { %1086 = vmatprep.subr.bf16.mxu0 %v1274_v2  ;;  %674 = vmatpush1.bf16.msra.mxu1 %v1192_v16  ;;  %v468_v58 = vld [vmem:[#allocation2] sm:$0xff]  ;;  %v470_v59 = vld [vmem:[#allocation2 + $0x10] sm:$0xff]  ;;  %v471_v0 = vld [vmem:[#allocation2 + $0x8] sm:$0xff] }
  0x39   : > { %675 = vmatprep.subr.bf16.mxu1 %v1193_v17  ;;  %v473_v1 = vld [vmem:[#allocation2 + $0x28] sm:$0xff]  ;;  %v472_v6 = vld [vmem:[#allocation2 + $0x20] sm:$0xff]  ;;  %v474_v7 = vld [vmem:[#allocation2 + $0x38] sm:$0xff] }
  0x3b   : > { %1087 = vmatpush3.bf16.msra.mxu0 %v1164_v9 }
  0x3c   : > { %1088 = vmatprep.subr.bf16.mxu0 %v1274_v2  ;;  %676 = vmatpush1.bf16.msra.mxu1 %v1198_v19 }
  0x3d   : > { %677 = vmatprep.subr.bf16.mxu1 %v1199_v20 }
  0x3f   : > { %1089 = vmatpush3.bf16.msra.mxu0 %v1165_v12 }
  0x40   : > { %1090 = vmatprep.subr.bf16.mxu0 %v1274_v2  ;;  %678 = vmatpush1.bf16.msra.mxu1 %v1204_v34 }
  0x41   : > { %679 = vmatprep.subr.bf16.mxu1 %v1205_v35 }
  0x43   : > { %1091 = vmatpush3.bf16.msra.mxu0 %v1166_v15 }
  0x44   : > { %1092 = vmatprep.subr.bf16.mxu0 %v1274_v2  ;;  %680 = vmatpush1.bf16.msra.mxu1 %v1210_v38 }
  0x45   : > { %681 = vmatprep.subr.bf16.mxu1 %v1211_v39 }
  0x47   : > { %1093 = vmatpush3.bf16.msra.mxu0 %v1167_v18 }
  0x48   : > { %710 = vmatprep.subr.bf16.mxu0 %v1173_v21  ;;  %682 = vmatpush1.bf16.msra.mxu1 %v1216_v42 }
  0x4a   : > { %1095 = vmatmul.mubr.bf16.vlgmr.msra.gmra.mxu0 %v1168_v22 }
  0x4b   : > { %711 = vmatpush1.bf16.msra.mxu0 %v1171_v23  ;;  %742 = vmatprep.mubr.bf16.mxu0 %v1276_v43 }
  0x4c   : > { %712 = vmatprep.subr.bf16.mxu0 %v1179_v24 }
  0x4f   : > { %713 = vmatpush1.bf16.msra.mxu0 %v1177_v25 }
  0x50   : > { %714 = vmatprep.subr.bf16.mxu0 %v1185_v26 }
  0x53   : > { %715 = vmatpush1.bf16.msra.mxu0 %v1183_v27 }
  0x54   : > { %716 = vmatprep.subr.bf16.mxu0 %v1191_v28 }
  0x57   : > { %717 = vmatpush1.bf16.msra.mxu0 %v1189_v29 }
  0x58   : > { %718 = vmatprep.subr.bf16.mxu0 %v1197_v30 }
  0x5b   : > { %719 = vmatpush1.bf16.msra.mxu0 %v1195_v31 }
  0x5c   : > { %720 = vmatprep.subr.bf16.mxu0 %v1203_v32 }
  0x5f   : > { %721 = vmatpush1.bf16.msra.mxu0 %v1201_v33 }
  0x60   : > { %722 = vmatprep.subr.bf16.mxu0 %v1209_v36 }
  0x63   : > { %723 = vmatpush1.bf16.msra.mxu0 %v1207_v37 }
  0x64   : > { %724 = vmatprep.subr.bf16.mxu0 %v1215_v40 }
  0x67   : > { %725 = vmatpush1.bf16.msra.mxu0 %v1213_v41 }
 0x10a   : > { %v457_v45 = vpop.f32.mrf.mxu0 }
 0x10b   : > { %v458_v47 = vadd.f32 %v1011_v44, %v457_v45 }
 0x10c   : > { %v1096_v46 = vpop.f32.mrf.mxu0 }
 0x10d   : > { %v464_v51 = vmax.f32 %v458_v47, 0.0 }
 0x10e   : > { %v460_v48 = vpop.f32.mrf.mxu0 }
 0x10f   : > { %v461_v49 = vadd.f32 %v1011_v44, %v460_v48 }
 0x110   : > { %v1097_v50 = vpop.f32.mrf.mxu0 }
 0x111   : > { %v465_v52 = vmax.f32 %v461_v49, 0.0 }
 0x113   : > { %v466_v53 = vpack.c.bf16 %v465_v52, %v464_v51 }
 0x115   : > { %700 = vmatmul.mubr.bf16.vlgmr.msra.gmra.mxu1 %v466_v53  ;;  %743 = vmatmul.mubr.bf16.vlgmr.msra.gmra.mxu0 %v466_v53 }
 0x1d5   : > { %v701_v56 = vpop.f32.mrf.mxu1  ;;  %v744_v57 = vpop.f32.mrf.mxu0 }
 0x1d6   : > { %v753_v60 = vadd.f32 %v701_v56, %v467_v54  ;;  %v755_v61 = vadd.f32 %v744_v57, %v469_v55 }
 0x1d7   : > { %v703_v62 = vpop.f32.mrf.mxu1  ;;  %v746_v63 = vpop.f32.mrf.mxu0 }
 0x1d8   : > { %761 = vst [vmem:[#allocation2 + $0x30] sm:$0xff] %v753_v60  ;;  %763 = vst [vmem:[#allocation2 + $0x18] sm:$0xff] %v755_v61  ;;  %v754_v2 = vadd.f32 %v703_v62, %v468_v58  ;;  %v756_v3 = vadd.f32 %v746_v63, %v470_v59 }
 0x1d9   : > { %v705_v4 = vpop.f32.mrf.mxu1  ;;  %v748_v5 = vpop.f32.mrf.mxu0 }
 0x1da   : > { %762 = vst [vmem:[#allocation2] sm:$0xff] %v754_v2  ;;  %764 = vst [vmem:[#allocation2 + $0x10] sm:$0xff] %v756_v3  ;;  %v757_v8 = vadd.f32 %v705_v4, %v471_v0  ;;  %v759_v9 = vadd.f32 %v748_v5, %v473_v1  ;;  %772 = sbr.rel (%p1053_p12) target bundleno = 493 (0x1ed), region = 48 }
 0x1db   : > { %v707_v10 = vpop.f32.mrf.mxu1  ;;  %v750_v11 = vpop.f32.mrf.mxu0 }
 0x1dc   : > { %765 = vst [vmem:[#allocation2 + $0x8] sm:$0xff] %v757_v8  ;;  %767 = vst [vmem:[#allocation2 + $0x28] sm:$0xff] %v759_v9  ;;  %v758_v12 = vadd.f32 %v707_v10, %v472_v6  ;;  %v760_v13 = vadd.f32 %v750_v11, %v474_v7 }
 0x1de   : > { %766 = vst [vmem:[#allocation2 + $0x20] sm:$0xff] %v758_v12  ;;  %768 = vst [vmem:[#allocation2 + $0x38] sm:$0xff] %v760_v13 }
 0x1df   : > { %v783_v14 = vlaneseq  ;;  %v781_v16 = vld [vmem:[%s1388_s12] sm:$0xf]  ;;  %v773_v17 = vld [vmem:[#allocation2 + $0x30] sm:$0xff]  ;;  %v775_v23 = vld [vmem:[#allocation2 + $0x18] sm:$0xff] }
 0x1e1   : > { %v784_v15 = vshrl.u32 %v783_v14, 7  ;;  %v774_v18 = vld [vmem:[#allocation2] sm:$0xff]  ;;  %v776_v24 = vld [vmem:[#allocation2 + $0x10] sm:$0xff] }
 0x1e3   : > { %v785_v19 = vsub.s32 0, %v784_v15  ;;  %v789_v20 = vsub.s32 1, %v784_v15  ;;  %v793_v21 = vsub.s32 2, %v784_v15  ;;  %v797_v22 = vsub.s32 3, %v784_v15  ;;  %v777_v25 = vld [vmem:[#allocation2 + $0x8] sm:$0xff] }
 0x1e4   : > { %v779_v31 = vld [vmem:[#allocation2 + $0x28] sm:$0xff] }
 0x1e5   : > { %v786_v26 = vrot.slane %v781_v16, %v785_v19  ;;  %v790_v27 = vrot.slane %v781_v16, %v789_v20  ;;  %v794_v28 = vrot.slane %v781_v16, %v793_v21  ;;  %v798_v29 = vrot.slane %v781_v16, %v797_v22  ;;  %v778_v30 = vld [vmem:[#allocation2 + $0x20] sm:$0xff]  ;;  %v780_v32 = vld [vmem:[#allocation2 + $0x38] sm:$0xff] }
 0x1e7   : > { %v803_v33 = vadd.f32 %v786_v26, %v773_v17  ;;  %v804_v34 = vadd.f32 %v790_v27, %v774_v18  ;;  %v805_v35 = vadd.f32 %v794_v28, %v775_v23  ;;  %v806_v36 = vadd.f32 %v798_v29, %v776_v24 }
 0x1e8   : > { %v807_v37 = vadd.f32 %v786_v26, %v777_v25  ;;  %v808_v38 = vadd.f32 %v790_v27, %v778_v30  ;;  %v809_v39 = vadd.f32 %v794_v28, %v779_v31  ;;  %v810_v40 = vadd.f32 %v798_v29, %v780_v32 }
 0x1e9   : > { %v1064_v41 = vpack.c.bf16 %v804_v34, %v803_v33  ;;  %v1065_v42 = vpack.c.bf16 %v806_v36, %v805_v35 }
 0x1ea   : > { %v1066_v43 = vpack.c.bf16 %v808_v38, %v807_v37  ;;  %v1067_v44 = vpack.c.bf16 %v810_v40, %v809_v39 }
 0x1eb   : > { %835 = vst [vmem:[%s1395_s10] sm:$0xff] %v1064_v41  ;;  %836 = vst [vmem:[%s1395_s10 + $0x8] sm:$0xff] %v1065_v42 }
 0x1ec   : > { %837 = vst [vmem:[%s1395_s10 + $0x10] sm:$0xff] %v1066_v43  ;;  %838 = vst [vmem:[%s1395_s10 + $0x18] sm:$0xff] %v1067_v44 }
 0x1ed PF: > { %845 = sbr.rel (!%p1349_p6) target bundleno = 503 (0x1f7), region = 52  ;;  %s1068_s20 = sshll.u32 (%p1349_p6), %s1259_s21, 4 }
 0x1ee   : > { %s1501_s24 = sld [smem:[#allocation11_spill]] (%p1349_p6) }
 0x1f2   : > { %v861_v45 = vld [vmem:[%s1395_s10] sm:$0xff]  ;;  %v863_v46 = vld [vmem:[%s1395_s10 + $0x8] sm:$0xff] }
 0x1f3   : > { %v865_v47 = vld [vmem:[%s1395_s10 + $0x10] sm:$0xff]  ;;  %v867_v48 = vld [vmem:[%s1395_s10 + $0x18] sm:$0xff] }
 0x1f4   : > { %s848_s25 = scalar_lea.vmem %s1501_s24, %s1068_s20 }
 0x1f5   : > { %862 = vst [vmem:[%s848_s25] sm:$0xff] %v861_v45  ;;  %864 = vst [vmem:[%s848_s25 + $0x8] sm:$0xff] %v863_v46 }
 0x1f6   : > { %866 = vst [vmem:[%s848_s25 + $0x20] sm:$0xff] %v865_v47  ;;  %868 = vst [vmem:[%s848_s25 + $0x28] sm:$0xff] %v867_v48 }
 0x1f7 PF: > { %s1502_s26 = sld [smem:[#allocation7_spill]] }
 0x1f8   : > { %s1503_s18 = sld [smem:[#allocation4_spill]] }
 0x1f9   : > { %s1504_s19 = sld [smem:[#allocation10_spill]] }
 0x1fa   : > { %s1505_s20 = sld [smem:[#allocation5_spill]] }
 0x1fb   : > { %s1506_s21 = sld [smem:[#allocation6_spill]] }
 0x1fc   : > { %s1507_s22 = sld [smem:[#allocation8_spill]] }
 0x1fd   : > { %s15_s24 = sadd.s32 1, %s1502_s26   ;;  %s1508_s23 = sld [smem:[#allocation9_spill]] }
 0x1fe   : > { %p12_p13 = scmp.ge.s32.totalorder %s15_s24, 160  }
 0x200   :  { %14 = sbr.rel (!%p12_p13) target bundleno = 6 (0x6), region = 113 }

// kernel: full_ppi_forward.7
= control target key start
LH: loop header
LB: loop body
LE: loop exit
PB: predicated region body
PF: predicated region fallthrough
CT: control target
= control target key end

     0   :  { %s3920_s18 = smov 0   ;;  %s3922_s19 = smov 0   ;;  %s4283_s0 = inlined_call_operand.vmem [shape: bf16[2,6,16,3200], index: 0, kind: input, shape index: {}]   ;;  %s4284_s1 = inlined_call_operand.vmem [shape: bf16[2,3200,128], index: 1, kind: input, shape index: {}]   ;;  %s4285_s2 = inlined_call_operand.vmem [shape: f32[2,1,128], index: 2, kind: input, shape index: {}]   ;;  %s4286_s3 = inlined_call_operand.vmem [shape: bf16[2,6,128,128], index: 3, kind: input, shape index: {}]   ;;  %s4287_s4 = inlined_call_operand.vmem [shape: f32[2,1,128], index: 4, kind: input, shape index: {}]   ;;  %s4288_s5 = inlined_call_operand.vmem [shape: bf16[16,256], index: 5, kind: output, shape index: {}]  }
   0x1   :  { %s3924_s20 = smov 0   ;;  %s3926_s21 = smov 0  }
   0x2   :  { %s3928_s22 = smov 0   ;;  %s3930_s23 = smov 0  }
   0x3   :  { %s3932_s24 = smov 0  }
   0x4 LB: > { %4294 = sst [smem:[#allocation4_spill]] %s3865_s19  ;;  %s24_s25 = sadd.s32 1, %s3877_s22  ;;  %s3885_s24 = sphi %s3932_s24, %s15_s24   ;;  %s3881_s23 = sphi %s3930_s23, %s4309_s23   ;;  %s3877_s22 = sphi %s3928_s22, %s4308_s22   ;;  %s3873_s21 = sphi %s3926_s21, %s4307_s21   ;;  %s3869_s20 = sphi %s3924_s20, %s4306_s20   ;;  %s3865_s19 = sphi %s3922_s19, %s4305_s19   ;;  %s3861_s18 = sphi %s3920_s18, %s4304_s18  }
   0x5   : > { %4295 = sst [smem:[#allocation5_spill]] %s3877_s22  ;;  %p25_p0 = scmp.ge.s32.totalorder %s24_s25, 6 }
   0x6   : > { %4296 = sst [smem:[#allocation6_spill]] %s3881_s23  ;;  %s27_s26 = sadd.s32 1, %s3881_s23 }
   0x7   : > { %4297 = sst [smem:[#allocation7_spill]] %s3885_s24  ;;  %s2941_s27 = sadd.s32 4294967295, %s3885_s24  }
   0x8   : > { %p178_p1 = scmp.ne.s32.totalorder %s3865_s19, %s3861_s18  ;;  %s4311_s25 = smov (%p25_p0, %s24_s25), 0 }
   0x9   : > { %4298 = sst [smem:[#allocation8_spill]] %s4311_s25  ;;  %s4313_s26 = smov (!%p25_p0, %s27_s26), %s3881_s23 }
   0xa   : > { %p179_p2 = scmp.eq.s32.totalorder %s2941_s27, 11  ;;  %p2945_p3 = scmp.ge.s32.totalorder %s3885_s24, 1 }
   0xb   : > { %p29_p4 = scmp.ge.s32.totalorder %s4313_s26, 2  ;;  %p247_p5 = scmp.lt.s32.totalorder %s3885_s24, 13 }
   0xc   : > { %p3962_p6 = por %p179_p2, %p178_p1  ;;  %s168_s30 = sadd.s32 1, %s3865_s19 }
   0xd   : > { %s4315_s26 = smov (%p29_p4, %s4313_s26), 0  ;;  %p248_p7 = pnand %p2945_p3, %p247_p5 }
   0xe   : > { %4300 = sst [smem:[#allocation9_spill]] %s4315_s26  ;;  %s165_s29 = ssub.s32 %s3881_s23, %s4315_s26 }
   0xf   : > { %p166_p8 = scmp.eq.s32.totalorder %s165_s29, 0  ;;  %251 = sbr.rel (%p248_p7) target bundleno = 684 (0x2ac), region = 40 }
  0x10   : > { %s295_s7 = sand.u32 (!%p248_p7), 1, %s3861_s18   ;;  %p298_p9 = scmp.lt.s32.totalorder (!%p248_p7), %s3873_s21, 1 }
  0x11   : > { %s3972_s6 = scalar_select %p166_p8, %s3865_s19, %s168_s30  }
  0x12   : > { %s2946_s8 = sshll.u32 (!%p248_p7), %s295_s7, 3  ;;  %p300_p10 = scmp.lt.s32.totalorder (!%p248_p7), %s3869_s20, 5 }
  0x13   : > { %4301 = sst [smem:[#allocation10_spill]] %s3972_s6  ;;  %p2951_p11 = scmp.ne.s32.totalorder (!%p248_p7), %s3869_s20, 0 }
  0x14   : > { %s3977_s9 = scalar_select %p298_p9, %s3873_s21, 1 }
  0x15   : > { %s301_s10 = scalar_select %p300_p10, %s3869_s20, 5 }
  0x16   : > { %s3524_s11 = smul.u32 300, %s3977_s9  ;;  %s326_s29 = scalar_lea.vmem %s4287_s4, %s3977_s9 }
  0x17   : > { %s3523_s15 = smul.u32 50, %s301_s10  ;;  %s2949_s16 = sshll.u32 %s301_s10, 4 }
  0x18   : > { %s3525_s17 = smul.u32 1600, %s3977_s9 }
  0x19   : > { %s304_s30 = sadd.s32 %s3524_s11, %s3523_s15  ;;  %s3526_s7 = smul.u32 96, %s3977_s9 }
  0x1a   : > { %s2947_s26 = sshll.u32 %s304_s30, 2  ;;  %s3994_s22 = scalar_lea.vmem %s4284_s1, %s3525_s17 }
  0x1b   : > { %s3999_s12 = scalar_lea.vmem %s4283_s0, %s2947_s26  ;;  %s321_s13 = sadd.s32 %s3526_s7, %s2949_s16 }
  0x1c   : > { %s2950_s10 = sshll.u32 %s321_s13, 2  ;;  %s4006_s11 = scalar_lea.vmem [#allocation3], %s2946_s8 }
  0x1d   : > { %s4004_s18 = scalar_lea.vmem %s4286_s3, %s2950_s10  ;;  %331 = sbr.rel (%p2951_p11) target bundleno = 36 (0x24), region = 44 }
  0x22   : > { %v3887_v0 = vmov 0.0  }
  0x23   : > { %332 = vst [vmem:[#allocation2] sm:$0xff] %v3887_v0  ;;  %333 = vst [vmem:[#allocation2 + $0x8] sm:$0xff] %v3887_v0 }
  0x24 PF: > { %v3586_v1 = vld [vmem:[%s3994_s22 + $0x78] sm:$0xff]   ;;  %v3590_v5 = vld [vmem:[%s3994_s22 + $0x70] sm:$0xff]   ;;  %v3594_v9 = vld [vmem:[%s3994_s22 + $0x68] sm:$0xff]   ;;  %vm3889_vm0 = vmmov 0   ;;  %s4302_s23 = scalar_lea.vmem %s4285_s2, %s3977_s9  ;;  %p3186_p12 = scmp.ne.s32.totalorder %s3869_s20, 5 }
  0x25   : > { %v3587_v2 = vld [vmem:[%s3994_s22 + $0x38] sm:$0xff]   ;;  %3201 = vmatprep.subr.bf16.mxu0 %v3586_v1  ;;  %v3591_v6 = vld [vmem:[%s3994_s22 + $0x30] sm:$0xff]   ;;  %v3595_v10 = vld [vmem:[%s3994_s22 + $0x28] sm:$0xff]  }
  0x26   : > { %v3588_v3 = vld [vmem:[%s3994_s22 + $0xf8] sm:$0xff]   ;;  %3202 = vmatpush3.bf16.msra.mxu0 %v3587_v2  ;;  %v3592_v7 = vld [vmem:[%s3994_s22 + $0xf0] sm:$0xff]   ;;  %v3596_v11 = vld [vmem:[%s3994_s22 + $0xe8] sm:$0xff]  }
  0x27   : > { %v3589_v4 = vld [vmem:[%s3994_s22 + $0xb8] sm:$0xff]   ;;  %3223 = vmatprep.subr.bf16.mxu1 %v3588_v3  ;;  %3203 = vmatprep.subr.bf16.mxu0 %v3590_v5  ;;  %v3593_v8 = vld [vmem:[%s3994_s22 + $0xb0] sm:$0xff]   ;;  %v3597_v12 = vld [vmem:[%s3994_s22 + $0xa8] sm:$0xff]  }
  0x28   : > { %3224 = vmatpush3.bf16.msra.mxu1 %v3589_v4  ;;  %v3598_v13 = vld [vmem:[%s3994_s22 + $0x60] sm:$0xff]   ;;  %v3602_v17 = vld [vmem:[%s3994_s22 + $0x58] sm:$0xff]   ;;  %v3606_v21 = vld [vmem:[%s3994_s22 + $0x50] sm:$0xff]  }
  0x29   : > { %3225 = vmatprep.subr.bf16.mxu1 %v3592_v7  ;;  %v3599_v14 = vld [vmem:[%s3994_s22 + $0x20] sm:$0xff]   ;;  %v3603_v18 = vld [vmem:[%s3994_s22 + $0x18] sm:$0xff]   ;;  %v3607_v22 = vld [vmem:[%s3994_s22 + $0x10] sm:$0xff]  }
  0x2a   : > { %3204 = vmatpush3.bf16.msra.mxu0 %v3591_v6  ;;  %v3600_v15 = vld [vmem:[%s3994_s22 + $0xe0] sm:$0xff]   ;;  %v3604_v19 = vld [vmem:[%s3994_s22 + $0xd8] sm:$0xff]   ;;  %v3608_v23 = vld [vmem:[%s3994_s22 + $0xd0] sm:$0xff]  }
  0x2b   : > { %3205 = vmatprep.subr.bf16.mxu0 %v3594_v9  ;;  %v3601_v16 = vld [vmem:[%s3994_s22 + $0xa0] sm:$0xff]   ;;  %v3605_v20 = vld [vmem:[%s3994_s22 + $0x98] sm:$0xff]   ;;  %v3609_v24 = vld [vmem:[%s3994_s22 + $0x90] sm:$0xff]  }
  0x2c   : > { %3226 = vmatpush3.bf16.msra.mxu1 %v3593_v8  ;;  %v3610_v25 = vld [vmem:[%s3994_s22 + $0x48] sm:$0xff]   ;;  %v3614_v29 = vld [vmem:[%s3994_s22 + $0x40] sm:$0xff]   ;;  %v3621_v35 = vld [vmem:[%s3994_s22 + $0x178] sm:$0xff]  }
  0x2d   : > { %3227 = vmatprep.subr.bf16.mxu1 %v3596_v11  ;;  %v3611_v26 = vld [vmem:[%s3994_s22 + $0x8] sm:$0xff]   ;;  %v3615_v30 = vld [vmem:[%s3994_s22] sm:$0xff]   ;;  %v3625_v38 = vld [vmem:[%s3994_s22 + $0x138] sm:$0xff]  }
  0x2e   : > { %3206 = vmatpush3.bf16.msra.mxu0 %v3595_v10  ;;  %v3612_v27 = vld [vmem:[%s3994_s22 + $0xc8] sm:$0xff]   ;;  %v3616_v31 = vld [vmem:[%s3994_s22 + $0xc0] sm:$0xff]   ;;  %v3626_v39 = vld [vmem:[%s3994_s22 + $0x1f8] sm:$0xff]  }
  0x2f   : > { %3207 = vmatprep.subr.bf16.mxu0 %v3598_v13  ;;  %v3613_v28 = vld [vmem:[%s3994_s22 + $0x88] sm:$0xff]   ;;  %v3617_v32 = vld [vmem:[%s3999_s12] ss:$100 sps:$4 sm:$0xff]   ;;  %v3627_v40 = vld [vmem:[%s3994_s22 + $0x1b8] sm:$0xff]  }
  0x30   : > { %3228 = vmatpush3.bf16.msra.mxu1 %v3597_v12  ;;  %v3619_v33 = vld [vmem:[%s3999_s12 + $0x4] ss:$100 sps:$4 sm:$0xff]   ;;  %v3624_v37 = vld [vmem:[%s3999_s12 + $0xc] ss:$100 sps:$4 sm:$0xff]   ;;  %v3640_v53 = vld [vmem:[%s3994_s22 + $0x158] sm:$0xff]  }
  0x31   : > { %3229 = vmatprep.subr.bf16.mxu1 %v3600_v15  ;;  %v3620_v34 = vld [vmem:[%s3994_s22 + $0x80] sm:$0xff]   ;;  %2125 = vmatprep.mubr.bf16.mxu0 %v3619_v33  ;;  %v3622_v36 = vld [vmem:[%s3999_s12 + $0x8] ss:$100 sps:$4 sm:$0xff]   ;;  %v3628_v41 = vld [vmem:[%s3994_s22 + $0x170] sm:$0xff]  }
  0x32   : > { %3208 = vmatpush3.bf16.msra.mxu0 %v3599_v14  ;;  %2166 = vmatprep.mubr.bf16.mxu1 %v3624_v37  ;;  %v3629_v42 = vld [vmem:[%s3994_s22 + $0x130] sm:$0xff]   ;;  %v3632_v45 = vld [vmem:[%s3994_s22 + $0x168] sm:$0xff]   ;;  %v3636_v49 = vld [vmem:[%s3994_s22 + $0x160] sm:$0xff]  }
  0x33   : > { %3209 = vmatprep.subr.bf16.mxu0 %v3602_v17  ;;  %v3630_v43 = vld [vmem:[%s3994_s22 + $0x1f0] sm:$0xff]   ;;  %v3633_v46 = vld [vmem:[%s3994_s22 + $0x128] sm:$0xff]   ;;  %v3637_v50 = vld [vmem:[%s3994_s22 + $0x120] sm:$0xff]  }
  0x34   : > { %3230 = vmatpush3.bf16.msra.mxu1 %v3601_v16  ;;  %v3631_v44 = vld [vmem:[%s3994_s22 + $0x1b0] sm:$0xff]   ;;  %v3634_v47 = vld [vmem:[%s3994_s22 + $0x1e8] sm:$0xff]   ;;  %v3638_v51 = vld [vmem:[%s3994_s22 + $0x1e0] sm:$0xff]  }
  0x35   : > { %3231 = vmatprep.subr.bf16.mxu1 %v3604_v19  ;;  %v3635_v48 = vld [vmem:[%s3994_s22 + $0x1a8] sm:$0xff]   ;;  %v3639_v52 = vld [vmem:[%s3994_s22 + $0x1a0] sm:$0xff]   ;;  %v3641_v54 = vld [vmem:[%s3994_s22 + $0x118] sm:$0xff]  }
  0x36   : > { %3210 = vmatpush3.bf16.msra.mxu0 %v3603_v18  ;;  %v3642_v55 = vld [vmem:[%s3994_s22 + $0x1d8] sm:$0xff]   ;;  %v3644_v57 = vld [vmem:[%s3994_s22 + $0x150] sm:$0xff]   ;;  %v3648_v61 = vld [vmem:[%s3994_s22 + $0x148] sm:$0xff]  }
  0x37   : > { %3211 = vmatprep.subr.bf16.mxu0 %v3606_v21  ;;  %v3643_v56 = vld [vmem:[%s3994_s22 + $0x198] sm:$0xff]   ;;  %v3645_v58 = vld [vmem:[%s3994_s22 + $0x110] sm:$0xff]   ;;  %v3649_v62 = vld [vmem:[%s3994_s22 + $0x108] sm:$0xff]  }
  0x38   : > { %3232 = vmatpush3.bf16.msra.mxu1 %v3605_v20  ;;  %v3646_v59 = vld [vmem:[%s3994_s22 + $0x1d0] sm:$0xff]   ;;  %v3650_v63 = vld [vmem:[%s3994_s22 + $0x1c8] sm:$0xff]   ;;  %v3652_v1 = vld [vmem:[%s3994_s22 + $0x140] sm:$0xff]  }
  0x39   : > { %3233 = vmatprep.subr.bf16.mxu1 %v3608_v23  ;;  %v3647_v60 = vld [vmem:[%s3994_s22 + $0x190] sm:$0xff]   ;;  %v3651_v0 = vld [vmem:[%s3994_s22 + $0x188] sm:$0xff]   ;;  %v3653_v2 = vld [vmem:[%s3994_s22 + $0x100] sm:$0xff]  }
  0x3a   : > { %3212 = vmatpush3.bf16.msra.mxu0 %v3607_v22  ;;  %v3654_v3 = vld [vmem:[%s3994_s22 + $0x1c0] sm:$0xff]   ;;  %v3655_v4 = vld [vmem:[%s3999_s12 + $0x10] ss:$100 sps:$4 sm:$0xff]   ;;  %v3659_v7 = vld [vmem:[%s3994_s22 + $0x278] sm:$0xff]  }
  0x3b   : > { %3213 = vmatprep.subr.bf16.mxu0 %v3610_v25  ;;  %v3657_v5 = vld [vmem:[%s3999_s12 + $0x14] ss:$100 sps:$4 sm:$0xff]   ;;  %v3658_v6 = vld [vmem:[%s3994_s22 + $0x180] sm:$0xff]   ;;  %v3670_v17 = vld [vmem:[%s3994_s22 + $0x268] sm:$0xff]  }
  0x3c   : > { %3234 = vmatpush3.bf16.msra.mxu1 %v3609_v24  ;;  %v3660_v8 = vld [vmem:[%s3999_s12 + $0x18] ss:$100 sps:$4 sm:$0xff]   ;;  %v3666_v13 = vld [vmem:[%s3994_s22 + $0x270] sm:$0xff]   ;;  %v3671_v18 = vld [vmem:[%s3994_s22 + $0x228] sm:$0xff]  }
  0x3d   : > { %3235 = vmatprep.subr.bf16.mxu1 %v3612_v27  ;;  %v3662_v9 = vld [vmem:[%s3999_s12 + $0x1c] ss:$100 sps:$4 sm:$0xff]   ;;  %v3667_v14 = vld [vmem:[%s3994_s22 + $0x230] sm:$0xff]   ;;  %v3672_v19 = vld [vmem:[%s3994_s22 + $0x2e8] sm:$0xff]  }
  0x3e   : > { %3214 = vmatpush3.bf16.msra.mxu0 %v3611_v26  ;;  %v3663_v10 = vld [vmem:[%s3994_s22 + $0x238] sm:$0xff]   ;;  %v3668_v15 = vld [vmem:[%s3994_s22 + $0x2f0] sm:$0xff]   ;;  %v3673_v20 = vld [vmem:[%s3994_s22 + $0x2a8] sm:$0xff]  }
  0x3f   : > { %3215 = vmatprep.subr.bf16.mxu0 %v3614_v29  ;;  %v3664_v11 = vld [vmem:[%s3994_s22 + $0x2f8] sm:$0xff]   ;;  %v3669_v16 = vld [vmem:[%s3994_s22 + $0x2b0] sm:$0xff]   ;;  %v3674_v21 = vld [vmem:[%s3994_s22 + $0x260] sm:$0xff]  }
  0x40   : > { %3236 = vmatpush3.bf16.msra.mxu1 %v3613_v28  ;;  %v3665_v12 = vld [vmem:[%s3994_s22 + $0x2b8] sm:$0xff]   ;;  %v3675_v22 = vld [vmem:[%s3994_s22 + $0x220] sm:$0xff]   ;;  %v3682_v29 = vld [vmem:[%s3994_s22 + $0x250] sm:$0xff]  }
  0x41   : > { %3237 = vmatprep.subr.bf16.mxu1 %v3616_v31  ;;  %v3676_v23 = vld [vmem:[%s3994_s22 + $0x2e0] sm:$0xff]   ;;  %v3678_v25 = vld [vmem:[%s3994_s22 + $0x258] sm:$0xff]   ;;  %v3684_v31 = vld [vmem:[%s3994_s22 + $0x2d0] sm:$0xff]  }
  0x42   : > { %3216 = vmatpush3.bf16.msra.mxu0 %v3615_v30  ;;  %v3677_v24 = vld [vmem:[%s3994_s22 + $0x2a0] sm:$0xff]   ;;  %v3679_v26 = vld [vmem:[%s3994_s22 + $0x218] sm:$0xff]   ;;  %v3683_v30 = vld [vmem:[%s3994_s22 + $0x210] sm:$0xff]  }
  0x43   : > { %3245 = vmatprep.subr.bf16.mxu0 %v3621_v35  ;;  %v3680_v27 = vld [vmem:[%s3994_s22 + $0x2d8] sm:$0xff]   ;;  %v3686_v33 = vld [vmem:[%s3994_s22 + $0x248] sm:$0xff]   ;;  %v3690_v37 = vld [vmem:[%s3994_s22 + $0x240] sm:$0xff]  }
  0x44   : > { %3238 = vmatpush3.bf16.msra.mxu1 %v3620_v34  ;;  %v3681_v28 = vld [vmem:[%s3994_s22 + $0x298] sm:$0xff]   ;;  %v3687_v34 = vld [vmem:[%s3994_s22 + $0x208] sm:$0xff]  }
  0x45   : > { %2126 = vmatmul.mubr.bf16.vlgmr.msra.gmra.mxu0 %v3617_v32  ;;  %3267 = vmatprep.subr.bf16.mxu1 %v3626_v39  ;;  %v3685_v32 = vld [vmem:[%s3994_s22 + $0x290] sm:$0xff]   ;;  %v3688_v35 = vld [vmem:[%s3994_s22 + $0x2c8] sm:$0xff]   ;;  %v3692_v39 = vld [vmem:[%s3994_s22 + $0x2c0] sm:$0xff]  }
  0x46   : > { %3246 = vmatpush3.bf16.msra.mxu0 %v3625_v38  ;;  %2207 = vmatprep.mubr.bf16.mxu0 %v3657_v5  ;;  %v3691_v38 = vld [vmem:[%s3994_s22 + $0x200] sm:$0xff]   ;;  %v3724_v5 = vld [vmem:[%s3994_s22 + $0x348] sm:$0xff]  }
  0x47   : > { %2167 = vmatmul.mubr.bf16.vlgmr.msra.gmra.mxu1 %v3622_v36  ;;  %3247 = vmatprep.subr.bf16.mxu0 %v3628_v41  ;;  %v3689_v36 = vld [vmem:[%s3994_s22 + $0x288] sm:$0xff]  }
  0x48   : > { %3268 = vmatpush3.bf16.msra.mxu1 %v3627_v40  ;;  %2248 = vmatprep.mubr.bf16.mxu1 %v3662_v9  ;;  %v3693_v40 = vld [vmem:[%s3999_s12 + $0x20] ss:$100 sps:$4 sm:$0xff]  }
  0x49   : > { %3269 = vmatprep.subr.bf16.mxu1 %v3630_v43  ;;  %v3695_v41 = vld [vmem:[%s3999_s12 + $0x24] ss:$100 sps:$4 sm:$0xff]   ;;  %v3697_v43 = vld [vmem:[%s3994_s22 + $0x378] sm:$0xff]  }
  0x4a   : > { %3248 = vmatpush3.bf16.msra.mxu0 %v3629_v42  ;;  %v3696_v42 = vld [vmem:[%s3994_s22 + $0x280] sm:$0xff]  }
  0x4b   : > { %3249 = vmatprep.subr.bf16.mxu0 %v3632_v45  ;;  %v3700_v45 = vld [vmem:[%s3999_s12 + $0x2c] ss:$100 sps:$4 sm:$0xff]   ;;  %v3728_v9 = vld [vmem:[%s3994_s22 + $0x340] sm:$0xff]  }
  0x4c   : > { %3270 = vmatpush3.bf16.msra.mxu1 %v3631_v44  ;;  %v3698_v44 = vld [vmem:[%s3999_s12 + $0x28] ss:$100 sps:$4 sm:$0xff]  }
  0x4d   : > { %3271 = vmatprep.subr.bf16.mxu1 %v3634_v47  ;;  %v3702_v47 = vld [vmem:[%s3994_s22 + $0x3f8] sm:$0xff]  }
  0x4e   : > { %3250 = vmatpush3.bf16.msra.mxu0 %v3633_v46  ;;  %v3701_v46 = vld [vmem:[%s3994_s22 + $0x338] sm:$0xff]  }
  0x4f   : > { %3251 = vmatprep.subr.bf16.mxu0 %v3636_v49  ;;  %v3704_v49 = vld [vmem:[%s3994_s22 + $0x370] sm:$0xff]  }
  0x50   : > { %3272 = vmatpush3.bf16.msra.mxu1 %v3635_v48  ;;  %v3703_v48 = vld [vmem:[%s3994_s22 + $0x3b8] sm:$0xff]  }
  0x51   : > { %3273 = vmatprep.subr.bf16.mxu1 %v3638_v51  ;;  %v3706_v51 = vld [vmem:[%s3994_s22 + $0x3f0] sm:$0xff]  }
  0x52   : > { %3252 = vmatpush3.bf16.msra.mxu0 %v3637_v50  ;;  %v3705_v50 = vld [vmem:[%s3994_s22 + $0x330] sm:$0xff]  }
  0x53   : > { %3253 = vmatprep.subr.bf16.mxu0 %v3640_v53  ;;  %v3708_v53 = vld [vmem:[%s3994_s22 + $0x368] sm:$0xff]  }
  0x54   : > { %3274 = vmatpush3.bf16.msra.mxu1 %v3639_v52  ;;  %v3707_v52 = vld [vmem:[%s3994_s22 + $0x3b0] sm:$0xff]  }
  0x55   : > { %3275 = vmatprep.subr.bf16.mxu1 %v3642_v55  ;;  %v3710_v55 = vld [vmem:[%s3994_s22 + $0x3e8] sm:$0xff]  }
  0x56   : > { %3254 = vmatpush3.bf16.msra.mxu0 %v3641_v54  ;;  %v3709_v54 = vld [vmem:[%s3994_s22 + $0x328] sm:$0xff]  }
  0x57   : > { %3255 = vmatprep.subr.bf16.mxu0 %v3644_v57  ;;  %v3712_v57 = vld [vmem:[%s3994_s22 + $0x360] sm:$0xff]  }
  0x58   : > { %3276 = vmatpush3.bf16.msra.mxu1 %v3643_v56  ;;  %v3711_v56 = vld [vmem:[%s3994_s22 + $0x3a8] sm:$0xff]  }
  0x59   : > { %3277 = vmatprep.subr.bf16.mxu1 %v3646_v59  ;;  %v3714_v59 = vld [vmem:[%s3994_s22 + $0x3e0] sm:$0xff]  }
  0x5a   : > { %3256 = vmatpush3.bf16.msra.mxu0 %v3645_v58  ;;  %v3713_v58 = vld [vmem:[%s3994_s22 + $0x320] sm:$0xff]  }
  0x5b   : > { %3257 = vmatprep.subr.bf16.mxu0 %v3648_v61  ;;  %v3716_v61 = vld [vmem:[%s3994_s22 + $0x358] sm:$0xff]  }
  0x5c   : > { %3278 = vmatpush3.bf16.msra.mxu1 %v3647_v60  ;;  %v3715_v60 = vld [vmem:[%s3994_s22 + $0x3a0] sm:$0xff]  }
  0x5d   : > { %3279 = vmatprep.subr.bf16.mxu1 %v3650_v63  ;;  %v3718_v63 = vld [vmem:[%s3994_s22 + $0x3d8] sm:$0xff]  }
  0x5e   : > { %3258 = vmatpush3.bf16.msra.mxu0 %v3649_v62  ;;  %v3717_v62 = vld [vmem:[%s3994_s22 + $0x318] sm:$0xff]  }
  0x5f   : > { %3259 = vmatprep.subr.bf16.mxu0 %v3652_v1  ;;  %v3720_v1 = vld [vmem:[%s3994_s22 + $0x350] sm:$0xff]  }
  0x60   : > { %3280 = vmatpush3.bf16.msra.mxu1 %v3651_v0  ;;  %v3719_v0 = vld [vmem:[%s3994_s22 + $0x398] sm:$0xff]  }
  0x61   : > { %3281 = vmatprep.subr.bf16.mxu1 %v3654_v3  ;;  %v3722_v3 = vld [vmem:[%s3994_s22 + $0x3d0] sm:$0xff]  }
  0x62   : > { %3260 = vmatpush3.bf16.msra.mxu0 %v3653_v2  ;;  %v3721_v2 = vld [vmem:[%s3994_s22 + $0x310] sm:$0xff]  }
  0x63   : > { %3289 = vmatprep.subr.bf16.mxu0 %v3659_v7  ;;  %v3726_v7 = vld [vmem:[%s3994_s22 + $0x3c8] sm:$0xff]  }
  0x64   : > { %3282 = vmatpush3.bf16.msra.mxu1 %v3658_v6  ;;  %v3725_v6 = vld [vmem:[%s3994_s22 + $0x308] sm:$0xff]  }
  0x65   : > { %2208 = vmatmul.mubr.bf16.vlgmr.msra.gmra.mxu0 %v3655_v4  ;;  %3311 = vmatprep.subr.bf16.mxu1 %v3664_v11  ;;  %v3723_v4 = vld [vmem:[%s3994_s22 + $0x390] sm:$0xff]   ;;  %v3730_v11 = vld [vmem:[%s3994_s22 + $0x3c0] sm:$0xff]  }
  0x66   : > { %3290 = vmatpush3.bf16.msra.mxu0 %v3663_v10  ;;  %2289 = vmatprep.mubr.bf16.mxu0 %v3695_v41  ;;  %v3729_v10 = vld [vmem:[%s3994_s22 + $0x300] sm:$0xff]   ;;  %v3762_v41 = vld [vmem:[%s3994_s22 + $0x448] sm:$0xff]  }
  0x67   : > { %2249 = vmatmul.mubr.bf16.vlgmr.msra.gmra.mxu1 %v3660_v8  ;;  %3291 = vmatprep.subr.bf16.mxu0 %v3666_v13  ;;  %v3727_v8 = vld [vmem:[%s3994_s22 + $0x388] sm:$0xff]   ;;  %v3733_v13 = vld [vmem:[%s3999_s12 + $0x34] ss:$100 sps:$4 sm:$0xff]  }
  0x68   : > { %3312 = vmatpush3.bf16.msra.mxu1 %v3665_v12  ;;  %2330 = vmatprep.mubr.bf16.mxu1 %v3700_v45  ;;  %v3731_v12 = vld [vmem:[%s3999_s12 + $0x30] ss:$100 sps:$4 sm:$0xff]   ;;  %v3766_v45 = vld [vmem:[%s3994_s22 + $0x440] sm:$0xff]  }
  0x69   : > { %3313 = vmatprep.subr.bf16.mxu1 %v3668_v15  ;;  %v3735_v15 = vld [vmem:[%s3994_s22 + $0x478] sm:$0xff]  }
  0x6a   : > { %3292 = vmatpush3.bf16.msra.mxu0 %v3667_v14  ;;  %v3734_v14 = vld [vmem:[%s3994_s22 + $0x380] sm:$0xff]  }
  0x6b   : > { %3293 = vmatprep.subr.bf16.mxu0 %v3670_v17  ;;  %v3738_v17 = vld [vmem:[%s3999_s12 + $0x3c] ss:$100 sps:$4 sm:$0xff]  }
  0x6c   : > { %3314 = vmatpush3.bf16.msra.mxu1 %v3669_v16  ;;  %v3736_v16 = vld [vmem:[%s3999_s12 + $0x38] ss:$100 sps:$4 sm:$0xff]  }
  0x6d   : > { %3315 = vmatprep.subr.bf16.mxu1 %v3672_v19  ;;  %v3740_v19 = vld [vmem:[%s3994_s22 + $0x4f8] sm:$0xff]  }
  0x6e   : > { %3294 = vmatpush3.bf16.msra.mxu0 %v3671_v18  ;;  %v3739_v18 = vld [vmem:[%s3994_s22 + $0x438] sm:$0xff]  }
  0x6f   : > { %3295 = vmatprep.subr.bf16.mxu0 %v3674_v21  ;;  %v3742_v21 = vld [vmem:[%s3994_s22 + $0x470] sm:$0xff]  }
  0x70   : > { %3316 = vmatpush3.bf16.msra.mxu1 %v3673_v20  ;;  %v3741_v20 = vld [vmem:[%s3994_s22 + $0x4b8] sm:$0xff]  }
  0x71   : > { %3317 = vmatprep.subr.bf16.mxu1 %v3676_v23  ;;  %v3744_v23 = vld [vmem:[%s3994_s22 + $0x4f0] sm:$0xff]  }
  0x72   : > { %3296 = vmatpush3.bf16.msra.mxu0 %v3675_v22  ;;  %v3743_v22 = vld [vmem:[%s3994_s22 + $0x430] sm:$0xff]  }
  0x73   : > { %3297 = vmatprep.subr.bf16.mxu0 %v3678_v25  ;;  %v3746_v25 = vld [vmem:[%s3994_s22 + $0x468] sm:$0xff]  }
  0x74   : > { %3318 = vmatpush3.bf16.msra.mxu1 %v3677_v24  ;;  %v3745_v24 = vld [vmem:[%s3994_s22 + $0x4b0] sm:$0xff]  }
  0x75   : > { %3319 = vmatprep.subr.bf16.mxu1 %v3680_v27  ;;  %v3748_v27 = vld [vmem:[%s3994_s22 + $0x4e8] sm:$0xff]  }
  0x76   : > { %3298 = vmatpush3.bf16.msra.mxu0 %v3679_v26  ;;  %v3747_v26 = vld [vmem:[%s3994_s22 + $0x428] sm:$0xff]  }
  0x77   : > { %3299 = vmatprep.subr.bf16.mxu0 %v3682_v29  ;;  %v3750_v29 = vld [vmem:[%s3994_s22 + $0x460] sm:$0xff]  }
  0x78   : > { %3320 = vmatpush3.bf16.msra.mxu1 %v3681_v28  ;;  %v3749_v28 = vld [vmem:[%s3994_s22 + $0x4a8] sm:$0xff]  }
  0x79   : > { %3321 = vmatprep.subr.bf16.mxu1 %v3684_v31  ;;  %v3752_v31 = vld [vmem:[%s3994_s22 + $0x4e0] sm:$0xff]  }
  0x7a   : > { %3300 = vmatpush3.bf16.msra.mxu0 %v3683_v30  ;;  %v3751_v30 = vld [vmem:[%s3994_s22 + $0x420] sm:$0xff]  }
  0x7b   : > { %3301 = vmatprep.subr.bf16.mxu0 %v3686_v33  ;;  %v3754_v33 = vld [vmem:[%s3994_s22 + $0x458] sm:$0xff]  }
  0x7c   : > { %3322 = vmatpush3.bf16.msra.mxu1 %v3685_v32  ;;  %v3753_v32 = vld [vmem:[%s3994_s22 + $0x4a0] sm:$0xff]  }
  0x7d   : > { %3323 = vmatprep.subr.bf16.mxu1 %v3688_v35  ;;  %v3756_v35 = vld [vmem:[%s3994_s22 + $0x4d8] sm:$0xff]  }
  0x7e   : > { %3302 = vmatpush3.bf16.msra.mxu0 %v3687_v34  ;;  %v3755_v34 = vld [vmem:[%s3994_s22 + $0x418] sm:$0xff]  }
  0x7f   : > { %3303 = vmatprep.subr.bf16.mxu0 %v3690_v37  ;;  %v3758_v37 = vld [vmem:[%s3994_s22 + $0x450] sm:$0xff]  }
  0x80   : > { %3324 = vmatpush3.bf16.msra.mxu1 %v3689_v36  ;;  %v3757_v36 = vld [vmem:[%s3994_s22 + $0x498] sm:$0xff]  }
  0x81   : > { %3325 = vmatprep.subr.bf16.mxu1 %v3692_v39  ;;  %v3760_v39 = vld [vmem:[%s3994_s22 + $0x4d0] sm:$0xff]  }
  0x82   : > { %3304 = vmatpush3.bf16.msra.mxu0 %v3691_v38  ;;  %v3759_v38 = vld [vmem:[%s3994_s22 + $0x410] sm:$0xff]  }
  0x83   : > { %3333 = vmatprep.subr.bf16.mxu0 %v3697_v43  ;;  %v3764_v43 = vld [vmem:[%s3994_s22 + $0x4c8] sm:$0xff]  }
  0x84   : > { %3326 = vmatpush3.bf16.msra.mxu1 %v3696_v42  ;;  %v3763_v42 = vld [vmem:[%s3994_s22 + $0x408] sm:$0xff]  }
  0x85   : > { %2290 = vmatmul.mubr.bf16.vlgmr.msra.gmra.mxu0 %v3693_v40  ;;  %3355 = vmatprep.subr.bf16.mxu1 %v3702_v47  ;;  %v3761_v40 = vld [vmem:[%s3994_s22 + $0x490] sm:$0xff]   ;;  %v3768_v47 = vld [vmem:[%s3994_s22 + $0x4c0] sm:$0xff]  }
  0x86   : > { %3334 = vmatpush3.bf16.msra.mxu0 %v3701_v46  ;;  %2371 = vmatprep.mubr.bf16.mxu0 %v3733_v13  ;;  %v3767_v46 = vld [vmem:[%s3994_s22 + $0x400] sm:$0xff]   ;;  %v3800_v13 = vld [vmem:[%s3994_s22 + $0x548] sm:$0xff]  }
  0x87   : > { %2331 = vmatmul.mubr.bf16.vlgmr.msra.gmra.mxu1 %v3698_v44  ;;  %3335 = vmatprep.subr.bf16.mxu0 %v3704_v49  ;;  %v3765_v44 = vld [vmem:[%s3994_s22 + $0x488] sm:$0xff]  }
  0x88   : > { %3356 = vmatpush3.bf16.msra.mxu1 %v3703_v48  ;;  %2412 = vmatprep.mubr.bf16.mxu1 %v3738_v17  ;;  %v3769_v48 = vld [vmem:[%s3999_s12 + $0x40] ss:$100 sps:$4 sm:$0xff]  }
  0x89   : > { %3357 = vmatprep.subr.bf16.mxu1 %v3706_v51  ;;  %v3771_v49 = vld [vmem:[%s3999_s12 + $0x44] ss:$100 sps:$4 sm:$0xff]   ;;  %v3773_v51 = vld [vmem:[%s3994_s22 + $0x578] sm:$0xff]  }
  0x8a   : > { %3336 = vmatpush3.bf16.msra.mxu0 %v3705_v50  ;;  %v3772_v50 = vld [vmem:[%s3994_s22 + $0x480] sm:$0xff]  }
  0x8b   : > { %3337 = vmatprep.subr.bf16.mxu0 %v3708_v53  ;;  %v3776_v53 = vld [vmem:[%s3999_s12 + $0x4c] ss:$100 sps:$4 sm:$0xff]   ;;  %v3804_v17 = vld [vmem:[%s3994_s22 + $0x540] sm:$0xff]  }
  0x8c   : > { %3358 = vmatpush3.bf16.msra.mxu1 %v3707_v52  ;;  %v3774_v52 = vld [vmem:[%s3999_s12 + $0x48] ss:$100 sps:$4 sm:$0xff]  }
  0x8d   : > { %3359 = vmatprep.subr.bf16.mxu1 %v3710_v55  ;;  %v3778_v55 = vld [vmem:[%s3994_s22 + $0x5f8] sm:$0xff]  }
  0x8e   : > { %3338 = vmatpush3.bf16.msra.mxu0 %v3709_v54  ;;  %v3777_v54 = vld [vmem:[%s3994_s22 + $0x538] sm:$0xff]  }
  0x8f   : > { %3339 = vmatprep.subr.bf16.mxu0 %v3712_v57  ;;  %v3780_v57 = vld [vmem:[%s3994_s22 + $0x570] sm:$0xff]  }
  0x90   : > { %3360 = vmatpush3.bf16.msra.mxu1 %v3711_v56  ;;  %v3779_v56 = vld [vmem:[%s3994_s22 + $0x5b8] sm:$0xff]  }
  0x91   : > { %3361 = vmatprep.subr.bf16.mxu1 %v3714_v59  ;;  %v3782_v59 = vld [vmem:[%s3994_s22 + $0x5f0] sm:$0xff]  }
  0x92   : > { %3340 = vmatpush3.bf16.msra.mxu0 %v3713_v58  ;;  %v3781_v58 = vld [vmem:[%s3994_s22 + $0x530] sm:$0xff]  }
  0x93   : > { %3341 = vmatprep.subr.bf16.mxu0 %v3716_v61  ;;  %v3784_v61 = vld [vmem:[%s3994_s22 + $0x568] sm:$0xff]  }
  0x94   : > { %3362 = vmatpush3.bf16.msra.mxu1 %v3715_v60  ;;  %v3783_v60 = vld [vmem:[%s3994_s22 + $0x5b0] sm:$0xff]  }
  0x95   : > { %3363 = vmatprep.subr.bf16.mxu1 %v3718_v63  ;;  %v3786_v63 = vld [vmem:[%s3994_s22 + $0x5e8] sm:$0xff]  }
  0x96   : > { %3342 = vmatpush3.bf16.msra.mxu0 %v3717_v62  ;;  %v3785_v62 = vld [vmem:[%s3994_s22 + $0x528] sm:$0xff]  }
  0x97   : > { %3343 = vmatprep.subr.bf16.mxu0 %v3720_v1  ;;  %v3788_v1 = vld [vmem:[%s3994_s22 + $0x560] sm:$0xff]  }
  0x98   : > { %3364 = vmatpush3.bf16.msra.mxu1 %v3719_v0  ;;  %v3787_v0 = vld [vmem:[%s3994_s22 + $0x5a8] sm:$0xff]  }
  0x99   : > { %3365 = vmatprep.subr.bf16.mxu1 %v3722_v3  ;;  %v3790_v3 = vld [vmem:[%s3994_s22 + $0x5e0] sm:$0xff]  }
  0x9a   : > { %3344 = vmatpush3.bf16.msra.mxu0 %v3721_v2  ;;  %v3789_v2 = vld [vmem:[%s3994_s22 + $0x520] sm:$0xff]  }
  0x9b   : > { %3345 = vmatprep.subr.bf16.mxu0 %v3724_v5  ;;  %v3792_v5 = vld [vmem:[%s3994_s22 + $0x558] sm:$0xff]  }
  0x9c   : > { %3366 = vmatpush3.bf16.msra.mxu1 %v3723_v4  ;;  %v3791_v4 = vld [vmem:[%s3994_s22 + $0x5a0] sm:$0xff]  }
  0x9d   : > { %3367 = vmatprep.subr.bf16.mxu1 %v3726_v7  ;;  %v3794_v7 = vld [vmem:[%s3994_s22 + $0x5d8] sm:$0xff]  }
  0x9e   : > { %3346 = vmatpush3.bf16.msra.mxu0 %v3725_v6  ;;  %v3793_v6 = vld [vmem:[%s3994_s22 + $0x518] sm:$0xff]  }
  0x9f   : > { %3347 = vmatprep.subr.bf16.mxu0 %v3728_v9  ;;  %v3796_v9 = vld [vmem:[%s3994_s22 + $0x550] sm:$0xff]  }
  0xa0   : > { %3368 = vmatpush3.bf16.msra.mxu1 %v3727_v8  ;;  %v3795_v8 = vld [vmem:[%s3994_s22 + $0x598] sm:$0xff]  }
  0xa1   : > { %3369 = vmatprep.subr.bf16.mxu1 %v3730_v11  ;;  %v3798_v11 = vld [vmem:[%s3994_s22 + $0x5d0] sm:$0xff]  }
  0xa2   : > { %3348 = vmatpush3.bf16.msra.mxu0 %v3729_v10  ;;  %v3797_v10 = vld [vmem:[%s3994_s22 + $0x510] sm:$0xff]  }
  0xa3   : > { %3377 = vmatprep.subr.bf16.mxu0 %v3735_v15  ;;  %v3802_v15 = vld [vmem:[%s3994_s22 + $0x5c8] sm:$0xff]  }
  0xa4   : > { %3370 = vmatpush3.bf16.msra.mxu1 %v3734_v14  ;;  %v3801_v14 = vld [vmem:[%s3994_s22 + $0x508] sm:$0xff]  }
  0xa5   : > { %2372 = vmatmul.mubr.bf16.vlgmr.msra.gmra.mxu0 %v3731_v12  ;;  %3399 = vmatprep.subr.bf16.mxu1 %v3740_v19  ;;  %v3799_v12 = vld [vmem:[%s3994_s22 + $0x590] sm:$0xff]   ;;  %v3806_v19 = vld [vmem:[%s3994_s22 + $0x5c0] sm:$0xff]  }
  0xa6   : > { %3378 = vmatpush3.bf16.msra.mxu0 %v3739_v18  ;;  %2453 = vmatprep.mubr.bf16.mxu0 %v3771_v49  ;;  %v3805_v18 = vld [vmem:[%s3994_s22 + $0x500] sm:$0xff]  }
  0xa7   : > { %2413 = vmatmul.mubr.bf16.vlgmr.msra.gmra.mxu1 %v3736_v16  ;;  %3379 = vmatprep.subr.bf16.mxu0 %v3742_v21  ;;  %v3803_v16 = vld [vmem:[%s3994_s22 + $0x588] sm:$0xff]   ;;  %v3809_v21 = vld [vmem:[%s3999_s12 + $0x54] ss:$100 sps:$4 sm:$0xff]  }
  0xa8   : > { %3400 = vmatpush3.bf16.msra.mxu1 %v3741_v20  ;;  %2494 = vmatprep.mubr.bf16.mxu1 %v3776_v53  ;;  %v3807_v20 = vld [vmem:[%s3999_s12 + $0x50] ss:$100 sps:$4 sm:$0xff]  }
  0xa9   : > { %3401 = vmatprep.subr.bf16.mxu1 %v3744_v23  ;;  %v3888_v23 = vmov 0.0  }
  0xaa   : > { %3380 = vmatpush3.bf16.msra.mxu0 %v3743_v22  ;;  %v3810_v22 = vld [vmem:[%s3994_s22 + $0x580] sm:$0xff]  }
  0xab   : > { %3381 = vmatprep.subr.bf16.mxu0 %v3746_v25  ;;  %v3813_v25 = vld [vmem:[%s3999_s12 + $0x5c] ss:$100 sps:$4 sm:$0xff]  }
  0xac   : > { %3402 = vmatpush3.bf16.msra.mxu1 %v3745_v24  ;;  %v3811_v24 = vld [vmem:[%s3999_s12 + $0x58] ss:$100 sps:$4 sm:$0xff]  }
  0xad   : > { %3403 = vmatprep.subr.bf16.mxu1 %v3748_v27  ;;  %v3815_v27 = vld [vmem:[%s3994_s22 + $0x630] sm:$0xff]  }
  0xae   : > { %3382 = vmatpush3.bf16.msra.mxu0 %v3747_v26  ;;  %v3814_v26 = vld [vmem:[%s3994_s22 + $0x638] sm:$0xff]  }
  0xaf   : > { %3383 = vmatprep.subr.bf16.mxu0 %v3750_v29  ;;  %v3817_v29 = vld [vmem:[%s3994_s22 + $0x620] sm:$0xff]  }
  0xb0   : > { %3404 = vmatpush3.bf16.msra.mxu1 %v3749_v28  ;;  %v3816_v28 = vld [vmem:[%s3994_s22 + $0x628] sm:$0xff]  }
  0xb1   : > { %3405 = vmatprep.subr.bf16.mxu1 %v3752_v31  ;;  %v3819_v31 = vld [vmem:[%s3994_s22 + $0x610] sm:$0xff]  }
  0xb2   : > { %3384 = vmatpush3.bf16.msra.mxu0 %v3751_v30  ;;  %v3818_v30 = vld [vmem:[%s3994_s22 + $0x618] sm:$0xff]  }
  0xb3   : > { %3385 = vmatprep.subr.bf16.mxu0 %v3754_v33  ;;  %v3821_v33 = vld [vmem:[%s3994_s22 + $0x600] sm:$0xff]  }
  0xb4   : > { %3406 = vmatpush3.bf16.msra.mxu1 %v3753_v32  ;;  %v3820_v32 = vld [vmem:[%s3994_s22 + $0x608] sm:$0xff]  }
  0xb5   : > { %3407 = vmatprep.subr.bf16.mxu1 %v3756_v35  ;;  %v3823_v35 = vld [vmem:[%s4004_s18 + $0x38] sm:$0xff]  }
  0xb6   : > { %3386 = vmatpush3.bf16.msra.mxu0 %v3755_v34  ;;  %v3822_v34 = vld [vmem:[%s3999_s12 + $0x60] ss:$100 sps:$4 sm:$0xff]  }
  0xb7   : > { %3387 = vmatprep.subr.bf16.mxu0 %v3758_v37  ;;  %v3825_v37 = vld [vmem:[%s4004_s18 + $0x28] sm:$0xff]  }
  0xb8   : > { %3408 = vmatpush3.bf16.msra.mxu1 %v3757_v36  ;;  %v3824_v36 = vld [vmem:[%s4004_s18 + $0x30] sm:$0xff]  }
  0xb9   : > { %3409 = vmatprep.subr.bf16.mxu1 %v3760_v39  ;;  %v3827_v39 = vld [vmem:[%s4004_s18 + $0x18] sm:$0xff]  }
  0xba   : > { %3388 = vmatpush3.bf16.msra.mxu0 %v3759_v38  ;;  %v3826_v38 = vld [vmem:[%s4004_s18 + $0x20] sm:$0xff]  }
  0xbb   : > { %3389 = vmatprep.subr.bf16.mxu0 %v3762_v41  ;;  %v3829_v41 = vld [vmem:[%s4004_s18 + $0x8] sm:$0xff]  }
  0xbc   : > { %3410 = vmatpush3.bf16.msra.mxu1 %v3761_v40  ;;  %v3828_v40 = vld [vmem:[%s4004_s18 + $0x10] sm:$0xff]  }
  0xbd   : > { %3411 = vmatprep.subr.bf16.mxu1 %v3764_v43 }
  0xbe   : > { %3390 = vmatpush3.bf16.msra.mxu0 %v3763_v42  ;;  %v3830_v42 = vld [vmem:[%s4004_s18] sm:$0xff]  }
  0xbf   : > { %3391 = vmatprep.subr.bf16.mxu0 %v3766_v45 }
  0xc0   : > { %3412 = vmatpush3.bf16.msra.mxu1 %v3765_v44 }
  0xc1   : > { %3413 = vmatprep.subr.bf16.mxu1 %v3768_v47 }
  0xc2   : > { %3392 = vmatpush3.bf16.msra.mxu0 %v3767_v46 }
  0xc3   : > { %3421 = vmatprep.subr.bf16.mxu0 %v3773_v51 }
  0xc4   : > { %3414 = vmatpush3.bf16.msra.mxu1 %v3772_v50 }
  0xc5   : > { %2454 = vmatmul.mubr.bf16.vlgmr.msra.gmra.mxu0 %v3769_v48  ;;  %3443 = vmatprep.subr.bf16.mxu1 %v3778_v55 }
  0xc6   : > { %3422 = vmatpush3.bf16.msra.mxu0 %v3777_v54  ;;  %2535 = vmatprep.mubr.bf16.mxu0 %v3809_v21 }
  0xc7   : > { %2495 = vmatmul.mubr.bf16.vlgmr.msra.gmra.mxu1 %v3774_v52  ;;  %3423 = vmatprep.subr.bf16.mxu0 %v3780_v57 }
  0xc8   : > { %3444 = vmatpush3.bf16.msra.mxu1 %v3779_v56  ;;  %2576 = vmatprep.mubr.bf16.mxu1 %v3813_v25 }
  0xc9   : > { %3445 = vmatprep.subr.bf16.mxu1 %v3782_v59 }
  0xca   : > { %3424 = vmatpush3.bf16.msra.mxu0 %v3781_v58 }
  0xcb   : > { %3425 = vmatprep.subr.bf16.mxu0 %v3784_v61 }
  0xcc   : > { %3446 = vmatpush3.bf16.msra.mxu1 %v3783_v60 }
  0xcd   : > { %3447 = vmatprep.subr.bf16.mxu1 %v3786_v63 }
  0xce   : > { %3426 = vmatpush3.bf16.msra.mxu0 %v3785_v62 }
  0xcf   : > { %3427 = vmatprep.subr.bf16.mxu0 %v3788_v1 }
  0xd0   : > { %3448 = vmatpush3.bf16.msra.mxu1 %v3787_v0 }
  0xd1   : > { %3449 = vmatprep.subr.bf16.mxu1 %v3790_v3 }
  0xd2   : > { %3428 = vmatpush3.bf16.msra.mxu0 %v3789_v2 }
  0xd3   : > { %3429 = vmatprep.subr.bf16.mxu0 %v3792_v5 }
  0xd4   : > { %3450 = vmatpush3.bf16.msra.mxu1 %v3791_v4 }
  0xd5   : > { %3451 = vmatprep.subr.bf16.mxu1 %v3794_v7 }
  0xd6   : > { %3430 = vmatpush3.bf16.msra.mxu0 %v3793_v6 }
  0xd7   : > { %3431 = vmatprep.subr.bf16.mxu0 %v3796_v9  ;;  %v2952_v9 = vld [vmem:[%s4302_s23] ss:$0 sm:$0xff] }
  0xd8   : > { %3452 = vmatpush3.bf16.msra.mxu1 %v3795_v8 }
  0xd9   : > { %3453 = vmatprep.subr.bf16.mxu1 %v3798_v11 }
  0xda   : > { %3432 = vmatpush3.bf16.msra.mxu0 %v3797_v10 }
  0xdb   : > { %3433 = vmatprep.subr.bf16.mxu0 %v3800_v13 }
  0xdc   : > { %3454 = vmatpush3.bf16.msra.mxu1 %v3799_v12 }
  0xdd   : > { %3455 = vmatprep.subr.bf16.mxu1 %v3802_v15 }
  0xde   : > { %3434 = vmatpush3.bf16.msra.mxu0 %v3801_v14 }
  0xdf   : > { %3435 = vmatprep.subr.bf16.mxu0 %v3804_v17 }
  0xe0   : > { %3456 = vmatpush3.bf16.msra.mxu1 %v3803_v16 }
  0xe1   : > { %3457 = vmatprep.subr.bf16.mxu1 %v3806_v19 }
  0xe2   : > { %3436 = vmatpush3.bf16.msra.mxu0 %v3805_v18 }
  0xe3   : > { %3483 = vmatprep.subr.bf16.mxu0 %v3888_v23 }
  0xe4   : > { %3458 = vmatpush3.bf16.msra.mxu1 %v3810_v22 }
  0xe5   : > { %2536 = vmatmul.mubr.bf16.vlgmr.msra.gmra.mxu0 %v3807_v20  ;;  %3503 = vmatprep.subr.bf16.mxu1 %v3888_v23 }
  0xe6   : > { %3499 = vmatprep.mubr.msk.bf16.mxu0 %vm3889_vm0, %v3888_v23  ;;  %3484 = vmatpush3.bf16.msra.mxu0 %v3814_v26 }
  0xe7   : > { %2577 = vmatmul.mubr.bf16.vlgmr.msra.gmra.mxu1 %v3811_v24  ;;  %3485 = vmatprep.subr.bf16.mxu0 %v3888_v23 }
  0xe8   : > { %3519 = vmatprep.mubr.msk.bf16.mxu1 %vm3889_vm0, %v3888_v23  ;;  %3504 = vmatpush3.bf16.msra.mxu1 %v3823_v35 }
  0xe9   : > { %3505 = vmatprep.subr.bf16.mxu1 %v3888_v23 }
  0xea   : > { %3486 = vmatpush3.bf16.msra.mxu0 %v3815_v27 }
  0xeb   : > { %3487 = vmatprep.subr.bf16.mxu0 %v3888_v23 }
  0xec   : > { %3506 = vmatpush3.bf16.msra.mxu1 %v3824_v36 }
  0xed   : > { %3507 = vmatprep.subr.bf16.mxu1 %v3888_v23 }
  0xee   : > { %3488 = vmatpush3.bf16.msra.mxu0 %v3816_v28 }
  0xef   : > { %3489 = vmatprep.subr.bf16.mxu0 %v3888_v23 }
  0xf0   : > { %3508 = vmatpush3.bf16.msra.mxu1 %v3825_v37 }
  0xf1   : > { %3509 = vmatprep.subr.bf16.mxu1 %v3888_v23 }
  0xf2   : > { %3490 = vmatpush3.bf16.msra.mxu0 %v3817_v29 }
  0xf3   : > { %3491 = vmatprep.subr.bf16.mxu0 %v3888_v23 }
  0xf4   : > { %3510 = vmatpush3.bf16.msra.mxu1 %v3826_v38 }
  0xf5   : > { %3511 = vmatprep.subr.bf16.mxu1 %v3888_v23 }
  0xf6   : > { %3492 = vmatpush3.bf16.msra.mxu0 %v3818_v30 }
  0xf7   : > { %3493 = vmatprep.subr.bf16.mxu0 %v3888_v23 }
  0xf8   : > { %3512 = vmatpush3.bf16.msra.mxu1 %v3827_v39 }
  0xf9   : > { %3513 = vmatprep.subr.bf16.mxu1 %v3888_v23 }
  0xfa   : > { %3494 = vmatpush3.bf16.msra.mxu0 %v3819_v31 }
  0xfb   : > { %3495 = vmatprep.subr.bf16.mxu0 %v3888_v23 }
  0xfc   : > { %3514 = vmatpush3.bf16.msra.mxu1 %v3828_v40 }
  0xfd   : > { %3515 = vmatprep.subr.bf16.mxu1 %v3888_v23 }
  0xfe   : > { %3496 = vmatpush3.bf16.msra.mxu0 %v3820_v32 }
  0xff   : > { %3497 = vmatprep.subr.bf16.mxu0 %v3888_v23 }
 0x100   : > { %3516 = vmatpush3.bf16.msra.mxu1 %v3829_v41 }
 0x101   : > { %3517 = vmatprep.subr.bf16.mxu1 %v3888_v23 }
 0x102   : > { %3498 = vmatpush3.bf16.msra.mxu0 %v3821_v33 }
 0x104   : > { %3518 = vmatpush3.bf16.msra.mxu1 %v3830_v42 }
 0x105   : > { %3500 = vmatmul.mubr.bf16.vlgmr.msra.gmra.mxu0 %v3822_v34  ;;  %v3217_v43 = vpop.f32.mrf.mxu0 }
 0x107   : > { %v3218_v44 = vpop.f32.mrf.mxu0  ;;  %v3239_v45 = vpop.f32.mrf.mxu1 }
 0x108   : > { %v3219_v8 = vadd.f32 %v3218_v44, %v3217_v43 }
 0x109   : > { %v3220_v46 = vpop.f32.mrf.mxu0  ;;  %v3240_v47 = vpop.f32.mrf.mxu1 }
 0x10a   : > { %v2128_v14 = vadd.f32 %v3219_v8, %v2952_v9  ;;  %v3241_v15 = vadd.f32 %v3240_v47, %v3239_v45 }
 0x10b   : > { %v3221_v48 = vpop.f32.mrf.mxu0  ;;  %v3242_v49 = vpop.f32.mrf.mxu1 }
 0x10c   : > { %v3222_v12 = vadd.f32 %v3221_v48, %v3220_v46  ;;  %v2169_v22 = vadd.f32 %v3241_v15, %v2128_v14 }
 0x10d   : > { %v3243_v51 = vpop.f32.mrf.mxu1 }
 0x10e   : > { %v2131_v17 = vadd.f32 %v3222_v12, %v2952_v9  ;;  %v3244_v18 = vadd.f32 %v3243_v51, %v3242_v49 }
 0x110   : > { %v2172_v24 = vadd.f32 %v3244_v18, %v2131_v17 }
 0x125   : > { %v3261_v50 = vpop.f32.mrf.mxu0 }
 0x127   : > { %v3262_v52 = vpop.f32.mrf.mxu0  ;;  %v3283_v53 = vpop.f32.mrf.mxu1 }
 0x128   : > { %v3263_v19 = vadd.f32 %v3262_v52, %v3261_v50 }
 0x129   : > { %v3264_v54 = vpop.f32.mrf.mxu0  ;;  %v3284_v55 = vpop.f32.mrf.mxu1 }
 0x12a   : > { %v2210_v25 = vadd.f32 %v3263_v19, %v2169_v22  ;;  %v3285_v26 = vadd.f32 %v3284_v55, %v3283_v53 }
 0x12b   : > { %v3265_v56 = vpop.f32.mrf.mxu0  ;;  %v3286_v57 = vpop.f32.mrf.mxu1 }
 0x12c   : > { %v3266_v23 = vadd.f32 %v3265_v56, %v3264_v54  ;;  %v2251_v32 = vadd.f32 %v3285_v26, %v2210_v25  ;;  %v2630_v25 = vld [vmem:[#allocation2 + $0x8] sm:$0xff] }
 0x12d   : > { %v3287_v59 = vpop.f32.mrf.mxu1 }
 0x12e   : > { %v2213_v29 = vadd.f32 %v3266_v23, %v2172_v24  ;;  %v3288_v30 = vadd.f32 %v3287_v59, %v3286_v57 }
 0x130   : > { %v2254_v36 = vadd.f32 %v3288_v30, %v2213_v29 }
 0x145   : > { %v3305_v58 = vpop.f32.mrf.mxu0 }
 0x147   : > { %v3306_v60 = vpop.f32.mrf.mxu0  ;;  %v3327_v61 = vpop.f32.mrf.mxu1 }
 0x148   : > { %v3307_v31 = vadd.f32 %v3306_v60, %v3305_v58 }
 0x149   : > { %v3308_v62 = vpop.f32.mrf.mxu0  ;;  %v3328_v63 = vpop.f32.mrf.mxu1 }
 0x14a   : > { %v2292_v37 = vadd.f32 %v3307_v31, %v2251_v32  ;;  %v3329_v38 = vadd.f32 %v3328_v63, %v3327_v61 }
 0x14b   : > { %v3309_v0 = vpop.f32.mrf.mxu0  ;;  %v3330_v1 = vpop.f32.mrf.mxu1 }
 0x14c   : > { %v3310_v33 = vadd.f32 %v3309_v0, %v3308_v62  ;;  %v2333_v44 = vadd.f32 %v3329_v38, %v2292_v37 }
 0x14d   : > { %v3331_v3 = vpop.f32.mrf.mxu1 }
 0x14e   : > { %v2295_v40 = vadd.f32 %v3310_v33, %v2254_v36  ;;  %v3332_v41 = vadd.f32 %v3331_v3, %v3330_v1 }
 0x150   : > { %v2336_v48 = vadd.f32 %v3332_v41, %v2295_v40 }
 0x165   : > { %v3349_v2 = vpop.f32.mrf.mxu0 }
 0x167   : > { %v3350_v4 = vpop.f32.mrf.mxu0  ;;  %v3371_v5 = vpop.f32.mrf.mxu1 }
 0x168   : > { %v3351_v42 = vadd.f32 %v3350_v4, %v3349_v2 }
 0x169   : > { %v3352_v6 = vpop.f32.mrf.mxu0  ;;  %v3372_v7 = vpop.f32.mrf.mxu1 }
 0x16a   : > { %v2374_v49 = vadd.f32 %v3351_v42, %v2333_v44  ;;  %v3373_v50 = vadd.f32 %v3372_v7, %v3371_v5 }
 0x16b   : > { %v3353_v10 = vpop.f32.mrf.mxu0  ;;  %v3374_v11 = vpop.f32.mrf.mxu1 }
 0x16c   : > { %v3354_v45 = vadd.f32 %v3353_v10, %v3352_v6  ;;  %v2415_v56 = vadd.f32 %v3373_v50, %v2374_v49 }
 0x16d   : > { %v3375_v16 = vpop.f32.mrf.mxu1 }
 0x16e   : > { %v2377_v51 = vadd.f32 %v3354_v45, %v2336_v48  ;;  %v3376_v52 = vadd.f32 %v3375_v16, %v3374_v11 }
 0x170   : > { %v2418_v58 = vadd.f32 %v3376_v52, %v2377_v51 }
 0x185   : > { %v3393_v13 = vpop.f32.mrf.mxu0 }
 0x187   : > { %v3394_v20 = vpop.f32.mrf.mxu0  ;;  %v3415_v21 = vpop.f32.mrf.mxu1 }
 0x188   : > { %v3395_v53 = vadd.f32 %v3394_v20, %v3393_v13 }
 0x189   : > { %v3396_v27 = vpop.f32.mrf.mxu0  ;;  %v3416_v28 = vpop.f32.mrf.mxu1 }
 0x18a   : > { %v2456_v59 = vadd.f32 %v3395_v53, %v2415_v56  ;;  %v3417_v60 = vadd.f32 %v3416_v28, %v3415_v21  ;;  %v2629_v21 = vld [vmem:[#allocation2] sm:$0xff] }
 0x18b   : > { %v3397_v34 = vpop.f32.mrf.mxu0  ;;  %v3418_v35 = vpop.f32.mrf.mxu1 }
 0x18c   : > { %v3398_v57 = vadd.f32 %v3397_v34, %v3396_v27  ;;  %v2497_v2 = vadd.f32 %v3417_v60, %v2456_v59 }
 0x18d   : > { %v3419_v43 = vpop.f32.mrf.mxu1 }
 0x18e   : > { %v2459_v63 = vadd.f32 %v3398_v57, %v2418_v58  ;;  %v3420_v0 = vadd.f32 %v3419_v43, %v3418_v35 }
 0x190   : > { %v2500_v6 = vadd.f32 %v3420_v0, %v2459_v63 }
 0x1a5   : > { %v3437_v39 = vpop.f32.mrf.mxu0 }
 0x1a7   : > { %v3438_v46 = vpop.f32.mrf.mxu0  ;;  %v3459_v47 = vpop.f32.mrf.mxu1 }
 0x1a8   : > { %v3439_v1 = vadd.f32 %v3438_v46, %v3437_v39 }
 0x1a9   : > { %v3440_v54 = vpop.f32.mrf.mxu0  ;;  %v3460_v55 = vpop.f32.mrf.mxu1 }
 0x1aa   : > { %v2538_v5 = vadd.f32 %v3439_v1, %v2497_v2  ;;  %v3461_v7 = vadd.f32 %v3460_v55, %v3459_v47 }
 0x1ab   : > { %v3441_v61 = vpop.f32.mrf.mxu0  ;;  %v3462_v62 = vpop.f32.mrf.mxu1 }
 0x1ac   : > { %v3442_v3 = vadd.f32 %v3441_v61, %v3440_v54  ;;  %v2579_v11 = vadd.f32 %v3461_v7, %v2538_v5 }
 0x1ad   : > { %v3463_v4 = vpop.f32.mrf.mxu1 }
 0x1ae   : > { %v2541_v8 = vadd.f32 %v3442_v3, %v2500_v6  ;;  %v3464_v9 = vadd.f32 %v3463_v4, %v3462_v62 }
 0x1b0   : > { %v2582_v14 = vadd.f32 %v3464_v9, %v2541_v8 }
 0x1c5   : > { %v2619_v10 = vpop.f32.mrf.mxu0 }
 0x1c6   : > { %v2620_v13 = vadd.f32 %v2619_v10, %v2579_v11 }
 0x1c7   : > { %v3501_v12 = vpop.f32.mrf.mxu0 }
 0x1c8   : > { %v2626_v18 = vmax.f32 %v2620_v13, 0.0 }
 0x1c9   : > { %v2622_v15 = vpop.f32.mrf.mxu0 }
 0x1ca   : > { %v2623_v16 = vadd.f32 %v2622_v15, %v2582_v14 }
 0x1cb   : > { %v3502_v17 = vpop.f32.mrf.mxu0 }
 0x1cc   : > { %v2627_v19 = vmax.f32 %v2623_v16, 0.0 }
 0x1ce   : > { %v2628_v20 = vpack.c.bf16 %v2627_v19, %v2626_v18 }
 0x1d0   : > { %3520 = vmatmul.mubr.bf16.vlgmr.msra.gmra.mxu1 %v2628_v20 }
 0x290   : > { %v2729_v22 = vpop.f32.mrf.mxu1 }
 0x291   : > { %v2736_v23 = vadd.f32 %v2729_v22, %v2629_v21 }
 0x292   : > { %v3521_v24 = vpop.f32.mrf.mxu1 }
 0x293   : > { %2738 = vst [vmem:[#allocation2] sm:$0xff] %v2736_v23  ;;  %2743 = sbr.rel (%p3186_p12) target bundleno = 676 (0x2a4), region = 48 }
 0x294   : > { %v2732_v26 = vpop.f32.mrf.mxu1 }
 0x295   : > { %v2737_v27 = vadd.f32 %v2732_v26, %v2630_v25 }
 0x296   : > { %v3522_v28 = vpop.f32.mrf.mxu1 }
 0x297   : > { %2739 = vst [vmem:[#allocation2 + $0x8] sm:$0xff] %v2737_v27 }
 0x298   : > { %v3187_v31 = vld [vmem:[%s326_s29] ss:$0 sm:$0xff] }
 0x29a   : > { %v2744_v29 = vld [vmem:[#allocation2] sm:$0xff] }
 0x29b   : > { %v2753_v32 = vadd.f32 %v3187_v31, %v2744_v29 }
 0x29e   : > { %v2745_v30 = vld [vmem:[#allocation2 + $0x8] sm:$0xff] }
 0x29f   : > { %v2754_v33 = vadd.f32 %v3187_v31, %v2745_v30 }
 0x2a1   : > { %v3199_v34 = vpack.c.bf16 %v2754_v33, %v2753_v32 }
 0x2a3   : > { %3200 = vst [vmem:[%s4006_s11] sm:$0xff] %v3199_v34  }
 0x2a4 PF: > { %2771 = sbr.rel (!%p3962_p6) target bundleno = 684 (0x2ac), region = 52  ;;  %s3191_s20 = sshll.u32 (%p3962_p6), %s3873_s21, 2 }
 0x2a5   : > { %s2773_s8 = scalar_lea.vmem (%p3962_p6), %s4288_s5, %s3191_s20 }
 0x2aa   : > { %v2790_v35 = vld [vmem:[%s4006_s11] sm:$0xf]  ;;  %v2792_v36 = vld [vmem:[%s4006_s11 + $0x4] sm:$0xf] }
 0x2ab   : > { %2791 = vst [vmem:[%s2773_s8] sm:$0xf] %v2790_v35  ;;  %2793 = vst [vmem:[%s2773_s8 + $0x8] sm:$0xf] %v2792_v36 }
 0x2ac PF: > { %s4303_s9 = sld [smem:[#allocation7_spill]] }
 0x2ad   : > { %s4304_s18 = sld [smem:[#allocation4_spill]] }
 0x2ae   : > { %s4305_s19 = sld [smem:[#allocation10_spill]] }
 0x2af   : > { %s4306_s20 = sld [smem:[#allocation5_spill]] }
 0x2b0   : > { %s4307_s21 = sld [smem:[#allocation6_spill]] }
 0x2b1   : > { %s4308_s22 = sld [smem:[#allocation8_spill]] }
 0x2b2   : > { %s15_s24 = sadd.s32 1, %s4303_s9   ;;  %s4309_s23 = sld [smem:[#allocation9_spill]] }
 0x2b3   : > { %p12_p13 = scmp.ge.s32.totalorder %s15_s24, 14  }
 0x2b5   :  { %14 = sbr.rel (!%p12_p13) target bundleno = 4 (0x4), region = 131 }

// kernel: full_ppi_forward.13
= control target key start
LH: loop header
LB: loop body
LE: loop exit
PB: predicated region body
PF: predicated region fallthrough
CT: control target
= control target key end

     0   :  { %s6116_s3 = smov 6   ;;  %s6117_s7 = smov 7   ;;  %v6121_v34 = vmov 0.0   ;;  %vm6123_vm0 = vmmov 0   ;;  %s6910_s0 = inlined_call_operand.smem [shape: u32[30], index: -1, kind: input, shape index: {}] }
   0x1   :  { %s6155_s6 = sld [smem:[%s6910_s0 + %s6116_s3]]   ;;  %s6118_s14 = smov 1  }
   0x2   :  { %s6160_s10 = sld [smem:[%s6910_s0 + %s6117_s7]]   ;;  %s6119_s18 = smov 19  }
   0x3   :  { %s1_s13 = sld [smem:[%s6910_s0]]   ;;  %s6120_s22 = smov 18  }
   0x4   :  { %s4553_s17 = sld [smem:[%s6910_s0 + %s6118_s14]]   ;;  %s6122_s26 = smov 8  }
   0x5   :  { %s6199_s21 = sld [smem:[%s6910_s0 + %s6119_s18]]   ;;  %s6124_s30 = smov 2  }
   0x6   :  { %s6205_s25 = sld [smem:[%s6910_s0 + %s6120_s22]]   ;;  %s6125_s4 = smov 9  }
   0x7   :  { %v5450_v0 = vld [vmem:[%s6155_s6 + $0x78] sm:$0xff]   ;;  %v5454_v4 = vld [vmem:[%s6155_s6 + $0x70] sm:$0xff]   ;;  %v5458_v8 = vld [vmem:[%s6155_s6 + $0x68] sm:$0xff]   ;;  %s6241_s29 = sld [smem:[%s6910_s0 + %s6122_s26]]   ;;  %s6126_s8 = smov 3  }
   0x8   :  { %v5451_v1 = vld [vmem:[%s6160_s10 + $0x78] sm:$0xff]   ;;  %5091 = vmatprep.subr.bf16.mxu0 %v5450_v0  ;;  %v5455_v5 = vld [vmem:[%s6160_s10 + $0x70] sm:$0xff]   ;;  %v5459_v9 = vld [vmem:[%s6160_s10 + $0x68] sm:$0xff]   ;;  %s6256_s3 = sld [smem:[%s6910_s0 + %s6124_s30]]   ;;  %s6127_s12 = smov 12  }
   0x9   :  { %v5452_v2 = vld [vmem:[%s6155_s6 + $0x38] sm:$0xff]   ;;  %5113 = vmatprep.subr.bf16.mxu1 %v5451_v1  ;;  %v5456_v6 = vld [vmem:[%s6155_s6 + $0x30] sm:$0xff]   ;;  %v5460_v10 = vld [vmem:[%s6155_s6 + $0x28] sm:$0xff]   ;;  %s6261_s7 = sld [smem:[%s6910_s0 + %s6125_s4]]   ;;  %s6128_s16 = smov 13  }
   0xa   :  { %v5453_v3 = vld [vmem:[%s6160_s10 + $0x38] sm:$0xff]   ;;  %5092 = vmatpush3.bf16.msra.mxu0 %v5452_v2  ;;  %v5457_v7 = vld [vmem:[%s6160_s10 + $0x30] sm:$0xff]   ;;  %v5461_v11 = vld [vmem:[%s6160_s10 + $0x28] sm:$0xff]   ;;  %s6266_s11 = sld [smem:[%s6910_s0 + %s6126_s8]]   ;;  %s6129_s20 = smov 20  }
   0xb   :  { %5114 = vmatpush3.bf16.msra.mxu1 %v5453_v3  ;;  %5093 = vmatprep.subr.bf16.mxu0 %v5454_v4  ;;  %v5462_v12 = vld [vmem:[%s6155_s6 + $0x60] sm:$0xff]   ;;  %v5466_v16 = vld [vmem:[%s6155_s6 + $0x58] sm:$0xff]   ;;  %v5470_v20 = vld [vmem:[%s6155_s6 + $0x50] sm:$0xff]   ;;  %s4564_s15 = sld [smem:[%s6910_s0 + %s6127_s12]]   ;;  %s6130_s24 = smov 21  }
   0xc   :  { %5115 = vmatprep.subr.bf16.mxu1 %v5455_v5  ;;  %v5463_v13 = vld [vmem:[%s6160_s10 + $0x60] sm:$0xff]   ;;  %v5467_v17 = vld [vmem:[%s6160_s10 + $0x58] sm:$0xff]   ;;  %v5471_v21 = vld [vmem:[%s6160_s10 + $0x50] sm:$0xff]   ;;  %s4565_s19 = sld [smem:[%s6910_s0 + %s6128_s16]]   ;;  %s6131_s28 = smov 10  }
   0xd   :  { %v5464_v14 = vld [vmem:[%s6155_s6 + $0x20] sm:$0xff]   ;;  %v5468_v18 = vld [vmem:[%s6155_s6 + $0x18] sm:$0xff]   ;;  %v5472_v22 = vld [vmem:[%s6155_s6 + $0x10] sm:$0xff]   ;;  %s4572_s23 = sld [smem:[%s6910_s0 + %s6129_s20]]   ;;  %s6132_s2 = smov 4  }
   0xe   :  { %5094 = vmatpush3.bf16.msra.mxu0 %v5456_v6  ;;  %v5465_v15 = vld [vmem:[%s6160_s10 + $0x20] sm:$0xff]   ;;  %v5469_v19 = vld [vmem:[%s6160_s10 + $0x18] sm:$0xff]   ;;  %v5473_v23 = vld [vmem:[%s6160_s10 + $0x10] sm:$0xff]   ;;  %s6323_s27 = sld [smem:[%s6910_s0 + %s6130_s24]]   ;;  %s6135_s14 = smov 11  }
   0xf   :  { %5116 = vmatpush3.bf16.msra.mxu1 %v5457_v7  ;;  %5095 = vmatprep.subr.bf16.mxu0 %v5458_v8  ;;  %v5474_v24 = vld [vmem:[%s6155_s6 + $0x48] sm:$0xff]   ;;  %v5478_v28 = vld [vmem:[%s6155_s6 + $0x40] sm:$0xff]   ;;  %v5488_v37 = vld [vmem:[%s6199_s21 + $0x38] sm:$0xff]   ;;  %s6330_s1 = sld [smem:[%s6910_s0 + %s6131_s28]]   ;;  %s6136_s18 = smov 22  }
  0x10   :  { %5117 = vmatprep.subr.bf16.mxu1 %v5459_v9  ;;  %v5475_v25 = vld [vmem:[%s6160_s10 + $0x48] sm:$0xff]   ;;  %v5479_v29 = vld [vmem:[%s6160_s10 + $0x40] sm:$0xff]   ;;  %v5489_v38 = vld [vmem:[%s6205_s25 + $0x38] sm:$0xff]   ;;  %s6365_s5 = sld [smem:[%s6910_s0 + %s6132_s2]]   ;;  %s6137_s22 = smov 5  }
  0x11   :  { %v5476_v26 = vld [vmem:[%s6155_s6 + $0x8] sm:$0xff]   ;;  %v5480_v30 = vld [vmem:[%s6155_s6] sm:$0xff]   ;;  %v5490_v39 = vld [vmem:[%s6199_s21 + $0x30] sm:$0xff]   ;;  %s6133_s6 = smov 14   ;;  %s6138_s26 = smov 16  }
  0x12   :  { %5096 = vmatpush3.bf16.msra.mxu0 %v5460_v10  ;;  %v5477_v27 = vld [vmem:[%s6160_s10 + $0x8] sm:$0xff]   ;;  %v5481_v31 = vld [vmem:[%s6160_s10] sm:$0xff]   ;;  %v5491_v40 = vld [vmem:[%s6205_s25 + $0x30] sm:$0xff]   ;;  %s4566_s9 = sld [smem:[%s6910_s0 + %s6133_s6]]   ;;  %s6134_s10 = smov 15  }
  0x13   :  { %5118 = vmatpush3.bf16.msra.mxu1 %v5461_v11  ;;  %5097 = vmatprep.subr.bf16.mxu0 %v5462_v12  ;;  %v5482_v32 = vld [vmem:[%s1_s13] ss:$8 sps:$4 sm:$0xff]   ;;  %v5484_v33 = vld [vmem:[%s1_s13 + $0x4] ss:$8 sps:$4 sm:$0xff]   ;;  %v5496_v45 = vld [vmem:[%s6199_s21 + $0x18] sm:$0xff]   ;;  %s4567_s13 = sld [smem:[%s6910_s0 + %s6134_s10]]   ;;  %s6139_s30 = smov 23  }
  0x14   :  { %5119 = vmatprep.subr.bf16.mxu1 %v5463_v13  ;;  %v5485_v35 = vld [vmem:[%s4553_s17] ss:$8 sps:$4 sm:$0xff]   ;;  %v5487_v36 = vld [vmem:[%s4553_s17 + $0x4] ss:$8 sps:$4 sm:$0xff]   ;;  %302 = vmatprep.mubr.bf16.mxu0 %v5484_v33  ;;  %v5497_v46 = vld [vmem:[%s6205_s25 + $0x18] sm:$0xff]   ;;  %s6435_s17 = sld [smem:[%s6910_s0 + %s6135_s14]]   ;;  %s6140_s4 = smov 17  }
  0x15   :  { %509 = vmatprep.mubr.bf16.mxu1 %v5487_v36  ;;  %v5492_v41 = vld [vmem:[%s6199_s21 + $0x28] sm:$0xff]   ;;  %v5494_v43 = vld [vmem:[%s6199_s21 + $0x20] sm:$0xff]   ;;  %v5498_v47 = vld [vmem:[%s6199_s21 + $0x10] sm:$0xff]   ;;  %s6141_s8 = smov 25   ;;  %s6142_s12 = smov 27  }
  0x16   :  { %5098 = vmatpush3.bf16.msra.mxu0 %v5464_v14  ;;  %v5493_v42 = vld [vmem:[%s6205_s25 + $0x28] sm:$0xff]   ;;  %v5495_v44 = vld [vmem:[%s6205_s25 + $0x20] sm:$0xff]   ;;  %v5499_v48 = vld [vmem:[%s6205_s25 + $0x10] sm:$0xff]   ;;  %s6143_s16 = smov 24   ;;  %s6144_s20 = smov 26  }
  0x17   :  { %5120 = vmatpush3.bf16.msra.mxu1 %v5465_v15  ;;  %5099 = vmatprep.subr.bf16.mxu0 %v5466_v16  ;;  %v5500_v49 = vld [vmem:[%s6199_s21 + $0x8] sm:$0xff]   ;;  %v5502_v51 = vld [vmem:[%s6199_s21] sm:$0xff]   ;;  %v5504_v53 = vld [vmem:[%s6241_s29 + $0x78] sm:$0xff]   ;;  %s6443_s21 = sld [smem:[%s6910_s0 + %s6136_s18]]   ;;  %s6145_s24 = smov 28  }
  0x18   :  { %5121 = vmatprep.subr.bf16.mxu1 %v5467_v17  ;;  %v5501_v50 = vld [vmem:[%s6205_s25 + $0x8] sm:$0xff]   ;;  %v5503_v52 = vld [vmem:[%s6205_s25] sm:$0xff]   ;;  %v5505_v13 = vld [vmem:[%s6241_s29 + $0x38] sm:$0xff]   ;;  %s6490_s25 = sld [smem:[%s6910_s0 + %s6137_s22]]   ;;  %s6146_s28 = smov 29  }
  0x19   :  { %v4582_v56 = vld [vmem:[%s4564_s15] ss:$0 sm:$0xff]  ;;  %v5522_v14 = vld [vmem:[%s6256_s3 + $0x4] ss:$8 sps:$4 sm:$0xff]   ;;  %v5506_v16 = vld [vmem:[%s6241_s29 + $0x70] sm:$0xff]   ;;  %s6879_s15 = sld [smem:[%s6910_s0 + %s6142_s12]]  }
  0x1a   :  { %5100 = vmatpush3.bf16.msra.mxu0 %v5468_v18  ;;  %v4601_v63 = vld [vmem:[%s4565_s19] ss:$0 sm:$0xff]  ;;  %v5507_v17 = vld [vmem:[%s6241_s29 + $0x30] sm:$0xff]   ;;  %v5508_v18 = vld [vmem:[%s6241_s29 + $0x68] sm:$0xff]   ;;  %s4576_s19 = sld [smem:[%s6910_s0 + %s6143_s16]]  }
  0x1b   :  { %5122 = vmatpush3.bf16.msra.mxu1 %v5469_v19  ;;  %5101 = vmatprep.subr.bf16.mxu0 %v5470_v20  ;;  %v5509_v19 = vld [vmem:[%s6241_s29 + $0x28] sm:$0xff]   ;;  %v5510_v20 = vld [vmem:[%s6241_s29 + $0x60] sm:$0xff]   ;;  %v5526_v36 = vld [vmem:[%s6261_s7 + $0x30] sm:$0xff]  }
  0x1c   :  { %5123 = vmatprep.subr.bf16.mxu1 %v5471_v21  ;;  %v5511_v21 = vld [vmem:[%s6241_s29 + $0x20] sm:$0xff]  }
  0x1d   :  { %v5541_v33 = vld [vmem:[%s6266_s11 + $0x4] ss:$8 sps:$4 sm:$0xff]  }
  0x1e   :  { %5102 = vmatpush3.bf16.msra.mxu0 %v5472_v22  ;;  %v5512_v22 = vld [vmem:[%s6241_s29 + $0x58] sm:$0xff]  }
  0x1f   :  { %5124 = vmatpush3.bf16.msra.mxu1 %v5473_v23  ;;  %5103 = vmatprep.subr.bf16.mxu0 %v5474_v24  ;;  %v5513_v23 = vld [vmem:[%s6241_s29 + $0x18] sm:$0xff]   ;;  %v5514_v24 = vld [vmem:[%s6241_s29 + $0x50] sm:$0xff]  }
  0x20   :  { %5125 = vmatprep.subr.bf16.mxu1 %v5475_v25  ;;  %v5515_v25 = vld [vmem:[%s6241_s29 + $0x10] sm:$0xff]  }
  0x22   :  { %5104 = vmatpush3.bf16.msra.mxu0 %v5476_v26  ;;  %v5516_v26 = vld [vmem:[%s6241_s29 + $0x48] sm:$0xff]  }
  0x23   :  { %5126 = vmatpush3.bf16.msra.mxu1 %v5477_v27  ;;  %5105 = vmatprep.subr.bf16.mxu0 %v5478_v28  ;;  %v5517_v27 = vld [vmem:[%s6241_s29 + $0x8] sm:$0xff]   ;;  %v5518_v28 = vld [vmem:[%s6241_s29 + $0x40] sm:$0xff]  }
  0x24   :  { %5127 = vmatprep.subr.bf16.mxu1 %v5479_v29  ;;  %v5519_v29 = vld [vmem:[%s6241_s29] sm:$0xff]   ;;  %s4568_s29 = sld [smem:[%s6910_s0 + %s6138_s26]]  }
  0x26   :  { %5106 = vmatpush3.bf16.msra.mxu0 %v5480_v30  ;;  %v5523_v30 = vld [vmem:[%s6261_s7 + $0x78] sm:$0xff]  }
  0x27   :  { %5128 = vmatpush3.bf16.msra.mxu1 %v5481_v31  ;;  %5299 = vmatprep.subr.bf16.mxu0 %v6121_v34  ;;  %v5520_v31 = vld [vmem:[%s6256_s3] ss:$8 sps:$4 sm:$0xff]   ;;  %s6737_s3 = sld [smem:[%s6910_s0 + %s6139_s30]]  }
  0x28   :  { %5319 = vmatprep.subr.bf16.mxu1 %v6121_v34 }
  0x29   :  { %303 = vmatmul.mubr.bf16.vlgmr.msra.gmra.mxu0 %v5482_v32  ;;  %v5524_v32 = vld [vmem:[%s6261_s7 + $0x38] sm:$0xff]  }
  0x2a   :  { %510 = vmatmul.mubr.bf16.vlgmr.msra.gmra.mxu1 %v5485_v35  ;;  %5300 = vmatpush3.bf16.msra.mxu0 %v5488_v37  ;;  %v5525_v35 = vld [vmem:[%s6261_s7 + $0x70] sm:$0xff]   ;;  %v5527_v37 = vld [vmem:[%s6261_s7 + $0x68] sm:$0xff]  }
  0x2b   :  { %5320 = vmatpush3.bf16.msra.mxu1 %v5489_v38  ;;  %5301 = vmatprep.subr.bf16.mxu0 %v6121_v34  ;;  %v5528_v38 = vld [vmem:[%s6261_s7 + $0x28] sm:$0xff]  }
  0x2c   :  { %5321 = vmatprep.subr.bf16.mxu1 %v6121_v34  ;;  %5315 = vmatprep.mubr.msk.bf16.mxu0 %vm6123_vm0, %v6121_v34 }
  0x2d   :  { %5335 = vmatprep.mubr.msk.bf16.mxu1 %vm6123_vm0, %v6121_v34 }
  0x2e   :  { %5302 = vmatpush3.bf16.msra.mxu0 %v5490_v39  ;;  %v5529_v39 = vld [vmem:[%s6261_s7 + $0x60] sm:$0xff]  }
  0x2f   :  { %5322 = vmatpush3.bf16.msra.mxu1 %v5491_v40  ;;  %5303 = vmatprep.subr.bf16.mxu0 %v6121_v34  ;;  %v5530_v40 = vld [vmem:[%s6261_s7 + $0x20] sm:$0xff]  }
  0x30   :  { %5323 = vmatprep.subr.bf16.mxu1 %v6121_v34 }
  0x32   :  { %5304 = vmatpush3.bf16.msra.mxu0 %v5492_v41  ;;  %v5531_v41 = vld [vmem:[%s6261_s7 + $0x58] sm:$0xff]  }
  0x33   :  { %5324 = vmatpush3.bf16.msra.mxu1 %v5493_v42  ;;  %5305 = vmatprep.subr.bf16.mxu0 %v6121_v34  ;;  %v5532_v42 = vld [vmem:[%s6261_s7 + $0x18] sm:$0xff]  }
  0x34   :  { %5325 = vmatprep.subr.bf16.mxu1 %v6121_v34 }
  0x36   :  { %5306 = vmatpush3.bf16.msra.mxu0 %v5494_v43  ;;  %v5533_v43 = vld [vmem:[%s6261_s7 + $0x50] sm:$0xff]  }
  0x37   :  { %5326 = vmatpush3.bf16.msra.mxu1 %v5495_v44  ;;  %5307 = vmatprep.subr.bf16.mxu0 %v6121_v34  ;;  %v5534_v44 = vld [vmem:[%s6261_s7 + $0x10] sm:$0xff]  }
  0x38   :  { %5327 = vmatprep.subr.bf16.mxu1 %v6121_v34 }
  0x3a   :  { %5308 = vmatpush3.bf16.msra.mxu0 %v5496_v45  ;;  %v5535_v45 = vld [vmem:[%s6261_s7 + $0x48] sm:$0xff]  }
  0x3b   :  { %5309 = vmatprep.subr.bf16.mxu0 %v6121_v34  ;;  %5328 = vmatpush3.bf16.msra.mxu1 %v5497_v46  ;;  %v5536_v46 = vld [vmem:[%s6261_s7 + $0x8] sm:$0xff]  }
  0x3c   :  { %5329 = vmatprep.subr.bf16.mxu1 %v6121_v34 }
  0x3e   :  { %5310 = vmatpush3.bf16.msra.mxu0 %v5498_v47  ;;  %v5537_v47 = vld [vmem:[%s6261_s7 + $0x40] sm:$0xff]  }
  0x3f   :  { %5330 = vmatpush3.bf16.msra.mxu1 %v5499_v48  ;;  %5311 = vmatprep.subr.bf16.mxu0 %v6121_v34  ;;  %v5538_v48 = vld [vmem:[%s6261_s7] sm:$0xff]   ;;  %s4569_s7 = sld [smem:[%s6910_s0 + %s6140_s4]]  }
  0x40   :  { %5331 = vmatprep.subr.bf16.mxu1 %v6121_v34 }
  0x42   :  { %5312 = vmatpush3.bf16.msra.mxu0 %v5500_v49  ;;  %v5539_v49 = vld [vmem:[%s6266_s11] ss:$8 sps:$4 sm:$0xff]   ;;  %s6853_s11 = sld [smem:[%s6910_s0 + %s6141_s8]]  }
  0x43   :  { %5332 = vmatpush3.bf16.msra.mxu1 %v5501_v50  ;;  %5313 = vmatprep.subr.bf16.mxu0 %v6121_v34  ;;  %v5542_v50 = vld [vmem:[%s4572_s23 + $0x38] sm:$0xff]  }
  0x44   :  { %5333 = vmatprep.subr.bf16.mxu1 %v6121_v34 }
  0x46   :  { %5314 = vmatpush3.bf16.msra.mxu0 %v5502_v51  ;;  %v5543_v51 = vld [vmem:[%s4572_s23 + $0x30] sm:$0xff]  }
  0x47   :  { %5334 = vmatpush3.bf16.msra.mxu1 %v5503_v52  ;;  %5153 = vmatprep.subr.bf16.mxu0 %v5504_v53  ;;  %v5544_v52 = vld [vmem:[%s4572_s23 + $0x28] sm:$0xff]   ;;  %v5545_v53 = vld [vmem:[%s4572_s23 + $0x20] sm:$0xff]  }
  0x48   :  { %5339 = vmatprep.subr.bf16.mxu1 %v6121_v34 }
  0xe9   :  { %v5107_v54 = vpop.f32.mrf.mxu0 }
  0xea   :  { %v5129_v55 = vpop.f32.mrf.mxu1 }
  0xeb   :  { %v5108_v57 = vpop.f32.mrf.mxu0 }
  0xec   :  { %v5109_v58 = vadd.f32 %v5108_v57, %v5107_v54  ;;  %v5130_v59 = vpop.f32.mrf.mxu1  ;;  %v5546_v54 = vld [vmem:[%s4572_s23 + $0x18] sm:$0xff]   ;;  %v5549_v57 = vld [vmem:[%s4572_s23] sm:$0xff]  }
  0xed   :  { %v5131_v60 = vadd.f32 %v5130_v59, %v5129_v55  ;;  %v5110_v61 = vpop.f32.mrf.mxu0  ;;  %v5547_v55 = vld [vmem:[%s4572_s23 + $0x10] sm:$0xff]  }
  0xee   :  { %v305_v62 = vadd.f32 %v5109_v58, %v4582_v56  ;;  %v5132_v0 = vpop.f32.mrf.mxu1  ;;  %v5556_v58 = vld [vmem:[%s6330_s1 + $0x70] ss:$8 sps:$4 sm:$0xff]   ;;  %v5558_v59 = vld [vmem:[%s6330_s1 + $0x74] ss:$8 sps:$4 sm:$0xff]  }
  0xef   :  { %v5111_v1 = vpop.f32.mrf.mxu0  ;;  %v512_v4 = vadd.f32 %v5131_v60, %v4601_v63  ;;  %v5562_v60 = vld [vmem:[%s6330_s1 + $0x64] ss:$8 sps:$4 sm:$0xff]  }
  0xf0   :  { %v5112_v2 = vadd.f32 %v5111_v1, %v5110_v61  ;;  %v5133_v3 = vpop.f32.mrf.mxu1  ;;  %v311_v6 = vmax.f32 %v305_v62, 0.0  ;;  %v5560_v61 = vld [vmem:[%s6330_s1 + $0x60] ss:$8 sps:$4 sm:$0xff]   ;;  %v5566_v62 = vld [vmem:[%s6330_s1 + $0x54] ss:$8 sps:$4 sm:$0xff]  }
  0xf1   :  { %v5134_v5 = vadd.f32 %v5133_v3, %v5132_v0  ;;  %v518_v10 = vmax.f32 %v512_v4, 0.0  ;;  %v5572_v0 = vld [vmem:[%s6330_s1 + $0x44] ss:$8 sps:$4 sm:$0xff]   ;;  %v5570_v1 = vld [vmem:[%s6330_s1 + $0x40] ss:$8 sps:$4 sm:$0xff]  }
  0xf2   :  { %v308_v7 = vadd.f32 %v5112_v2, %v4582_v56  ;;  %v5548_v56 = vld [vmem:[%s4572_s23 + $0x8] sm:$0xff]   ;;  %v5578_v2 = vld [vmem:[%s6330_s1 + $0x34] ss:$8 sps:$4 sm:$0xff]   ;;  %v5576_v3 = vld [vmem:[%s6330_s1 + $0x30] ss:$8 sps:$4 sm:$0xff]   ;;  %s4578_s23 = sld [smem:[%s6910_s0 + %s6144_s20]]  }
  0xf3   :  { %v515_v8 = vadd.f32 %v5134_v5, %v4601_v63  ;;  %v5564_v63 = vld [vmem:[%s6330_s1 + $0x50] ss:$8 sps:$4 sm:$0xff]   ;;  %v5584_v4 = vld [vmem:[%s6330_s1 + $0x24] ss:$8 sps:$4 sm:$0xff]   ;;  %v5582_v5 = vld [vmem:[%s6330_s1 + $0x20] ss:$8 sps:$4 sm:$0xff]  }
  0xf4   :  { %v312_v9 = vmax.f32 %v308_v7, 0.0  ;;  %v5588_v7 = vld [vmem:[%s6330_s1 + $0x10] ss:$8 sps:$4 sm:$0xff]  }
  0xf5   :  { %v519_v11 = vmax.f32 %v515_v8, 0.0  ;;  %v5596_v8 = vld [vmem:[%s6330_s1 + $0x4] ss:$8 sps:$4 sm:$0xff]  }
  0xf6   :  { %v313_v12 = vpack.c.bf16 %v312_v9, %v311_v6  ;;  %v5590_v6 = vld [vmem:[%s6330_s1 + $0x14] ss:$8 sps:$4 sm:$0xff]   ;;  %v5594_v9 = vld [vmem:[%s6330_s1] ss:$8 sps:$4 sm:$0xff]  }
  0xf7   :  { %v520_v15 = vpack.c.bf16 %v519_v11, %v518_v10  ;;  %v5602_v10 = vld [vmem:[%s6330_s1 + $0xf4] ss:$8 sps:$4 sm:$0xff]   ;;  %v5600_v11 = vld [vmem:[%s6330_s1 + $0xf0] ss:$8 sps:$4 sm:$0xff]  }
  0xf8   :  { %5336 = vmatmul.mubr.bf16.vlgmr.msra.gmra.mxu1 %v313_v12  ;;  %v5608_v12 = vld [vmem:[%s6330_s1 + $0xe4] ss:$8 sps:$4 sm:$0xff]  }
  0xf9   :  { %5316 = vmatmul.mubr.bf16.vlgmr.msra.gmra.mxu0 %v520_v15  ;;  %5355 = vmatprep.mubr.msk.bf16.mxu1 %vm6123_vm0, %v6121_v34  ;;  %v5612_v15 = vld [vmem:[%s6330_s1 + $0xd0] ss:$8 sps:$4 sm:$0xff]  }
  0xfa   :  { %5154 = vmatpush3.bf16.msra.mxu0 %v5505_v13  ;;  %894 = vmatprep.mubr.bf16.mxu0 %v5522_v14  ;;  %v5606_v13 = vld [vmem:[%s6330_s1 + $0xe0] ss:$8 sps:$4 sm:$0xff]   ;;  %v5614_v14 = vld [vmem:[%s6330_s1 + $0xd4] ss:$8 sps:$4 sm:$0xff]  }
  0xfb   :  { %5155 = vmatprep.subr.bf16.mxu0 %v5506_v16  ;;  %5340 = vmatpush3.bf16.msra.mxu1 %v5542_v50  ;;  %v5620_v16 = vld [vmem:[%s6330_s1 + $0xc4] ss:$8 sps:$4 sm:$0xff]   ;;  %v5550_v50 = vld [vmem:[%s6323_s27 + $0x38] sm:$0xff]  }
  0xfc   :  { %5341 = vmatprep.subr.bf16.mxu1 %v6121_v34 }
  0xfe   :  { %5156 = vmatpush3.bf16.msra.mxu0 %v5507_v17  ;;  %v5618_v17 = vld [vmem:[%s6330_s1 + $0xc0] ss:$8 sps:$4 sm:$0xff]  }
  0xff   :  { %5157 = vmatprep.subr.bf16.mxu0 %v5508_v18  ;;  %5342 = vmatpush3.bf16.msra.mxu1 %v5543_v51  ;;  %v5626_v18 = vld [vmem:[%s6330_s1 + $0xb4] ss:$8 sps:$4 sm:$0xff]  }
 0x100   :  { %5343 = vmatprep.subr.bf16.mxu1 %v6121_v34 }
 0x102   :  { %5158 = vmatpush3.bf16.msra.mxu0 %v5509_v19  ;;  %v5624_v19 = vld [vmem:[%s6330_s1 + $0xb0] ss:$8 sps:$4 sm:$0xff]  }
 0x103   :  { %5159 = vmatprep.subr.bf16.mxu0 %v5510_v20  ;;  %5344 = vmatpush3.bf16.msra.mxu1 %v5544_v52  ;;  %v5632_v20 = vld [vmem:[%s6330_s1 + $0xa4] ss:$8 sps:$4 sm:$0xff]   ;;  %v5551_v52 = vld [vmem:[%s6323_s27 + $0x30] sm:$0xff]  }
 0x104   :  { %5345 = vmatprep.subr.bf16.mxu1 %v6121_v34 }
 0x106   :  { %5160 = vmatpush3.bf16.msra.mxu0 %v5511_v21  ;;  %v5630_v21 = vld [vmem:[%s6330_s1 + $0xa0] ss:$8 sps:$4 sm:$0xff]  }
 0x107   :  { %5161 = vmatprep.subr.bf16.mxu0 %v5512_v22  ;;  %5346 = vmatpush3.bf16.msra.mxu1 %v5545_v53  ;;  %v5638_v22 = vld [vmem:[%s6330_s1 + $0x94] ss:$8 sps:$4 sm:$0xff]   ;;  %v5552_v53 = vld [vmem:[%s6323_s27 + $0x28] sm:$0xff]  }
 0x108   :  { %5347 = vmatprep.subr.bf16.mxu1 %v6121_v34 }
 0x10a   :  { %5162 = vmatpush3.bf16.msra.mxu0 %v5513_v23  ;;  %v5636_v23 = vld [vmem:[%s6330_s1 + $0x90] ss:$8 sps:$4 sm:$0xff]  }
 0x10b   :  { %5163 = vmatprep.subr.bf16.mxu0 %v5514_v24  ;;  %5348 = vmatpush3.bf16.msra.mxu1 %v5546_v54  ;;  %v5553_v54 = vld [vmem:[%s6323_s27 + $0x20] sm:$0xff]  }
 0x10c   :  { %5349 = vmatprep.subr.bf16.mxu1 %v6121_v34 }
 0x10e   :  { %5164 = vmatpush3.bf16.msra.mxu0 %v5515_v25 }
 0x10f   :  { %5165 = vmatprep.subr.bf16.mxu0 %v5516_v26  ;;  %5350 = vmatpush3.bf16.msra.mxu1 %v5547_v55  ;;  %v5644_v26 = vld [vmem:[%s6330_s1 + $0x84] ss:$8 sps:$4 sm:$0xff]   ;;  %v5554_v55 = vld [vmem:[%s6323_s27 + $0x18] sm:$0xff]  }
 0x110   :  { %5351 = vmatprep.subr.bf16.mxu1 %v6121_v34 }
 0x112   :  { %5166 = vmatpush3.bf16.msra.mxu0 %v5517_v27 }
 0x113   :  { %5167 = vmatprep.subr.bf16.mxu0 %v5518_v28  ;;  %5352 = vmatpush3.bf16.msra.mxu1 %v5548_v56 }
 0x114   :  { %5353 = vmatprep.subr.bf16.mxu1 %v6121_v34 }
 0x116   :  { %5168 = vmatpush3.bf16.msra.mxu0 %v5519_v29 }
 0x117   :  { %5184 = vmatprep.subr.bf16.mxu0 %v5523_v30  ;;  %5354 = vmatpush3.bf16.msra.mxu1 %v5549_v57  ;;  %v5642_v30 = vld [vmem:[%s6330_s1 + $0x80] ss:$8 sps:$4 sm:$0xff]   ;;  %v5555_v57 = vld [vmem:[%s6323_s27 + $0x10] sm:$0xff]  }
 0x118   :  { %5359 = vmatprep.subr.bf16.mxu1 %v6121_v34 }
 0x119   :  { %895 = vmatmul.mubr.bf16.vlgmr.msra.gmra.mxu0 %v5520_v31 }
 0x11a   :  { %5185 = vmatpush3.bf16.msra.mxu0 %v5524_v32  ;;  %1192 = vmatprep.mubr.bf16.mxu0 %v5541_v33 }
 0x11b   :  { %5186 = vmatprep.subr.bf16.mxu0 %v5525_v35  ;;  %v5648_v35 = vld [vmem:[%s6365_s5] ss:$16 sps:$4 sm:$0xff]  }
 0x11e   :  { %5187 = vmatpush3.bf16.msra.mxu0 %v5526_v36  ;;  %v5650_v36 = vld [vmem:[%s6365_s5 + $0x4] ss:$16 sps:$4 sm:$0xff]  }
 0x11f   :  { %5188 = vmatprep.subr.bf16.mxu0 %v5527_v37 }
 0x122   :  { %5189 = vmatpush3.bf16.msra.mxu0 %v5528_v38 }
 0x123   :  { %5190 = vmatprep.subr.bf16.mxu0 %v5529_v39 }
 0x126   :  { %5191 = vmatpush3.bf16.msra.mxu0 %v5530_v40 }
 0x127   :  { %5192 = vmatprep.subr.bf16.mxu0 %v5531_v41 }
 0x12a   :  { %5193 = vmatpush3.bf16.msra.mxu0 %v5532_v42  ;;  %v4636_v42 = vld [vmem:[%s4566_s9] ss:$0 sm:$0xff] }
 0x12b   :  { %5194 = vmatprep.subr.bf16.mxu0 %v5533_v43 }
 0x12e   :  { %5195 = vmatpush3.bf16.msra.mxu0 %v5534_v44 }
 0x12f   :  { %5196 = vmatprep.subr.bf16.mxu0 %v5535_v45 }
 0x132   :  { %5197 = vmatpush3.bf16.msra.mxu0 %v5536_v46 }
 0x133   :  { %5198 = vmatprep.subr.bf16.mxu0 %v5537_v47 }
 0x136   :  { %5199 = vmatpush3.bf16.msra.mxu0 %v5538_v48 }
 0x137   :  { %1731 = vmatprep.subr.bf16.mxu0 %v5558_v59 }
 0x139   :  { %1193 = vmatmul.mubr.bf16.vlgmr.msra.gmra.mxu0 %v5539_v49 }
 0x13a   :  { %1732 = vmatpush1.bf16.msra.mxu0 %v5556_v58  ;;  %1763 = vmatprep.mubr.bf16.mxu0 %v5650_v36  ;;  %v5639_v36 = vld [vmem:[%s6330_s1 + $0x1b0] ss:$8 sps:$4 sm:$0xff]  }
 0x13b   :  { %1733 = vmatprep.subr.bf16.mxu0 %v5562_v60  ;;  %v4663_v60 = vld [vmem:[%s4567_s13] ss:$0 sm:$0xff] }
 0x13e   :  { %1734 = vmatpush1.bf16.msra.mxu0 %v5560_v61 }
 0x13f   :  { %1735 = vmatprep.subr.bf16.mxu0 %v5566_v62  ;;  %v5559_v62 = vld [vmem:[%s6323_s27 + $0x8] sm:$0xff]  }
 0x142   :  { %1736 = vmatpush1.bf16.msra.mxu0 %v5564_v63 }
 0x143   :  { %1737 = vmatprep.subr.bf16.mxu0 %v5572_v0 }
 0x146   :  { %1738 = vmatpush1.bf16.msra.mxu0 %v5570_v1 }
 0x147   :  { %1739 = vmatprep.subr.bf16.mxu0 %v5578_v2  ;;  %v5563_v2 = vld [vmem:[%s6323_s27] sm:$0xff]   ;;  %s4580_s27 = sld [smem:[%s6910_s0 + %s6145_s24]]  }
 0x14a   :  { %1740 = vmatpush1.bf16.msra.mxu0 %v5576_v3 }
 0x14b   :  { %1741 = vmatprep.subr.bf16.mxu0 %v5584_v4  ;;  %v5569_v4 = vld [vmem:[%s6330_s1 + $0x174] ss:$8 sps:$4 sm:$0xff]  }
 0x14e   :  { %1742 = vmatpush1.bf16.msra.mxu0 %v5582_v5 }
 0x14f   :  { %1743 = vmatprep.subr.bf16.mxu0 %v5590_v6 }
 0x152   :  { %1744 = vmatpush1.bf16.msra.mxu0 %v5588_v7  ;;  %v5567_v7 = vld [vmem:[%s6330_s1 + $0x170] ss:$8 sps:$4 sm:$0xff]  }
 0x153   :  { %1745 = vmatprep.subr.bf16.mxu0 %v5596_v8  ;;  %v5659_v8 = vld [vmem:[%s6365_s5 + $0xc] ss:$16 sps:$4 sm:$0xff]  }
 0x156   :  { %1746 = vmatpush1.bf16.msra.mxu0 %v5594_v9 }
 0x157   :  { %1747 = vmatprep.subr.bf16.mxu0 %v5602_v10  ;;  %v5575_v10 = vld [vmem:[%s6330_s1 + $0x164] ss:$8 sps:$4 sm:$0xff]  }
 0x15a   :  { %1748 = vmatpush2.bf16.msra.mxu0 %v5600_v11  ;;  %v5573_v11 = vld [vmem:[%s6330_s1 + $0x160] ss:$8 sps:$4 sm:$0xff]  }
 0x15b   :  { %1749 = vmatprep.subr.bf16.mxu0 %v5608_v12  ;;  %v5581_v12 = vld [vmem:[%s6330_s1 + $0x154] ss:$8 sps:$4 sm:$0xff]  }
 0x15e   :  { %1750 = vmatpush2.bf16.msra.mxu0 %v5606_v13  ;;  %v5579_v13 = vld [vmem:[%s6330_s1 + $0x150] ss:$8 sps:$4 sm:$0xff]  }
 0x15f   :  { %1751 = vmatprep.subr.bf16.mxu0 %v5614_v14  ;;  %v5587_v14 = vld [vmem:[%s6330_s1 + $0x144] ss:$8 sps:$4 sm:$0xff]  }
 0x162   :  { %1752 = vmatpush2.bf16.msra.mxu0 %v5612_v15  ;;  %v5585_v15 = vld [vmem:[%s6330_s1 + $0x140] ss:$8 sps:$4 sm:$0xff]  }
 0x163   :  { %1753 = vmatprep.subr.bf16.mxu0 %v5620_v16  ;;  %v5593_v16 = vld [vmem:[%s6330_s1 + $0x134] ss:$8 sps:$4 sm:$0xff]  }
 0x166   :  { %1754 = vmatpush2.bf16.msra.mxu0 %v5618_v17  ;;  %v5591_v17 = vld [vmem:[%s6330_s1 + $0x130] ss:$8 sps:$4 sm:$0xff]  }
 0x167   :  { %1755 = vmatprep.subr.bf16.mxu0 %v5626_v18  ;;  %v5599_v18 = vld [vmem:[%s6330_s1 + $0x124] ss:$8 sps:$4 sm:$0xff]  }
 0x16a   :  { %1756 = vmatpush2.bf16.msra.mxu0 %v5624_v19  ;;  %v5597_v19 = vld [vmem:[%s6330_s1 + $0x120] ss:$8 sps:$4 sm:$0xff]  }
 0x16b   :  { %1757 = vmatprep.subr.bf16.mxu0 %v5632_v20  ;;  %v5605_v20 = vld [vmem:[%s6330_s1 + $0x114] ss:$8 sps:$4 sm:$0xff]  }
 0x16e   :  { %1758 = vmatpush2.bf16.msra.mxu0 %v5630_v21  ;;  %v5603_v21 = vld [vmem:[%s6330_s1 + $0x110] ss:$8 sps:$4 sm:$0xff]  }
 0x16f   :  { %1759 = vmatprep.subr.bf16.mxu0 %v5638_v22  ;;  %v5611_v22 = vld [vmem:[%s6330_s1 + $0x104] ss:$8 sps:$4 sm:$0xff]  }
 0x172   :  { %1760 = vmatpush2.bf16.msra.mxu0 %v5636_v23  ;;  %v5609_v23 = vld [vmem:[%s6330_s1 + $0x100] ss:$8 sps:$4 sm:$0xff]  }
 0x173   :  { %1761 = vmatprep.subr.bf16.mxu0 %v5644_v26  ;;  %v5623_v26 = vld [vmem:[%s6330_s1 + $0x1e4] ss:$8 sps:$4 sm:$0xff]  }
 0x176   :  { %1762 = vmatpush2.bf16.msra.mxu0 %v5642_v30  ;;  %v5627_v30 = vld [vmem:[%s6330_s1 + $0x1d0] ss:$8 sps:$4 sm:$0xff]  }
 0x179   :  { %1764 = vmatmul.mubr.bf16.vlgmr.msra.gmra.mxu0 %v5648_v35  ;;  %v5641_v35 = vld [vmem:[%s6330_s1 + $0x1b4] ss:$8 sps:$4 sm:$0xff]  }
 0x1b8   :  { %v708_v24 = vpop.f32.mrf.mxu1 }
 0x1b9   :  { %v619_v25 = vpop.f32.mrf.mxu0 }
 0x1ba   :  { %v6368_v27 = vadd.f32 %v708_v24, %v619_v25  ;;  %v5337_v28 = vpop.f32.mrf.mxu1  ;;  %v5617_v24 = vld [vmem:[%s6330_s1 + $0x1f4] ss:$8 sps:$4 sm:$0xff]   ;;  %v5615_v25 = vld [vmem:[%s6330_s1 + $0x1f0] ss:$8 sps:$4 sm:$0xff]  }
 0x1bb   :  { %v5317_v29 = vpop.f32.mrf.mxu0  ;;  %v5621_v28 = vld [vmem:[%s6330_s1 + $0x1e0] ss:$8 sps:$4 sm:$0xff]  }
 0x1bc   :  { %v711_v31 = vpop.f32.mrf.mxu1  ;;  %v5629_v29 = vld [vmem:[%s6330_s1 + $0x1d4] ss:$8 sps:$4 sm:$0xff]  }
 0x1bd   :  { %v622_v32 = vpop.f32.mrf.mxu0 }
 0x1be   :  { %v6371_v33 = vadd.f32 %v711_v31, %v622_v32  ;;  %v5338_v37 = vpop.f32.mrf.mxu1  ;;  %v5635_v31 = vld [vmem:[%s6330_s1 + $0x1c4] ss:$8 sps:$4 sm:$0xff]   ;;  %v5633_v32 = vld [vmem:[%s6330_s1 + $0x1c0] ss:$8 sps:$4 sm:$0xff]  }
 0x1bf   :  { %v5318_v38 = vpop.f32.mrf.mxu0  ;;  %v5647_v37 = vld [vmem:[%s6330_s1 + $0x1a4] ss:$8 sps:$4 sm:$0xff]  }
 0x1c0   :  { %v5645_v38 = vld [vmem:[%s6330_s1 + $0x1a0] ss:$8 sps:$4 sm:$0xff]  }
 0x1d9   :  { %v5169_v39 = vpop.f32.mrf.mxu0 }
 0x1db   :  { %v5170_v40 = vpop.f32.mrf.mxu0 }
 0x1dc   :  { %v5171_v41 = vadd.f32 %v5170_v40, %v5169_v39  ;;  %v5653_v39 = vld [vmem:[%s6330_s1 + $0x194] ss:$8 sps:$4 sm:$0xff]   ;;  %v5651_v40 = vld [vmem:[%s6330_s1 + $0x190] ss:$8 sps:$4 sm:$0xff]  }
 0x1dd   :  { %v5172_v43 = vpop.f32.mrf.mxu0 }
 0x1de   :  { %v897_v45 = vadd.f32 %v5171_v41, %v4636_v42  ;;  %v5656_v41 = vld [vmem:[%s6330_s1 + $0x184] ss:$8 sps:$4 sm:$0xff]  }
 0x1df   :  { %v5173_v44 = vpop.f32.mrf.mxu0 }
 0x1e0   :  { %v5174_v46 = vadd.f32 %v5173_v44, %v5172_v43  ;;  %v903_v48 = vmax.f32 %v897_v45, 0.0  ;;  %v5657_v43 = vld [vmem:[%s6365_s5 + $0x8] ss:$16 sps:$4 sm:$0xff]   ;;  %v5660_v44 = vld [vmem:[%s6435_s17 + $0xe0] ss:$16 sps:$4 sm:$0xff]  }
 0x1e1   :  { %v5662_v45 = vld [vmem:[%s6435_s17 + $0xe4] ss:$16 sps:$4 sm:$0xff]  }
 0x1e2   :  { %v900_v47 = vadd.f32 %v5174_v46, %v4636_v42  ;;  %v5654_v42 = vld [vmem:[%s6330_s1 + $0x180] ss:$8 sps:$4 sm:$0xff]   ;;  %v5665_v46 = vld [vmem:[%s6435_s17 + $0xc4] ss:$16 sps:$4 sm:$0xff]   ;;  %s4581_s1 = sld [smem:[%s6910_s0 + %s6146_s28]]  }
 0x1e4   :  { %v904_v49 = vmax.f32 %v900_v47, 0.0  ;;  %v5663_v47 = vld [vmem:[%s6435_s17 + $0xc0] ss:$16 sps:$4 sm:$0xff]  }
 0x1e6   :  { %v905_v51 = vpack.c.bf16 %v904_v49, %v903_v48  ;;  %v5668_v48 = vld [vmem:[%s6435_s17 + $0xa4] ss:$16 sps:$4 sm:$0xff]   ;;  %v5666_v49 = vld [vmem:[%s6435_s17 + $0xa0] ss:$16 sps:$4 sm:$0xff]  }
 0x1e8   :  { %5356 = vmatmul.mubr.bf16.vlgmr.msra.gmra.mxu1 %v905_v51  ;;  %v5669_v51 = vld [vmem:[%s6435_s17 + $0x80] ss:$16 sps:$4 sm:$0xff]  }
 0x1e9   :  { %5360 = vmatpush3.bf16.msra.mxu1 %v5550_v50  ;;  %5375 = vmatprep.mubr.msk.bf16.mxu1 %vm6123_vm0, %v6121_v34  ;;  %v5671_v50 = vld [vmem:[%s6435_s17 + $0x84] ss:$16 sps:$4 sm:$0xff]  }
 0x1ea   :  { %5361 = vmatprep.subr.bf16.mxu1 %v6121_v34 }
 0x1ed   :  { %5362 = vmatpush3.bf16.msra.mxu1 %v5551_v52  ;;  %v5684_v52 = vld [vmem:[%s6443_s21 + $0x78] sm:$0xff]  }
 0x1ee   :  { %5363 = vmatprep.subr.bf16.mxu1 %v6121_v34  ;;  %5215 = vmatprep.subr.bf16.mxu0 %v5684_v52 }
 0x1f1   :  { %5364 = vmatpush3.bf16.msra.mxu1 %v5552_v53  ;;  %v5685_v53 = vld [vmem:[%s6443_s21 + $0x38] sm:$0xff]  }
 0x1f2   :  { %5365 = vmatprep.subr.bf16.mxu1 %v6121_v34  ;;  %5216 = vmatpush3.bf16.msra.mxu0 %v5685_v53 }
 0x1f5   :  { %5366 = vmatpush3.bf16.msra.mxu1 %v5553_v54  ;;  %v5674_v54 = vld [vmem:[%s6435_s17 + $0x64] ss:$16 sps:$4 sm:$0xff]  }
 0x1f6   :  { %5367 = vmatprep.subr.bf16.mxu1 %v6121_v34 }
 0x1f9   :  { %5368 = vmatpush3.bf16.msra.mxu1 %v5554_v55  ;;  %v5200_v56 = vpop.f32.mrf.mxu0  ;;  %v5689_v55 = vld [vmem:[%s6443_s21 + $0x70] sm:$0xff]  }
 0x1fa   :  { %5369 = vmatprep.subr.bf16.mxu1 %v6121_v34  ;;  %5217 = vmatprep.subr.bf16.mxu0 %v5689_v55  ;;  %v5763_v55 = vld [vmem:[%s6435_s17 + $0x420] ss:$16 sps:$4 sm:$0xff]  }
 0x1fb   :  { %v5201_v58 = vpop.f32.mrf.mxu0 }
 0x1fc   :  { %v5202_v59 = vadd.f32 %v5201_v58, %v5200_v56  ;;  %v5690_v56 = vld [vmem:[%s6443_s21 + $0x30] sm:$0xff]  }
 0x1fd   :  { %5370 = vmatpush3.bf16.msra.mxu1 %v5555_v57  ;;  %v5203_v61 = vpop.f32.mrf.mxu0  ;;  %v5672_v57 = vld [vmem:[%s6435_s17 + $0x60] ss:$16 sps:$4 sm:$0xff]   ;;  %v5677_v58 = vld [vmem:[%s6435_s17 + $0x44] ss:$16 sps:$4 sm:$0xff]   ;;  %5218 = vmatpush3.bf16.msra.mxu0 %v5690_v56 }
 0x1fe   :  { %5371 = vmatprep.subr.bf16.mxu1 %v6121_v34  ;;  %v1195_v0 = vadd.f32 %v5202_v59, %v4663_v60  ;;  %v5694_v59 = vld [vmem:[%s6443_s21 + $0x68] sm:$0xff]   ;;  %v5769_v56 = vld [vmem:[%s6435_s17 + $0x400] ss:$16 sps:$4 sm:$0xff]  }
 0x1ff   :  { %v5204_v63 = vpop.f32.mrf.mxu0  ;;  %5219 = vmatprep.subr.bf16.mxu0 %v5694_v59  ;;  %v5781_v59 = vld [vmem:[%s6435_s17 + $0x5c0] ss:$16 sps:$4 sm:$0xff]  }
 0x200   :  { %v5205_v1 = vadd.f32 %v5204_v63, %v5203_v61  ;;  %v1201_v5 = vmax.f32 %v1195_v0, 0.0  ;;  %v5675_v61 = vld [vmem:[%s6435_s17 + $0x40] ss:$16 sps:$4 sm:$0xff]  }
 0x201   :  { %5372 = vmatpush3.bf16.msra.mxu1 %v5559_v62  ;;  %v5680_v62 = vld [vmem:[%s6435_s17 + $0x24] ss:$16 sps:$4 sm:$0xff]  }
 0x202   :  { %v1198_v3 = vadd.f32 %v5205_v1, %v4663_v60  ;;  %5373 = vmatprep.subr.bf16.mxu1 %v6121_v34  ;;  %v5695_v60 = vld [vmem:[%s6443_s21 + $0x28] sm:$0xff]   ;;  %v5699_v63 = vld [vmem:[%s6443_s21 + $0x60] sm:$0xff]  }
 0x203   :  { %5220 = vmatpush3.bf16.msra.mxu0 %v5695_v60  ;;  %v5700_v0 = vld [vmem:[%s6443_s21 + $0x20] sm:$0xff]  }
 0x204   :  { %v1202_v6 = vmax.f32 %v1198_v3, 0.0  ;;  %v5678_v1 = vld [vmem:[%s6435_s17 + $0x20] ss:$16 sps:$4 sm:$0xff]   ;;  %5221 = vmatprep.subr.bf16.mxu0 %v5699_v63  ;;  %v5704_v3 = vld [vmem:[%s6443_s21 + $0x58] sm:$0xff]   ;;  %v5789_v60 = vld [vmem:[%s6435_s17 + $0x5a4] ss:$16 sps:$4 sm:$0xff]  }
 0x205   :  { %5374 = vmatpush3.bf16.msra.mxu1 %v5563_v2  ;;  %v5683_v2 = vld [vmem:[%s6435_s17 + $0x4] ss:$16 sps:$4 sm:$0xff]   ;;  %v5793_v63 = vld [vmem:[%s6435_s17 + $0x580] ss:$16 sps:$4 sm:$0xff]  }
 0x206   :  { %v1203_v9 = vpack.c.bf16 %v1202_v6, %v1201_v5  ;;  %1774 = vmatprep.subr.bf16.mxu1 %v5569_v4  ;;  %v5705_v4 = vld [vmem:[%s6443_s21 + $0x18] sm:$0xff]   ;;  %v5681_v5 = vld [vmem:[%s6435_s17] ss:$16 sps:$4 sm:$0xff]   ;;  %v5688_v6 = vld [vmem:[%s6435_s17 + $0x1e4] ss:$16 sps:$4 sm:$0xff]  }
 0x207   :  { %5222 = vmatpush3.bf16.msra.mxu0 %v5700_v0  ;;  %v5801_v0 = vld [vmem:[%s6435_s17 + $0x564] ss:$16 sps:$4 sm:$0xff]  }
 0x208   :  { %5376 = vmatmul.mubr.bf16.vlgmr.msra.gmra.mxu1 %v1203_v9  ;;  %5223 = vmatprep.subr.bf16.mxu0 %v5704_v3  ;;  %v5691_v9 = vld [vmem:[%s6435_s17 + $0x1c0] ss:$16 sps:$4 sm:$0xff]  }
 0x209   :  { %1775 = vmatpush1.bf16.msra.mxu1 %v5567_v7  ;;  %1806 = vmatprep.mubr.bf16.mxu1 %v5659_v8  ;;  %v5686_v7 = vld [vmem:[%s6435_s17 + $0x1e0] ss:$16 sps:$4 sm:$0xff]   ;;  %v5693_v8 = vld [vmem:[%s6435_s17 + $0x1c4] ss:$16 sps:$4 sm:$0xff]  }
 0x20a   :  { %1776 = vmatprep.subr.bf16.mxu1 %v5575_v10  ;;  %v5698_v10 = vld [vmem:[%s6435_s17 + $0x1a4] ss:$16 sps:$4 sm:$0xff]  }
 0x20b   :  { %5224 = vmatpush3.bf16.msra.mxu0 %v5705_v4 }
 0x20d   :  { %1777 = vmatpush1.bf16.msra.mxu1 %v5573_v11  ;;  %v5696_v11 = vld [vmem:[%s6435_s17 + $0x1a0] ss:$16 sps:$4 sm:$0xff]  }
 0x20e   :  { %1778 = vmatprep.subr.bf16.mxu1 %v5581_v12  ;;  %v5703_v12 = vld [vmem:[%s6435_s17 + $0x184] ss:$16 sps:$4 sm:$0xff]  }
 0x211   :  { %1779 = vmatpush1.bf16.msra.mxu1 %v5579_v13  ;;  %v5701_v13 = vld [vmem:[%s6435_s17 + $0x180] ss:$16 sps:$4 sm:$0xff]  }
 0x212   :  { %1780 = vmatprep.subr.bf16.mxu1 %v5587_v14  ;;  %v5708_v14 = vld [vmem:[%s6435_s17 + $0x164] ss:$16 sps:$4 sm:$0xff]  }
 0x215   :  { %1781 = vmatpush1.bf16.msra.mxu1 %v5585_v15  ;;  %v5706_v15 = vld [vmem:[%s6435_s17 + $0x160] ss:$16 sps:$4 sm:$0xff]  }
 0x216   :  { %1782 = vmatprep.subr.bf16.mxu1 %v5593_v16  ;;  %v5709_v16 = vld [vmem:[%s6443_s21 + $0x50] sm:$0xff]  }
 0x217   :  { %5225 = vmatprep.subr.bf16.mxu0 %v5709_v16 }
 0x219   :  { %1783 = vmatpush1.bf16.msra.mxu1 %v5591_v17  ;;  %v5710_v17 = vld [vmem:[%s6443_s21 + $0x10] sm:$0xff]  }
 0x21a   :  { %1784 = vmatprep.subr.bf16.mxu1 %v5599_v18  ;;  %v5713_v18 = vld [vmem:[%s6435_s17 + $0x144] ss:$16 sps:$4 sm:$0xff]   ;;  %5226 = vmatpush3.bf16.msra.mxu0 %v5710_v17 }
 0x21d   :  { %1785 = vmatpush1.bf16.msra.mxu1 %v5597_v19  ;;  %v5711_v19 = vld [vmem:[%s6435_s17 + $0x140] ss:$16 sps:$4 sm:$0xff]  }
 0x21e   :  { %1786 = vmatprep.subr.bf16.mxu1 %v5605_v20  ;;  %v5714_v20 = vld [vmem:[%s6443_s21 + $0x48] sm:$0xff]  }
 0x21f   :  { %5227 = vmatprep.subr.bf16.mxu0 %v5714_v20  ;;  %v5831_v20 = vld [vmem:[%s6435_s17 + $0xcc] ss:$16 sps:$4 sm:$0xff]  }
 0x221   :  { %1787 = vmatpush1.bf16.msra.mxu1 %v5603_v21  ;;  %v5715_v21 = vld [vmem:[%s6443_s21 + $0x8] sm:$0xff]  }
 0x222   :  { %1788 = vmatprep.subr.bf16.mxu1 %v5611_v22  ;;  %v5718_v22 = vld [vmem:[%s6435_s17 + $0x124] ss:$16 sps:$4 sm:$0xff]   ;;  %5228 = vmatpush3.bf16.msra.mxu0 %v5715_v21  ;;  %v5829_v21 = vld [vmem:[%s6435_s17 + $0xc8] ss:$16 sps:$4 sm:$0xff]  }
 0x225   :  { %1789 = vmatpush1.bf16.msra.mxu1 %v5609_v23  ;;  %v5716_v23 = vld [vmem:[%s6435_s17 + $0x120] ss:$16 sps:$4 sm:$0xff]  }
 0x226   :  { %1790 = vmatprep.subr.bf16.mxu1 %v5617_v24  ;;  %v5719_v24 = vld [vmem:[%s6443_s21 + $0x40] sm:$0xff]  }
 0x227   :  { %5229 = vmatprep.subr.bf16.mxu0 %v5719_v24  ;;  %v5843_v24 = vld [vmem:[%s6435_s17 + $0x8c] ss:$16 sps:$4 sm:$0xff]  }
 0x229   :  { %1791 = vmatpush2.bf16.msra.mxu1 %v5615_v25  ;;  %v5720_v25 = vld [vmem:[%s6443_s21] sm:$0xff]  }
 0x22a   :  { %1792 = vmatprep.subr.bf16.mxu1 %v5623_v26  ;;  %v5723_v26 = vld [vmem:[%s6435_s17 + $0x104] ss:$16 sps:$4 sm:$0xff]   ;;  %5230 = vmatpush3.bf16.msra.mxu0 %v5720_v25  ;;  %v5841_v25 = vld [vmem:[%s6435_s17 + $0x88] ss:$16 sps:$4 sm:$0xff]  }
 0x22d   :  { %1793 = vmatpush2.bf16.msra.mxu1 %v5621_v28  ;;  %v5721_v28 = vld [vmem:[%s6435_s17 + $0x100] ss:$16 sps:$4 sm:$0xff]  }
 0x22e   :  { %1794 = vmatprep.subr.bf16.mxu1 %v5629_v29  ;;  %v5726_v29 = vld [vmem:[%s6435_s17 + $0x2e4] ss:$16 sps:$4 sm:$0xff]  }
 0x22f   :  { %3643 = vmatprep.subr.bf16.mxu0 %v5726_v29  ;;  %v5855_v29 = vld [vmem:[%s6435_s17 + $0x4c] ss:$16 sps:$4 sm:$0xff]  }
 0x231   :  { %1795 = vmatpush2.bf16.msra.mxu1 %v5627_v30  ;;  %v1994_v30 = vld [vmem:[%s6490_s25] sm:$0xff] }
 0x232   :  { %1796 = vmatprep.subr.bf16.mxu1 %v5635_v31  ;;  %v1998_v31 = vld [vmem:[%s6490_s25 + $0x20] sm:$0xff] }
 0x235   :  { %1797 = vmatpush2.bf16.msra.mxu1 %v5633_v32  ;;  %v6498_v32 = vcombine.high %v1994_v30, %v1998_v31 }
 0x236   :  { %1798 = vmatprep.subr.bf16.mxu1 %v5641_v35  ;;  %v5729_v35 = vld [vmem:[%s6435_s17 + $0x4e4] ss:$16 sps:$4 sm:$0xff]  }
 0x239   :  { %1799 = vmatpush2.bf16.msra.mxu1 %v5639_v36  ;;  %v6501_v36 = vcombine.low %v1994_v30, %v1998_v31  ;;  %v5853_v30 = vld [vmem:[%s6435_s17 + $0x48] ss:$16 sps:$4 sm:$0xff]   ;;  %v5861_v31 = vld [vmem:[%s6435_s17 + $0x2c] ss:$16 sps:$4 sm:$0xff]  }
 0x23a   :  { %1800 = vmatprep.subr.bf16.mxu1 %v5647_v37  ;;  %v5727_v37 = vld [vmem:[%s6435_s17 + $0x4e0] ss:$16 sps:$4 sm:$0xff]  }
 0x23d   :  { %1801 = vmatpush2.bf16.msra.mxu1 %v5645_v38  ;;  %v5735_v38 = vld [vmem:[%s6435_s17 + $0x4c4] ss:$16 sps:$4 sm:$0xff]  }
 0x23e   :  { %1802 = vmatprep.subr.bf16.mxu1 %v5653_v39  ;;  %v5733_v39 = vld [vmem:[%s6435_s17 + $0x4c0] ss:$16 sps:$4 sm:$0xff]  }
 0x241   :  { %1803 = vmatpush2.bf16.msra.mxu1 %v5651_v40  ;;  %v5741_v40 = vld [vmem:[%s6435_s17 + $0x4a4] ss:$16 sps:$4 sm:$0xff]  }
 0x242   :  { %1804 = vmatprep.subr.bf16.mxu1 %v5656_v41  ;;  %v5739_v41 = vld [vmem:[%s6435_s17 + $0x4a0] ss:$16 sps:$4 sm:$0xff]  }
 0x245   :  { %1805 = vmatpush2.bf16.msra.mxu1 %v5654_v42  ;;  %v5747_v42 = vld [vmem:[%s6435_s17 + $0x484] ss:$16 sps:$4 sm:$0xff]  }
 0x246   :  { %3600 = vmatprep.subr.bf16.mxu1 %v5662_v45  ;;  %v5751_v45 = vld [vmem:[%s6435_s17 + $0x460] ss:$16 sps:$4 sm:$0xff]  }
 0x248   :  { %1807 = vmatmul.mubr.bf16.vlgmr.msra.gmra.mxu1 %v5657_v43  ;;  %v5745_v43 = vld [vmem:[%s6435_s17 + $0x480] ss:$16 sps:$4 sm:$0xff]  }
 0x249   :  { %3601 = vmatpush1.bf16.msra.mxu1 %v5660_v44  ;;  %3632 = vmatprep.mubr.bf16.mxu1 %v6498_v32  ;;  %v5753_v44 = vld [vmem:[%s6435_s17 + $0x464] ss:$16 sps:$4 sm:$0xff]  }
 0x24a   :  { %3602 = vmatprep.subr.bf16.mxu1 %v5665_v46 }
 0x24d   :  { %3603 = vmatpush1.bf16.msra.mxu1 %v5663_v47 }
 0x24e   :  { %3604 = vmatprep.subr.bf16.mxu1 %v5668_v48 }
 0x251   :  { %3605 = vmatpush1.bf16.msra.mxu1 %v5666_v49  ;;  %v5759_v49 = vld [vmem:[%s6435_s17 + $0x444] ss:$16 sps:$4 sm:$0xff]  }
 0x252   :  { %3606 = vmatprep.subr.bf16.mxu1 %v5671_v50  ;;  %v5757_v50 = vld [vmem:[%s6435_s17 + $0x440] ss:$16 sps:$4 sm:$0xff]  }
 0x255   :  { %3607 = vmatpush1.bf16.msra.mxu1 %v5669_v51 }
 0x256   :  { %3608 = vmatprep.subr.bf16.mxu1 %v5674_v54  ;;  %v5765_v54 = vld [vmem:[%s6435_s17 + $0x424] ss:$16 sps:$4 sm:$0xff]  }
 0x259   :  { %3609 = vmatpush1.bf16.msra.mxu1 %v5672_v57  ;;  %v5777_v57 = vld [vmem:[%s6435_s17 + $0x5e4] ss:$16 sps:$4 sm:$0xff]  }
 0x25a   :  { %3610 = vmatprep.subr.bf16.mxu1 %v5677_v58  ;;  %v5775_v58 = vld [vmem:[%s6435_s17 + $0x5e0] ss:$16 sps:$4 sm:$0xff]  }
 0x25d   :  { %3611 = vmatpush1.bf16.msra.mxu1 %v5675_v61  ;;  %v5787_v61 = vld [vmem:[%s6435_s17 + $0x5a0] ss:$16 sps:$4 sm:$0xff]  }
 0x25e   :  { %3612 = vmatprep.subr.bf16.mxu1 %v5680_v62  ;;  %v5795_v62 = vld [vmem:[%s6435_s17 + $0x584] ss:$16 sps:$4 sm:$0xff]  }
 0x261   :  { %3613 = vmatpush1.bf16.msra.mxu1 %v5678_v1  ;;  %v5799_v1 = vld [vmem:[%s6435_s17 + $0x560] ss:$16 sps:$4 sm:$0xff]  }
 0x262   :  { %3614 = vmatprep.subr.bf16.mxu1 %v5683_v2 }
 0x265   :  { %3615 = vmatpush1.bf16.msra.mxu1 %v5681_v5  ;;  %v5807_v5 = vld [vmem:[%s6435_s17 + $0x544] ss:$16 sps:$4 sm:$0xff]  }
 0x266   :  { %3616 = vmatprep.subr.bf16.mxu1 %v5688_v6  ;;  %v5805_v6 = vld [vmem:[%s6435_s17 + $0x540] ss:$16 sps:$4 sm:$0xff]  }
 0x269   :  { %3617 = vmatpush2.bf16.msra.mxu1 %v5686_v7 }
 0x26a   :  { %3618 = vmatprep.subr.bf16.mxu1 %v5693_v8 }
 0x26d   :  { %3619 = vmatpush2.bf16.msra.mxu1 %v5691_v9 }
 0x26e   :  { %3620 = vmatprep.subr.bf16.mxu1 %v5698_v10  ;;  %v5813_v10 = vld [vmem:[%s6435_s17 + $0x524] ss:$16 sps:$4 sm:$0xff]  }
 0x271   :  { %3621 = vmatpush2.bf16.msra.mxu1 %v5696_v11  ;;  %v5811_v11 = vld [vmem:[%s6435_s17 + $0x520] ss:$16 sps:$4 sm:$0xff]  }
 0x272   :  { %3622 = vmatprep.subr.bf16.mxu1 %v5703_v12  ;;  %v5819_v12 = vld [vmem:[%s6435_s17 + $0x504] ss:$16 sps:$4 sm:$0xff]  }
 0x275   :  { %3623 = vmatpush2.bf16.msra.mxu1 %v5701_v13  ;;  %v5817_v13 = vld [vmem:[%s6435_s17 + $0x500] ss:$16 sps:$4 sm:$0xff]  }
 0x276   :  { %3624 = vmatprep.subr.bf16.mxu1 %v5708_v14  ;;  %v1996_v14 = vld [vmem:[%s6490_s25 + $0x10] sm:$0xff] }
 0x279   :  { %3625 = vmatpush2.bf16.msra.mxu1 %v5706_v15  ;;  %v2000_v15 = vld [vmem:[%s6490_s25 + $0x30] sm:$0xff] }
 0x27a   :  { %3626 = vmatprep.subr.bf16.mxu1 %v5713_v18  ;;  %v6544_v16 = vcombine.high %v1996_v14, %v2000_v15  ;;  %v6546_v17 = vcombine.low %v1996_v14, %v2000_v15  ;;  %v5825_v18 = vld [vmem:[%s6435_s17 + $0xec] ss:$16 sps:$4 sm:$0xff]  }
 0x27d   :  { %3627 = vmatpush2.bf16.msra.mxu1 %v5711_v19  ;;  %v5823_v19 = vld [vmem:[%s6435_s17 + $0xe8] ss:$16 sps:$4 sm:$0xff]  }
 0x27e   :  { %3628 = vmatprep.subr.bf16.mxu1 %v5718_v22  ;;  %v5837_v22 = vld [vmem:[%s6435_s17 + $0xac] ss:$16 sps:$4 sm:$0xff]  }
 0x281   :  { %3629 = vmatpush2.bf16.msra.mxu1 %v5716_v23  ;;  %v5835_v23 = vld [vmem:[%s6435_s17 + $0xa8] ss:$16 sps:$4 sm:$0xff]  }
 0x282   :  { %3630 = vmatprep.subr.bf16.mxu1 %v5723_v26  ;;  %v5849_v26 = vld [vmem:[%s6435_s17 + $0x6c] ss:$16 sps:$4 sm:$0xff]  }
 0x285   :  { %3631 = vmatpush2.bf16.msra.mxu1 %v5721_v28  ;;  %v5847_v28 = vld [vmem:[%s6435_s17 + $0x68] ss:$16 sps:$4 sm:$0xff]  }
 0x286   :  { %3686 = vmatprep.subr.bf16.mxu1 %v5729_v35  ;;  %v5867_v35 = vld [vmem:[%s6435_s17 + $0xc] ss:$16 sps:$4 sm:$0xff]  }
 0x288   :  { %3633 = vmatmul.mubr.bf16.vlgmr.msra.gmra.mxu1 %v6501_v36 }
 0x289   :  { %3687 = vmatpush1.bf16.msra.mxu1 %v5727_v37  ;;  %3718 = vmatprep.mubr.bf16.mxu1 %v6544_v16  ;;  %v5865_v37 = vld [vmem:[%s6435_s17 + $0x8] ss:$16 sps:$4 sm:$0xff]  }
 0x28a   :  { %3688 = vmatprep.subr.bf16.mxu1 %v5735_v38  ;;  %v5873_v38 = vld [vmem:[%s6435_s17 + $0x1ec] ss:$16 sps:$4 sm:$0xff]  }
 0x28d   :  { %3689 = vmatpush1.bf16.msra.mxu1 %v5733_v39  ;;  %v5871_v39 = vld [vmem:[%s6435_s17 + $0x1e8] ss:$16 sps:$4 sm:$0xff]  }
 0x28e   :  { %3690 = vmatprep.subr.bf16.mxu1 %v5741_v40  ;;  %v1381_v40 = vlaneseq }
 0x291   :  { %3691 = vmatpush1.bf16.msra.mxu1 %v5739_v41  ;;  %v5879_v41 = vld [vmem:[%s6435_s17 + $0x1cc] ss:$16 sps:$4 sm:$0xff]  }
 0x292   :  { %3692 = vmatprep.subr.bf16.mxu1 %v5747_v42  ;;  %v5877_v42 = vld [vmem:[%s6435_s17 + $0x1c8] ss:$16 sps:$4 sm:$0xff]  }
 0x295   :  { %3693 = vmatpush1.bf16.msra.mxu1 %v5745_v43  ;;  %v6574_v43 = vshrl.u32 %v1381_v40, 7  ;;  %v5939_v40 = vld [vmem:[%s6435_s17 + $0x48c] ss:$16 sps:$4 sm:$0xff]  }
 0x296   :  { %3694 = vmatprep.subr.bf16.mxu1 %v5753_v44  ;;  %v1765_v44 = vpop.f32.mrf.mxu0 }
 0x299   :  { %3695 = vmatpush1.bf16.msra.mxu1 %v5751_v45  ;;  %v5885_v45 = vld [vmem:[%s6435_s17 + $0x1ac] ss:$16 sps:$4 sm:$0xff]  }
 0x29a   :  { %3696 = vmatprep.subr.bf16.mxu1 %v5759_v49  ;;  %v5891_v49 = vld [vmem:[%s6435_s17 + $0x18c] ss:$16 sps:$4 sm:$0xff]  }
 0x29d   :  { %3697 = vmatpush1.bf16.msra.mxu1 %v5757_v50  ;;  %v1379_v50 = vld [vmem:[%s4568_s29] sm:$0x3] }
 0x29e   :  { %3698 = vmatprep.subr.bf16.mxu1 %v5765_v54 }
 0x2a1   :  { %3699 = vmatpush1.bf16.msra.mxu1 %v5763_v55  ;;  %v5897_v55 = vld [vmem:[%s6435_s17 + $0x16c] ss:$16 sps:$4 sm:$0xff]  }
 0x2a8   :  { %v1004_v46 = vpop.f32.mrf.mxu1 }
 0x2a9   :  { %v1011_v47 = vadd.f32 %v1004_v46, %v6368_v27  ;;  %v5771_v27 = vld [vmem:[%s6435_s17 + $0x404] ss:$16 sps:$4 sm:$0xff]   ;;  %v5883_v46 = vld [vmem:[%s6435_s17 + $0x1a8] ss:$16 sps:$4 sm:$0xff]  }
 0x2aa   :  { %v5357_v48 = vpop.f32.mrf.mxu1  ;;  %3700 = vmatprep.subr.bf16.mxu1 %v5771_v27 }
 0x2ab   :  { %3701 = vmatpush1.bf16.msra.mxu1 %v5769_v56  ;;  %v1767_v48 = vpop.f32.mrf.mxu0  ;;  %v5895_v56 = vld [vmem:[%s6435_s17 + $0x168] ss:$16 sps:$4 sm:$0xff]  }
 0x2ac   :  { %v1007_v51 = vpop.f32.mrf.mxu1  ;;  %3702 = vmatprep.subr.bf16.mxu1 %v5777_v57 }
 0x2ad   :  { %v1012_v52 = vadd.f32 %v1007_v51, %v6371_v33  ;;  %v5783_v33 = vld [vmem:[%s6435_s17 + $0x5c4] ss:$16 sps:$4 sm:$0xff]   ;;  %v1387_v51 = vsub.s32 1, %v6574_v43  ;;  %v1769_v54 = vpop.f32.mrf.mxu0 }
 0x2ae   :  { %v5358_v53 = vpop.f32.mrf.mxu1 }
 0x2af   :  { %3703 = vmatpush2.bf16.msra.mxu1 %v5775_v58  ;;  %v1388_v27 = vrot.slane %v1379_v50, %v1387_v51 }
 0x2b0   :  { %3704 = vmatprep.subr.bf16.mxu1 %v5783_v33  ;;  %v1771_v33 = vpop.f32.mrf.mxu0 }
 0x2b3   :  { %3705 = vmatpush2.bf16.msra.mxu1 %v5781_v59 }
 0x2b4   :  { %3706 = vmatprep.subr.bf16.mxu1 %v5789_v60  ;;  %v5903_v60 = vld [vmem:[%s6435_s17 + $0x14c] ss:$16 sps:$4 sm:$0xff]  }
 0x2b7   :  { %3707 = vmatpush2.bf16.msra.mxu1 %v5787_v61  ;;  %v1768_v61 = vadd.f32 %v1767_v48, %v1388_v27  ;;  %v5943_v48 = vld [vmem:[%s6435_s17 + $0x468] ss:$16 sps:$4 sm:$0xff]  }
 0x2b8   :  { %3708 = vmatprep.subr.bf16.mxu1 %v5795_v62 }
 0x2bb   :  { %3709 = vmatpush2.bf16.msra.mxu1 %v5793_v63  ;;  %v5901_v63 = vld [vmem:[%s6435_s17 + $0x148] ss:$16 sps:$4 sm:$0xff]  }
 0x2bc   :  { %3710 = vmatprep.subr.bf16.mxu1 %v5801_v0 }
 0x2bf   :  { %3711 = vmatpush2.bf16.msra.mxu1 %v5799_v1  ;;  %v1772_v1 = vadd.f32 %v1771_v33, %v1388_v27  ;;  %v5766_v27 = vld [vmem:[%s6435_s17 + $0x200] ss:$16 sps:$4 sm:$0xff]  }
 0x2c0   :  { %3712 = vmatprep.subr.bf16.mxu1 %v5807_v5  ;;  %v5772_v33 = vld [vmem:[%s6435_s17 + $0x3e0] ss:$16 sps:$4 sm:$0xff]  }
 0x2c3   :  { %3713 = vmatpush2.bf16.msra.mxu1 %v5805_v6 }
 0x2c4   :  { %3714 = vmatprep.subr.bf16.mxu1 %v5813_v10  ;;  %v5907_v10 = vld [vmem:[%s6435_s17 + $0x128] ss:$16 sps:$4 sm:$0xff]  }
 0x2c7   :  { %3715 = vmatpush2.bf16.msra.mxu1 %v5811_v11 }
 0x2c8   :  { %v1302_v2 = vpop.f32.mrf.mxu1  ;;  %3716 = vmatprep.subr.bf16.mxu1 %v5819_v12  ;;  %v6593_v12 = vld [vmem:[%s6490_s25 + $0x8] sm:$0xff] }
 0x2c9   :  { %v6532_v3 = vadd.f32 %v1302_v2, %v1011_v47  ;;  %v1383_v47 = vsub.s32 0, %v6574_v43 }
 0x2ca   :  { %v5377_v4 = vpop.f32.mrf.mxu1 }
 0x2cb   :  { %3717 = vmatpush2.bf16.msra.mxu1 %v5817_v13  ;;  %v1384_v53 = vrot.slane %v1379_v50, %v1383_v47  ;;  %v6596_v13 = vld [vmem:[%s6490_s25 + $0x28] sm:$0xff] }
 0x2cc   :  { %v1305_v7 = vpop.f32.mrf.mxu1  ;;  %3772 = vmatprep.subr.bf16.mxu1 %v5825_v18  ;;  %v5951_v50 = vld [vmem:[%s6435_s17 + $0x44c] ss:$16 sps:$4 sm:$0xff]  }
 0x2cd   :  { %v6536_v8 = vadd.f32 %v1305_v7, %v1012_v52  ;;  %v5889_v52 = vld [vmem:[%s6435_s17 + $0x188] ss:$16 sps:$4 sm:$0xff]   ;;  %v1766_v58 = vadd.f32 %v1765_v44, %v1384_v53  ;;  %v1770_v62 = vadd.f32 %v1769_v54, %v1384_v53  ;;  %v5909_v7 = vld [vmem:[%s6435_s17 + $0x12c] ss:$16 sps:$4 sm:$0xff]   ;;  %v5756_v44 = vld [vmem:[%s6435_s17 + $0x244] ss:$16 sps:$4 sm:$0xff]  }
 0x2ce   :  { %v5378_v9 = vpop.f32.mrf.mxu1  ;;  %3719 = vmatmul.mubr.bf16.vlgmr.msra.gmra.mxu1 %v6546_v17  ;;  %v5949_v53 = vld [vmem:[%s6435_s17 + $0x448] ss:$16 sps:$4 sm:$0xff]   ;;  %v5768_v54 = vld [vmem:[%s6435_s17 + $0x204] ss:$16 sps:$4 sm:$0xff]  }
 0x2cf   :  { %3773 = vmatpush1.bf16.msra.mxu1 %v5823_v19  ;;  %3804 = vmatprep.mubr.bf16.mxu1 %v6498_v32  ;;  %v5859_v32 = vld [vmem:[%s6435_s17 + $0x28] ss:$16 sps:$4 sm:$0xff]   ;;  %v5915_v19 = vld [vmem:[%s6435_s17 + $0x10c] ss:$16 sps:$4 sm:$0xff]  }
 0x2d0   :  { %3774 = vmatprep.subr.bf16.mxu1 %v5831_v20 }
 0x2d3   :  { %3775 = vmatpush1.bf16.msra.mxu1 %v5829_v21  ;;  %v5724_v21 = vld [vmem:[%s6435_s17 + $0x2e0] ss:$16 sps:$4 sm:$0xff]  }
 0x2d4   :  { %3776 = vmatprep.subr.bf16.mxu1 %v5837_v22  ;;  %v6602_v22 = vcombine.high %v6593_v12, %v6596_v13 }
 0x2d7   :  { %3777 = vmatpush1.bf16.msra.mxu1 %v5835_v23  ;;  %v5913_v23 = vld [vmem:[%s6435_s17 + $0x108] ss:$16 sps:$4 sm:$0xff]  }
 0x2d8   :  { %3778 = vmatprep.subr.bf16.mxu1 %v5843_v24 }
 0x2db   :  { %3779 = vmatpush1.bf16.msra.mxu1 %v5841_v25  ;;  %v5732_v25 = vld [vmem:[%s6435_s17 + $0x2c4] ss:$16 sps:$4 sm:$0xff]  }
 0x2dc   :  { %3780 = vmatprep.subr.bf16.mxu1 %v5849_v26  ;;  %v5921_v26 = vld [vmem:[%s6435_s17 + $0x4ec] ss:$16 sps:$4 sm:$0xff]  }
 0x2df   :  { %3781 = vmatpush1.bf16.msra.mxu1 %v5847_v28  ;;  %v5730_v28 = vld [vmem:[%s6435_s17 + $0x2c0] ss:$16 sps:$4 sm:$0xff]  }
 0x2e0   :  { %3782 = vmatprep.subr.bf16.mxu1 %v5855_v29  ;;  %v5919_v29 = vld [vmem:[%s6435_s17 + $0x4e8] ss:$16 sps:$4 sm:$0xff]  }
 0x2e3   :  { %3783 = vmatpush1.bf16.msra.mxu1 %v5853_v30  ;;  %v5738_v30 = vld [vmem:[%s6435_s17 + $0x2a4] ss:$16 sps:$4 sm:$0xff]  }
 0x2e4   :  { %3784 = vmatprep.subr.bf16.mxu1 %v5861_v31  ;;  %v5927_v31 = vld [vmem:[%s6435_s17 + $0x4cc] ss:$16 sps:$4 sm:$0xff]  }
 0x2e7   :  { %3785 = vmatpush1.bf16.msra.mxu1 %v5859_v32  ;;  %v5736_v32 = vld [vmem:[%s6435_s17 + $0x2a0] ss:$16 sps:$4 sm:$0xff]  }
 0x2e8   :  { %3786 = vmatprep.subr.bf16.mxu1 %v5867_v35  ;;  %v5925_v35 = vld [vmem:[%s6435_s17 + $0x4c8] ss:$16 sps:$4 sm:$0xff]  }
 0x2eb   :  { %3787 = vmatpush1.bf16.msra.mxu1 %v5865_v37  ;;  %v5744_v37 = vld [vmem:[%s6435_s17 + $0x284] ss:$16 sps:$4 sm:$0xff]  }
 0x2ec   :  { %3788 = vmatprep.subr.bf16.mxu1 %v5873_v38  ;;  %v5933_v38 = vld [vmem:[%s6435_s17 + $0x4ac] ss:$16 sps:$4 sm:$0xff]  }
 0x2ef   :  { %3789 = vmatpush2.bf16.msra.mxu1 %v5871_v39  ;;  %v5931_v39 = vld [vmem:[%s6435_s17 + $0x4a8] ss:$16 sps:$4 sm:$0xff]  }
 0x2f0   :  { %3790 = vmatprep.subr.bf16.mxu1 %v5879_v41  ;;  %v5748_v41 = vld [vmem:[%s6435_s17 + $0x260] ss:$16 sps:$4 sm:$0xff]  }
 0x2f3   :  { %3791 = vmatpush2.bf16.msra.mxu1 %v5877_v42  ;;  %v5937_v42 = vld [vmem:[%s6435_s17 + $0x488] ss:$16 sps:$4 sm:$0xff]  }
 0x2f4   :  { %3792 = vmatprep.subr.bf16.mxu1 %v5885_v45  ;;  %v5945_v45 = vld [vmem:[%s6435_s17 + $0x46c] ss:$16 sps:$4 sm:$0xff]  }
 0x2f7   :  { %3793 = vmatpush2.bf16.msra.mxu1 %v5883_v46  ;;  %v5754_v46 = vld [vmem:[%s6435_s17 + $0x240] ss:$16 sps:$4 sm:$0xff]  }
 0x2f8   :  { %3794 = vmatprep.subr.bf16.mxu1 %v5891_v49  ;;  %v5762_v49 = vld [vmem:[%s6435_s17 + $0x224] ss:$16 sps:$4 sm:$0xff]  }
 0x2fb   :  { %3795 = vmatpush2.bf16.msra.mxu1 %v5889_v52  ;;  %v5760_v52 = vld [vmem:[%s6435_s17 + $0x220] ss:$16 sps:$4 sm:$0xff]  }
 0x2fc   :  { %3796 = vmatprep.subr.bf16.mxu1 %v5897_v55  ;;  %v5957_v55 = vld [vmem:[%s6435_s17 + $0x42c] ss:$16 sps:$4 sm:$0xff]  }
 0x2ff   :  { %3797 = vmatpush2.bf16.msra.mxu1 %v5895_v56  ;;  %v5955_v56 = vld [vmem:[%s6435_s17 + $0x428] ss:$16 sps:$4 sm:$0xff]  }
 0x300   :  { %3798 = vmatprep.subr.bf16.mxu1 %v5903_v60  ;;  %v5780_v60 = vld [vmem:[%s6435_s17 + $0x3c4] ss:$16 sps:$4 sm:$0xff]  }
 0x303   :  { %3799 = vmatpush2.bf16.msra.mxu1 %v5901_v63  ;;  %v5967_v63 = vld [vmem:[%s6435_s17 + $0x5e8] ss:$16 sps:$4 sm:$0xff]  }
 0x304   :  { %3800 = vmatprep.subr.bf16.mxu1 %v5909_v7  ;;  %v5790_v7 = vld [vmem:[%s6435_s17 + $0x380] ss:$16 sps:$4 sm:$0xff]  }
 0x307   :  { %3801 = vmatpush2.bf16.msra.mxu1 %v5907_v10  ;;  %v5798_v10 = vld [vmem:[%s6435_s17 + $0x364] ss:$16 sps:$4 sm:$0xff]  }
 0x308   :  { %v1808_v57 = vpop.f32.mrf.mxu1  ;;  %3802 = vmatprep.subr.bf16.mxu1 %v5915_v19  ;;  %v5993_v19 = vld [vmem:[%s6435_s17 + $0x56c] ss:$16 sps:$4 sm:$0xff]  }
 0x309   :  { %v1809_v5 = vadd.f32 %v1808_v57, %v1766_v58  ;;  %v5774_v57 = vld [vmem:[%s6435_s17 + $0x3e4] ss:$16 sps:$4 sm:$0xff]   ;;  %v5963_v58 = vld [vmem:[%s6435_s17 + $0x40c] ss:$16 sps:$4 sm:$0xff]  }
 0x30a   :  { %v1810_v59 = vpop.f32.mrf.mxu1 }
 0x30b   :  { %v1811_v2 = vadd.f32 %v1810_v59, %v1768_v61  ;;  %v1817_v18 = vmax.f32 %v1809_v5, 0.0  ;;  %3803 = vmatpush2.bf16.msra.mxu1 %v5913_v23  ;;  %v5961_v59 = vld [vmem:[%s6435_s17 + $0x408] ss:$16 sps:$4 sm:$0xff]   ;;  %v5969_v61 = vld [vmem:[%s6435_s17 + $0x5ec] ss:$16 sps:$4 sm:$0xff]  }
 0x30c   :  { %v1812_v0 = vpop.f32.mrf.mxu1  ;;  %3858 = vmatprep.subr.bf16.mxu1 %v5921_v26  ;;  %v5792_v5 = vld [vmem:[%s6435_s17 + $0x384] ss:$16 sps:$4 sm:$0xff]   ;;  %v5997_v26 = vld [vmem:[%s6435_s17 + $0x548] ss:$16 sps:$4 sm:$0xff]  }
 0x30d   :  { %v1813_v4 = vadd.f32 %v1812_v0, %v1770_v62  ;;  %v1818_v14 = vmax.f32 %v1811_v2, 0.0  ;;  %v5778_v62 = vld [vmem:[%s6435_s17 + $0x3c0] ss:$16 sps:$4 sm:$0xff]   ;;  %v5786_v0 = vld [vmem:[%s6435_s17 + $0x3a4] ss:$16 sps:$4 sm:$0xff]  }
 0x30e   :  { %v1814_v6 = vpop.f32.mrf.mxu1  ;;  %3805 = vmatmul.mubr.bf16.vlgmr.msra.gmra.mxu1 %v6501_v36  ;;  %v5742_v36 = vld [vmem:[%s6435_s17 + $0x280] ss:$16 sps:$4 sm:$0xff]   ;;  %v5810_v23 = vld [vmem:[%s6435_s17 + $0x324] ss:$16 sps:$4 sm:$0xff]  }
 0x30f   :  { %v1815_v9 = vadd.f32 %v1814_v6, %v1772_v1  ;;  %v1819_v11 = vmax.f32 %v1813_v4, 0.0  ;;  %3859 = vmatpush1.bf16.msra.mxu1 %v5919_v29  ;;  %3890 = vmatprep.mubr.bf16.mxu1 %v6544_v16  ;;  %v5750_v16 = vld [vmem:[%s6435_s17 + $0x264] ss:$16 sps:$4 sm:$0xff]   ;;  %v5975_v1 = vld [vmem:[%s6435_s17 + $0x5cc] ss:$16 sps:$4 sm:$0xff]  }
 0x310   :  { %3860 = vmatprep.subr.bf16.mxu1 %v5927_v31  ;;  %v5784_v2 = vld [vmem:[%s6435_s17 + $0x3a0] ss:$16 sps:$4 sm:$0xff]   ;;  %v5973_v4 = vld [vmem:[%s6435_s17 + $0x5c8] ss:$16 sps:$4 sm:$0xff]   ;;  %v5981_v6 = vld [vmem:[%s6435_s17 + $0x5ac] ss:$16 sps:$4 sm:$0xff]  }
 0x311   :  { %v1820_v15 = vmax.f32 %v1815_v9, 0.0  ;;  %v1821_v24 = vpack.c.bf16 %v1819_v11, %v1817_v18  ;;  %v5979_v9 = vld [vmem:[%s6435_s17 + $0x5a8] ss:$16 sps:$4 sm:$0xff]   ;;  %v5987_v11 = vld [vmem:[%s6435_s17 + $0x58c] ss:$16 sps:$4 sm:$0xff]  }
 0x312   :  { %v5804_v18 = vld [vmem:[%s6435_s17 + $0x344] ss:$16 sps:$4 sm:$0xff]   ;;  %v6005_v29 = vld [vmem:[%s6435_s17 + $0x52c] ss:$16 sps:$4 sm:$0xff]   ;;  %v6003_v31 = vld [vmem:[%s6435_s17 + $0x528] ss:$16 sps:$4 sm:$0xff]  }
 0x313   :  { %v1822_v20 = vpack.c.bf16 %v1820_v15, %v1818_v14  ;;  %3861 = vmatpush1.bf16.msra.mxu1 %v5925_v35  ;;  %v5796_v14 = vld [vmem:[%s6435_s17 + $0x360] ss:$16 sps:$4 sm:$0xff]   ;;  %v5985_v15 = vld [vmem:[%s6435_s17 + $0x588] ss:$16 sps:$4 sm:$0xff]  }
 0x314   :  { %3862 = vmatprep.subr.bf16.mxu1 %v5933_v38  ;;  %v6670_v35 = vld [vmem:[%s6490_s25 + $0x18] sm:$0xff]  ;;  %v6677_v38 = vcombine.low %v6593_v12, %v6596_v13  ;;  %v5826_v12 = vld [vmem:[%s6435_s17 + $0x6c0] ss:$16 sps:$4 sm:$0xff]   ;;  %v5834_v13 = vld [vmem:[%s6435_s17 + $0x6a4] ss:$16 sps:$4 sm:$0xff]  }
 0x315   :  { %1983 = vmatprep.mubr.bf16.mxu0 %v1822_v20  ;;  %v5802_v20 = vld [vmem:[%s6435_s17 + $0x340] ss:$16 sps:$4 sm:$0xff]  }
 0x316   :  { %1984 = vmatmul.mubr.bf16.vlgmr.msra.gmra.mxu0 %v1821_v24  ;;  %v5999_v24 = vld [vmem:[%s6435_s17 + $0x54c] ss:$16 sps:$4 sm:$0xff]  }
 0x317   :  { %3644 = vmatpush1.bf16.msra.mxu0 %v5724_v21  ;;  %3675 = vmatprep.mubr.bf16.mxu0 %v6602_v22  ;;  %v5991_v21 = vld [vmem:[%s6435_s17 + $0x568] ss:$16 sps:$4 sm:$0xff]  }
 0x318   :  { %3645 = vmatprep.subr.bf16.mxu0 %v5732_v25  ;;  %3863 = vmatpush1.bf16.msra.mxu1 %v5931_v39  ;;  %v5808_v25 = vld [vmem:[%s6435_s17 + $0x320] ss:$16 sps:$4 sm:$0xff]  }
 0x319   :  { %3864 = vmatprep.subr.bf16.mxu1 %v5939_v40  ;;  %v5820_v39 = vld [vmem:[%s6435_s17 + $0x6e0] ss:$16 sps:$4 sm:$0xff]   ;;  %v6009_v40 = vld [vmem:[%s6435_s17 + $0x508] ss:$16 sps:$4 sm:$0xff]  }
 0x31b   :  { %3646 = vmatpush1.bf16.msra.mxu0 %v5730_v28  ;;  %v5816_v28 = vld [vmem:[%s6435_s17 + $0x304] ss:$16 sps:$4 sm:$0xff]  }
 0x31c   :  { %3647 = vmatprep.subr.bf16.mxu0 %v5738_v30  ;;  %3865 = vmatpush1.bf16.msra.mxu1 %v5937_v42  ;;  %v5814_v30 = vld [vmem:[%s6435_s17 + $0x300] ss:$16 sps:$4 sm:$0xff]  }
 0x31d   :  { %3866 = vmatprep.subr.bf16.mxu1 %v5945_v45  ;;  %v5832_v42 = vld [vmem:[%s6435_s17 + $0x6a0] ss:$16 sps:$4 sm:$0xff]  }
 0x31e   :  { %v5838_v45 = vld [vmem:[%s6435_s17 + $0x680] ss:$16 sps:$4 sm:$0xff]  }
 0x31f   :  { %3648 = vmatpush1.bf16.msra.mxu0 %v5736_v32  ;;  %v5822_v32 = vld [vmem:[%s6435_s17 + $0x6e4] ss:$16 sps:$4 sm:$0xff]  }
 0x320   :  { %3649 = vmatprep.subr.bf16.mxu0 %v5744_v37  ;;  %3867 = vmatpush1.bf16.msra.mxu1 %v5943_v48  ;;  %v6673_v37 = vld [vmem:[%s6490_s25 + $0x38] sm:$0xff]  ;;  %v5844_v48 = vld [vmem:[%s6435_s17 + $0x660] ss:$16 sps:$4 sm:$0xff]  }
 0x321   :  { %3868 = vmatprep.subr.bf16.mxu1 %v5951_v50  ;;  %v5858_v50 = vld [vmem:[%s6435_s17 + $0x624] ss:$16 sps:$4 sm:$0xff]  }
 0x323   :  { %3650 = vmatpush1.bf16.msra.mxu0 %v5742_v36  ;;  %v6011_v36 = vld [vmem:[%s6435_s17 + $0x50c] ss:$16 sps:$4 sm:$0xff]  }
 0x324   :  { %3651 = vmatprep.subr.bf16.mxu0 %v5750_v16  ;;  %3869 = vmatpush1.bf16.msra.mxu1 %v5949_v53  ;;  %v6683_v16 = vcombine.high %v6670_v35, %v6673_v37  ;;  %v5864_v53 = vld [vmem:[%s6435_s17 + $0x604] ss:$16 sps:$4 sm:$0xff]  }
 0x325   :  { %3870 = vmatprep.subr.bf16.mxu1 %v5957_v55  ;;  %v5870_v55 = vld [vmem:[%s6435_s17 + $0x7e4] ss:$16 sps:$4 sm:$0xff]  }
 0x327   :  { %3652 = vmatpush1.bf16.msra.mxu0 %v5748_v41  ;;  %v5828_v41 = vld [vmem:[%s6435_s17 + $0x6c4] ss:$16 sps:$4 sm:$0xff]  }
 0x328   :  { %3653 = vmatprep.subr.bf16.mxu0 %v5756_v44  ;;  %3871 = vmatpush1.bf16.msra.mxu1 %v5955_v56  ;;  %v5840_v44 = vld [vmem:[%s6435_s17 + $0x684] ss:$16 sps:$4 sm:$0xff]  }
 0x329   :  { %3872 = vmatprep.subr.bf16.mxu1 %v5963_v58  ;;  %v5876_v56 = vld [vmem:[%s6435_s17 + $0x7c4] ss:$16 sps:$4 sm:$0xff]  }
 0x32a   :  { %v5882_v58 = vld [vmem:[%s6435_s17 + $0x7a4] ss:$16 sps:$4 sm:$0xff]  }
 0x32b   :  { %3654 = vmatpush1.bf16.msra.mxu0 %v5754_v46  ;;  %v5846_v46 = vld [vmem:[%s6435_s17 + $0x664] ss:$16 sps:$4 sm:$0xff]  }
 0x32c   :  { %3655 = vmatprep.subr.bf16.mxu0 %v5762_v49  ;;  %3873 = vmatpush1.bf16.msra.mxu1 %v5961_v59  ;;  %v5852_v49 = vld [vmem:[%s6435_s17 + $0x644] ss:$16 sps:$4 sm:$0xff]  }
 0x32d   :  { %3874 = vmatprep.subr.bf16.mxu1 %v5969_v61  ;;  %v5888_v59 = vld [vmem:[%s6435_s17 + $0x784] ss:$16 sps:$4 sm:$0xff]  }
 0x32e   :  { %v5894_v61 = vld [vmem:[%s6435_s17 + $0x764] ss:$16 sps:$4 sm:$0xff]  }
 0x32f   :  { %3656 = vmatpush1.bf16.msra.mxu0 %v5760_v52  ;;  %v5856_v52 = vld [vmem:[%s6435_s17 + $0x620] ss:$16 sps:$4 sm:$0xff]  }
 0x330   :  { %3657 = vmatprep.subr.bf16.mxu0 %v5768_v54  ;;  %3875 = vmatpush2.bf16.msra.mxu1 %v5967_v63  ;;  %v5862_v54 = vld [vmem:[%s6435_s17 + $0x600] ss:$16 sps:$4 sm:$0xff]   ;;  %v5900_v63 = vld [vmem:[%s6435_s17 + $0x744] ss:$16 sps:$4 sm:$0xff]  }
 0x331   :  { %3876 = vmatprep.subr.bf16.mxu1 %v5975_v1  ;;  %v5906_v1 = vld [vmem:[%s6435_s17 + $0x724] ss:$16 sps:$4 sm:$0xff]  }
 0x333   :  { %3658 = vmatpush1.bf16.msra.mxu0 %v5766_v27  ;;  %v5868_v27 = vld [vmem:[%s6435_s17 + $0x7e0] ss:$16 sps:$4 sm:$0xff]  }
 0x334   :  { %3659 = vmatprep.subr.bf16.mxu0 %v5774_v57  ;;  %3877 = vmatpush2.bf16.msra.mxu1 %v5973_v4  ;;  %v5874_v57 = vld [vmem:[%s6435_s17 + $0x7c0] ss:$16 sps:$4 sm:$0xff]   ;;  %v5912_v4 = vld [vmem:[%s6435_s17 + $0x704] ss:$16 sps:$4 sm:$0xff]  }
 0x335   :  { %3878 = vmatprep.subr.bf16.mxu1 %v5981_v6  ;;  %v5918_v6 = vld [vmem:[%s6435_s17 + $0x2ec] ss:$16 sps:$4 sm:$0xff]  }
 0x337   :  { %3660 = vmatpush2.bf16.msra.mxu0 %v5772_v33  ;;  %v5880_v33 = vld [vmem:[%s6435_s17 + $0x7a0] ss:$16 sps:$4 sm:$0xff]  }
 0x338   :  { %3661 = vmatprep.subr.bf16.mxu0 %v5780_v60  ;;  %3879 = vmatpush2.bf16.msra.mxu1 %v5979_v9  ;;  %v5886_v60 = vld [vmem:[%s6435_s17 + $0x780] ss:$16 sps:$4 sm:$0xff]   ;;  %v5916_v9 = vld [vmem:[%s6435_s17 + $0x2e8] ss:$16 sps:$4 sm:$0xff]  }
 0x339   :  { %3880 = vmatprep.subr.bf16.mxu1 %v5987_v11  ;;  %v5922_v11 = vld [vmem:[%s6435_s17 + $0x2c8] ss:$16 sps:$4 sm:$0xff]  }
 0x33b   :  { %3662 = vmatpush2.bf16.msra.mxu0 %v5778_v62  ;;  %v5892_v62 = vld [vmem:[%s6435_s17 + $0x760] ss:$16 sps:$4 sm:$0xff]  }
 0x33c   :  { %3663 = vmatprep.subr.bf16.mxu0 %v5786_v0  ;;  %3881 = vmatpush2.bf16.msra.mxu1 %v5985_v15  ;;  %v5898_v0 = vld [vmem:[%s6435_s17 + $0x740] ss:$16 sps:$4 sm:$0xff]   ;;  %v5928_v15 = vld [vmem:[%s6435_s17 + $0x2a8] ss:$16 sps:$4 sm:$0xff]  }
 0x33d   :  { %3882 = vmatprep.subr.bf16.mxu1 %v5993_v19  ;;  %v5934_v19 = vld [vmem:[%s6435_s17 + $0x288] ss:$16 sps:$4 sm:$0xff]  }
 0x33f   :  { %3664 = vmatpush2.bf16.msra.mxu0 %v5784_v2  ;;  %v5904_v2 = vld [vmem:[%s6435_s17 + $0x720] ss:$16 sps:$4 sm:$0xff]  }
 0x340   :  { %3665 = vmatprep.subr.bf16.mxu0 %v5792_v5  ;;  %3883 = vmatpush2.bf16.msra.mxu1 %v5991_v21  ;;  %v5910_v5 = vld [vmem:[%s6435_s17 + $0x700] ss:$16 sps:$4 sm:$0xff]   ;;  %v5948_v21 = vld [vmem:[%s6435_s17 + $0x24c] ss:$16 sps:$4 sm:$0xff]  }
 0x341   :  { %3884 = vmatprep.subr.bf16.mxu1 %v5999_v24  ;;  %v5954_v24 = vld [vmem:[%s6435_s17 + $0x22c] ss:$16 sps:$4 sm:$0xff]  }
 0x343   :  { %3666 = vmatpush2.bf16.msra.mxu0 %v5790_v7  ;;  %v6722_v7 = vcombine.low %v6670_v35, %v6673_v37  ;;  %v5958_v35 = vld [vmem:[%s6435_s17 + $0x208] ss:$16 sps:$4 sm:$0xff]  }
 0x344   :  { %3667 = vmatprep.subr.bf16.mxu0 %v5798_v10  ;;  %3885 = vmatpush2.bf16.msra.mxu1 %v5997_v26  ;;  %v5924_v10 = vld [vmem:[%s6435_s17 + $0x2cc] ss:$16 sps:$4 sm:$0xff]  }
 0x345   :  { %3886 = vmatprep.subr.bf16.mxu1 %v6005_v29  ;;  %v6061_v26 = vld [vmem:[%s6737_s3 + $0x38] sm:$0xff]   ;;  %v6063_v29 = vld [vmem:[%s6737_s3 + $0x30] sm:$0xff]   ;;  %v6065_v37 = vld [vmem:[%s6737_s3 + $0x28] sm:$0xff]  }
 0x347   :  { %3668 = vmatpush2.bf16.msra.mxu0 %v5796_v14  ;;  %v5930_v14 = vld [vmem:[%s6435_s17 + $0x2ac] ss:$16 sps:$4 sm:$0xff]  }
 0x348   :  { %3669 = vmatprep.subr.bf16.mxu0 %v5804_v18  ;;  %3887 = vmatpush2.bf16.msra.mxu1 %v6003_v31  ;;  %v5936_v18 = vld [vmem:[%s6435_s17 + $0x28c] ss:$16 sps:$4 sm:$0xff]   ;;  %v5952_v31 = vld [vmem:[%s6435_s17 + $0x228] ss:$16 sps:$4 sm:$0xff]  }
 0x349   :  { %3888 = vmatprep.subr.bf16.mxu1 %v6011_v36  ;;  %v5966_v36 = vld [vmem:[%s6435_s17 + $0x3ec] ss:$16 sps:$4 sm:$0xff]  }
 0x34b   :  { %3670 = vmatpush2.bf16.msra.mxu0 %v5802_v20  ;;  %v5942_v20 = vld [vmem:[%s6435_s17 + $0x26c] ss:$16 sps:$4 sm:$0xff]  }
 0x34c   :  { %3671 = vmatprep.subr.bf16.mxu0 %v5810_v23  ;;  %3889 = vmatpush2.bf16.msra.mxu1 %v6009_v40  ;;  %v5946_v23 = vld [vmem:[%s6435_s17 + $0x248] ss:$16 sps:$4 sm:$0xff]   ;;  %v6067_v40 = vld [vmem:[%s6737_s3 + $0x20] sm:$0xff]  }
 0x34f   :  { %3672 = vmatpush2.bf16.msra.mxu0 %v5808_v25  ;;  %3891 = vmatmul.mubr.bf16.vlgmr.msra.gmra.mxu1 %v6546_v17  ;;  %v5850_v17 = vld [vmem:[%s6435_s17 + $0x640] ss:$16 sps:$4 sm:$0xff]   ;;  %v6060_v25 = vld [vmem:[%s6737_s3 + $0x78] sm:$0xff]  }
 0x350   :  { %3673 = vmatprep.subr.bf16.mxu0 %v5816_v28  ;;  %5237 = vmatprep.subr.bf16.mxu1 %v6060_v25  ;;  %v6062_v28 = vld [vmem:[%s6737_s3 + $0x70] sm:$0xff]   ;;  %v6038_v25 = vld [vmem:[%s6435_s17 + $0x7ec] ss:$16 sps:$4 sm:$0xff]  }
 0x351   :  { %5238 = vmatpush3.bf16.msra.mxu1 %v6061_v26  ;;  %v6036_v26 = vld [vmem:[%s6435_s17 + $0x7e8] ss:$16 sps:$4 sm:$0xff]  }
 0x352   :  { %5239 = vmatprep.subr.bf16.mxu1 %v6062_v28  ;;  %v6041_v28 = vld [vmem:[%s6435_s17 + $0x7cc] ss:$16 sps:$4 sm:$0xff]  }
 0x353   :  { %3674 = vmatpush2.bf16.msra.mxu0 %v5814_v30  ;;  %v6064_v30 = vld [vmem:[%s6737_s3 + $0x68] sm:$0xff]  }
 0x354   :  { %3729 = vmatprep.subr.bf16.mxu0 %v5822_v32  ;;  %v5960_v32 = vld [vmem:[%s6435_s17 + $0x20c] ss:$16 sps:$4 sm:$0xff]  }
 0x355   :  { %5240 = vmatpush3.bf16.msra.mxu1 %v6063_v29  ;;  %v6039_v29 = vld [vmem:[%s6435_s17 + $0x7c8] ss:$16 sps:$4 sm:$0xff]  }
 0x356   :  { %3676 = vmatmul.mubr.bf16.vlgmr.msra.gmra.mxu0 %v6677_v38  ;;  %5241 = vmatprep.subr.bf16.mxu1 %v6064_v30  ;;  %v6044_v30 = vld [vmem:[%s6435_s17 + $0x7ac] ss:$16 sps:$4 sm:$0xff]  }
 0x357   :  { %3730 = vmatpush1.bf16.msra.mxu0 %v5820_v39  ;;  %3761 = vmatprep.mubr.bf16.mxu0 %v6683_v16  ;;  %v6066_v39 = vld [vmem:[%s6737_s3 + $0x60] sm:$0xff]  }
 0x358   :  { %3731 = vmatprep.subr.bf16.mxu0 %v5828_v41  ;;  %v6068_v41 = vld [vmem:[%s6737_s3 + $0x58] sm:$0xff]  }
 0x359   :  { %5242 = vmatpush3.bf16.msra.mxu1 %v6065_v37  ;;  %v6050_v37 = vld [vmem:[%s6435_s17 + $0x76c] ss:$16 sps:$4 sm:$0xff]  }
 0x35a   :  { %5243 = vmatprep.subr.bf16.mxu1 %v6066_v39  ;;  %v6053_v39 = vld [vmem:[%s6435_s17 + $0x74c] ss:$16 sps:$4 sm:$0xff]  }
 0x35b   :  { %3732 = vmatpush1.bf16.msra.mxu0 %v5826_v12  ;;  %v5964_v12 = vld [vmem:[%s6435_s17 + $0x3e8] ss:$16 sps:$4 sm:$0xff]  }
 0x35c   :  { %3733 = vmatprep.subr.bf16.mxu0 %v5834_v13  ;;  %v5972_v13 = vld [vmem:[%s6435_s17 + $0x3cc] ss:$16 sps:$4 sm:$0xff]  }
 0x35d   :  { %5244 = vmatpush3.bf16.msra.mxu1 %v6067_v40  ;;  %v6051_v40 = vld [vmem:[%s6435_s17 + $0x748] ss:$16 sps:$4 sm:$0xff]  }
 0x35e   :  { %5245 = vmatprep.subr.bf16.mxu1 %v6068_v41  ;;  %v6056_v41 = vld [vmem:[%s6435_s17 + $0x72c] ss:$16 sps:$4 sm:$0xff]  }
 0x35f   :  { %3734 = vmatpush1.bf16.msra.mxu0 %v5832_v42  ;;  %v6069_v42 = vld [vmem:[%s6737_s3 + $0x18] sm:$0xff]  }
 0x360   :  { %3735 = vmatprep.subr.bf16.mxu0 %v5840_v44  ;;  %v5970_v44 = vld [vmem:[%s6435_s17 + $0x3c8] ss:$16 sps:$4 sm:$0xff]  }
 0x361   :  { %5246 = vmatpush3.bf16.msra.mxu1 %v6069_v42  ;;  %v6057_v42 = vld [vmem:[%s6435_s17 + $0x708] ss:$16 sps:$4 sm:$0xff]  }
 0x363   :  { %3736 = vmatpush1.bf16.msra.mxu0 %v5838_v45  ;;  %v5978_v45 = vld [vmem:[%s6435_s17 + $0x3ac] ss:$16 sps:$4 sm:$0xff]  }
 0x364   :  { %3737 = vmatprep.subr.bf16.mxu0 %v5846_v46  ;;  %v5976_v46 = vld [vmem:[%s6435_s17 + $0x3a8] ss:$16 sps:$4 sm:$0xff]  }
 0x367   :  { %3738 = vmatpush1.bf16.msra.mxu0 %v5844_v48  ;;  %v5984_v48 = vld [vmem:[%s6435_s17 + $0x38c] ss:$16 sps:$4 sm:$0xff]  }
 0x368   :  { %3739 = vmatprep.subr.bf16.mxu0 %v5852_v49  ;;  %v5982_v49 = vld [vmem:[%s6435_s17 + $0x388] ss:$16 sps:$4 sm:$0xff]  }
 0x36b   :  { %3740 = vmatpush1.bf16.msra.mxu0 %v5850_v17  ;;  %v5990_v17 = vld [vmem:[%s6435_s17 + $0x36c] ss:$16 sps:$4 sm:$0xff]  }
 0x36c   :  { %3741 = vmatprep.subr.bf16.mxu0 %v5858_v50  ;;  %v5988_v50 = vld [vmem:[%s6435_s17 + $0x368] ss:$16 sps:$4 sm:$0xff]  }
 0x36f   :  { %3742 = vmatpush1.bf16.msra.mxu0 %v5856_v52  ;;  %v5996_v52 = vld [vmem:[%s6435_s17 + $0x34c] ss:$16 sps:$4 sm:$0xff]  }
 0x370   :  { %3743 = vmatprep.subr.bf16.mxu0 %v5864_v53  ;;  %v5994_v53 = vld [vmem:[%s6435_s17 + $0x348] ss:$16 sps:$4 sm:$0xff]  }
 0x373   :  { %3744 = vmatpush1.bf16.msra.mxu0 %v5862_v54  ;;  %v6002_v54 = vld [vmem:[%s6435_s17 + $0x32c] ss:$16 sps:$4 sm:$0xff]  }
 0x374   :  { %3745 = vmatprep.subr.bf16.mxu0 %v5870_v55  ;;  %v6000_v55 = vld [vmem:[%s6435_s17 + $0x328] ss:$16 sps:$4 sm:$0xff]  }
 0x377   :  { %3746 = vmatpush2.bf16.msra.mxu0 %v5868_v27  ;;  %v6008_v27 = vld [vmem:[%s6435_s17 + $0x30c] ss:$16 sps:$4 sm:$0xff]  }
 0x378   :  { %3747 = vmatprep.subr.bf16.mxu0 %v5876_v56  ;;  %v6006_v56 = vld [vmem:[%s6435_s17 + $0x308] ss:$16 sps:$4 sm:$0xff]  }
 0x37b   :  { %3748 = vmatpush2.bf16.msra.mxu0 %v5874_v57  ;;  %v6014_v57 = vld [vmem:[%s6435_s17 + $0x6ec] ss:$16 sps:$4 sm:$0xff]  }
 0x37c   :  { %3749 = vmatprep.subr.bf16.mxu0 %v5882_v58  ;;  %v6012_v58 = vld [vmem:[%s6435_s17 + $0x6e8] ss:$16 sps:$4 sm:$0xff]  }
 0x37f   :  { %3750 = vmatpush2.bf16.msra.mxu0 %v5880_v33  ;;  %v6017_v33 = vld [vmem:[%s6435_s17 + $0x6cc] ss:$16 sps:$4 sm:$0xff]  }
 0x380   :  { %3751 = vmatprep.subr.bf16.mxu0 %v5888_v59 }
 0x383   :  { %3752 = vmatpush2.bf16.msra.mxu0 %v5886_v60  ;;  %v6070_v60 = vld [vmem:[%s6737_s3 + $0x50] sm:$0xff]  }
 0x384   :  { %3753 = vmatprep.subr.bf16.mxu0 %v5894_v61  ;;  %v6015_v61 = vld [vmem:[%s6435_s17 + $0x6c8] ss:$16 sps:$4 sm:$0xff]   ;;  %5247 = vmatprep.subr.bf16.mxu1 %v6070_v60 }
 0x387   :  { %3754 = vmatpush2.bf16.msra.mxu0 %v5892_v62  ;;  %v6071_v62 = vld [vmem:[%s6737_s3 + $0x10] sm:$0xff]  }
 0x388   :  { %3755 = vmatprep.subr.bf16.mxu0 %v5900_v63  ;;  %5248 = vmatpush3.bf16.msra.mxu1 %v6071_v62 }
 0x38b   :  { %3756 = vmatpush2.bf16.msra.mxu0 %v5898_v0  ;;  %v6020_v0 = vld [vmem:[%s6435_s17 + $0x6ac] ss:$16 sps:$4 sm:$0xff]  }
 0x38c   :  { %3757 = vmatprep.subr.bf16.mxu0 %v5906_v1 }
 0x38f   :  { %3758 = vmatpush2.bf16.msra.mxu0 %v5904_v2 }
 0x390   :  { %3759 = vmatprep.subr.bf16.mxu0 %v5912_v4 }
 0x393   :  { %3760 = vmatpush2.bf16.msra.mxu0 %v5910_v5  ;;  %v6018_v5 = vld [vmem:[%s6435_s17 + $0x6a8] ss:$16 sps:$4 sm:$0xff]  }
 0x394   :  { %3815 = vmatprep.subr.bf16.mxu0 %v5918_v6 }
 0x396   :  { %3762 = vmatmul.mubr.bf16.vlgmr.msra.gmra.mxu0 %v6722_v7 }
 0x397   :  { %3816 = vmatpush1.bf16.msra.mxu0 %v5916_v9  ;;  %3847 = vmatprep.mubr.bf16.mxu0 %v6602_v22  ;;  %v5940_v22 = vld [vmem:[%s6435_s17 + $0x268] ss:$16 sps:$4 sm:$0xff]   ;;  %v6023_v9 = vld [vmem:[%s6435_s17 + $0x68c] ss:$16 sps:$4 sm:$0xff]  }
 0x398   :  { %3817 = vmatprep.subr.bf16.mxu0 %v5924_v10 }
 0x39b   :  { %3818 = vmatpush1.bf16.msra.mxu0 %v5922_v11  ;;  %v6074_v11 = vld [vmem:[%s6737_s3 + $0x40] sm:$0xff]  }
 0x39c   :  { %3819 = vmatprep.subr.bf16.mxu0 %v5930_v14 }
 0x39f   :  { %3820 = vmatpush1.bf16.msra.mxu0 %v5928_v15  ;;  %v6075_v15 = vld [vmem:[%s6737_s3] sm:$0xff]  }
 0x3a0   :  { %3821 = vmatprep.subr.bf16.mxu0 %v5936_v18  ;;  %v6026_v18 = vld [vmem:[%s6435_s17 + $0x66c] ss:$16 sps:$4 sm:$0xff]  }
 0x3a3   :  { %3822 = vmatpush1.bf16.msra.mxu0 %v5934_v19  ;;  %v6024_v19 = vld [vmem:[%s6435_s17 + $0x668] ss:$16 sps:$4 sm:$0xff]  }
 0x3a4   :  { %3823 = vmatprep.subr.bf16.mxu0 %v5942_v20  ;;  %v6027_v20 = vld [vmem:[%s6435_s17 + $0x648] ss:$16 sps:$4 sm:$0xff]  }
 0x3a7   :  { %3824 = vmatpush1.bf16.msra.mxu0 %v5940_v22  ;;  %v6032_v22 = vld [vmem:[%s6435_s17 + $0x62c] ss:$16 sps:$4 sm:$0xff]  }
 0x3a8   :  { %3825 = vmatprep.subr.bf16.mxu0 %v5948_v21  ;;  %v6030_v21 = vld [vmem:[%s6435_s17 + $0x628] ss:$16 sps:$4 sm:$0xff]  }
 0x3ab   :  { %3826 = vmatpush1.bf16.msra.mxu0 %v5946_v23  ;;  %v6035_v23 = vld [vmem:[%s6435_s17 + $0x60c] ss:$16 sps:$4 sm:$0xff]  }
 0x3ac   :  { %3827 = vmatprep.subr.bf16.mxu0 %v5954_v24  ;;  %v6033_v24 = vld [vmem:[%s6435_s17 + $0x608] ss:$16 sps:$4 sm:$0xff]  }
 0x3af   :  { %3828 = vmatpush1.bf16.msra.mxu0 %v5952_v31  ;;  %v6042_v31 = vld [vmem:[%s6435_s17 + $0x7a8] ss:$16 sps:$4 sm:$0xff]  }
 0x3b0   :  { %3829 = vmatprep.subr.bf16.mxu0 %v5960_v32  ;;  %v6047_v32 = vld [vmem:[%s6435_s17 + $0x78c] ss:$16 sps:$4 sm:$0xff]  }
 0x3b3   :  { %3830 = vmatpush1.bf16.msra.mxu0 %v5958_v35  ;;  %v6045_v35 = vld [vmem:[%s6435_s17 + $0x788] ss:$16 sps:$4 sm:$0xff]  }
 0x3b4   :  { %3831 = vmatprep.subr.bf16.mxu0 %v5966_v36  ;;  %v6048_v36 = vld [vmem:[%s6435_s17 + $0x768] ss:$16 sps:$4 sm:$0xff]  }
 0x3b7   :  { %3832 = vmatpush2.bf16.msra.mxu0 %v5964_v12  ;;  %v6054_v12 = vld [vmem:[%s6435_s17 + $0x728] ss:$16 sps:$4 sm:$0xff]  }
 0x3b8   :  { %3833 = vmatprep.subr.bf16.mxu0 %v5972_v13  ;;  %v6059_v13 = vld [vmem:[%s6435_s17 + $0x70c] ss:$16 sps:$4 sm:$0xff]  }
 0x3bb   :  { %3834 = vmatpush2.bf16.msra.mxu0 %v5970_v44  ;;  %v6076_v44 = vld [vmem:[%s6737_s3 + $0xf8] sm:$0xff]  }
 0x3bc   :  { %3835 = vmatprep.subr.bf16.mxu0 %v5978_v45  ;;  %v6077_v45 = vld [vmem:[%s6737_s3 + $0xb8] sm:$0xff]  }
 0x3bf   :  { %3836 = vmatpush2.bf16.msra.mxu0 %v5976_v46  ;;  %v6078_v46 = vld [vmem:[%s6737_s3 + $0xf0] sm:$0xff]  }
 0x3c0   :  { %3837 = vmatprep.subr.bf16.mxu0 %v5984_v48  ;;  %v6079_v48 = vld [vmem:[%s6737_s3 + $0xb0] sm:$0xff]  }
 0x3c3   :  { %3838 = vmatpush2.bf16.msra.mxu0 %v5982_v49  ;;  %v6080_v49 = vld [vmem:[%s6737_s3 + $0xe8] sm:$0xff]  }
 0x3c4   :  { %3839 = vmatprep.subr.bf16.mxu0 %v5990_v17  ;;  %v6081_v17 = vld [vmem:[%s6737_s3 + $0xa8] sm:$0xff]  }
 0x3c7   :  { %3840 = vmatpush2.bf16.msra.mxu0 %v5988_v50  ;;  %v6082_v50 = vld [vmem:[%s6737_s3 + $0xe0] sm:$0xff]  }
 0x3c8   :  { %3841 = vmatprep.subr.bf16.mxu0 %v5996_v52  ;;  %v6083_v52 = vld [vmem:[%s6737_s3 + $0xa0] sm:$0xff]  }
 0x3cb   :  { %3842 = vmatpush2.bf16.msra.mxu0 %v5994_v53  ;;  %v6084_v53 = vld [vmem:[%s6737_s3 + $0xd8] sm:$0xff]  }
 0x3cc   :  { %3843 = vmatprep.subr.bf16.mxu0 %v6002_v54  ;;  %v3634_v54 = vpop.f32.mrf.mxu1 }
 0x3cf   :  { %3844 = vmatpush2.bf16.msra.mxu0 %v6000_v55  ;;  %v3636_v55 = vpop.f32.mrf.mxu1 }
 0x3d0   :  { %3845 = vmatprep.subr.bf16.mxu0 %v6008_v27 }
 0x3d1   :  { %v3638_v27 = vpop.f32.mrf.mxu1 }
 0x3d3   :  { %3846 = vmatpush2.bf16.msra.mxu0 %v6006_v56  ;;  %v3640_v56 = vpop.f32.mrf.mxu1 }
 0x3d4   :  { %3901 = vmatprep.subr.bf16.mxu0 %v6014_v57 }
 0x3d6   :  { %3848 = vmatmul.mubr.bf16.vlgmr.msra.gmra.mxu0 %v6677_v38  ;;  %v5231_v59 = vpop.f32.mrf.mxu0  ;;  %v6072_v38 = vld [vmem:[%s6737_s3 + $0x48] sm:$0xff]  }
 0x3d7   :  { %3902 = vmatpush1.bf16.msra.mxu0 %v6012_v58  ;;  %3933 = vmatprep.mubr.bf16.mxu0 %v6683_v16  ;;  %v6073_v16 = vld [vmem:[%s6737_s3 + $0x8] sm:$0xff]   ;;  %v6833_v58 = vld [vmem:[%s4569_s7] sm:$0xf] }
 0x3d8   :  { %v5232_v63 = vpop.f32.mrf.mxu0  ;;  %3903 = vmatprep.subr.bf16.mxu0 %v6017_v33  ;;  %5249 = vmatprep.subr.bf16.mxu1 %v6072_v38  ;;  %v2267_v60 = vrot.slane %v6833_v58, %v1387_v51  ;;  %v6086_v51 = vld [vmem:[%s6737_s3 + $0xd0] sm:$0xff]  }
 0x3d9   :  { %v5233_v1 = vadd.f32 %v5232_v63, %v5231_v59  ;;  %5250 = vmatpush3.bf16.msra.mxu1 %v6073_v16  ;;  %v3720_v59 = vpop.f32.mrf.mxu1 }
 0x3da   :  { %v5234_v2 = vpop.f32.mrf.mxu0  ;;  %5251 = vmatprep.subr.bf16.mxu1 %v6074_v11  ;;  %v3641_v16 = vadd.f32 %v3640_v56, %v2267_v60 }
 0x3db   :  { %v6783_v4 = vadd.f32 %v5233_v1, %v6532_v3  ;;  %3904 = vmatpush1.bf16.msra.mxu0 %v6015_v61  ;;  %v6021_v3 = vld [vmem:[%s6435_s17 + $0x688] ss:$16 sps:$4 sm:$0xff]   ;;  %v2263_v61 = vrot.slane %v6833_v58, %v1383_v47  ;;  %v3722_v63 = vpop.f32.mrf.mxu1 }
 0x3dc   :  { %v5235_v6 = vpop.f32.mrf.mxu0  ;;  %3905 = vmatprep.subr.bf16.mxu0 %v6020_v0  ;;  %v3637_v0 = vadd.f32 %v3636_v55, %v2267_v60 }
 0x3dd   :  { %v5236_v10 = vadd.f32 %v5235_v6, %v5234_v2  ;;  %5252 = vmatpush3.bf16.msra.mxu1 %v6075_v15  ;;  %v3635_v1 = vadd.f32 %v3634_v54, %v2263_v61  ;;  %v3639_v2 = vadd.f32 %v3638_v27, %v2263_v61  ;;  %v6087_v15 = vld [vmem:[%s6737_s3 + $0x90] sm:$0xff]  }
 0x3de   :  { %5379 = vmatprep.subr.bf16.mxu1 %v6121_v34 }
 0x3df   :  { %v6790_v14 = vadd.f32 %v5236_v10, %v6536_v8  ;;  %3906 = vmatpush1.bf16.msra.mxu0 %v6018_v5  ;;  %v6029_v8 = vld [vmem:[%s6435_s17 + $0x64c] ss:$16 sps:$4 sm:$0xff]   ;;  %v3724_v5 = vpop.f32.mrf.mxu1 }
 0x3e0   :  { %3907 = vmatprep.subr.bf16.mxu0 %v6023_v9 }
 0x3e3   :  { %3908 = vmatpush1.bf16.msra.mxu0 %v6021_v3 }
 0x3e4   :  { %3909 = vmatprep.subr.bf16.mxu0 %v6026_v18  ;;  %v3726_v18 = vpop.f32.mrf.mxu1 }
 0x3e7   :  { %3910 = vmatpush1.bf16.msra.mxu0 %v6024_v19 }
 0x3e8   :  { %3911 = vmatprep.subr.bf16.mxu0 %v6029_v8 }
 0x3eb   :  { %3912 = vmatpush1.bf16.msra.mxu0 %v6027_v20 }
 0x3ec   :  { %3913 = vmatprep.subr.bf16.mxu0 %v6032_v22 }
 0x3ef   :  { %3914 = vmatpush1.bf16.msra.mxu0 %v6030_v21  ;;  %v6088_v21 = vld [vmem:[%s6737_s3 + $0xc8] sm:$0xff]  }
 0x3f0   :  { %3915 = vmatprep.subr.bf16.mxu0 %v6035_v23 }
 0x3f3   :  { %3916 = vmatpush1.bf16.msra.mxu0 %v6033_v24 }
 0x3f4   :  { %3917 = vmatprep.subr.bf16.mxu0 %v6038_v25 }
 0x3f7   :  { %3918 = vmatpush2.bf16.msra.mxu0 %v6036_v26  ;;  %v6089_v26 = vld [vmem:[%s6737_s3 + $0x88] sm:$0xff]  }
 0x3f8   :  { %3919 = vmatprep.subr.bf16.mxu0 %v6041_v28 }
 0x3fb   :  { %3920 = vmatpush2.bf16.msra.mxu0 %v6039_v29 }
 0x3fc   :  { %3921 = vmatprep.subr.bf16.mxu0 %v6044_v30 }
 0x3ff   :  { %3922 = vmatpush2.bf16.msra.mxu0 %v6042_v31 }
 0x400   :  { %3923 = vmatprep.subr.bf16.mxu0 %v6047_v32  ;;  %v6090_v32 = vld [vmem:[%s6737_s3 + $0xc0] sm:$0xff]  }
 0x403   :  { %3924 = vmatpush2.bf16.msra.mxu0 %v6045_v35 }
 0x404   :  { %3925 = vmatprep.subr.bf16.mxu0 %v6050_v37 }
 0x407   :  { %3926 = vmatpush2.bf16.msra.mxu0 %v6048_v36  ;;  %v6091_v36 = vld [vmem:[%s6737_s3 + $0x80] sm:$0xff]  }
 0x408   :  { %3927 = vmatprep.subr.bf16.mxu0 %v6053_v39 }
 0x40b   :  { %3928 = vmatpush2.bf16.msra.mxu0 %v6051_v40 }
 0x40c   :  { %3929 = vmatprep.subr.bf16.mxu0 %v6056_v41 }
 0x40f   :  { %3930 = vmatpush2.bf16.msra.mxu0 %v6054_v12  ;;  %v6092_v12 = vld [vmem:[%s6853_s11 + $0x38] sm:$0xff]  }
 0x410   :  { %3931 = vmatprep.subr.bf16.mxu0 %v6059_v13  ;;  %v6093_v13 = vld [vmem:[%s6853_s11 + $0x30] sm:$0xff]  }
 0x413   :  { %3932 = vmatpush2.bf16.msra.mxu0 %v6057_v42  ;;  %v6094_v42 = vld [vmem:[%s6853_s11 + $0x28] sm:$0xff]  }
 0x414   :  { %5259 = vmatprep.subr.bf16.mxu0 %v6076_v44  ;;  %v3806_v44 = vpop.f32.mrf.mxu1 }
 0x416   :  { %3934 = vmatmul.mubr.bf16.vlgmr.msra.gmra.mxu0 %v6722_v7  ;;  %v6085_v7 = vld [vmem:[%s6737_s3 + $0x98] sm:$0xff]   ;;  %v3677_v57 = vpop.f32.mrf.mxu0 }
 0x417   :  { %5260 = vmatpush3.bf16.msra.mxu0 %v6077_v45  ;;  %v3678_v10 = vadd.f32 %v3677_v57, %v3635_v1  ;;  %v3808_v45 = vpop.f32.mrf.mxu1 }
 0x418   :  { %5261 = vmatprep.subr.bf16.mxu0 %v6078_v46  ;;  %v3679_v33 = vpop.f32.mrf.mxu0 }
 0x419   :  { %v3680_v6 = vadd.f32 %v3679_v33, %v3637_v0  ;;  %v3721_v20 = vadd.f32 %v3720_v59, %v3678_v10  ;;  %v3810_v46 = vpop.f32.mrf.mxu1 }
 0x41a   :  { %v3681_v62 = vpop.f32.mrf.mxu0 }
 0x41b   :  { %5262 = vmatpush3.bf16.msra.mxu0 %v6079_v48  ;;  %v3682_v9 = vadd.f32 %v3681_v62, %v3639_v2  ;;  %v3723_v47 = vadd.f32 %v3722_v63, %v3680_v6  ;;  %v3812_v48 = vpop.f32.mrf.mxu1 }
 0x41c   :  { %5263 = vmatprep.subr.bf16.mxu0 %v6080_v49  ;;  %v3683_v38 = vpop.f32.mrf.mxu0 }
 0x41d   :  { %v3684_v3 = vadd.f32 %v3683_v38, %v3641_v16  ;;  %v3725_v8 = vadd.f32 %v3724_v5, %v3682_v9 }
 0x41f   :  { %5264 = vmatpush3.bf16.msra.mxu0 %v6081_v17  ;;  %v3727_v23 = vadd.f32 %v3726_v18, %v3684_v3  ;;  %v2274_v17 = vsub.s32 3, %v6574_v43 }
 0x420   :  { %5265 = vmatprep.subr.bf16.mxu0 %v6082_v50  ;;  %v2270_v50 = vsub.s32 2, %v6574_v43 }
 0x422   :  { %v2271_v54 = vrot.slane %v6833_v58, %v2270_v50 }
 0x423   :  { %5266 = vmatpush3.bf16.msra.mxu0 %v6083_v52 }
 0x424   :  { %5267 = vmatprep.subr.bf16.mxu0 %v6084_v53  ;;  %v3892_v53 = vpop.f32.mrf.mxu1  ;;  %v3807_v57 = vadd.f32 %v3806_v44, %v2271_v54  ;;  %v3811_v33 = vadd.f32 %v3810_v46, %v2271_v54 }
 0x426   :  { %v3894_v27 = vpop.f32.mrf.mxu1 }
 0x427   :  { %5268 = vmatpush3.bf16.msra.mxu0 %v6085_v7  ;;  %v2275_v7 = vrot.slane %v6833_v58, %v2274_v17  ;;  %v5070_v17 = vld [vmem:[%s4576_s19] ss:$0 sm:$0xff] }
 0x428   :  { %5269 = vmatprep.subr.bf16.mxu0 %v6086_v51  ;;  %v3896_v60 = vpop.f32.mrf.mxu1 }
 0x429   :  { %v3809_v56 = vadd.f32 %v3808_v45, %v2275_v7  ;;  %v3813_v61 = vadd.f32 %v3812_v48, %v2275_v7 }
 0x42a   :  { %v3898_v43 = vpop.f32.mrf.mxu1 }
 0x42b   :  { %5270 = vmatpush3.bf16.msra.mxu0 %v6087_v15 }
 0x42c   :  { %5271 = vmatprep.subr.bf16.mxu0 %v6088_v21  ;;  %v6095_v21 = vld [vmem:[%s6853_s11 + $0x20] sm:$0xff]  }
 0x42f   :  { %5272 = vmatpush3.bf16.msra.mxu0 %v6089_v26  ;;  %v6099_v26 = vld [vmem:[%s6853_s11] sm:$0xff]  }
 0x430   :  { %5273 = vmatprep.subr.bf16.mxu0 %v6090_v32  ;;  %v6104_v32 = vld [vmem:[%s6879_s15 + $0x18] sm:$0xff]  }
 0x433   :  { %5274 = vmatpush3.bf16.msra.mxu0 %v6091_v36 }
 0x434   :  { %5399 = vmatprep.subr.bf16.mxu0 %v6121_v34 }
 0x456   :  { %v3763_v11 = vpop.f32.mrf.mxu0 }
 0x457   :  { %v3764_v28 = vadd.f32 %v3763_v11, %v3721_v20 }
 0x458   :  { %v3765_v19 = vpop.f32.mrf.mxu0 }
 0x459   :  { %v3766_v24 = vadd.f32 %v3765_v19, %v3723_v47  ;;  %v3944_v39 = vmax.f32 %v3764_v28, 0.0  ;;  %v6100_v28 = vld [vmem:[%s6879_s15 + $0x38] sm:$0xff]  }
 0x45a   :  { %v3767_v22 = vpop.f32.mrf.mxu0 }
 0x45b   :  { %v3768_v25 = vadd.f32 %v3767_v22, %v3725_v8  ;;  %v3945_v35 = vmax.f32 %v3766_v24, 0.0  ;;  %v6097_v24 = vld [vmem:[%s6853_s11 + $0x10] sm:$0xff]  }
 0x45c   :  { %v3769_v29 = vpop.f32.mrf.mxu0 }
 0x45d   :  { %v3770_v30 = vadd.f32 %v3769_v29, %v3727_v23  ;;  %v3948_v31 = vmax.f32 %v3768_v25, 0.0  ;;  %v6096_v23 = vld [vmem:[%s6853_s11 + $0x18] sm:$0xff]   ;;  %v6098_v25 = vld [vmem:[%s6853_s11 + $0x8] sm:$0xff]   ;;  %v6101_v29 = vld [vmem:[%s6879_s15 + $0x30] sm:$0xff]  }
 0x45f   :  { %v3949_v37 = vmax.f32 %v3770_v30, 0.0  ;;  %v3952_v41 = vpack.c.bf16 %v3948_v31, %v3944_v39  ;;  %v6102_v30 = vld [vmem:[%s6879_s15 + $0x28] sm:$0xff]   ;;  %v6103_v31 = vld [vmem:[%s6879_s15 + $0x20] sm:$0xff]  }
 0x461   :  { %v3953_v40 = vpack.c.bf16 %v3949_v37, %v3945_v35 }
 0x463   :  { %4244 = vmatprep.mubr.bf16.mxu1 %v3953_v40 }
 0x464   :  { %4245 = vmatmul.mubr.bf16.vlgmr.msra.gmra.mxu1 %v3952_v41 }
 0x465   :  { %5395 = vmatprep.mubr.msk.bf16.mxu1 %vm6123_vm0, %v6121_v34  ;;  %5380 = vmatpush3.bf16.msra.mxu1 %v6092_v12 }
 0x466   :  { %5381 = vmatprep.subr.bf16.mxu1 %v6121_v34 }
 0x469   :  { %5382 = vmatpush3.bf16.msra.mxu1 %v6093_v13 }
 0x46a   :  { %5383 = vmatprep.subr.bf16.mxu1 %v6121_v34 }
 0x46d   :  { %5384 = vmatpush3.bf16.msra.mxu1 %v6094_v42 }
 0x46e   :  { %5385 = vmatprep.subr.bf16.mxu1 %v6121_v34 }
 0x471   :  { %5386 = vmatpush3.bf16.msra.mxu1 %v6095_v21 }
 0x472   :  { %5387 = vmatprep.subr.bf16.mxu1 %v6121_v34 }
 0x475   :  { %5388 = vmatpush3.bf16.msra.mxu1 %v6096_v23 }
 0x476   :  { %5389 = vmatprep.subr.bf16.mxu1 %v6121_v34 }
 0x479   :  { %5390 = vmatpush3.bf16.msra.mxu1 %v6097_v24 }
 0x47a   :  { %5391 = vmatprep.subr.bf16.mxu1 %v6121_v34 }
 0x47d   :  { %5392 = vmatpush3.bf16.msra.mxu1 %v6098_v25 }
 0x47e   :  { %5393 = vmatprep.subr.bf16.mxu1 %v6121_v34 }
 0x481   :  { %5394 = vmatpush3.bf16.msra.mxu1 %v6099_v26 }
 0x496   :  { %v3849_v49 = vpop.f32.mrf.mxu0 }
 0x497   :  { %v3850_v0 = vadd.f32 %v3849_v49, %v3807_v57  ;;  %v6106_v57 = vld [vmem:[%s6879_s15 + $0x8] sm:$0xff]  }
 0x498   :  { %v3851_v52 = vpop.f32.mrf.mxu0 }
 0x499   :  { %v3852_v62 = vadd.f32 %v3851_v52, %v3809_v56  ;;  %v3893_v6 = vadd.f32 %v3892_v53, %v3850_v0  ;;  %v6105_v56 = vld [vmem:[%s6879_s15 + $0x10] sm:$0xff]  }
 0x49a   :  { %v3853_v55 = vpop.f32.mrf.mxu0 }
 0x49b   :  { %v3854_v63 = vadd.f32 %v3853_v55, %v3811_v33  ;;  %v3895_v5 = vadd.f32 %v3894_v27, %v3852_v62 }
 0x49c   :  { %v3855_v59 = vpop.f32.mrf.mxu0 }
 0x49d   :  { %v3856_v2 = vadd.f32 %v3855_v59, %v3813_v61  ;;  %v3897_v16 = vadd.f32 %v3896_v60, %v3854_v63 }
 0x49f   :  { %v3899_v58 = vadd.f32 %v3898_v43, %v3856_v2 }
 0x4d6   :  { %v3935_v1 = vpop.f32.mrf.mxu0 }
 0x4d7   :  { %v3936_v51 = vadd.f32 %v3935_v1, %v3893_v6 }
 0x4d8   :  { %v3937_v38 = vpop.f32.mrf.mxu0 }
 0x4d9   :  { %v3938_v10 = vadd.f32 %v3937_v38, %v3895_v5  ;;  %v3946_v8 = vmax.f32 %v3936_v51, 0.0 }
 0x4da   :  { %v3939_v9 = vpop.f32.mrf.mxu0 }
 0x4db   :  { %v3940_v11 = vadd.f32 %v3939_v9, %v3897_v16  ;;  %v3947_v19 = vmax.f32 %v3938_v10, 0.0 }
 0x4dc   :  { %v3941_v3 = vpop.f32.mrf.mxu0 }
 0x4dd   :  { %v3942_v15 = vadd.f32 %v3941_v3, %v3899_v58  ;;  %v3950_v18 = vmax.f32 %v3940_v11, 0.0 }
 0x4df   :  { %v3951_v47 = vmax.f32 %v3942_v15, 0.0  ;;  %v3954_v22 = vpack.c.bf16 %v3950_v18, %v3946_v8 }
 0x4e1   :  { %v3955_v20 = vpack.c.bf16 %v3951_v47, %v3947_v19 }
 0x4e3   :  { %4285 = vmatprep.mubr.bf16.mxu0 %v3955_v20 }
 0x4e4   :  { %4286 = vmatmul.mubr.bf16.vlgmr.msra.gmra.mxu0 %v3954_v22 }
 0x4e5   :  { %5415 = vmatprep.mubr.msk.bf16.mxu0 %vm6123_vm0, %v6121_v34  ;;  %5400 = vmatpush3.bf16.msra.mxu0 %v6100_v28 }
 0x4e6   :  { %5401 = vmatprep.subr.bf16.mxu0 %v6121_v34 }
 0x4e9   :  { %5402 = vmatpush3.bf16.msra.mxu0 %v6101_v29 }
 0x4ea   :  { %5403 = vmatprep.subr.bf16.mxu0 %v6121_v34 }
 0x4ed   :  { %5404 = vmatpush3.bf16.msra.mxu0 %v6102_v30 }
 0x4ee   :  { %5405 = vmatprep.subr.bf16.mxu0 %v6121_v34 }
 0x4f1   :  { %5406 = vmatpush3.bf16.msra.mxu0 %v6103_v31 }
 0x4f2   :  { %5407 = vmatprep.subr.bf16.mxu0 %v6121_v34 }
 0x4f5   :  { %5408 = vmatpush3.bf16.msra.mxu0 %v6104_v32 }
 0x4f6   :  { %5409 = vmatprep.subr.bf16.mxu0 %v6121_v34 }
 0x4f9   :  { %5410 = vmatpush3.bf16.msra.mxu0 %v6105_v56 }
 0x4fa   :  { %5411 = vmatprep.subr.bf16.mxu0 %v6121_v34 }
 0x4fd   :  { %5412 = vmatpush3.bf16.msra.mxu0 %v6106_v57 }
 0x4fe   :  { %5413 = vmatprep.subr.bf16.mxu0 %v6121_v34  ;;  %v5080_v34 = vld [vmem:[%s4580_s27] ss:$0 sm:$0xff] }
 0x524   :  { %v5253_v35 = vpop.f32.mrf.mxu1 }
 0x526   :  { %v5254_v37 = vpop.f32.mrf.mxu1 }
 0x527   :  { %v5255_v41 = vadd.f32 %v5254_v37, %v5253_v35 }
 0x528   :  { %v5256_v36 = vpop.f32.mrf.mxu1 }
 0x52a   :  { %v5257_v13 = vpop.f32.mrf.mxu1 }
 0x52b   :  { %v5258_v46 = vadd.f32 %v5257_v13, %v5256_v36 }
 0x5a4   :  { %v5275_v39 = vpop.f32.mrf.mxu0 }
 0x5a6   :  { %v5276_v40 = vpop.f32.mrf.mxu0 }
 0x5a7   :  { %v5277_v12 = vadd.f32 %v5276_v40, %v5275_v39 }
 0x5a8   :  { %v5278_v42 = vpop.f32.mrf.mxu0 }
 0x5a9   :  { %v4288_v44 = vadd.f32 %v5277_v12, %v5255_v41 }
 0x5aa   :  { %v5279_v45 = vpop.f32.mrf.mxu0 }
 0x5ab   :  { %v4294_v48 = vadd.f32 %v4288_v44, %v6783_v4  ;;  %v5280_v49 = vadd.f32 %v5279_v45, %v5278_v42  ;;  %v6107_v4 = vld [vmem:[%s6879_s15] sm:$0xff]  }
 0x5ac   :  { %5414 = vmatpush3.bf16.msra.mxu0 %v6107_v4 }
 0x5ad   :  { %v4291_v50 = vadd.f32 %v5280_v49, %v5258_v46  ;;  %v4303_v52 = vadd.f32 %v5070_v17, %v4294_v48 }
 0x5af   :  { %v4295_v53 = vadd.f32 %v4291_v50, %v6790_v14  ;;  %v4305_v54 = vmax.f32 %v4303_v52, 0.0  ;;  %v5071_v14 = vld [vmem:[%s4578_s23] ss:$0 sm:$0xff] }
 0x5b1   :  { %v4304_v7 = vadd.f32 %v5070_v17, %v4295_v53 }
 0x5b3   :  { %v4306_v55 = vmax.f32 %v4304_v7, 0.0 }
 0x5b5   :  { %v4307_v27 = vpack.c.bf16 %v4306_v55, %v4305_v54 }
 0x5b7   :  { %5396 = vmatmul.mubr.bf16.vlgmr.msra.gmra.mxu1 %v4307_v27 }
 0x677   :  { %v4413_v33 = vpop.f32.mrf.mxu1 }
 0x678   :  { %v4414_v60 = vadd.f32 %v5071_v14, %v4413_v33 }
 0x679   :  { %v5397_v59 = vpop.f32.mrf.mxu1 }
 0x67a   :  { %v4420_v0 = vmax.f32 %v4414_v60, 0.0 }
 0x67b   :  { %v4416_v61 = vpop.f32.mrf.mxu1 }
 0x67c   :  { %v4417_v62 = vadd.f32 %v5071_v14, %v4416_v61 }
 0x67d   :  { %v5398_v63 = vpop.f32.mrf.mxu1 }
 0x67e   :  { %v4421_v1 = vmax.f32 %v4417_v62, 0.0 }
 0x680   :  { %v4422_v2 = vpack.c.bf16 %v4421_v1, %v4420_v0 }
 0x682   :  { %5416 = vmatmul.mubr.bf16.vlgmr.msra.gmra.mxu0 %v4422_v2 }
 0x742   :  { %v4528_v43 = vpop.f32.mrf.mxu0 }
 0x743   :  { %v4529_v38 = vadd.f32 %v5080_v34, %v4528_v43 }
 0x744   :  { %v5417_v5 = vpop.f32.mrf.mxu0 }
 0x745   :  { %v5089_v16 = vmul.f32 -1.442695, %v4529_v38 }
 0x746   :  { %v4531_v6 = vpop.f32.mrf.mxu0 }
 0x747   :  { %6108 = vpow2.f32 %v5089_v16  ;;  %v4532_v9 = vadd.f32 %v5080_v34, %v4531_v6 }
 0x748   :  { %v5418_v58 = vpop.f32.mrf.mxu0 }
 0x749   :  { %v5090_v10 = vmul.f32 -1.442695, %v4532_v9 }
 0x74b   :  { %6110 = vpow2.f32 %v5090_v10 }
 0x754   :  { %v6109_v11 = vpop.eup %6108 }
 0x755   :  { %v4541_v51 = vadd.f32 1.0, %v6109_v11 }
 0x757   :  { %6112 = vrcp.f32 %v4541_v51 }
 0x758   :  { %v6111_v3 = vpop.eup %6110 }
 0x759   :  { %v4542_v15 = vadd.f32 1.0, %v6111_v3 }
 0x75b   :  { %6114 = vrcp.f32 %v4542_v15 }
 0x764   :  { %v6113_v18 = vpop.eup %6112 }
 0x765   :  { %4547 = vst [vmem:[%s4581_s1] sm:$0xff] %v6113_v18 }
 0x768   :  { %v6115_v19 = vpop.eup %6114 }
 0x769   :  { %4548 = vst [vmem:[%s4581_s1 + $0x8] sm:$0xff] %v6115_v19 }

</bundles_post_ra>
